<compile_context>
chip_gen: v5e
topology: v5e:2x2
jax: 0.10.0
libtpu: 0.0.40
codegen_flags: <defaults>
</compile_context>

<pallas_src>
import jax
import jax.numpy as jnp
from jax import lax
from jax.experimental import pallas as pl
from jax.experimental.pallas import tpu as pltpu


# ----------------------------------------------------------------------------
# Shared LSTM cell math (PyTorch gate order i, f, g, o).
# ----------------------------------------------------------------------------
def _lstm_cell(gates, c_prev):
    H = c_prev.shape[-1]
    i_g = jax.nn.sigmoid(gates[:, 0 * H:1 * H])
    f_g = jax.nn.sigmoid(gates[:, 1 * H:2 * H])
    g_g = jnp.tanh(gates[:, 2 * H:3 * H])
    o_g = jax.nn.sigmoid(gates[:, 3 * H:4 * H])
    c_new = f_g * c_prev + i_g * g_g
    h_new = o_g * jnp.tanh(c_new)
    return h_new, c_new


# ----------------------------------------------------------------------------
# Fused bidirectional encoder LSTM + bridge (fwd+bwd memory sum), one launch.
# ----------------------------------------------------------------------------
def _bilstm_encode_bridge_kernel(x_ref, wih_ref, whh_ref, b_ref, mask_ref,
                                 mem_ref, hT_ref, cT_ref,
                                 gx_scr, hf_scr, cf_scr, hb_scr, cb_scr):
    L, B, _ = gx_scr.shape
    H = hT_ref.shape[-1]
    G = 4 * H

    # Hoisted input projection for both directions: one (L*B, E) x (E, 8H) matmul.
    gx = jnp.dot(x_ref[...], wih_ref[...],
                 preferred_element_type=jnp.float32) + b_ref[...]
    gx_scr[...] = gx.reshape(L, B, 2 * G)

    hf_scr[...] = jnp.zeros_like(hf_scr)
    cf_scr[...] = jnp.zeros_like(cf_scr)
    hb_scr[...] = jnp.zeros_like(hb_scr)
    cb_scr[...] = jnp.zeros_like(cb_scr)
    mem_ref[...] = jnp.zeros_like(mem_ref)   # bridge accumulator (in place)

    def step(s, carry):
        tb = L - 1 - s                       # backward direction time index

        hf_prev = hf_scr[...]
        cf_prev = cf_scr[...]
        hb_prev = hb_scr[...]
        cb_prev = cb_scr[...]

        # One block-diagonal hidden matmul for both directions: (B,2H)x(2H,8H).
        g_h = jnp.dot(jnp.concatenate([hf_prev, hb_prev], axis=-1), whh_ref[...],
                      preferred_element_type=jnp.float32)
        g_f = gx_scr[s][:, :G] + g_h[:, :G]
        g_b = gx_scr[tb][:, G:] + g_h[:, G:]

        hf_new, cf_new = _lstm_cell(g_f, cf_prev)
        hb_new, cb_new = _lstm_cell(g_b, cb_prev)

        # Per-example length masking (packed-sequence semantics).
        vf = mask_ref[s] > 0.0               # (B, 1)
        vb = mask_ref[tb] > 0.0              # (B, 1)

        hf_scr[...] = jnp.where(vf, hf_new, hf_prev)
        cf_scr[...] = jnp.where(vf, cf_new, cf_prev)
        hb_scr[...] = jnp.where(vb, hb_new, hb_prev)
        cb_scr[...] = jnp.where(vb, cb_new, cb_prev)

        # Bridge: accumulate fwd at s and bwd at tb into the zero-initialized
        # bank (read-add-write for both directions is correct regardless of
        # s/tb visit order). Padded rows stay 0 and are also masked in attention.
        mem_ref[s] = mem_ref[s] + jnp.where(vf, hf_new, 0.0)
        mem_ref[tb] = mem_ref[tb] + jnp.where(vb, hb_new, 0.0)
        return carry

    lax.fori_loop(0, L, step, 0, unroll=True)

    # Bridge hidden/cell selection: backward-direction final state only.
    hT_ref[...] = hb_scr[...]
    cT_ref[...] = cb_scr[...]


def encode_and_bridge(prep, x_flat, step_mask, *, L, B):
    """x_flat: (L*B, E) time-major flattened; step_mask: (L, B, 1) float.
    Returns (memory (L,B,H) fwd+bwd summed, h_bwd (B,H), c_bwd (B,H))."""
    H = prep["enc_whh_bd"].shape[0] // 2
    vm = pltpu.MemorySpace.VMEM
    out_shape = (jax.ShapeDtypeStruct((L, B, H), jnp.float32),
                 jax.ShapeDtypeStruct((B, H), jnp.float32),
                 jax.ShapeDtypeStruct((B, H), jnp.float32))
    return pl.pallas_call(
        _bilstm_encode_bridge_kernel,
        out_shape=out_shape,
        in_specs=[pl.BlockSpec(memory_space=vm)] * 5,
        out_specs=(pl.BlockSpec(memory_space=vm),
                   pl.BlockSpec(memory_space=vm),
                   pl.BlockSpec(memory_space=vm)),
        scratch_shapes=[
            pltpu.VMEM((L, B, 8 * H), jnp.float32),   # precomputed input gates
            pltpu.VMEM((B, H), jnp.float32),          # h fwd
            pltpu.VMEM((B, H), jnp.float32),          # c fwd
            pltpu.VMEM((B, H), jnp.float32),          # h bwd
            pltpu.VMEM((B, H), jnp.float32),          # c bwd
        ],
    )(x_flat, prep["enc_wih"], prep["enc_whh_bd"], prep["enc_b"], step_mask)


# ----------------------------------------------------------------------------
# Fused decoder LSTM + dot attention + output projection, one launch.
# ----------------------------------------------------------------------------
def _decoder_attn_kernel(y_ref, wih_ref, whh_ref, b_ref, h0_ref, c0_ref,
                         mem_ref, mask_ref, wc_ref, wv_ref, bv_ref,
                         logits_ref,
                         gx_scr, h_scr, c_scr, dech_scr):
    T, B, _ = gx_scr.shape
    H = h0_ref.shape[-1]
    V = logits_ref.shape[-1]

    # Hoisted input projection: one (T*B, E) x (E, 4H) matmul.
    gx = jnp.dot(y_ref[...], wih_ref[...],
                 preferred_element_type=jnp.float32) + b_ref[...]
    gx_scr[...] = gx.reshape(T, B, 4 * H)

    h_scr[...] = h0_ref[...]
    c_scr[...] = c0_ref[...]

    def step(t, carry):
        h_prev = h_scr[...]
        c_prev = c_scr[...]
        gates = gx_scr[t] + jnp.dot(h_prev, whh_ref[...],
                                    preferred_element_type=jnp.float32)
        h_new, c_new = _lstm_cell(gates, c_prev)
        dech_scr[t] = h_new
        h_scr[...] = h_new
        c_scr[...] = c_new
        return carry

    lax.fori_loop(0, T, step, 0, unroll=True)

    dech = dech_scr[...]                     # (T, B, H)
    mem = mem_ref[...]                       # (B, L, H), batch-major

    # Batch-major decoder hiddens (B tiny & static: two cheap slices).
    h_bth = jnp.concatenate([dech[:, bi, :][None] for bi in range(B)],
                            axis=0)          # (B, T, H)

    # ---- batched dot attention over the bridged memory bank ----
    scores = lax.dot_general(h_bth, mem, (((2,), (2,)), ((0,), (0,))),
                             preferred_element_type=jnp.float32)   # (B, T, L)
    scores = jnp.where(mask_ref[...] > 0.0, scores, -1e9)
    scores = scores - scores.max(axis=-1, keepdims=True)
    p = jnp.exp(scores)
    p = p * pl.reciprocal(p.sum(axis=-1, keepdims=True), approx=True)
    ctx = lax.dot_general(p, mem, (((2,), (1,)), ((0,), (0,))),
                          preferred_element_type=jnp.float32)      # (B, T, H)

    # Fused output projection: [h | ctx] @ [wc_h; wc_c], then vocab matmul.
    hc = jnp.concatenate([h_bth, ctx], axis=-1).reshape(B * T, 2 * H)
    attn_h = jnp.tanh(jnp.dot(hc, wc_ref[...],
                              preferred_element_type=jnp.float32))
    logits = jnp.dot(attn_h, wv_ref[...],
                     preferred_element_type=jnp.float32) + bv_ref[...]  # (B*T, V)

    # Single contiguous lane-dense store.
    logits_ref[...] = logits.reshape(B, T, V).astype(logits_ref.dtype)


def decode_with_attention(prep, y_flat, h0, c0, mem_blh, attn_mask, *, T, B):
    """y_flat: (T*B, E); h0/c0: (B, H); mem_blh: (B, L, H); attn_mask: (B, 1, L).
    Returns logits (B, T, V)."""
    H = h0.shape[-1]
    V = prep["wv"].shape[-1]
    vm = pltpu.MemorySpace.VMEM
    return pl.pallas_call(
        _decoder_attn_kernel,
        out_shape=jax.ShapeDtypeStruct((B, T, V), jnp.float32),
        in_specs=[pl.BlockSpec(memory_space=vm)] * 11,
        out_specs=pl.BlockSpec(memory_space=vm),
        scratch_shapes=[
            pltpu.VMEM((T, B, 4 * H), jnp.float32),   # precomputed input gates
            pltpu.VMEM((B, H), jnp.float32),          # h
            pltpu.VMEM((B, H), jnp.float32),          # c
            pltpu.VMEM((T, B, H), jnp.float32),       # decoder hidden states
        ],
    )(y_flat, prep["dec_wih"], prep["dec_whh"], prep["dec_b"],
      h0, c0, mem_blh, attn_mask, prep["wc"], prep["wv"], prep["bv"])


# ----------------------------------------------------------------------------
# Parameters (raw, mirroring the PyTorch module) + one-time preprocessing.
# ----------------------------------------------------------------------------
def init_params(key, *, v_src=40, v_tgt=128, emb=16, hidden=32):
    ks = jax.random.split(key, 16)
    s = 0.1
    return {
        "src_embed": s * jax.random.normal(ks[0], (v_src, emb), jnp.float32),
        "tgt_embed": s * jax.random.normal(ks[1], (v_tgt, emb), jnp.float32),
        # encoder forward / backward LSTM
        "enc_f_wih": s * jax.random.normal(ks[2], (emb, 4 * hidden), jnp.float32),
        "enc_f_whh": s * jax.random.normal(ks[3], (hidden, 4 * hidden), jnp.float32),
        "enc_f_b":   s * jax.random.normal(ks[4], (1, 4 * hidden), jnp.float32),
        "enc_b_wih": s * jax.random.normal(ks[5], (emb, 4 * hidden), jnp.float32),
        "enc_b_whh": s * jax.random.normal(ks[6], (hidden, 4 * hidden), jnp.float32),
        "enc_b_b":   s * jax.random.normal(ks[7], (1, 4 * hidden), jnp.float32),
        # decoder LSTM
        "dec_wih": s * jax.random.normal(ks[8], (emb, 4 * hidden), jnp.float32),
        "dec_whh": s * jax.random.normal(ks[9], (hidden, 4 * hidden), jnp.float32),
        "dec_b":   s * jax.random.normal(ks[10], (1, 4 * hidden), jnp.float32),
        # attention output projection + vocab projection
        "wc_h": s * jax.random.normal(ks[11], (hidden, hidden), jnp.float32),
        "wc_c": s * jax.random.normal(ks[12], (hidden, hidden), jnp.float32),
        "wv":   s * jax.random.normal(ks[13], (hidden, v_tgt), jnp.float32),
        "bv":   s * jax.random.normal(ks[14], (1, v_tgt), jnp.float32),
    }


def prepare_params(params):
    """One-time weight preprocessing hoisted out of the per-call forward."""
    H = params["enc_f_whh"].shape[0]
    zeros = jnp.zeros((H, 4 * H), jnp.float32)
    whh_bd = jnp.concatenate([
        jnp.concatenate([params["enc_f_whh"], zeros], axis=-1),
        jnp.concatenate([zeros, params["enc_b_whh"]], axis=-1)], axis=0)   # (2H, 8H)
    prep = dict(params)
    prep["enc_wih"] = jnp.concatenate(
        [params["enc_f_wih"], params["enc_b_wih"]], axis=-1)               # (E, 8H)
    prep["enc_b"] = jnp.concatenate(
        [params["enc_f_b"], params["enc_b_b"]], axis=-1)                   # (1, 8H)
    prep["enc_whh_bd"] = whh_bd
    prep["wc"] = jnp.concatenate([params["wc_h"], params["wc_c"]], axis=0)  # (2H, H)
    return prep


def make_mask_by_lengths(lengths, max_len):
    return jnp.arange(max_len)[None, :] < lengths[:, None]          # (B, L) bool


# ----------------------------------------------------------------------------
# Seq2Seq (encode -> bridge -> decode), mirroring the PyTorch module structure.
# ----------------------------------------------------------------------------
@jax.jit
def seq2seq_forward(prep, src_ids, lengths, tgt_ids):
    B, L = src_ids.shape
    T = tgt_ids.shape[1]
    E = prep["src_embed"].shape[-1]
    src_mask = make_mask_by_lengths(lengths, L)                      # (B, L) bool

    # ---- encode + bridge (fused kernel) ----
    x_tm = jnp.take(prep["src_embed"], src_ids.T, axis=0)            # (L, B, E)
    x_flat = x_tm.reshape(L * B, E)                                  # flatten in XLA
    step_mask = src_mask.T.astype(jnp.float32)[:, :, None]           # (L, B, 1)
    mem_tm, h_bwd, c_bwd = encode_and_bridge(prep, x_flat, step_mask, L=L, B=B)

    # ---- decode (LSTM + attention + projection, fused kernel) ----
    mem_blh = jnp.transpose(mem_tm, (1, 0, 2))                       # (B, L, H) XLA glue
    y_tm = jnp.take(prep["tgt_embed"], tgt_ids.T, axis=0)            # (T, B, E)
    y_flat = y_tm.reshape(T * B, E)
    attn_mask = src_mask.astype(jnp.float32)[:, None, :]             # (B, 1, L)
    logits = decode_with_attention(prep, y_flat, h_bwd, c_bwd, mem_blh,
                                   attn_mask, T=T, B=B)
    return logits                                                    # (B, T, V)


if __name__ == "__main__":
    B, L_SRC, T_TGT = 2, 16, 8
    V_SRC, V_TGT, EMB, HID = 40, 128, 16, 32

    key = jax.random.PRNGKey(0)
    k_param, k_src, k_tgt = jax.random.split(key, 3)

    params = init_params(k_param, v_src=V_SRC, v_tgt=V_TGT, emb=EMB, hidden=HID)
    prep = prepare_params(params)                       # one-time weight prep

    src_ids = jax.random.randint(k_src, (B, L_SRC), 0, V_SRC, dtype=jnp.int32)
    tgt_ids = jax.random.randint(k_tgt, (B, T_TGT), 0, V_TGT, dtype=jnp.int32)
    lengths = jnp.array([L_SRC, L_SRC - 4], dtype=jnp.int32)

    logits = seq2seq_forward(prep, src_ids, lengths, tgt_ids)
    jax.block_until_ready(logits)
    assert logits.shape == (B, T_TGT, V_TGT)
    assert bool(jnp.all(jnp.isfinite(logits)))
    print("KERNEL_OK")
</pallas_src>

<mosaic_0001>
module attributes {stable_mosaic.version = 11 : i64} {
  func.func @_decoder_attn_kernel(%arg0: memref<16x16xf32, #tpu.memory_space<vmem>>, %arg1: memref<16x128xf32, #tpu.memory_space<vmem>>, %arg2: memref<32x128xf32, #tpu.memory_space<vmem>>, %arg3: memref<1x128xf32, #tpu.memory_space<vmem>>, %arg4: memref<2x32xf32, #tpu.memory_space<vmem>>, %arg5: memref<2x32xf32, #tpu.memory_space<vmem>>, %arg6: memref<2x16x32xf32, #tpu.memory_space<vmem>>, %arg7: memref<2x1x16xf32, #tpu.memory_space<vmem>>, %arg8: memref<64x32xf32, #tpu.memory_space<vmem>>, %arg9: memref<32x128xf32, #tpu.memory_space<vmem>>, %arg10: memref<1x128xf32, #tpu.memory_space<vmem>>, %arg11: memref<2x8x128xf32, #tpu.memory_space<vmem>>, %arg12: memref<8x2x128xf32, #tpu.memory_space<vmem>>, %arg13: memref<2x32xf32, #tpu.memory_space<vmem>>, %arg14: memref<2x32xf32, #tpu.memory_space<vmem>>, %arg15: memref<8x2x32xf32, #tpu.memory_space<vmem>>) attributes {dimension_semantics = [], scalar_prefetch = 0 : i64, scratch_operands = 4 : i64, tpu.core_type = #tpu.core_type<tc>} {
    %c0 = arith.constant 0 : index
    %c0_0 = arith.constant 0 : index
    %0 = vector.load %arg0[%c0, %c0_0] : memref<16x16xf32, #tpu.memory_space<vmem>>, vector<16x16xf32>
    %c0_1 = arith.constant 0 : index
    %c0_2 = arith.constant 0 : index
    %1 = vector.load %arg1[%c0_1, %c0_2] : memref<16x128xf32, #tpu.memory_space<vmem>>, vector<16x128xf32>
    %cst = arith.constant dense<0.000000e+00> : vector<16x128xf32>
    %2 = tpu.matmul %0, %1, %cst {dimension_numbers = #tpu.dot_dimension_numbers<[1], [0], [0], [1], [0, 0, 1, 1], [], []>} : vector<16x16xf32>, vector<16x128xf32>, vector<16x128xf32> -> vector<16x128xf32>
    %c0_3 = arith.constant 0 : index
    %c0_4 = arith.constant 0 : index
    %3 = vector.load %arg3[%c0_3, %c0_4] : memref<1x128xf32, #tpu.memory_space<vmem>>, vector<1x128xf32>
    %4 = vector.broadcast %3 : vector<1x128xf32> to vector<16x128xf32>
    %5 = arith.addf %2, %4 : vector<16x128xf32>
    %6 = vector.shape_cast %5 : vector<16x128xf32> to vector<8x2x128xf32>
    %c0_5 = arith.constant 0 : index
    %c0_6 = arith.constant 0 : index
    %c0_7 = arith.constant 0 : index
    %7 = vector.load %arg12[%c0_5, %c0_6, %c0_7] : memref<8x2x128xf32, #tpu.memory_space<vmem>>, vector<8x2x128xf32>
    tpu.vector_store %arg12[%c0_5, %c0_6, %c0_7], %6 {strides = array<i32>} : memref<8x2x128xf32, #tpu.memory_space<vmem>>, vector<8x2x128xf32>,
    %c0_8 = arith.constant 0 : index
    %c0_9 = arith.constant 0 : index
    %8 = vector.load %arg4[%c0_8, %c0_9] : memref<2x32xf32, #tpu.memory_space<vmem>>, vector<2x32xf32>
    %c0_10 = arith.constant 0 : index
    %c0_11 = arith.constant 0 : index
    %9 = vector.load %arg13[%c0_10, %c0_11] : memref<2x32xf32, #tpu.memory_space<vmem>>, vector<2x32xf32>
    tpu.vector_store %arg13[%c0_10, %c0_11], %8 {strides = array<i32>} : memref<2x32xf32, #tpu.memory_space<vmem>>, vector<2x32xf32>,
    %c0_12 = arith.constant 0 : index
    %c0_13 = arith.constant 0 : index
    %10 = vector.load %arg5[%c0_12, %c0_13] : memref<2x32xf32, #tpu.memory_space<vmem>>, vector<2x32xf32>
    %c0_14 = arith.constant 0 : index
    %c0_15 = arith.constant 0 : index
    %11 = vector.load %arg14[%c0_14, %c0_15] : memref<2x32xf32, #tpu.memory_space<vmem>>, vector<2x32xf32>
    tpu.vector_store %arg14[%c0_14, %c0_15], %10 {strides = array<i32>} : memref<2x32xf32, #tpu.memory_space<vmem>>, vector<2x32xf32>,
    %c0_i32 = arith.constant 0 : i32
    %c0_16 = arith.constant 0 : index
    %c0_17 = arith.constant 0 : index
    %12 = vector.load %arg13[%c0_16, %c0_17] : memref<2x32xf32, #tpu.memory_space<vmem>>, vector<2x32xf32>
    %c0_18 = arith.constant 0 : index
    %c0_19 = arith.constant 0 : index
    %13 = vector.load %arg14[%c0_18, %c0_19] : memref<2x32xf32, #tpu.memory_space<vmem>>, vector<2x32xf32>
    %14 = arith.index_cast %c0_i32 : i32 to index
    %c0_20 = arith.constant 0 : index
    %c0_21 = arith.constant 0 : index
    %15 = vector.load %arg12[%14, %c0_20, %c0_21] : memref<8x2x128xf32, #tpu.memory_space<vmem>>, vector<1x2x128xf32>
    %16 = vector.shape_cast %15 : vector<1x2x128xf32> to vector<2x128xf32>
    %c0_22 = arith.constant 0 : index
    %c0_23 = arith.constant 0 : index
    %17 = vector.load %arg2[%c0_22, %c0_23] : memref<32x128xf32, #tpu.memory_space<vmem>>, vector<32x128xf32>
    %cst_24 = arith.constant dense<0.000000e+00> : vector<2x128xf32>
    %18 = tpu.matmul %12, %17, %cst_24 {dimension_numbers = #tpu.dot_dimension_numbers<[1], [0], [0], [1], [0, 0, 1, 1], [], []>} : vector<2x32xf32>, vector<32x128xf32>, vector<2x128xf32> -> vector<2x128xf32>
    %19 = arith.addf %16, %18 : vector<2x128xf32>
    %20 = vector.extract_strided_slice %19 {offsets = [0, 0], sizes = [2, 32], strides = [1, 1]} : vector<2x128xf32> to vector<2x32xf32>
    %21 = arith.negf %20 : vector<2x32xf32>
    %22 = math.exp %21 : vector<2x32xf32>
    %cst_25 = arith.constant 1.000000e+00 : f32
    %23 = vector.broadcast %cst_25 : f32 to vector<2x32xf32>
    %24 = arith.addf %23, %22 : vector<2x32xf32>
    %25 = arith.divf %23, %24 : vector<2x32xf32>
    %26 = vector.extract_strided_slice %19 {offsets = [0, 32], sizes = [2, 32], strides = [1, 1]} : vector<2x128xf32> to vector<2x32xf32>
    %27 = arith.negf %26 : vector<2x32xf32>
    %28 = math.exp %27 : vector<2x32xf32>
    %cst_26 = arith.constant 1.000000e+00 : f32
    %29 = vector.broadcast %cst_26 : f32 to vector<2x32xf32>
    %30 = arith.addf %29, %28 : vector<2x32xf32>
    %31 = arith.divf %29, %30 : vector<2x32xf32>
    %32 = vector.extract_strided_slice %19 {offsets = [0, 64], sizes = [2, 32], strides = [1, 1]} : vector<2x128xf32> to vector<2x32xf32>
    %33 = math.tanh %32 : vector<2x32xf32>
    %34 = vector.extract_strided_slice %19 {offsets = [0, 96], sizes = [2, 32], strides = [1, 1]} : vector<2x128xf32> to vector<2x32xf32>
    %35 = arith.negf %34 : vector<2x32xf32>
    %36 = math.exp %35 : vector<2x32xf32>
    %cst_27 = arith.constant 1.000000e+00 : f32
    %37 = vector.broadcast %cst_27 : f32 to vector<2x32xf32>
    %38 = arith.addf %37, %36 : vector<2x32xf32>
    %39 = arith.divf %37, %38 : vector<2x32xf32>
    %40 = arith.mulf %31, %13 : vector<2x32xf32>
    %41 = arith.mulf %25, %33 : vector<2x32xf32>
    %42 = arith.addf %40, %41 : vector<2x32xf32>
    %43 = math.tanh %42 : vector<2x32xf32>
    %44 = arith.mulf %39, %43 : vector<2x32xf32>
    %45 = arith.index_cast %c0_i32 : i32 to index
    %c0_28 = arith.constant 0 : index
    %c0_29 = arith.constant 0 : index
    %46 = vector.load %arg15[%45, %c0_28, %c0_29] : memref<8x2x32xf32, #tpu.memory_space<vmem>>, vector<1x2x32xf32>
    %47 = vector.shape_cast %46 : vector<1x2x32xf32> to vector<2x32xf32>
    %48 = vector.shape_cast %44 : vector<2x32xf32> to vector<1x2x32xf32>
    tpu.vector_store %arg15[%45, %c0_28, %c0_29], %48 {strides = array<i32>} : memref<8x2x32xf32, #tpu.memory_space<vmem>>, vector<1x2x32xf32>,
    %c0_30 = arith.constant 0 : index
    %c0_31 = arith.constant 0 : index
    %49 = vector.load %arg13[%c0_30, %c0_31] : memref<2x32xf32, #tpu.memory_space<vmem>>, vector<2x32xf32>
    tpu.vector_store %arg13[%c0_30, %c0_31], %44 {strides = array<i32>} : memref<2x32xf32, #tpu.memory_space<vmem>>, vector<2x32xf32>,
    %c0_32 = arith.constant 0 : index
    %c0_33 = arith.constant 0 : index
    %50 = vector.load %arg14[%c0_32, %c0_33] : memref<2x32xf32, #tpu.memory_space<vmem>>, vector<2x32xf32>
    tpu.vector_store %arg14[%c0_32, %c0_33], %42 {strides = array<i32>} : memref<2x32xf32, #tpu.memory_space<vmem>>, vector<2x32xf32>,
    %c1_i32 = arith.constant 1 : i32
    %c0_34 = arith.constant 0 : index
    %c0_35 = arith.constant 0 : index
    %51 = vector.load %arg13[%c0_34, %c0_35] : memref<2x32xf32, #tpu.memory_space<vmem>>, vector<2x32xf32>
    %c0_36 = arith.constant 0 : index
    %c0_37 = arith.constant 0 : index
    %52 = vector.load %arg14[%c0_36, %c0_37] : memref<2x32xf32, #tpu.memory_space<vmem>>, vector<2x32xf32>
    %53 = arith.index_cast %c1_i32 : i32 to index
    %c0_38 = arith.constant 0 : index
    %c0_39 = arith.constant 0 : index
    %54 = vector.load %arg12[%53, %c0_38, %c0_39] : memref<8x2x128xf32, #tpu.memory_space<vmem>>, vector<1x2x128xf32>
    %55 = vector.shape_cast %54 : vector<1x2x128xf32> to vector<2x128xf32>
    %c0_40 = arith.constant 0 : index
    %c0_41 = arith.constant 0 : index
    %56 = vector.load %arg2[%c0_40, %c0_41] : memref<32x128xf32, #tpu.memory_space<vmem>>, vector<32x128xf32>
    %cst_42 = arith.constant dense<0.000000e+00> : vector<2x128xf32>
    %57 = tpu.matmul %51, %56, %cst_42 {dimension_numbers = #tpu.dot_dimension_numbers<[1], [0], [0], [1], [0, 0, 1, 1], [], []>} : vector<2x32xf32>, vector<32x128xf32>, vector<2x128xf32> -> vector<2x128xf32>
    %58 = arith.addf %55, %57 : vector<2x128xf32>
    %59 = vector.extract_strided_slice %58 {offsets = [0, 0], sizes = [2, 32], strides = [1, 1]} : vector<2x128xf32> to vector<2x32xf32>
    %60 = arith.negf %59 : vector<2x32xf32>
    %61 = math.exp %60 : vector<2x32xf32>
    %cst_43 = arith.constant 1.000000e+00 : f32
    %62 = vector.broadcast %cst_43 : f32 to vector<2x32xf32>
    %63 = arith.addf %62, %61 : vector<2x32xf32>
    %64 = arith.divf %62, %63 : vector<2x32xf32>
    %65 = vector.extract_strided_slice %58 {offsets = [0, 32], sizes = [2, 32], strides = [1, 1]} : vector<2x128xf32> to vector<2x32xf32>
    %66 = arith.negf %65 : vector<2x32xf32>
    %67 = math.exp %66 : vector<2x32xf32>
    %cst_44 = arith.constant 1.000000e+00 : f32
    %68 = vector.broadcast %cst_44 : f32 to vector<2x32xf32>
    %69 = arith.addf %68, %67 : vector<2x32xf32>
    %70 = arith.divf %68, %69 : vector<2x32xf32>
    %71 = vector.extract_strided_slice %58 {offsets = [0, 64], sizes = [2, 32], strides = [1, 1]} : vector<2x128xf32> to vector<2x32xf32>
    %72 = math.tanh %71 : vector<2x32xf32>
    %73 = vector.extract_strided_slice %58 {offsets = [0, 96], sizes = [2, 32], strides = [1, 1]} : vector<2x128xf32> to vector<2x32xf32>
    %74 = arith.negf %73 : vector<2x32xf32>
    %75 = math.exp %74 : vector<2x32xf32>
    %cst_45 = arith.constant 1.000000e+00 : f32
    %76 = vector.broadcast %cst_45 : f32 to vector<2x32xf32>
    %77 = arith.addf %76, %75 : vector<2x32xf32>
    %78 = arith.divf %76, %77 : vector<2x32xf32>
    %79 = arith.mulf %70, %52 : vector<2x32xf32>
    %80 = arith.mulf %64, %72 : vector<2x32xf32>
    %81 = arith.addf %79, %80 : vector<2x32xf32>
    %82 = math.tanh %81 : vector<2x32xf32>
    %83 = arith.mulf %78, %82 : vector<2x32xf32>
    %84 = arith.index_cast %c1_i32 : i32 to index
    %c0_46 = arith.constant 0 : index
    %c0_47 = arith.constant 0 : index
    %85 = vector.load %arg15[%84, %c0_46, %c0_47] : memref<8x2x32xf32, #tpu.memory_space<vmem>>, vector<1x2x32xf32>
    %86 = vector.shape_cast %85 : vector<1x2x32xf32> to vector<2x32xf32>
    %87 = vector.shape_cast %83 : vector<2x32xf32> to vector<1x2x32xf32>
    tpu.vector_store %arg15[%84, %c0_46, %c0_47], %87 {strides = array<i32>} : memref<8x2x32xf32, #tpu.memory_space<vmem>>, vector<1x2x32xf32>,
    %c0_48 = arith.constant 0 : index
    %c0_49 = arith.constant 0 : index
    %88 = vector.load %arg13[%c0_48, %c0_49] : memref<2x32xf32, #tpu.memory_space<vmem>>, vector<2x32xf32>
    tpu.vector_store %arg13[%c0_48, %c0_49], %83 {strides = array<i32>} : memref<2x32xf32, #tpu.memory_space<vmem>>, vector<2x32xf32>,
    %c0_50 = arith.constant 0 : index
    %c0_51 = arith.constant 0 : index
    %89 = vector.load %arg14[%c0_50, %c0_51] : memref<2x32xf32, #tpu.memory_space<vmem>>, vector<2x32xf32>
    tpu.vector_store %arg14[%c0_50, %c0_51], %81 {strides = array<i32>} : memref<2x32xf32, #tpu.memory_space<vmem>>, vector<2x32xf32>,
    %c2_i32 = arith.constant 2 : i32
    %c0_52 = arith.constant 0 : index
    %c0_53 = arith.constant 0 : index
    %90 = vector.load %arg13[%c0_52, %c0_53] : memref<2x32xf32, #tpu.memory_space<vmem>>, vector<2x32xf32>
    %c0_54 = arith.constant 0 : index
    %c0_55 = arith.constant 0 : index
    %91 = vector.load %arg14[%c0_54, %c0_55] : memref<2x32xf32, #tpu.memory_space<vmem>>, vector<2x32xf32>
    %92 = arith.index_cast %c2_i32 : i32 to index
    %c0_56 = arith.constant 0 : index
    %c0_57 = arith.constant 0 : index
    %93 = vector.load %arg12[%92, %c0_56, %c0_57] : memref<8x2x128xf32, #tpu.memory_space<vmem>>, vector<1x2x128xf32>
    %94 = vector.shape_cast %93 : vector<1x2x128xf32> to vector<2x128xf32>
    %c0_58 = arith.constant 0 : index
    %c0_59 = arith.constant 0 : index
    %95 = vector.load %arg2[%c0_58, %c0_59] : memref<32x128xf32, #tpu.memory_space<vmem>>, vector<32x128xf32>
    %cst_60 = arith.constant dense<0.000000e+00> : vector<2x128xf32>
    %96 = tpu.matmul %90, %95, %cst_60 {dimension_numbers = #tpu.dot_dimension_numbers<[1], [0], [0], [1], [0, 0, 1, 1], [], []>} : vector<2x32xf32>, vector<32x128xf32>, vector<2x128xf32> -> vector<2x128xf32>
    %97 = arith.addf %94, %96 : vector<2x128xf32>
    %98 = vector.extract_strided_slice %97 {offsets = [0, 0], sizes = [2, 32], strides = [1, 1]} : vector<2x128xf32> to vector<2x32xf32>
    %99 = arith.negf %98 : vector<2x32xf32>
    %100 = math.exp %99 : vector<2x32xf32>
    %cst_61 = arith.constant 1.000000e+00 : f32
    %101 = vector.broadcast %cst_61 : f32 to vector<2x32xf32>
    %102 = arith.addf %101, %100 : vector<2x32xf32>
    %103 = arith.divf %101, %102 : vector<2x32xf32>
    %104 = vector.extract_strided_slice %97 {offsets = [0, 32], sizes = [2, 32], strides = [1, 1]} : vector<2x128xf32> to vector<2x32xf32>
    %105 = arith.negf %104 : vector<2x32xf32>
    %106 = math.exp %105 : vector<2x32xf32>
    %cst_62 = arith.constant 1.000000e+00 : f32
    %107 = vector.broadcast %cst_62 : f32 to vector<2x32xf32>
    %108 = arith.addf %107, %106 : vector<2x32xf32>
    %109 = arith.divf %107, %108 : vector<2x32xf32>
    %110 = vector.extract_strided_slice %97 {offsets = [0, 64], sizes = [2, 32], strides = [1, 1]} : vector<2x128xf32> to vector<2x32xf32>
    %111 = math.tanh %110 : vector<2x32xf32>
    %112 = vector.extract_strided_slice %97 {offsets = [0, 96], sizes = [2, 32], strides = [1, 1]} : vector<2x128xf32> to vector<2x32xf32>
    %113 = arith.negf %112 : vector<2x32xf32>
    %114 = math.exp %113 : vector<2x32xf32>
    %cst_63 = arith.constant 1.000000e+00 : f32
    %115 = vector.broadcast %cst_63 : f32 to vector<2x32xf32>
    %116 = arith.addf %115, %114 : vector<2x32xf32>
    %117 = arith.divf %115, %116 : vector<2x32xf32>
    %118 = arith.mulf %109, %91 : vector<2x32xf32>
    %119 = arith.mulf %103, %111 : vector<2x32xf32>
    %120 = arith.addf %118, %119 : vector<2x32xf32>
    %121 = math.tanh %120 : vector<2x32xf32>
    %122 = arith.mulf %117, %121 : vector<2x32xf32>
    %123 = arith.index_cast %c2_i32 : i32 to index
    %c0_64 = arith.constant 0 : index
    %c0_65 = arith.constant 0 : index
    %124 = vector.load %arg15[%123, %c0_64, %c0_65] : memref<8x2x32xf32, #tpu.memory_space<vmem>>, vector<1x2x32xf32>
    %125 = vector.shape_cast %124 : vector<1x2x32xf32> to vector<2x32xf32>
    %126 = vector.shape_cast %122 : vector<2x32xf32> to vector<1x2x32xf32>
    tpu.vector_store %arg15[%123, %c0_64, %c0_65], %126 {strides = array<i32>} : memref<8x2x32xf32, #tpu.memory_space<vmem>>, vector<1x2x32xf32>,
    %c0_66 = arith.constant 0 : index
    %c0_67 = arith.constant 0 : index
    %127 = vector.load %arg13[%c0_66, %c0_67] : memref<2x32xf32, #tpu.memory_space<vmem>>, vector<2x32xf32>
    tpu.vector_store %arg13[%c0_66, %c0_67], %122 {strides = array<i32>} : memref<2x32xf32, #tpu.memory_space<vmem>>, vector<2x32xf32>,
    %c0_68 = arith.constant 0 : index
    %c0_69 = arith.constant 0 : index
    %128 = vector.load %arg14[%c0_68, %c0_69] : memref<2x32xf32, #tpu.memory_space<vmem>>, vector<2x32xf32>
    tpu.vector_store %arg14[%c0_68, %c0_69], %120 {strides = array<i32>} : memref<2x32xf32, #tpu.memory_space<vmem>>, vector<2x32xf32>,
    %c3_i32 = arith.constant 3 : i32
    %c0_70 = arith.constant 0 : index
    %c0_71 = arith.constant 0 : index
    %129 = vector.load %arg13[%c0_70, %c0_71] : memref<2x32xf32, #tpu.memory_space<vmem>>, vector<2x32xf32>
    %c0_72 = arith.constant 0 : index
    %c0_73 = arith.constant 0 : index
    %130 = vector.load %arg14[%c0_72, %c0_73] : memref<2x32xf32, #tpu.memory_space<vmem>>, vector<2x32xf32>
    %131 = arith.index_cast %c3_i32 : i32 to index
    %c0_74 = arith.constant 0 : index
    %c0_75 = arith.constant 0 : index
    %132 = vector.load %arg12[%131, %c0_74, %c0_75] : memref<8x2x128xf32, #tpu.memory_space<vmem>>, vector<1x2x128xf32>
    %133 = vector.shape_cast %132 : vector<1x2x128xf32> to vector<2x128xf32>
    %c0_76 = arith.constant 0 : index
    %c0_77 = arith.constant 0 : index
    %134 = vector.load %arg2[%c0_76, %c0_77] : memref<32x128xf32, #tpu.memory_space<vmem>>, vector<32x128xf32>
    %cst_78 = arith.constant dense<0.000000e+00> : vector<2x128xf32>
    %135 = tpu.matmul %129, %134, %cst_78 {dimension_numbers = #tpu.dot_dimension_numbers<[1], [0], [0], [1], [0, 0, 1, 1], [], []>} : vector<2x32xf32>, vector<32x128xf32>, vector<2x128xf32> -> vector<2x128xf32>
    %136 = arith.addf %133, %135 : vector<2x128xf32>
    %137 = vector.extract_strided_slice %136 {offsets = [0, 0], sizes = [2, 32], strides = [1, 1]} : vector<2x128xf32> to vector<2x32xf32>
    %138 = arith.negf %137 : vector<2x32xf32>
    %139 = math.exp %138 : vector<2x32xf32>
    %cst_79 = arith.constant 1.000000e+00 : f32
    %140 = vector.broadcast %cst_79 : f32 to vector<2x32xf32>
    %141 = arith.addf %140, %139 : vector<2x32xf32>
    %142 = arith.divf %140, %141 : vector<2x32xf32>
    %143 = vector.extract_strided_slice %136 {offsets = [0, 32], sizes = [2, 32], strides = [1, 1]} : vector<2x128xf32> to vector<2x32xf32>
    %144 = arith.negf %143 : vector<2x32xf32>
    %145 = math.exp %144 : vector<2x32xf32>
    %cst_80 = arith.constant 1.000000e+00 : f32
    %146 = vector.broadcast %cst_80 : f32 to vector<2x32xf32>
    %147 = arith.addf %146, %145 : vector<2x32xf32>
    %148 = arith.divf %146, %147 : vector<2x32xf32>
    %149 = vector.extract_strided_slice %136 {offsets = [0, 64], sizes = [2, 32], strides = [1, 1]} : vector<2x128xf32> to vector<2x32xf32>
    %150 = math.tanh %149 : vector<2x32xf32>
    %151 = vector.extract_strided_slice %136 {offsets = [0, 96], sizes = [2, 32], strides = [1, 1]} : vector<2x128xf32> to vector<2x32xf32>
    %152 = arith.negf %151 : vector<2x32xf32>
    %153 = math.exp %152 : vector<2x32xf32>
    %cst_81 = arith.constant 1.000000e+00 : f32
    %154 = vector.broadcast %cst_81 : f32 to vector<2x32xf32>
    %155 = arith.addf %154, %153 : vector<2x32xf32>
    %156 = arith.divf %154, %155 : vector<2x32xf32>
    %157 = arith.mulf %148, %130 : vector<2x32xf32>
    %158 = arith.mulf %142, %150 : vector<2x32xf32>
    %159 = arith.addf %157, %158 : vector<2x32xf32>
    %160 = math.tanh %159 : vector<2x32xf32>
    %161 = arith.mulf %156, %160 : vector<2x32xf32>
    %162 = arith.index_cast %c3_i32 : i32 to index
    %c0_82 = arith.constant 0 : index
    %c0_83 = arith.constant 0 : index
    %163 = vector.load %arg15[%162, %c0_82, %c0_83] : memref<8x2x32xf32, #tpu.memory_space<vmem>>, vector<1x2x32xf32>
    %164 = vector.shape_cast %163 : vector<1x2x32xf32> to vector<2x32xf32>
    %165 = vector.shape_cast %161 : vector<2x32xf32> to vector<1x2x32xf32>
    tpu.vector_store %arg15[%162, %c0_82, %c0_83], %165 {strides = array<i32>} : memref<8x2x32xf32, #tpu.memory_space<vmem>>, vector<1x2x32xf32>,
    %c0_84 = arith.constant 0 : index
    %c0_85 = arith.constant 0 : index
    %166 = vector.load %arg13[%c0_84, %c0_85] : memref<2x32xf32, #tpu.memory_space<vmem>>, vector<2x32xf32>
    tpu.vector_store %arg13[%c0_84, %c0_85], %161 {strides = array<i32>} : memref<2x32xf32, #tpu.memory_space<vmem>>, vector<2x32xf32>,
    %c0_86 = arith.constant 0 : index
    %c0_87 = arith.constant 0 : index
    %167 = vector.load %arg14[%c0_86, %c0_87] : memref<2x32xf32, #tpu.memory_space<vmem>>, vector<2x32xf32>
    tpu.vector_store %arg14[%c0_86, %c0_87], %159 {strides = array<i32>} : memref<2x32xf32, #tpu.memory_space<vmem>>, vector<2x32xf32>,
    %c4_i32 = arith.constant 4 : i32
    %c0_88 = arith.constant 0 : index
    %c0_89 = arith.constant 0 : index
    %168 = vector.load %arg13[%c0_88, %c0_89] : memref<2x32xf32, #tpu.memory_space<vmem>>, vector<2x32xf32>
    %c0_90 = arith.constant 0 : index
    %c0_91 = arith.constant 0 : index
    %169 = vector.load %arg14[%c0_90, %c0_91] : memref<2x32xf32, #tpu.memory_space<vmem>>, vector<2x32xf32>
    %170 = arith.index_cast %c4_i32 : i32 to index
    %c0_92 = arith.constant 0 : index
    %c0_93 = arith.constant 0 : index
    %171 = vector.load %arg12[%170, %c0_92, %c0_93] : memref<8x2x128xf32, #tpu.memory_space<vmem>>, vector<1x2x128xf32>
    %172 = vector.shape_cast %171 : vector<1x2x128xf32> to vector<2x128xf32>
    %c0_94 = arith.constant 0 : index
    %c0_95 = arith.constant 0 : index
    %173 = vector.load %arg2[%c0_94, %c0_95] : memref<32x128xf32, #tpu.memory_space<vmem>>, vector<32x128xf32>
    %cst_96 = arith.constant dense<0.000000e+00> : vector<2x128xf32>
    %174 = tpu.matmul %168, %173, %cst_96 {dimension_numbers = #tpu.dot_dimension_numbers<[1], [0], [0], [1], [0, 0, 1, 1], [], []>} : vector<2x32xf32>, vector<32x128xf32>, vector<2x128xf32> -> vector<2x128xf32>
    %175 = arith.addf %172, %174 : vector<2x128xf32>
    %176 = vector.extract_strided_slice %175 {offsets = [0, 0], sizes = [2, 32], strides = [1, 1]} : vector<2x128xf32> to vector<2x32xf32>
    %177 = arith.negf %176 : vector<2x32xf32>
    %178 = math.exp %177 : vector<2x32xf32>
    %cst_97 = arith.constant 1.000000e+00 : f32
    %179 = vector.broadcast %cst_97 : f32 to vector<2x32xf32>
    %180 = arith.addf %179, %178 : vector<2x32xf32>
    %181 = arith.divf %179, %180 : vector<2x32xf32>
    %182 = vector.extract_strided_slice %175 {offsets = [0, 32], sizes = [2, 32], strides = [1, 1]} : vector<2x128xf32> to vector<2x32xf32>
    %183 = arith.negf %182 : vector<2x32xf32>
    %184 = math.exp %183 : vector<2x32xf32>
    %cst_98 = arith.constant 1.000000e+00 : f32
    %185 = vector.broadcast %cst_98 : f32 to vector<2x32xf32>
    %186 = arith.addf %185, %184 : vector<2x32xf32>
    %187 = arith.divf %185, %186 : vector<2x32xf32>
    %188 = vector.extract_strided_slice %175 {offsets = [0, 64], sizes = [2, 32], strides = [1, 1]} : vector<2x128xf32> to vector<2x32xf32>
    %189 = math.tanh %188 : vector<2x32xf32>
    %190 = vector.extract_strided_slice %175 {offsets = [0, 96], sizes = [2, 32], strides = [1, 1]} : vector<2x128xf32> to vector<2x32xf32>
    %191 = arith.negf %190 : vector<2x32xf32>
    %192 = math.exp %191 : vector<2x32xf32>
    %cst_99 = arith.constant 1.000000e+00 : f32
    %193 = vector.broadcast %cst_99 : f32 to vector<2x32xf32>
    %194 = arith.addf %193, %192 : vector<2x32xf32>
    %195 = arith.divf %193, %194 : vector<2x32xf32>
    %196 = arith.mulf %187, %169 : vector<2x32xf32>
    %197 = arith.mulf %181, %189 : vector<2x32xf32>
    %198 = arith.addf %196, %197 : vector<2x32xf32>
    %199 = math.tanh %198 : vector<2x32xf32>
    %200 = arith.mulf %195, %199 : vector<2x32xf32>
    %201 = arith.index_cast %c4_i32 : i32 to index
    %c0_100 = arith.constant 0 : index
    %c0_101 = arith.constant 0 : index
    %202 = vector.load %arg15[%201, %c0_100, %c0_101] : memref<8x2x32xf32, #tpu.memory_space<vmem>>, vector<1x2x32xf32>
    %203 = vector.shape_cast %202 : vector<1x2x32xf32> to vector<2x32xf32>
    %204 = vector.shape_cast %200 : vector<2x32xf32> to vector<1x2x32xf32>
    tpu.vector_store %arg15[%201, %c0_100, %c0_101], %204 {strides = array<i32>} : memref<8x2x32xf32, #tpu.memory_space<vmem>>, vector<1x2x32xf32>,
    %c0_102 = arith.constant 0 : index
    %c0_103 = arith.constant 0 : index
    %205 = vector.load %arg13[%c0_102, %c0_103] : memref<2x32xf32, #tpu.memory_space<vmem>>, vector<2x32xf32>
    tpu.vector_store %arg13[%c0_102, %c0_103], %200 {strides = array<i32>} : memref<2x32xf32, #tpu.memory_space<vmem>>, vector<2x32xf32>,
    %c0_104 = arith.constant 0 : index
    %c0_105 = arith.constant 0 : index
    %206 = vector.load %arg14[%c0_104, %c0_105] : memref<2x32xf32, #tpu.memory_space<vmem>>, vector<2x32xf32>
    tpu.vector_store %arg14[%c0_104, %c0_105], %198 {strides = array<i32>} : memref<2x32xf32, #tpu.memory_space<vmem>>, vector<2x32xf32>,
    %c5_i32 = arith.constant 5 : i32
    %c0_106 = arith.constant 0 : index
    %c0_107 = arith.constant 0 : index
    %207 = vector.load %arg13[%c0_106, %c0_107] : memref<2x32xf32, #tpu.memory_space<vmem>>, vector<2x32xf32>
    %c0_108 = arith.constant 0 : index
    %c0_109 = arith.constant 0 : index
    %208 = vector.load %arg14[%c0_108, %c0_109] : memref<2x32xf32, #tpu.memory_space<vmem>>, vector<2x32xf32>
    %209 = arith.index_cast %c5_i32 : i32 to index
    %c0_110 = arith.constant 0 : index
    %c0_111 = arith.constant 0 : index
    %210 = vector.load %arg12[%209, %c0_110, %c0_111] : memref<8x2x128xf32, #tpu.memory_space<vmem>>, vector<1x2x128xf32>
    %211 = vector.shape_cast %210 : vector<1x2x128xf32> to vector<2x128xf32>
    %c0_112 = arith.constant 0 : index
    %c0_113 = arith.constant 0 : index
    %212 = vector.load %arg2[%c0_112, %c0_113] : memref<32x128xf32, #tpu.memory_space<vmem>>, vector<32x128xf32>
    %cst_114 = arith.constant dense<0.000000e+00> : vector<2x128xf32>
    %213 = tpu.matmul %207, %212, %cst_114 {dimension_numbers = #tpu.dot_dimension_numbers<[1], [0], [0], [1], [0, 0, 1, 1], [], []>} : vector<2x32xf32>, vector<32x128xf32>, vector<2x128xf32> -> vector<2x128xf32>
    %214 = arith.addf %211, %213 : vector<2x128xf32>
    %215 = vector.extract_strided_slice %214 {offsets = [0, 0], sizes = [2, 32], strides = [1, 1]} : vector<2x128xf32> to vector<2x32xf32>
    %216 = arith.negf %215 : vector<2x32xf32>
    %217 = math.exp %216 : vector<2x32xf32>
    %cst_115 = arith.constant 1.000000e+00 : f32
    %218 = vector.broadcast %cst_115 : f32 to vector<2x32xf32>
    %219 = arith.addf %218, %217 : vector<2x32xf32>
    %220 = arith.divf %218, %219 : vector<2x32xf32>
    %221 = vector.extract_strided_slice %214 {offsets = [0, 32], sizes = [2, 32], strides = [1, 1]} : vector<2x128xf32> to vector<2x32xf32>
    %222 = arith.negf %221 : vector<2x32xf32>
    %223 = math.exp %222 : vector<2x32xf32>
    %cst_116 = arith.constant 1.000000e+00 : f32
    %224 = vector.broadcast %cst_116 : f32 to vector<2x32xf32>
    %225 = arith.addf %224, %223 : vector<2x32xf32>
    %226 = arith.divf %224, %225 : vector<2x32xf32>
    %227 = vector.extract_strided_slice %214 {offsets = [0, 64], sizes = [2, 32], strides = [1, 1]} : vector<2x128xf32> to vector<2x32xf32>
    %228 = math.tanh %227 : vector<2x32xf32>
    %229 = vector.extract_strided_slice %214 {offsets = [0, 96], sizes = [2, 32], strides = [1, 1]} : vector<2x128xf32> to vector<2x32xf32>
    %230 = arith.negf %229 : vector<2x32xf32>
    %231 = math.exp %230 : vector<2x32xf32>
    %cst_117 = arith.constant 1.000000e+00 : f32
    %232 = vector.broadcast %cst_117 : f32 to vector<2x32xf32>
    %233 = arith.addf %232, %231 : vector<2x32xf32>
    %234 = arith.divf %232, %233 : vector<2x32xf32>
    %235 = arith.mulf %226, %208 : vector<2x32xf32>
    %236 = arith.mulf %220, %228 : vector<2x32xf32>
    %237 = arith.addf %235, %236 : vector<2x32xf32>
    %238 = math.tanh %237 : vector<2x32xf32>
    %239 = arith.mulf %234, %238 : vector<2x32xf32>
    %240 = arith.index_cast %c5_i32 : i32 to index
    %c0_118 = arith.constant 0 : index
    %c0_119 = arith.constant 0 : index
    %241 = vector.load %arg15[%240, %c0_118, %c0_119] : memref<8x2x32xf32, #tpu.memory_space<vmem>>, vector<1x2x32xf32>
    %242 = vector.shape_cast %241 : vector<1x2x32xf32> to vector<2x32xf32>
    %243 = vector.shape_cast %239 : vector<2x32xf32> to vector<1x2x32xf32>
    tpu.vector_store %arg15[%240, %c0_118, %c0_119], %243 {strides = array<i32>} : memref<8x2x32xf32, #tpu.memory_space<vmem>>, vector<1x2x32xf32>,
    %c0_120 = arith.constant 0 : index
    %c0_121 = arith.constant 0 : index
    %244 = vector.load %arg13[%c0_120, %c0_121] : memref<2x32xf32, #tpu.memory_space<vmem>>, vector<2x32xf32>
    tpu.vector_store %arg13[%c0_120, %c0_121], %239 {strides = array<i32>} : memref<2x32xf32, #tpu.memory_space<vmem>>, vector<2x32xf32>,
    %c0_122 = arith.constant 0 : index
    %c0_123 = arith.constant 0 : index
    %245 = vector.load %arg14[%c0_122, %c0_123] : memref<2x32xf32, #tpu.memory_space<vmem>>, vector<2x32xf32>
    tpu.vector_store %arg14[%c0_122, %c0_123], %237 {strides = array<i32>} : memref<2x32xf32, #tpu.memory_space<vmem>>, vector<2x32xf32>,
    %c6_i32 = arith.constant 6 : i32
    %c0_124 = arith.constant 0 : index
    %c0_125 = arith.constant 0 : index
    %246 = vector.load %arg13[%c0_124, %c0_125] : memref<2x32xf32, #tpu.memory_space<vmem>>, vector<2x32xf32>
    %c0_126 = arith.constant 0 : index
    %c0_127 = arith.constant 0 : index
    %247 = vector.load %arg14[%c0_126, %c0_127] : memref<2x32xf32, #tpu.memory_space<vmem>>, vector<2x32xf32>
    %248 = arith.index_cast %c6_i32 : i32 to index
    %c0_128 = arith.constant 0 : index
    %c0_129 = arith.constant 0 : index
    %249 = vector.load %arg12[%248, %c0_128, %c0_129] : memref<8x2x128xf32, #tpu.memory_space<vmem>>, vector<1x2x128xf32>
    %250 = vector.shape_cast %249 : vector<1x2x128xf32> to vector<2x128xf32>
    %c0_130 = arith.constant 0 : index
    %c0_131 = arith.constant 0 : index
    %251 = vector.load %arg2[%c0_130, %c0_131] : memref<32x128xf32, #tpu.memory_space<vmem>>, vector<32x128xf32>
    %cst_132 = arith.constant dense<0.000000e+00> : vector<2x128xf32>
    %252 = tpu.matmul %246, %251, %cst_132 {dimension_numbers = #tpu.dot_dimension_numbers<[1], [0], [0], [1], [0, 0, 1, 1], [], []>} : vector<2x32xf32>, vector<32x128xf32>, vector<2x128xf32> -> vector<2x128xf32>
    %253 = arith.addf %250, %252 : vector<2x128xf32>
    %254 = vector.extract_strided_slice %253 {offsets = [0, 0], sizes = [2, 32], strides = [1, 1]} : vector<2x128xf32> to vector<2x32xf32>
    %255 = arith.negf %254 : vector<2x32xf32>
    %256 = math.exp %255 : vector<2x32xf32>
    %cst_133 = arith.constant 1.000000e+00 : f32
    %257 = vector.broadcast %cst_133 : f32 to vector<2x32xf32>
    %258 = arith.addf %257, %256 : vector<2x32xf32>
    %259 = arith.divf %257, %258 : vector<2x32xf32>
    %260 = vector.extract_strided_slice %253 {offsets = [0, 32], sizes = [2, 32], strides = [1, 1]} : vector<2x128xf32> to vector<2x32xf32>
    %261 = arith.negf %260 : vector<2x32xf32>
    %262 = math.exp %261 : vector<2x32xf32>
    %cst_134 = arith.constant 1.000000e+00 : f32
    %263 = vector.broadcast %cst_134 : f32 to vector<2x32xf32>
    %264 = arith.addf %263, %262 : vector<2x32xf32>
    %265 = arith.divf %263, %264 : vector<2x32xf32>
    %266 = vector.extract_strided_slice %253 {offsets = [0, 64], sizes = [2, 32], strides = [1, 1]} : vector<2x128xf32> to vector<2x32xf32>
    %267 = math.tanh %266 : vector<2x32xf32>
    %268 = vector.extract_strided_slice %253 {offsets = [0, 96], sizes = [2, 32], strides = [1, 1]} : vector<2x128xf32> to vector<2x32xf32>
    %269 = arith.negf %268 : vector<2x32xf32>
    %270 = math.exp %269 : vector<2x32xf32>
    %cst_135 = arith.constant 1.000000e+00 : f32
    %271 = vector.broadcast %cst_135 : f32 to vector<2x32xf32>
    %272 = arith.addf %271, %270 : vector<2x32xf32>
    %273 = arith.divf %271, %272 : vector<2x32xf32>
    %274 = arith.mulf %265, %247 : vector<2x32xf32>
    %275 = arith.mulf %259, %267 : vector<2x32xf32>
    %276 = arith.addf %274, %275 : vector<2x32xf32>
    %277 = math.tanh %276 : vector<2x32xf32>
    %278 = arith.mulf %273, %277 : vector<2x32xf32>
    %279 = arith.index_cast %c6_i32 : i32 to index
    %c0_136 = arith.constant 0 : index
    %c0_137 = arith.constant 0 : index
    %280 = vector.load %arg15[%279, %c0_136, %c0_137] : memref<8x2x32xf32, #tpu.memory_space<vmem>>, vector<1x2x32xf32>
    %281 = vector.shape_cast %280 : vector<1x2x32xf32> to vector<2x32xf32>
    %282 = vector.shape_cast %278 : vector<2x32xf32> to vector<1x2x32xf32>
    tpu.vector_store %arg15[%279, %c0_136, %c0_137], %282 {strides = array<i32>} : memref<8x2x32xf32, #tpu.memory_space<vmem>>, vector<1x2x32xf32>,
    %c0_138 = arith.constant 0 : index
    %c0_139 = arith.constant 0 : index
    %283 = vector.load %arg13[%c0_138, %c0_139] : memref<2x32xf32, #tpu.memory_space<vmem>>, vector<2x32xf32>
    tpu.vector_store %arg13[%c0_138, %c0_139], %278 {strides = array<i32>} : memref<2x32xf32, #tpu.memory_space<vmem>>, vector<2x32xf32>,
    %c0_140 = arith.constant 0 : index
    %c0_141 = arith.constant 0 : index
    %284 = vector.load %arg14[%c0_140, %c0_141] : memref<2x32xf32, #tpu.memory_space<vmem>>, vector<2x32xf32>
    tpu.vector_store %arg14[%c0_140, %c0_141], %276 {strides = array<i32>} : memref<2x32xf32, #tpu.memory_space<vmem>>, vector<2x32xf32>,
    %c7_i32 = arith.constant 7 : i32
    %c0_142 = arith.constant 0 : index
    %c0_143 = arith.constant 0 : index
    %285 = vector.load %arg13[%c0_142, %c0_143] : memref<2x32xf32, #tpu.memory_space<vmem>>, vector<2x32xf32>
    %c0_144 = arith.constant 0 : index
    %c0_145 = arith.constant 0 : index
    %286 = vector.load %arg14[%c0_144, %c0_145] : memref<2x32xf32, #tpu.memory_space<vmem>>, vector<2x32xf32>
    %287 = arith.index_cast %c7_i32 : i32 to index
    %c0_146 = arith.constant 0 : index
    %c0_147 = arith.constant 0 : index
    %288 = vector.load %arg12[%287, %c0_146, %c0_147] : memref<8x2x128xf32, #tpu.memory_space<vmem>>, vector<1x2x128xf32>
    %289 = vector.shape_cast %288 : vector<1x2x128xf32> to vector<2x128xf32>
    %c0_148 = arith.constant 0 : index
    %c0_149 = arith.constant 0 : index
    %290 = vector.load %arg2[%c0_148, %c0_149] : memref<32x128xf32, #tpu.memory_space<vmem>>, vector<32x128xf32>
    %cst_150 = arith.constant dense<0.000000e+00> : vector<2x128xf32>
    %291 = tpu.matmul %285, %290, %cst_150 {dimension_numbers = #tpu.dot_dimension_numbers<[1], [0], [0], [1], [0, 0, 1, 1], [], []>} : vector<2x32xf32>, vector<32x128xf32>, vector<2x128xf32> -> vector<2x128xf32>
    %292 = arith.addf %289, %291 : vector<2x128xf32>
    %293 = vector.extract_strided_slice %292 {offsets = [0, 0], sizes = [2, 32], strides = [1, 1]} : vector<2x128xf32> to vector<2x32xf32>
    %294 = arith.negf %293 : vector<2x32xf32>
    %295 = math.exp %294 : vector<2x32xf32>
    %cst_151 = arith.constant 1.000000e+00 : f32
    %296 = vector.broadcast %cst_151 : f32 to vector<2x32xf32>
    %297 = arith.addf %296, %295 : vector<2x32xf32>
    %298 = arith.divf %296, %297 : vector<2x32xf32>
    %299 = vector.extract_strided_slice %292 {offsets = [0, 32], sizes = [2, 32], strides = [1, 1]} : vector<2x128xf32> to vector<2x32xf32>
    %300 = arith.negf %299 : vector<2x32xf32>
    %301 = math.exp %300 : vector<2x32xf32>
    %cst_152 = arith.constant 1.000000e+00 : f32
    %302 = vector.broadcast %cst_152 : f32 to vector<2x32xf32>
    %303 = arith.addf %302, %301 : vector<2x32xf32>
    %304 = arith.divf %302, %303 : vector<2x32xf32>
    %305 = vector.extract_strided_slice %292 {offsets = [0, 64], sizes = [2, 32], strides = [1, 1]} : vector<2x128xf32> to vector<2x32xf32>
    %306 = math.tanh %305 : vector<2x32xf32>
    %307 = vector.extract_strided_slice %292 {offsets = [0, 96], sizes = [2, 32], strides = [1, 1]} : vector<2x128xf32> to vector<2x32xf32>
    %308 = arith.negf %307 : vector<2x32xf32>
    %309 = math.exp %308 : vector<2x32xf32>
    %cst_153 = arith.constant 1.000000e+00 : f32
    %310 = vector.broadcast %cst_153 : f32 to vector<2x32xf32>
    %311 = arith.addf %310, %309 : vector<2x32xf32>
    %312 = arith.divf %310, %311 : vector<2x32xf32>
    %313 = arith.mulf %304, %286 : vector<2x32xf32>
    %314 = arith.mulf %298, %306 : vector<2x32xf32>
    %315 = arith.addf %313, %314 : vector<2x32xf32>
    %316 = math.tanh %315 : vector<2x32xf32>
    %317 = arith.mulf %312, %316 : vector<2x32xf32>
    %318 = arith.index_cast %c7_i32 : i32 to index
    %c0_154 = arith.constant 0 : index
    %c0_155 = arith.constant 0 : index
    %319 = vector.load %arg15[%318, %c0_154, %c0_155] : memref<8x2x32xf32, #tpu.memory_space<vmem>>, vector<1x2x32xf32>
    %320 = vector.shape_cast %319 : vector<1x2x32xf32> to vector<2x32xf32>
    %321 = vector.shape_cast %317 : vector<2x32xf32> to vector<1x2x32xf32>
    tpu.vector_store %arg15[%318, %c0_154, %c0_155], %321 {strides = array<i32>} : memref<8x2x32xf32, #tpu.memory_space<vmem>>, vector<1x2x32xf32>,
    %c0_156 = arith.constant 0 : index
    %c0_157 = arith.constant 0 : index
    %322 = vector.load %arg13[%c0_156, %c0_157] : memref<2x32xf32, #tpu.memory_space<vmem>>, vector<2x32xf32>
    tpu.vector_store %arg13[%c0_156, %c0_157], %317 {strides = array<i32>} : memref<2x32xf32, #tpu.memory_space<vmem>>, vector<2x32xf32>,
    %c0_158 = arith.constant 0 : index
    %c0_159 = arith.constant 0 : index
    %323 = vector.load %arg14[%c0_158, %c0_159] : memref<2x32xf32, #tpu.memory_space<vmem>>, vector<2x32xf32>
    tpu.vector_store %arg14[%c0_158, %c0_159], %315 {strides = array<i32>} : memref<2x32xf32, #tpu.memory_space<vmem>>, vector<2x32xf32>,
    %c8_i32 = arith.constant 8 : i32
    %c0_160 = arith.constant 0 : index
    %c0_161 = arith.constant 0 : index
    %c0_162 = arith.constant 0 : index
    %324 = vector.load %arg15[%c0_160, %c0_161, %c0_162] : memref<8x2x32xf32, #tpu.memory_space<vmem>>, vector<8x2x32xf32>
    %c0_163 = arith.constant 0 : index
    %c0_164 = arith.constant 0 : index
    %c0_165 = arith.constant 0 : index
    %325 = vector.load %arg6[%c0_163, %c0_164, %c0_165] : memref<2x16x32xf32, #tpu.memory_space<vmem>>, vector<2x16x32xf32>
    %326 = vector.extract_strided_slice %324 {offsets = [0, 0, 0], sizes = [8, 1, 32], strides = [1, 1, 1]} : vector<8x2x32xf32> to vector<8x1x32xf32>
    %327 = vector.shape_cast %326 : vector<8x1x32xf32> to vector<8x32xf32>
    %328 = vector.shape_cast %327 : vector<8x32xf32> to vector<1x8x32xf32>
    %329 = vector.extract_strided_slice %324 {offsets = [0, 1, 0], sizes = [8, 1, 32], strides = [1, 1, 1]} : vector<8x2x32xf32> to vector<8x1x32xf32>
    %330 = vector.shape_cast %329 : vector<8x1x32xf32> to vector<8x32xf32>
    %331 = vector.shape_cast %330 : vector<8x32xf32> to vector<1x8x32xf32>
    %332 = tpu.concatenate %328, %331 in 0 : vector<1x8x32xf32>, vector<1x8x32xf32> -> vector<2x8x32xf32>
    %cst_166 = arith.constant dense<0.000000e+00> : vector<2x8x16xf32>
    %333 = tpu.matmul %332, %325, %cst_166 {dimension_numbers = #tpu.dot_dimension_numbers<[2], [2], [1], [1], [0, 0, 0, 1, 1, 1], [0], [0]>} : vector<2x8x32xf32>, vector<2x16x32xf32>, vector<2x8x16xf32> -> vector<2x8x16xf32>
    %c0_167 = arith.constant 0 : index
    %c0_168 = arith.constant 0 : index
    %c0_169 = arith.constant 0 : index
    %334 = vector.load %arg7[%c0_167, %c0_168, %c0_169] : memref<2x1x16xf32, #tpu.memory_space<vmem>>, vector<2x1x16xf32>
    %cst_170 = arith.constant 0.000000e+00 : f32
    %335 = vector.broadcast %cst_170 : f32 to vector<2x1x16xf32>
    %336 = arith.cmpf ogt, %334, %335 : vector<2x1x16xf32>
    %cst_171 = arith.constant -1.000000e+09 : f32
    %337 = vector.shape_cast %336 : vector<2x1x16xi1> to vector<2x1x16xi1>
    %338 = vector.broadcast %337 : vector<2x1x16xi1> to vector<2x8x16xi1>
    %339 = vector.broadcast %cst_171 : f32 to vector<2x8x16xf32>
    %340 = arith.select %338, %333, %339 : vector<2x8x16xi1>, vector<2x8x16xf32>
    %cst_172 = arith.constant dense<0xFF800000> : vector<2x8xf32>
    %341 = vector.multi_reduction <maximumf>, %340, %cst_172 [2] : vector<2x8x16xf32> to vector<2x8xf32>
    %342 = vector.shape_cast %341 : vector<2x8xf32> to vector<2x8x1xf32>
    %343 = vector.broadcast %342 : vector<2x8x1xf32> to vector<2x8x16xf32>
    %344 = arith.subf %340, %343 : vector<2x8x16xf32>
    %345 = math.exp %344 : vector<2x8x16xf32>
    %cst_173 = arith.constant dense<0.000000e+00> : vector<2x8xf32>
    %346 = vector.multi_reduction <add>, %345, %cst_173 [2] : vector<2x8x16xf32> to vector<2x8xf32>
    %347 = vector.shape_cast %346 : vector<2x8xf32> to vector<2x8x1xf32>
    %348 = tpu.reciprocal %347 {approx = true} : vector<2x8x1xf32> -> vector<2x8x1xf32>
    %349 = vector.broadcast %348 : vector<2x8x1xf32> to vector<2x8x16xf32>
    %350 = arith.mulf %345, %349 : vector<2x8x16xf32>
    %cst_174 = arith.constant dense<0.000000e+00> : vector<2x8x32xf32>
    %351 = tpu.matmul %350, %325, %cst_174 {dimension_numbers = #tpu.dot_dimension_numbers<[2], [1], [1], [2], [0, 0, 0, 1, 1, 2], [0], [0]>} : vector<2x8x16xf32>, vector<2x16x32xf32>, vector<2x8x32xf32> -> vector<2x8x32xf32>
    %352 = tpu.concatenate %332, %351 in 2 : vector<2x8x32xf32>, vector<2x8x32xf32> -> vector<2x8x64xf32>
    %353 = vector.shape_cast %352 : vector<2x8x64xf32> to vector<16x64xf32>
    %c0_175 = arith.constant 0 : index
    %c0_176 = arith.constant 0 : index
    %354 = vector.load %arg8[%c0_175, %c0_176] : memref<64x32xf32, #tpu.memory_space<vmem>>, vector<64x32xf32>
    %cst_177 = arith.constant dense<0.000000e+00> : vector<16x32xf32>
    %355 = tpu.matmul %353, %354, %cst_177 {dimension_numbers = #tpu.dot_dimension_numbers<[1], [0], [0], [1], [0, 0, 1, 1], [], []>} : vector<16x64xf32>, vector<64x32xf32>, vector<16x32xf32> -> vector<16x32xf32>
    %356 = math.tanh %355 : vector<16x32xf32>
    %c0_178 = arith.constant 0 : index
    %c0_179 = arith.constant 0 : index
    %357 = vector.load %arg9[%c0_178, %c0_179] : memref<32x128xf32, #tpu.memory_space<vmem>>, vector<32x128xf32>
    %cst_180 = arith.constant dense<0.000000e+00> : vector<16x128xf32>
    %358 = tpu.matmul %356, %357, %cst_180 {dimension_numbers = #tpu.dot_dimension_numbers<[1], [0], [0], [1], [0, 0, 1, 1], [], []>} : vector<16x32xf32>, vector<32x128xf32>, vector<16x128xf32> -> vector<16x128xf32>
    %c0_181 = arith.constant 0 : index
    %c0_182 = arith.constant 0 : index
    %359 = vector.load %arg10[%c0_181, %c0_182] : memref<1x128xf32, #tpu.memory_space<vmem>>, vector<1x128xf32>
    %360 = vector.broadcast %359 : vector<1x128xf32> to vector<16x128xf32>
    %361 = arith.addf %358, %360 : vector<16x128xf32>
    %362 = vector.shape_cast %361 : vector<16x128xf32> to vector<2x8x128xf32>
    %c0_183 = arith.constant 0 : index
    %c0_184 = arith.constant 0 : index
    %c0_185 = arith.constant 0 : index
    %363 = vector.load %arg11[%c0_183, %c0_184, %c0_185] : memref<2x8x128xf32, #tpu.memory_space<vmem>>, vector<2x8x128xf32>
    tpu.vector_store %arg11[%c0_183, %c0_184, %c0_185], %362 {strides = array<i32>} : memref<2x8x128xf32, #tpu.memory_space<vmem>>, vector<2x8x128xf32>,
    return
  }
}

module attributes {stable_mosaic.version = 11 : i64} {
  func.func @_bilstm_encode_bridge_kernel(%arg0: memref<32x16xf32, #tpu.memory_space<vmem>>, %arg1: memref<16x256xf32, #tpu.memory_space<vmem>>, %arg2: memref<64x256xf32, #tpu.memory_space<vmem>>, %arg3: memref<1x256xf32, #tpu.memory_space<vmem>>, %arg4: memref<16x2x1xf32, #tpu.memory_space<vmem>>, %arg5: memref<16x2x32xf32, #tpu.memory_space<vmem>>, %arg6: memref<2x32xf32, #tpu.memory_space<vmem>>, %arg7: memref<2x32xf32, #tpu.memory_space<vmem>>, %arg8: memref<16x2x256xf32, #tpu.memory_space<vmem>>, %arg9: memref<2x32xf32, #tpu.memory_space<vmem>>, %arg10: memref<2x32xf32, #tpu.memory_space<vmem>>, %arg11: memref<2x32xf32, #tpu.memory_space<vmem>>, %arg12: memref<2x32xf32, #tpu.memory_space<vmem>>) attributes {dimension_semantics = [], scalar_prefetch = 0 : i64, scratch_operands = 5 : i64, tpu.core_type = #tpu.core_type<tc>} {
    %c0 = arith.constant 0 : index
    %c0_0 = arith.constant 0 : index
    %0 = vector.load %arg0[%c0, %c0_0] : memref<32x16xf32, #tpu.memory_space<vmem>>, vector<32x16xf32>
    %c0_1 = arith.constant 0 : index
    %c0_2 = arith.constant 0 : index
    %1 = vector.load %arg1[%c0_1, %c0_2] : memref<16x256xf32, #tpu.memory_space<vmem>>, vector<16x256xf32>
    %cst = arith.constant dense<0.000000e+00> : vector<32x256xf32>
    %2 = tpu.matmul %0, %1, %cst {dimension_numbers = #tpu.dot_dimension_numbers<[1], [0], [0], [1], [0, 0, 1, 1], [], []>} : vector<32x16xf32>, vector<16x256xf32>, vector<32x256xf32> -> vector<32x256xf32>
    %c0_3 = arith.constant 0 : index
    %c0_4 = arith.constant 0 : index
    %3 = vector.load %arg3[%c0_3, %c0_4] : memref<1x256xf32, #tpu.memory_space<vmem>>, vector<1x256xf32>
    %4 = vector.broadcast %3 : vector<1x256xf32> to vector<32x256xf32>
    %5 = arith.addf %2, %4 : vector<32x256xf32>
    %6 = vector.shape_cast %5 : vector<32x256xf32> to vector<16x2x256xf32>
    %c0_5 = arith.constant 0 : index
    %c0_6 = arith.constant 0 : index
    %c0_7 = arith.constant 0 : index
    %7 = vector.load %arg8[%c0_5, %c0_6, %c0_7] : memref<16x2x256xf32, #tpu.memory_space<vmem>>, vector<16x2x256xf32>
    tpu.vector_store %arg8[%c0_5, %c0_6, %c0_7], %6 {strides = array<i32>} : memref<16x2x256xf32, #tpu.memory_space<vmem>>, vector<16x2x256xf32>,
    %cst_8 = arith.constant 0.000000e+00 : f32
    %8 = vector.broadcast %cst_8 : f32 to vector<2x32xf32>
    %c0_9 = arith.constant 0 : index
    %c0_10 = arith.constant 0 : index
    %9 = vector.load %arg9[%c0_9, %c0_10] : memref<2x32xf32, #tpu.memory_space<vmem>>, vector<2x32xf32>
    tpu.vector_store %arg9[%c0_9, %c0_10], %8 {strides = array<i32>} : memref<2x32xf32, #tpu.memory_space<vmem>>, vector<2x32xf32>,
    %cst_11 = arith.constant 0.000000e+00 : f32
    %10 = vector.broadcast %cst_11 : f32 to vector<2x32xf32>
    %c0_12 = arith.constant 0 : index
    %c0_13 = arith.constant 0 : index
    %11 = vector.load %arg10[%c0_12, %c0_13] : memref<2x32xf32, #tpu.memory_space<vmem>>, vector<2x32xf32>
    tpu.vector_store %arg10[%c0_12, %c0_13], %10 {strides = array<i32>} : memref<2x32xf32, #tpu.memory_space<vmem>>, vector<2x32xf32>,
    %cst_14 = arith.constant 0.000000e+00 : f32
    %12 = vector.broadcast %cst_14 : f32 to vector<2x32xf32>
    %c0_15 = arith.constant 0 : index
    %c0_16 = arith.constant 0 : index
    %13 = vector.load %arg11[%c0_15, %c0_16] : memref<2x32xf32, #tpu.memory_space<vmem>>, vector<2x32xf32>
    tpu.vector_store %arg11[%c0_15, %c0_16], %12 {strides = array<i32>} : memref<2x32xf32, #tpu.memory_space<vmem>>, vector<2x32xf32>,
    %cst_17 = arith.constant 0.000000e+00 : f32
    %14 = vector.broadcast %cst_17 : f32 to vector<2x32xf32>
    %c0_18 = arith.constant 0 : index
    %c0_19 = arith.constant 0 : index
    %15 = vector.load %arg12[%c0_18, %c0_19] : memref<2x32xf32, #tpu.memory_space<vmem>>, vector<2x32xf32>
    tpu.vector_store %arg12[%c0_18, %c0_19], %14 {strides = array<i32>} : memref<2x32xf32, #tpu.memory_space<vmem>>, vector<2x32xf32>,
    %cst_20 = arith.constant 0.000000e+00 : f32
    %16 = vector.broadcast %cst_20 : f32 to vector<16x2x32xf32>
    %c0_21 = arith.constant 0 : index
    %c0_22 = arith.constant 0 : index
    %c0_23 = arith.constant 0 : index
    %17 = vector.load %arg5[%c0_21, %c0_22, %c0_23] : memref<16x2x32xf32, #tpu.memory_space<vmem>>, vector<16x2x32xf32>
    tpu.vector_store %arg5[%c0_21, %c0_22, %c0_23], %16 {strides = array<i32>} : memref<16x2x32xf32, #tpu.memory_space<vmem>>, vector<16x2x32xf32>,
    %c0_i32 = arith.constant 0 : i32
    %c15_i32 = arith.constant 15 : i32
    %18 = arith.subi %c15_i32, %c0_i32 : i32
    %c0_24 = arith.constant 0 : index
    %c0_25 = arith.constant 0 : index
    %19 = vector.load %arg9[%c0_24, %c0_25] : memref<2x32xf32, #tpu.memory_space<vmem>>, vector<2x32xf32>
    %c0_26 = arith.constant 0 : index
    %c0_27 = arith.constant 0 : index
    %20 = vector.load %arg10[%c0_26, %c0_27] : memref<2x32xf32, #tpu.memory_space<vmem>>, vector<2x32xf32>
    %c0_28 = arith.constant 0 : index
    %c0_29 = arith.constant 0 : index
    %21 = vector.load %arg11[%c0_28, %c0_29] : memref<2x32xf32, #tpu.memory_space<vmem>>, vector<2x32xf32>
    %c0_30 = arith.constant 0 : index
    %c0_31 = arith.constant 0 : index
    %22 = vector.load %arg12[%c0_30, %c0_31] : memref<2x32xf32, #tpu.memory_space<vmem>>, vector<2x32xf32>
    %23 = tpu.concatenate %19, %21 in 1 : vector<2x32xf32>, vector<2x32xf32> -> vector<2x64xf32>
    %c0_32 = arith.constant 0 : index
    %c0_33 = arith.constant 0 : index
    %24 = vector.load %arg2[%c0_32, %c0_33] : memref<64x256xf32, #tpu.memory_space<vmem>>, vector<64x256xf32>
    %cst_34 = arith.constant dense<0.000000e+00> : vector<2x256xf32>
    %25 = tpu.matmul %23, %24, %cst_34 {dimension_numbers = #tpu.dot_dimension_numbers<[1], [0], [0], [1], [0, 0, 1, 1], [], []>} : vector<2x64xf32>, vector<64x256xf32>, vector<2x256xf32> -> vector<2x256xf32>
    %26 = arith.index_cast %c0_i32 : i32 to index
    %c0_35 = arith.constant 0 : index
    %c0_36 = arith.constant 0 : index
    %27 = vector.load %arg8[%26, %c0_35, %c0_36] : memref<16x2x256xf32, #tpu.memory_space<vmem>>, vector<1x2x256xf32>
    %28 = vector.shape_cast %27 : vector<1x2x256xf32> to vector<2x256xf32>
    %29 = vector.extract_strided_slice %28 {offsets = [0, 0], sizes = [2, 128], strides = [1, 1]} : vector<2x256xf32> to vector<2x128xf32>
    %30 = vector.extract_strided_slice %25 {offsets = [0, 0], sizes = [2, 128], strides = [1, 1]} : vector<2x256xf32> to vector<2x128xf32>
    %31 = arith.addf %29, %30 : vector<2x128xf32>
    %32 = arith.index_cast %18 : i32 to index
    %c0_37 = arith.constant 0 : index
    %c0_38 = arith.constant 0 : index
    %33 = vector.load %arg8[%32, %c0_37, %c0_38] : memref<16x2x256xf32, #tpu.memory_space<vmem>>, vector<1x2x256xf32>
    %34 = vector.shape_cast %33 : vector<1x2x256xf32> to vector<2x256xf32>
    %35 = vector.extract_strided_slice %34 {offsets = [0, 128], sizes = [2, 128], strides = [1, 1]} : vector<2x256xf32> to vector<2x128xf32>
    %36 = vector.extract_strided_slice %25 {offsets = [0, 128], sizes = [2, 128], strides = [1, 1]} : vector<2x256xf32> to vector<2x128xf32>
    %37 = arith.addf %35, %36 : vector<2x128xf32>
    %38 = vector.extract_strided_slice %31 {offsets = [0, 0], sizes = [2, 32], strides = [1, 1]} : vector<2x128xf32> to vector<2x32xf32>
    %39 = arith.negf %38 : vector<2x32xf32>
    %40 = math.exp %39 : vector<2x32xf32>
    %cst_39 = arith.constant 1.000000e+00 : f32
    %41 = vector.broadcast %cst_39 : f32 to vector<2x32xf32>
    %42 = arith.addf %41, %40 : vector<2x32xf32>
    %43 = arith.divf %41, %42 : vector<2x32xf32>
    %44 = vector.extract_strided_slice %31 {offsets = [0, 32], sizes = [2, 32], strides = [1, 1]} : vector<2x128xf32> to vector<2x32xf32>
    %45 = arith.negf %44 : vector<2x32xf32>
    %46 = math.exp %45 : vector<2x32xf32>
    %cst_40 = arith.constant 1.000000e+00 : f32
    %47 = vector.broadcast %cst_40 : f32 to vector<2x32xf32>
    %48 = arith.addf %47, %46 : vector<2x32xf32>
    %49 = arith.divf %47, %48 : vector<2x32xf32>
    %50 = vector.extract_strided_slice %31 {offsets = [0, 64], sizes = [2, 32], strides = [1, 1]} : vector<2x128xf32> to vector<2x32xf32>
    %51 = math.tanh %50 : vector<2x32xf32>
    %52 = vector.extract_strided_slice %31 {offsets = [0, 96], sizes = [2, 32], strides = [1, 1]} : vector<2x128xf32> to vector<2x32xf32>
    %53 = arith.negf %52 : vector<2x32xf32>
    %54 = math.exp %53 : vector<2x32xf32>
    %cst_41 = arith.constant 1.000000e+00 : f32
    %55 = vector.broadcast %cst_41 : f32 to vector<2x32xf32>
    %56 = arith.addf %55, %54 : vector<2x32xf32>
    %57 = arith.divf %55, %56 : vector<2x32xf32>
    %58 = arith.mulf %49, %20 : vector<2x32xf32>
    %59 = arith.mulf %43, %51 : vector<2x32xf32>
    %60 = arith.addf %58, %59 : vector<2x32xf32>
    %61 = math.tanh %60 : vector<2x32xf32>
    %62 = arith.mulf %57, %61 : vector<2x32xf32>
    %63 = vector.extract_strided_slice %37 {offsets = [0, 0], sizes = [2, 32], strides = [1, 1]} : vector<2x128xf32> to vector<2x32xf32>
    %64 = arith.negf %63 : vector<2x32xf32>
    %65 = math.exp %64 : vector<2x32xf32>
    %cst_42 = arith.constant 1.000000e+00 : f32
    %66 = vector.broadcast %cst_42 : f32 to vector<2x32xf32>
    %67 = arith.addf %66, %65 : vector<2x32xf32>
    %68 = arith.divf %66, %67 : vector<2x32xf32>
    %69 = vector.extract_strided_slice %37 {offsets = [0, 32], sizes = [2, 32], strides = [1, 1]} : vector<2x128xf32> to vector<2x32xf32>
    %70 = arith.negf %69 : vector<2x32xf32>
    %71 = math.exp %70 : vector<2x32xf32>
    %cst_43 = arith.constant 1.000000e+00 : f32
    %72 = vector.broadcast %cst_43 : f32 to vector<2x32xf32>
    %73 = arith.addf %72, %71 : vector<2x32xf32>
    %74 = arith.divf %72, %73 : vector<2x32xf32>
    %75 = vector.extract_strided_slice %37 {offsets = [0, 64], sizes = [2, 32], strides = [1, 1]} : vector<2x128xf32> to vector<2x32xf32>
    %76 = math.tanh %75 : vector<2x32xf32>
    %77 = vector.extract_strided_slice %37 {offsets = [0, 96], sizes = [2, 32], strides = [1, 1]} : vector<2x128xf32> to vector<2x32xf32>
    %78 = arith.negf %77 : vector<2x32xf32>
    %79 = math.exp %78 : vector<2x32xf32>
    %cst_44 = arith.constant 1.000000e+00 : f32
    %80 = vector.broadcast %cst_44 : f32 to vector<2x32xf32>
    %81 = arith.addf %80, %79 : vector<2x32xf32>
    %82 = arith.divf %80, %81 : vector<2x32xf32>
    %83 = arith.mulf %74, %22 : vector<2x32xf32>
    %84 = arith.mulf %68, %76 : vector<2x32xf32>
    %85 = arith.addf %83, %84 : vector<2x32xf32>
    %86 = math.tanh %85 : vector<2x32xf32>
    %87 = arith.mulf %82, %86 : vector<2x32xf32>
    %88 = arith.index_cast %c0_i32 : i32 to index
    %c0_45 = arith.constant 0 : index
    %c0_46 = arith.constant 0 : index
    %89 = vector.load %arg4[%88, %c0_45, %c0_46] : memref<16x2x1xf32, #tpu.memory_space<vmem>>, vector<1x2x1xf32>
    %90 = vector.shape_cast %89 : vector<1x2x1xf32> to vector<2x1xf32>
    %cst_47 = arith.constant 0.000000e+00 : f32
    %91 = vector.broadcast %cst_47 : f32 to vector<2x1xf32>
    %92 = arith.cmpf ogt, %90, %91 : vector<2x1xf32>
    %93 = arith.index_cast %18 : i32 to index
    %c0_48 = arith.constant 0 : index
    %c0_49 = arith.constant 0 : index
    %94 = vector.load %arg4[%93, %c0_48, %c0_49] : memref<16x2x1xf32, #tpu.memory_space<vmem>>, vector<1x2x1xf32>
    %95 = vector.shape_cast %94 : vector<1x2x1xf32> to vector<2x1xf32>
    %cst_50 = arith.constant 0.000000e+00 : f32
    %96 = vector.broadcast %cst_50 : f32 to vector<2x1xf32>
    %97 = arith.cmpf ogt, %95, %96 : vector<2x1xf32>
    %98 = vector.shape_cast %92 : vector<2x1xi1> to vector<2x1xi1>
    %99 = vector.broadcast %98 : vector<2x1xi1> to vector<2x32xi1>
    %100 = arith.select %99, %62, %19 : vector<2x32xi1>, vector<2x32xf32>
    %c0_51 = arith.constant 0 : index
    %c0_52 = arith.constant 0 : index
    %101 = vector.load %arg9[%c0_51, %c0_52] : memref<2x32xf32, #tpu.memory_space<vmem>>, vector<2x32xf32>
    tpu.vector_store %arg9[%c0_51, %c0_52], %100 {strides = array<i32>} : memref<2x32xf32, #tpu.memory_space<vmem>>, vector<2x32xf32>,
    %102 = vector.shape_cast %92 : vector<2x1xi1> to vector<2x1xi1>
    %103 = vector.broadcast %102 : vector<2x1xi1> to vector<2x32xi1>
    %104 = arith.select %103, %60, %20 : vector<2x32xi1>, vector<2x32xf32>
    %c0_53 = arith.constant 0 : index
    %c0_54 = arith.constant 0 : index
    %105 = vector.load %arg10[%c0_53, %c0_54] : memref<2x32xf32, #tpu.memory_space<vmem>>, vector<2x32xf32>
    tpu.vector_store %arg10[%c0_53, %c0_54], %104 {strides = array<i32>} : memref<2x32xf32, #tpu.memory_space<vmem>>, vector<2x32xf32>,
    %106 = vector.shape_cast %97 : vector<2x1xi1> to vector<2x1xi1>
    %107 = vector.broadcast %106 : vector<2x1xi1> to vector<2x32xi1>
    %108 = arith.select %107, %87, %21 : vector<2x32xi1>, vector<2x32xf32>
    %c0_55 = arith.constant 0 : index
    %c0_56 = arith.constant 0 : index
    %109 = vector.load %arg11[%c0_55, %c0_56] : memref<2x32xf32, #tpu.memory_space<vmem>>, vector<2x32xf32>
    tpu.vector_store %arg11[%c0_55, %c0_56], %108 {strides = array<i32>} : memref<2x32xf32, #tpu.memory_space<vmem>>, vector<2x32xf32>,
    %110 = vector.shape_cast %97 : vector<2x1xi1> to vector<2x1xi1>
    %111 = vector.broadcast %110 : vector<2x1xi1> to vector<2x32xi1>
    %112 = arith.select %111, %85, %22 : vector<2x32xi1>, vector<2x32xf32>
    %c0_57 = arith.constant 0 : index
    %c0_58 = arith.constant 0 : index
    %113 = vector.load %arg12[%c0_57, %c0_58] : memref<2x32xf32, #tpu.memory_space<vmem>>, vector<2x32xf32>
    tpu.vector_store %arg12[%c0_57, %c0_58], %112 {strides = array<i32>} : memref<2x32xf32, #tpu.memory_space<vmem>>, vector<2x32xf32>,
    %114 = arith.index_cast %c0_i32 : i32 to index
    %c0_59 = arith.constant 0 : index
    %c0_60 = arith.constant 0 : index
    %115 = vector.load %arg5[%114, %c0_59, %c0_60] : memref<16x2x32xf32, #tpu.memory_space<vmem>>, vector<1x2x32xf32>
    %116 = vector.shape_cast %115 : vector<1x2x32xf32> to vector<2x32xf32>
    %cst_61 = arith.constant 0.000000e+00 : f32
    %117 = vector.shape_cast %92 : vector<2x1xi1> to vector<2x1xi1>
    %118 = vector.broadcast %117 : vector<2x1xi1> to vector<2x32xi1>
    %119 = vector.broadcast %cst_61 : f32 to vector<2x32xf32>
    %120 = arith.select %118, %62, %119 : vector<2x32xi1>, vector<2x32xf32>
    %121 = arith.addf %116, %120 : vector<2x32xf32>
    %122 = arith.index_cast %c0_i32 : i32 to index
    %c0_62 = arith.constant 0 : index
    %c0_63 = arith.constant 0 : index
    %123 = vector.load %arg5[%122, %c0_62, %c0_63] : memref<16x2x32xf32, #tpu.memory_space<vmem>>, vector<1x2x32xf32>
    %124 = vector.shape_cast %123 : vector<1x2x32xf32> to vector<2x32xf32>
    %125 = vector.shape_cast %121 : vector<2x32xf32> to vector<1x2x32xf32>
    tpu.vector_store %arg5[%122, %c0_62, %c0_63], %125 {strides = array<i32>} : memref<16x2x32xf32, #tpu.memory_space<vmem>>, vector<1x2x32xf32>,
    %126 = arith.index_cast %18 : i32 to index
    %c0_64 = arith.constant 0 : index
    %c0_65 = arith.constant 0 : index
    %127 = vector.load %arg5[%126, %c0_64, %c0_65] : memref<16x2x32xf32, #tpu.memory_space<vmem>>, vector<1x2x32xf32>
    %128 = vector.shape_cast %127 : vector<1x2x32xf32> to vector<2x32xf32>
    %cst_66 = arith.constant 0.000000e+00 : f32
    %129 = vector.shape_cast %97 : vector<2x1xi1> to vector<2x1xi1>
    %130 = vector.broadcast %129 : vector<2x1xi1> to vector<2x32xi1>
    %131 = vector.broadcast %cst_66 : f32 to vector<2x32xf32>
    %132 = arith.select %130, %87, %131 : vector<2x32xi1>, vector<2x32xf32>
    %133 = arith.addf %128, %132 : vector<2x32xf32>
    %134 = arith.index_cast %18 : i32 to index
    %c0_67 = arith.constant 0 : index
    %c0_68 = arith.constant 0 : index
    %135 = vector.load %arg5[%134, %c0_67, %c0_68] : memref<16x2x32xf32, #tpu.memory_space<vmem>>, vector<1x2x32xf32>
    %136 = vector.shape_cast %135 : vector<1x2x32xf32> to vector<2x32xf32>
    %137 = vector.shape_cast %133 : vector<2x32xf32> to vector<1x2x32xf32>
    tpu.vector_store %arg5[%134, %c0_67, %c0_68], %137 {strides = array<i32>} : memref<16x2x32xf32, #tpu.memory_space<vmem>>, vector<1x2x32xf32>,
    %c1_i32 = arith.constant 1 : i32
    %c15_i32_69 = arith.constant 15 : i32
    %138 = arith.subi %c15_i32_69, %c1_i32 : i32
    %c0_70 = arith.constant 0 : index
    %c0_71 = arith.constant 0 : index
    %139 = vector.load %arg9[%c0_70, %c0_71] : memref<2x32xf32, #tpu.memory_space<vmem>>, vector<2x32xf32>
    %c0_72 = arith.constant 0 : index
    %c0_73 = arith.constant 0 : index
    %140 = vector.load %arg10[%c0_72, %c0_73] : memref<2x32xf32, #tpu.memory_space<vmem>>, vector<2x32xf32>
    %c0_74 = arith.constant 0 : index
    %c0_75 = arith.constant 0 : index
    %141 = vector.load %arg11[%c0_74, %c0_75] : memref<2x32xf32, #tpu.memory_space<vmem>>, vector<2x32xf32>
    %c0_76 = arith.constant 0 : index
    %c0_77 = arith.constant 0 : index
    %142 = vector.load %arg12[%c0_76, %c0_77] : memref<2x32xf32, #tpu.memory_space<vmem>>, vector<2x32xf32>
    %143 = tpu.concatenate %139, %141 in 1 : vector<2x32xf32>, vector<2x32xf32> -> vector<2x64xf32>
    %c0_78 = arith.constant 0 : index
    %c0_79 = arith.constant 0 : index
    %144 = vector.load %arg2[%c0_78, %c0_79] : memref<64x256xf32, #tpu.memory_space<vmem>>, vector<64x256xf32>
    %cst_80 = arith.constant dense<0.000000e+00> : vector<2x256xf32>
    %145 = tpu.matmul %143, %144, %cst_80 {dimension_numbers = #tpu.dot_dimension_numbers<[1], [0], [0], [1], [0, 0, 1, 1], [], []>} : vector<2x64xf32>, vector<64x256xf32>, vector<2x256xf32> -> vector<2x256xf32>
    %146 = arith.index_cast %c1_i32 : i32 to index
    %c0_81 = arith.constant 0 : index
    %c0_82 = arith.constant 0 : index
    %147 = vector.load %arg8[%146, %c0_81, %c0_82] : memref<16x2x256xf32, #tpu.memory_space<vmem>>, vector<1x2x256xf32>
    %148 = vector.shape_cast %147 : vector<1x2x256xf32> to vector<2x256xf32>
    %149 = vector.extract_strided_slice %148 {offsets = [0, 0], sizes = [2, 128], strides = [1, 1]} : vector<2x256xf32> to vector<2x128xf32>
    %150 = vector.extract_strided_slice %145 {offsets = [0, 0], sizes = [2, 128], strides = [1, 1]} : vector<2x256xf32> to vector<2x128xf32>
    %151 = arith.addf %149, %150 : vector<2x128xf32>
    %152 = arith.index_cast %138 : i32 to index
    %c0_83 = arith.constant 0 : index
    %c0_84 = arith.constant 0 : index
    %153 = vector.load %arg8[%152, %c0_83, %c0_84] : memref<16x2x256xf32, #tpu.memory_space<vmem>>, vector<1x2x256xf32>
    %154 = vector.shape_cast %153 : vector<1x2x256xf32> to vector<2x256xf32>
    %155 = vector.extract_strided_slice %154 {offsets = [0, 128], sizes = [2, 128], strides = [1, 1]} : vector<2x256xf32> to vector<2x128xf32>
    %156 = vector.extract_strided_slice %145 {offsets = [0, 128], sizes = [2, 128], strides = [1, 1]} : vector<2x256xf32> to vector<2x128xf32>
    %157 = arith.addf %155, %156 : vector<2x128xf32>
    %158 = vector.extract_strided_slice %151 {offsets = [0, 0], sizes = [2, 32], strides = [1, 1]} : vector<2x128xf32> to vector<2x32xf32>
    %159 = arith.negf %158 : vector<2x32xf32>
    %160 = math.exp %159 : vector<2x32xf32>
    %cst_85 = arith.constant 1.000000e+00 : f32
    %161 = vector.broadcast %cst_85 : f32 to vector<2x32xf32>
    %162 = arith.addf %161, %160 : vector<2x32xf32>
    %163 = arith.divf %161, %162 : vector<2x32xf32>
    %164 = vector.extract_strided_slice %151 {offsets = [0, 32], sizes = [2, 32], strides = [1, 1]} : vector<2x128xf32> to vector<2x32xf32>
    %165 = arith.negf %164 : vector<2x32xf32>
    %166 = math.exp %165 : vector<2x32xf32>
    %cst_86 = arith.constant 1.000000e+00 : f32
    %167 = vector.broadcast %cst_86 : f32 to vector<2x32xf32>
    %168 = arith.addf %167, %166 : vector<2x32xf32>
    %169 = arith.divf %167, %168 : vector<2x32xf32>
    %170 = vector.extract_strided_slice %151 {offsets = [0, 64], sizes = [2, 32], strides = [1, 1]} : vector<2x128xf32> to vector<2x32xf32>
    %171 = math.tanh %170 : vector<2x32xf32>
    %172 = vector.extract_strided_slice %151 {offsets = [0, 96], sizes = [2, 32], strides = [1, 1]} : vector<2x128xf32> to vector<2x32xf32>
    %173 = arith.negf %172 : vector<2x32xf32>
    %174 = math.exp %173 : vector<2x32xf32>
    %cst_87 = arith.constant 1.000000e+00 : f32
    %175 = vector.broadcast %cst_87 : f32 to vector<2x32xf32>
    %176 = arith.addf %175, %174 : vector<2x32xf32>
    %177 = arith.divf %175, %176 : vector<2x32xf32>
    %178 = arith.mulf %169, %140 : vector<2x32xf32>
    %179 = arith.mulf %163, %171 : vector<2x32xf32>
    %180 = arith.addf %178, %179 : vector<2x32xf32>
    %181 = math.tanh %180 : vector<2x32xf32>
    %182 = arith.mulf %177, %181 : vector<2x32xf32>
    %183 = vector.extract_strided_slice %157 {offsets = [0, 0], sizes = [2, 32], strides = [1, 1]} : vector<2x128xf32> to vector<2x32xf32>
    %184 = arith.negf %183 : vector<2x32xf32>
    %185 = math.exp %184 : vector<2x32xf32>
    %cst_88 = arith.constant 1.000000e+00 : f32
    %186 = vector.broadcast %cst_88 : f32 to vector<2x32xf32>
    %187 = arith.addf %186, %185 : vector<2x32xf32>
    %188 = arith.divf %186, %187 : vector<2x32xf32>
    %189 = vector.extract_strided_slice %157 {offsets = [0, 32], sizes = [2, 32], strides = [1, 1]} : vector<2x128xf32> to vector<2x32xf32>
    %190 = arith.negf %189 : vector<2x32xf32>
    %191 = math.exp %190 : vector<2x32xf32>
    %cst_89 = arith.constant 1.000000e+00 : f32
    %192 = vector.broadcast %cst_89 : f32 to vector<2x32xf32>
    %193 = arith.addf %192, %191 : vector<2x32xf32>
    %194 = arith.divf %192, %193 : vector<2x32xf32>
    %195 = vector.extract_strided_slice %157 {offsets = [0, 64], sizes = [2, 32], strides = [1, 1]} : vector<2x128xf32> to vector<2x32xf32>
    %196 = math.tanh %195 : vector<2x32xf32>
    %197 = vector.extract_strided_slice %157 {offsets = [0, 96], sizes = [2, 32], strides = [1, 1]} : vector<2x128xf32> to vector<2x32xf32>
    %198 = arith.negf %197 : vector<2x32xf32>
    %199 = math.exp %198 : vector<2x32xf32>
    %cst_90 = arith.constant 1.000000e+00 : f32
    %200 = vector.broadcast %cst_90 : f32 to vector<2x32xf32>
    %201 = arith.addf %200, %199 : vector<2x32xf32>
    %202 = arith.divf %200, %201 : vector<2x32xf32>
    %203 = arith.mulf %194, %142 : vector<2x32xf32>
    %204 = arith.mulf %188, %196 : vector<2x32xf32>
    %205 = arith.addf %203, %204 : vector<2x32xf32>
    %206 = math.tanh %205 : vector<2x32xf32>
    %207 = arith.mulf %202, %206 : vector<2x32xf32>
    %208 = arith.index_cast %c1_i32 : i32 to index
    %c0_91 = arith.constant 0 : index
    %c0_92 = arith.constant 0 : index
    %209 = vector.load %arg4[%208, %c0_91, %c0_92] : memref<16x2x1xf32, #tpu.memory_space<vmem>>, vector<1x2x1xf32>
    %210 = vector.shape_cast %209 : vector<1x2x1xf32> to vector<2x1xf32>
    %cst_93 = arith.constant 0.000000e+00 : f32
    %211 = vector.broadcast %cst_93 : f32 to vector<2x1xf32>
    %212 = arith.cmpf ogt, %210, %211 : vector<2x1xf32>
    %213 = arith.index_cast %138 : i32 to index
    %c0_94 = arith.constant 0 : index
    %c0_95 = arith.constant 0 : index
    %214 = vector.load %arg4[%213, %c0_94, %c0_95] : memref<16x2x1xf32, #tpu.memory_space<vmem>>, vector<1x2x1xf32>
    %215 = vector.shape_cast %214 : vector<1x2x1xf32> to vector<2x1xf32>
    %cst_96 = arith.constant 0.000000e+00 : f32
    %216 = vector.broadcast %cst_96 : f32 to vector<2x1xf32>
    %217 = arith.cmpf ogt, %215, %216 : vector<2x1xf32>
    %218 = vector.shape_cast %212 : vector<2x1xi1> to vector<2x1xi1>
    %219 = vector.broadcast %218 : vector<2x1xi1> to vector<2x32xi1>
    %220 = arith.select %219, %182, %139 : vector<2x32xi1>, vector<2x32xf32>
    %c0_97 = arith.constant 0 : index
    %c0_98 = arith.constant 0 : index
    %221 = vector.load %arg9[%c0_97, %c0_98] : memref<2x32xf32, #tpu.memory_space<vmem>>, vector<2x32xf32>
    tpu.vector_store %arg9[%c0_97, %c0_98], %220 {strides = array<i32>} : memref<2x32xf32, #tpu.memory_space<vmem>>, vector<2x32xf32>,
    %222 = vector.shape_cast %212 : vector<2x1xi1> to vector<2x1xi1>
    %223 = vector.broadcast %222 : vector<2x1xi1> to vector<2x32xi1>
    %224 = arith.select %223, %180, %140 : vector<2x32xi1>, vector<2x32xf32>
    %c0_99 = arith.constant 0 : index
    %c0_100 = arith.constant 0 : index
    %225 = vector.load %arg10[%c0_99, %c0_100] : memref<2x32xf32, #tpu.memory_space<vmem>>, vector<2x32xf32>
    tpu.vector_store %arg10[%c0_99, %c0_100], %224 {strides = array<i32>} : memref<2x32xf32, #tpu.memory_space<vmem>>, vector<2x32xf32>,
    %226 = vector.shape_cast %217 : vector<2x1xi1> to vector<2x1xi1>
    %227 = vector.broadcast %226 : vector<2x1xi1> to vector<2x32xi1>
    %228 = arith.select %227, %207, %141 : vector<2x32xi1>, vector<2x32xf32>
    %c0_101 = arith.constant 0 : index
    %c0_102 = arith.constant 0 : index
    %229 = vector.load %arg11[%c0_101, %c0_102] : memref<2x32xf32, #tpu.memory_space<vmem>>, vector<2x32xf32>
    tpu.vector_store %arg11[%c0_101, %c0_102], %228 {strides = array<i32>} : memref<2x32xf32, #tpu.memory_space<vmem>>, vector<2x32xf32>,
    %230 = vector.shape_cast %217 : vector<2x1xi1> to vector<2x1xi1>
    %231 = vector.broadcast %230 : vector<2x1xi1> to vector<2x32xi1>
    %232 = arith.select %231, %205, %142 : vector<2x32xi1>, vector<2x32xf32>
    %c0_103 = arith.constant 0 : index
    %c0_104 = arith.constant 0 : index
    %233 = vector.load %arg12[%c0_103, %c0_104] : memref<2x32xf32, #tpu.memory_space<vmem>>, vector<2x32xf32>
    tpu.vector_store %arg12[%c0_103, %c0_104], %232 {strides = array<i32>} : memref<2x32xf32, #tpu.memory_space<vmem>>, vector<2x32xf32>,
    %234 = arith.index_cast %c1_i32 : i32 to index
    %c0_105 = arith.constant 0 : index
    %c0_106 = arith.constant 0 : index
    %235 = vector.load %arg5[%234, %c0_105, %c0_106] : memref<16x2x32xf32, #tpu.memory_space<vmem>>, vector<1x2x32xf32>
    %236 = vector.shape_cast %235 : vector<1x2x32xf32> to vector<2x32xf32>
    %cst_107 = arith.constant 0.000000e+00 : f32
    %237 = vector.shape_cast %212 : vector<2x1xi1> to vector<2x1xi1>
    %238 = vector.broadcast %237 : vector<2x1xi1> to vector<2x32xi1>
    %239 = vector.broadcast %cst_107 : f32 to vector<2x32xf32>
    %240 = arith.select %238, %182, %239 : vector<2x32xi1>, vector<2x32xf32>
    %241 = arith.addf %236, %240 : vector<2x32xf32>
    %242 = arith.index_cast %c1_i32 : i32 to index
    %c0_108 = arith.constant 0 : index
    %c0_109 = arith.constant 0 : index
    %243 = vector.load %arg5[%242, %c0_108, %c0_109] : memref<16x2x32xf32, #tpu.memory_space<vmem>>, vector<1x2x32xf32>
    %244 = vector.shape_cast %243 : vector<1x2x32xf32> to vector<2x32xf32>
    %245 = vector.shape_cast %241 : vector<2x32xf32> to vector<1x2x32xf32>
    tpu.vector_store %arg5[%242, %c0_108, %c0_109], %245 {strides = array<i32>} : memref<16x2x32xf32, #tpu.memory_space<vmem>>, vector<1x2x32xf32>,
    %246 = arith.index_cast %138 : i32 to index
    %c0_110 = arith.constant 0 : index
    %c0_111 = arith.constant 0 : index
    %247 = vector.load %arg5[%246, %c0_110, %c0_111] : memref<16x2x32xf32, #tpu.memory_space<vmem>>, vector<1x2x32xf32>
    %248 = vector.shape_cast %247 : vector<1x2x32xf32> to vector<2x32xf32>
    %cst_112 = arith.constant 0.000000e+00 : f32
    %249 = vector.shape_cast %217 : vector<2x1xi1> to vector<2x1xi1>
    %250 = vector.broadcast %249 : vector<2x1xi1> to vector<2x32xi1>
    %251 = vector.broadcast %cst_112 : f32 to vector<2x32xf32>
    %252 = arith.select %250, %207, %251 : vector<2x32xi1>, vector<2x32xf32>
    %253 = arith.addf %248, %252 : vector<2x32xf32>
    %254 = arith.index_cast %138 : i32 to index
    %c0_113 = arith.constant 0 : index
    %c0_114 = arith.constant 0 : index
    %255 = vector.load %arg5[%254, %c0_113, %c0_114] : memref<16x2x32xf32, #tpu.memory_space<vmem>>, vector<1x2x32xf32>
    %256 = vector.shape_cast %255 : vector<1x2x32xf32> to vector<2x32xf32>
    %257 = vector.shape_cast %253 : vector<2x32xf32> to vector<1x2x32xf32>
    tpu.vector_store %arg5[%254, %c0_113, %c0_114], %257 {strides = array<i32>} : memref<16x2x32xf32, #tpu.memory_space<vmem>>, vector<1x2x32xf32>,
    %c2_i32 = arith.constant 2 : i32
    %c15_i32_115 = arith.constant 15 : i32
    %258 = arith.subi %c15_i32_115, %c2_i32 : i32
    %c0_116 = arith.constant 0 : index
    %c0_117 = arith.constant 0 : index
    %259 = vector.load %arg9[%c0_116, %c0_117] : memref<2x32xf32, #tpu.memory_space<vmem>>, vector<2x32xf32>
    %c0_118 = arith.constant 0 : index
    %c0_119 = arith.constant 0 : index
    %260 = vector.load %arg10[%c0_118, %c0_119] : memref<2x32xf32, #tpu.memory_space<vmem>>, vector<2x32xf32>
    %c0_120 = arith.constant 0 : index
    %c0_121 = arith.constant 0 : index
    %261 = vector.load %arg11[%c0_120, %c0_121] : memref<2x32xf32, #tpu.memory_space<vmem>>, vector<2x32xf32>
    %c0_122 = arith.constant 0 : index
    %c0_123 = arith.constant 0 : index
    %262 = vector.load %arg12[%c0_122, %c0_123] : memref<2x32xf32, #tpu.memory_space<vmem>>, vector<2x32xf32>
    %263 = tpu.concatenate %259, %261 in 1 : vector<2x32xf32>, vector<2x32xf32> -> vector<2x64xf32>
    %c0_124 = arith.constant 0 : index
    %c0_125 = arith.constant 0 : index
    %264 = vector.load %arg2[%c0_124, %c0_125] : memref<64x256xf32, #tpu.memory_space<vmem>>, vector<64x256xf32>
    %cst_126 = arith.constant dense<0.000000e+00> : vector<2x256xf32>
    %265 = tpu.matmul %263, %264, %cst_126 {dimension_numbers = #tpu.dot_dimension_numbers<[1], [0], [0], [1], [0, 0, 1, 1], [], []>} : vector<2x64xf32>, vector<64x256xf32>, vector<2x256xf32> -> vector<2x256xf32>
    %266 = arith.index_cast %c2_i32 : i32 to index
    %c0_127 = arith.constant 0 : index
    %c0_128 = arith.constant 0 : index
    %267 = vector.load %arg8[%266, %c0_127, %c0_128] : memref<16x2x256xf32, #tpu.memory_space<vmem>>, vector<1x2x256xf32>
    %268 = vector.shape_cast %267 : vector<1x2x256xf32> to vector<2x256xf32>
    %269 = vector.extract_strided_slice %268 {offsets = [0, 0], sizes = [2, 128], strides = [1, 1]} : vector<2x256xf32> to vector<2x128xf32>
    %270 = vector.extract_strided_slice %265 {offsets = [0, 0], sizes = [2, 128], strides = [1, 1]} : vector<2x256xf32> to vector<2x128xf32>
    %271 = arith.addf %269, %270 : vector<2x128xf32>
    %272 = arith.index_cast %258 : i32 to index
    %c0_129 = arith.constant 0 : index
    %c0_130 = arith.constant 0 : index
    %273 = vector.load %arg8[%272, %c0_129, %c0_130] : memref<16x2x256xf32, #tpu.memory_space<vmem>>, vector<1x2x256xf32>
    %274 = vector.shape_cast %273 : vector<1x2x256xf32> to vector<2x256xf32>
    %275 = vector.extract_strided_slice %274 {offsets = [0, 128], sizes = [2, 128], strides = [1, 1]} : vector<2x256xf32> to vector<2x128xf32>
    %276 = vector.extract_strided_slice %265 {offsets = [0, 128], sizes = [2, 128], strides = [1, 1]} : vector<2x256xf32> to vector<2x128xf32>
    %277 = arith.addf %275, %276 : vector<2x128xf32>
    %278 = vector.extract_strided_slice %271 {offsets = [0, 0], sizes = [2, 32], strides = [1, 1]} : vector<2x128xf32> to vector<2x32xf32>
    %279 = arith.negf %278 : vector<2x32xf32>
    %280 = math.exp %279 : vector<2x32xf32>
    %cst_131 = arith.constant 1.000000e+00 : f32
    %281 = vector.broadcast %cst_131 : f32 to vector<2x32xf32>
    %282 = arith.addf %281, %280 : vector<2x32xf32>
    %283 = arith.divf %281, %282 : vector<2x32xf32>
    %284 = vector.extract_strided_slice %271 {offsets = [0, 32], sizes = [2, 32], strides = [1, 1]} : vector<2x128xf32> to vector<2x32xf32>
    %285 = arith.negf %284 : vector<2x32xf32>
    %286 = math.exp %285 : vector<2x32xf32>
    %cst_132 = arith.constant 1.000000e+00 : f32
    %287 = vector.broadcast %cst_132 : f32 to vector<2x32xf32>
    %288 = arith.addf %287, %286 : vector<2x32xf32>
    %289 = arith.divf %287, %288 : vector<2x32xf32>
    %290 = vector.extract_strided_slice %271 {offsets = [0, 64], sizes = [2, 32], strides = [1, 1]} : vector<2x128xf32> to vector<2x32xf32>
    %291 = math.tanh %290 : vector<2x32xf32>
    %292 = vector.extract_strided_slice %271 {offsets = [0, 96], sizes = [2, 32], strides = [1, 1]} : vector<2x128xf32> to vector<2x32xf32>
    %293 = arith.negf %292 : vector<2x32xf32>
    %294 = math.exp %293 : vector<2x32xf32>
    %cst_133 = arith.constant 1.000000e+00 : f32
    %295 = vector.broadcast %cst_133 : f32 to vector<2x32xf32>
    %296 = arith.addf %295, %294 : vector<2x32xf32>
    %297 = arith.divf %295, %296 : vector<2x32xf32>
    %298 = arith.mulf %289, %260 : vector<2x32xf32>
    %299 = arith.mulf %283, %291 : vector<2x32xf32>
    %300 = arith.addf %298, %299 : vector<2x32xf32>
    %301 = math.tanh %300 : vector<2x32xf32>
    %302 = arith.mulf %297, %301 : vector<2x32xf32>
    %303 = vector.extract_strided_slice %277 {offsets = [0, 0], sizes = [2, 32], strides = [1, 1]} : vector<2x128xf32> to vector<2x32xf32>
    %304 = arith.negf %303 : vector<2x32xf32>
    %305 = math.exp %304 : vector<2x32xf32>
    %cst_134 = arith.constant 1.000000e+00 : f32
    %306 = vector.broadcast %cst_134 : f32 to vector<2x32xf32>
    %307 = arith.addf %306, %305 : vector<2x32xf32>
    %308 = arith.divf %306, %307 : vector<2x32xf32>
    %309 = vector.extract_strided_slice %277 {offsets = [0, 32], sizes = [2, 32], strides = [1, 1]} : vector<2x128xf32> to vector<2x32xf32>
    %310 = arith.negf %309 : vector<2x32xf32>
    %311 = math.exp %310 : vector<2x32xf32>
    %cst_135 = arith.constant 1.000000e+00 : f32
    %312 = vector.broadcast %cst_135 : f32 to vector<2x32xf32>
    %313 = arith.addf %312, %311 : vector<2x32xf32>
    %314 = arith.divf %312, %313 : vector<2x32xf32>
    %315 = vector.extract_strided_slice %277 {offsets = [0, 64], sizes = [2, 32], strides = [1, 1]} : vector<2x128xf32> to vector<2x32xf32>
    %316 = math.tanh %315 : vector<2x32xf32>
    %317 = vector.extract_strided_slice %277 {offsets = [0, 96], sizes = [2, 32], strides = [1, 1]} : vector<2x128xf32> to vector<2x32xf32>
    %318 = arith.negf %317 : vector<2x32xf32>
    %319 = math.exp %318 : vector<2x32xf32>
    %cst_136 = arith.constant 1.000000e+00 : f32
    %320 = vector.broadcast %cst_136 : f32 to vector<2x32xf32>
    %321 = arith.addf %320, %319 : vector<2x32xf32>
    %322 = arith.divf %320, %321 : vector<2x32xf32>
    %323 = arith.mulf %314, %262 : vector<2x32xf32>
    %324 = arith.mulf %308, %316 : vector<2x32xf32>
    %325 = arith.addf %323, %324 : vector<2x32xf32>
    %326 = math.tanh %325 : vector<2x32xf32>
    %327 = arith.mulf %322, %326 : vector<2x32xf32>
    %328 = arith.index_cast %c2_i32 : i32 to index
    %c0_137 = arith.constant 0 : index
    %c0_138 = arith.constant 0 : index
    %329 = vector.load %arg4[%328, %c0_137, %c0_138] : memref<16x2x1xf32, #tpu.memory_space<vmem>>, vector<1x2x1xf32>
    %330 = vector.shape_cast %329 : vector<1x2x1xf32> to vector<2x1xf32>
    %cst_139 = arith.constant 0.000000e+00 : f32
    %331 = vector.broadcast %cst_139 : f32 to vector<2x1xf32>
    %332 = arith.cmpf ogt, %330, %331 : vector<2x1xf32>
    %333 = arith.index_cast %258 : i32 to index
    %c0_140 = arith.constant 0 : index
    %c0_141 = arith.constant 0 : index
    %334 = vector.load %arg4[%333, %c0_140, %c0_141] : memref<16x2x1xf32, #tpu.memory_space<vmem>>, vector<1x2x1xf32>
    %335 = vector.shape_cast %334 : vector<1x2x1xf32> to vector<2x1xf32>
    %cst_142 = arith.constant 0.000000e+00 : f32
    %336 = vector.broadcast %cst_142 : f32 to vector<2x1xf32>
    %337 = arith.cmpf ogt, %335, %336 : vector<2x1xf32>
    %338 = vector.shape_cast %332 : vector<2x1xi1> to vector<2x1xi1>
    %339 = vector.broadcast %338 : vector<2x1xi1> to vector<2x32xi1>
    %340 = arith.select %339, %302, %259 : vector<2x32xi1>, vector<2x32xf32>
    %c0_143 = arith.constant 0 : index
    %c0_144 = arith.constant 0 : index
    %341 = vector.load %arg9[%c0_143, %c0_144] : memref<2x32xf32, #tpu.memory_space<vmem>>, vector<2x32xf32>
    tpu.vector_store %arg9[%c0_143, %c0_144], %340 {strides = array<i32>} : memref<2x32xf32, #tpu.memory_space<vmem>>, vector<2x32xf32>,
    %342 = vector.shape_cast %332 : vector<2x1xi1> to vector<2x1xi1>
    %343 = vector.broadcast %342 : vector<2x1xi1> to vector<2x32xi1>
    %344 = arith.select %343, %300, %260 : vector<2x32xi1>, vector<2x32xf32>
    %c0_145 = arith.constant 0 : index
    %c0_146 = arith.constant 0 : index
    %345 = vector.load %arg10[%c0_145, %c0_146] : memref<2x32xf32, #tpu.memory_space<vmem>>, vector<2x32xf32>
    tpu.vector_store %arg10[%c0_145, %c0_146], %344 {strides = array<i32>} : memref<2x32xf32, #tpu.memory_space<vmem>>, vector<2x32xf32>,
    %346 = vector.shape_cast %337 : vector<2x1xi1> to vector<2x1xi1>
    %347 = vector.broadcast %346 : vector<2x1xi1> to vector<2x32xi1>
    %348 = arith.select %347, %327, %261 : vector<2x32xi1>, vector<2x32xf32>
    %c0_147 = arith.constant 0 : index
    %c0_148 = arith.constant 0 : index
    %349 = vector.load %arg11[%c0_147, %c0_148] : memref<2x32xf32, #tpu.memory_space<vmem>>, vector<2x32xf32>
    tpu.vector_store %arg11[%c0_147, %c0_148], %348 {strides = array<i32>} : memref<2x32xf32, #tpu.memory_space<vmem>>, vector<2x32xf32>,
    %350 = vector.shape_cast %337 : vector<2x1xi1> to vector<2x1xi1>
    %351 = vector.broadcast %350 : vector<2x1xi1> to vector<2x32xi1>
    %352 = arith.select %351, %325, %262 : vector<2x32xi1>, vector<2x32xf32>
    %c0_149 = arith.constant 0 : index
    %c0_150 = arith.constant 0 : index
    %353 = vector.load %arg12[%c0_149, %c0_150] : memref<2x32xf32, #tpu.memory_space<vmem>>, vector<2x32xf32>
    tpu.vector_store %arg12[%c0_149, %c0_150], %352 {strides = array<i32>} : memref<2x32xf32, #tpu.memory_space<vmem>>, vector<2x32xf32>,
    %354 = arith.index_cast %c2_i32 : i32 to index
    %c0_151 = arith.constant 0 : index
    %c0_152 = arith.constant 0 : index
    %355 = vector.load %arg5[%354, %c0_151, %c0_152] : memref<16x2x32xf32, #tpu.memory_space<vmem>>, vector<1x2x32xf32>
    %356 = vector.shape_cast %355 : vector<1x2x32xf32> to vector<2x32xf32>
    %cst_153 = arith.constant 0.000000e+00 : f32
    %357 = vector.shape_cast %332 : vector<2x1xi1> to vector<2x1xi1>
    %358 = vector.broadcast %357 : vector<2x1xi1> to vector<2x32xi1>
    %359 = vector.broadcast %cst_153 : f32 to vector<2x32xf32>
    %360 = arith.select %358, %302, %359 : vector<2x32xi1>, vector<2x32xf32>
    %361 = arith.addf %356, %360 : vector<2x32xf32>
    %362 = arith.index_cast %c2_i32 : i32 to index
    %c0_154 = arith.constant 0 : index
    %c0_155 = arith.constant 0 : index
    %363 = vector.load %arg5[%362, %c0_154, %c0_155] : memref<16x2x32xf32, #tpu.memory_space<vmem>>, vector<1x2x32xf32>
    %364 = vector.shape_cast %363 : vector<1x2x32xf32> to vector<2x32xf32>
    %365 = vector.shape_cast %361 : vector<2x32xf32> to vector<1x2x32xf32>
    tpu.vector_store %arg5[%362, %c0_154, %c0_155], %365 {strides = array<i32>} : memref<16x2x32xf32, #tpu.memory_space<vmem>>, vector<1x2x32xf32>,
    %366 = arith.index_cast %258 : i32 to index
    %c0_156 = arith.constant 0 : index
    %c0_157 = arith.constant 0 : index
    %367 = vector.load %arg5[%366, %c0_156, %c0_157] : memref<16x2x32xf32, #tpu.memory_space<vmem>>, vector<1x2x32xf32>
    %368 = vector.shape_cast %367 : vector<1x2x32xf32> to vector<2x32xf32>
    %cst_158 = arith.constant 0.000000e+00 : f32
    %369 = vector.shape_cast %337 : vector<2x1xi1> to vector<2x1xi1>
    %370 = vector.broadcast %369 : vector<2x1xi1> to vector<2x32xi1>
    %371 = vector.broadcast %cst_158 : f32 to vector<2x32xf32>
    %372 = arith.select %370, %327, %371 : vector<2x32xi1>, vector<2x32xf32>
    %373 = arith.addf %368, %372 : vector<2x32xf32>
    %374 = arith.index_cast %258 : i32 to index
    %c0_159 = arith.constant 0 : index
    %c0_160 = arith.constant 0 : index
    %375 = vector.load %arg5[%374, %c0_159, %c0_160] : memref<16x2x32xf32, #tpu.memory_space<vmem>>, vector<1x2x32xf32>
    %376 = vector.shape_cast %375 : vector<1x2x32xf32> to vector<2x32xf32>
    %377 = vector.shape_cast %373 : vector<2x32xf32> to vector<1x2x32xf32>
    tpu.vector_store %arg5[%374, %c0_159, %c0_160], %377 {strides = array<i32>} : memref<16x2x32xf32, #tpu.memory_space<vmem>>, vector<1x2x32xf32>,
    %c3_i32 = arith.constant 3 : i32
    %c15_i32_161 = arith.constant 15 : i32
    %378 = arith.subi %c15_i32_161, %c3_i32 : i32
    %c0_162 = arith.constant 0 : index
    %c0_163 = arith.constant 0 : index
    %379 = vector.load %arg9[%c0_162, %c0_163] : memref<2x32xf32, #tpu.memory_space<vmem>>, vector<2x32xf32>
    %c0_164 = arith.constant 0 : index
    %c0_165 = arith.constant 0 : index
    %380 = vector.load %arg10[%c0_164, %c0_165] : memref<2x32xf32, #tpu.memory_space<vmem>>, vector<2x32xf32>
    %c0_166 = arith.constant 0 : index
    %c0_167 = arith.constant 0 : index
    %381 = vector.load %arg11[%c0_166, %c0_167] : memref<2x32xf32, #tpu.memory_space<vmem>>, vector<2x32xf32>
    %c0_168 = arith.constant 0 : index
    %c0_169 = arith.constant 0 : index
    %382 = vector.load %arg12[%c0_168, %c0_169] : memref<2x32xf32, #tpu.memory_space<vmem>>, vector<2x32xf32>
    %383 = tpu.concatenate %379, %381 in 1 : vector<2x32xf32>, vector<2x32xf32> -> vector<2x64xf32>
    %c0_170 = arith.constant 0 : index
    %c0_171 = arith.constant 0 : index
    %384 = vector.load %arg2[%c0_170, %c0_171] : memref<64x256xf32, #tpu.memory_space<vmem>>, vector<64x256xf32>
    %cst_172 = arith.constant dense<0.000000e+00> : vector<2x256xf32>
    %385 = tpu.matmul %383, %384, %cst_172 {dimension_numbers = #tpu.dot_dimension_numbers<[1], [0], [0], [1], [0, 0, 1, 1], [], []>} : vector<2x64xf32>, vector<64x256xf32>, vector<2x256xf32> -> vector<2x256xf32>
    %386 = arith.index_cast %c3_i32 : i32 to index
    %c0_173 = arith.constant 0 : index
    %c0_174 = arith.constant 0 : index
    %387 = vector.load %arg8[%386, %c0_173, %c0_174] : memref<16x2x256xf32, #tpu.memory_space<vmem>>, vector<1x2x256xf32>
    %388 = vector.shape_cast %387 : vector<1x2x256xf32> to vector<2x256xf32>
    %389 = vector.extract_strided_slice %388 {offsets = [0, 0], sizes = [2, 128], strides = [1, 1]} : vector<2x256xf32> to vector<2x128xf32>
    %390 = vector.extract_strided_slice %385 {offsets = [0, 0], sizes = [2, 128], strides = [1, 1]} : vector<2x256xf32> to vector<2x128xf32>
    %391 = arith.addf %389, %390 : vector<2x128xf32>
    %392 = arith.index_cast %378 : i32 to index
    %c0_175 = arith.constant 0 : index
    %c0_176 = arith.constant 0 : index
    %393 = vector.load %arg8[%392, %c0_175, %c0_176] : memref<16x2x256xf32, #tpu.memory_space<vmem>>, vector<1x2x256xf32>
    %394 = vector.shape_cast %393 : vector<1x2x256xf32> to vector<2x256xf32>
    %395 = vector.extract_strided_slice %394 {offsets = [0, 128], sizes = [2, 128], strides = [1, 1]} : vector<2x256xf32> to vector<2x128xf32>
    %396 = vector.extract_strided_slice %385 {offsets = [0, 128], sizes = [2, 128], strides = [1, 1]} : vector<2x256xf32> to vector<2x128xf32>
    %397 = arith.addf %395, %396 : vector<2x128xf32>
    %398 = vector.extract_strided_slice %391 {offsets = [0, 0], sizes = [2, 32], strides = [1, 1]} : vector<2x128xf32> to vector<2x32xf32>
    %399 = arith.negf %398 : vector<2x32xf32>
    %400 = math.exp %399 : vector<2x32xf32>
    %cst_177 = arith.constant 1.000000e+00 : f32
    %401 = vector.broadcast %cst_177 : f32 to vector<2x32xf32>
    %402 = arith.addf %401, %400 : vector<2x32xf32>
    %403 = arith.divf %401, %402 : vector<2x32xf32>
    %404 = vector.extract_strided_slice %391 {offsets = [0, 32], sizes = [2, 32], strides = [1, 1]} : vector<2x128xf32> to vector<2x32xf32>
    %405 = arith.negf %404 : vector<2x32xf32>
    %406 = math.exp %405 : vector<2x32xf32>
    %cst_178 = arith.constant 1.000000e+00 : f32
    %407 = vector.broadcast %cst_178 : f32 to vector<2x32xf32>
    %408 = arith.addf %407, %406 : vector<2x32xf32>
    %409 = arith.divf %407, %408 : vector<2x32xf32>
    %410 = vector.extract_strided_slice %391 {offsets = [0, 64], sizes = [2, 32], strides = [1, 1]} : vector<2x128xf32> to vector<2x32xf32>
    %411 = math.tanh %410 : vector<2x32xf32>
    %412 = vector.extract_strided_slice %391 {offsets = [0, 96], sizes = [2, 32], strides = [1, 1]} : vector<2x128xf32> to vector<2x32xf32>
    %413 = arith.negf %412 : vector<2x32xf32>
    %414 = math.exp %413 : vector<2x32xf32>
    %cst_179 = arith.constant 1.000000e+00 : f32
    %415 = vector.broadcast %cst_179 : f32 to vector<2x32xf32>
    %416 = arith.addf %415, %414 : vector<2x32xf32>
    %417 = arith.divf %415, %416 : vector<2x32xf32>
    %418 = arith.mulf %409, %380 : vector<2x32xf32>
    %419 = arith.mulf %403, %411 : vector<2x32xf32>
    %420 = arith.addf %418, %419 : vector<2x32xf32>
    %421 = math.tanh %420 : vector<2x32xf32>
    %422 = arith.mulf %417, %421 : vector<2x32xf32>
    %423 = vector.extract_strided_slice %397 {offsets = [0, 0], sizes = [2, 32], strides = [1, 1]} : vector<2x128xf32> to vector<2x32xf32>
    %424 = arith.negf %423 : vector<2x32xf32>
    %425 = math.exp %424 : vector<2x32xf32>
    %cst_180 = arith.constant 1.000000e+00 : f32
    %426 = vector.broadcast %cst_180 : f32 to vector<2x32xf32>
    %427 = arith.addf %426, %425 : vector<2x32xf32>
    %428 = arith.divf %426, %427 : vector<2x32xf32>
    %429 = vector.extract_strided_slice %397 {offsets = [0, 32], sizes = [2, 32], strides = [1, 1]} : vector<2x128xf32> to vector<2x32xf32>
    %430 = arith.negf %429 : vector<2x32xf32>
    %431 = math.exp %430 : vector<2x32xf32>
    %cst_181 = arith.constant 1.000000e+00 : f32
    %432 = vector.broadcast %cst_181 : f32 to vector<2x32xf32>
    %433 = arith.addf %432, %431 : vector<2x32xf32>
    %434 = arith.divf %432, %433 : vector<2x32xf32>
    %435 = vector.extract_strided_slice %397 {offsets = [0, 64], sizes = [2, 32], strides = [1, 1]} : vector<2x128xf32> to vector<2x32xf32>
    %436 = math.tanh %435 : vector<2x32xf32>
    %437 = vector.extract_strided_slice %397 {offsets = [0, 96], sizes = [2, 32], strides = [1, 1]} : vector<2x128xf32> to vector<2x32xf32>
    %438 = arith.negf %437 : vector<2x32xf32>
    %439 = math.exp %438 : vector<2x32xf32>
    %cst_182 = arith.constant 1.000000e+00 : f32
    %440 = vector.broadcast %cst_182 : f32 to vector<2x32xf32>
    %441 = arith.addf %440, %439 : vector<2x32xf32>
    %442 = arith.divf %440, %441 : vector<2x32xf32>
    %443 = arith.mulf %434, %382 : vector<2x32xf32>
    %444 = arith.mulf %428, %436 : vector<2x32xf32>
    %445 = arith.addf %443, %444 : vector<2x32xf32>
    %446 = math.tanh %445 : vector<2x32xf32>
    %447 = arith.mulf %442, %446 : vector<2x32xf32>
    %448 = arith.index_cast %c3_i32 : i32 to index
    %c0_183 = arith.constant 0 : index
    %c0_184 = arith.constant 0 : index
    %449 = vector.load %arg4[%448, %c0_183, %c0_184] : memref<16x2x1xf32, #tpu.memory_space<vmem>>, vector<1x2x1xf32>
    %450 = vector.shape_cast %449 : vector<1x2x1xf32> to vector<2x1xf32>
    %cst_185 = arith.constant 0.000000e+00 : f32
    %451 = vector.broadcast %cst_185 : f32 to vector<2x1xf32>
    %452 = arith.cmpf ogt, %450, %451 : vector<2x1xf32>
    %453 = arith.index_cast %378 : i32 to index
    %c0_186 = arith.constant 0 : index
    %c0_187 = arith.constant 0 : index
    %454 = vector.load %arg4[%453, %c0_186, %c0_187] : memref<16x2x1xf32, #tpu.memory_space<vmem>>, vector<1x2x1xf32>
    %455 = vector.shape_cast %454 : vector<1x2x1xf32> to vector<2x1xf32>
    %cst_188 = arith.constant 0.000000e+00 : f32
    %456 = vector.broadcast %cst_188 : f32 to vector<2x1xf32>
    %457 = arith.cmpf ogt, %455, %456 : vector<2x1xf32>
    %458 = vector.shape_cast %452 : vector<2x1xi1> to vector<2x1xi1>
    %459 = vector.broadcast %458 : vector<2x1xi1> to vector<2x32xi1>
    %460 = arith.select %459, %422, %379 : vector<2x32xi1>, vector<2x32xf32>
    %c0_189 = arith.constant 0 : index
    %c0_190 = arith.constant 0 : index
    %461 = vector.load %arg9[%c0_189, %c0_190] : memref<2x32xf32, #tpu.memory_space<vmem>>, vector<2x32xf32>
    tpu.vector_store %arg9[%c0_189, %c0_190], %460 {strides = array<i32>} : memref<2x32xf32, #tpu.memory_space<vmem>>, vector<2x32xf32>,
    %462 = vector.shape_cast %452 : vector<2x1xi1> to vector<2x1xi1>
    %463 = vector.broadcast %462 : vector<2x1xi1> to vector<2x32xi1>
    %464 = arith.select %463, %420, %380 : vector<2x32xi1>, vector<2x32xf32>
    %c0_191 = arith.constant 0 : index
    %c0_192 = arith.constant 0 : index
    %465 = vector.load %arg10[%c0_191, %c0_192] : memref<2x32xf32, #tpu.memory_space<vmem>>, vector<2x32xf32>
    tpu.vector_store %arg10[%c0_191, %c0_192], %464 {strides = array<i32>} : memref<2x32xf32, #tpu.memory_space<vmem>>, vector<2x32xf32>,
    %466 = vector.shape_cast %457 : vector<2x1xi1> to vector<2x1xi1>
    %467 = vector.broadcast %466 : vector<2x1xi1> to vector<2x32xi1>
    %468 = arith.select %467, %447, %381 : vector<2x32xi1>, vector<2x32xf32>
    %c0_193 = arith.constant 0 : index
    %c0_194 = arith.constant 0 : index
    %469 = vector.load %arg11[%c0_193, %c0_194] : memref<2x32xf32, #tpu.memory_space<vmem>>, vector<2x32xf32>
    tpu.vector_store %arg11[%c0_193, %c0_194], %468 {strides = array<i32>} : memref<2x32xf32, #tpu.memory_space<vmem>>, vector<2x32xf32>,
    %470 = vector.shape_cast %457 : vector<2x1xi1> to vector<2x1xi1>
    %471 = vector.broadcast %470 : vector<2x1xi1> to vector<2x32xi1>
    %472 = arith.select %471, %445, %382 : vector<2x32xi1>, vector<2x32xf32>
    %c0_195 = arith.constant 0 : index
    %c0_196 = arith.constant 0 : index
    %473 = vector.load %arg12[%c0_195, %c0_196] : memref<2x32xf32, #tpu.memory_space<vmem>>, vector<2x32xf32>
    tpu.vector_store %arg12[%c0_195, %c0_196], %472 {strides = array<i32>} : memref<2x32xf32, #tpu.memory_space<vmem>>, vector<2x32xf32>,
    %474 = arith.index_cast %c3_i32 : i32 to index
    %c0_197 = arith.constant 0 : index
    %c0_198 = arith.constant 0 : index
    %475 = vector.load %arg5[%474, %c0_197, %c0_198] : memref<16x2x32xf32, #tpu.memory_space<vmem>>, vector<1x2x32xf32>
    %476 = vector.shape_cast %475 : vector<1x2x32xf32> to vector<2x32xf32>
    %cst_199 = arith.constant 0.000000e+00 : f32
    %477 = vector.shape_cast %452 : vector<2x1xi1> to vector<2x1xi1>
    %478 = vector.broadcast %477 : vector<2x1xi1> to vector<2x32xi1>
    %479 = vector.broadcast %cst_199 : f32 to vector<2x32xf32>
    %480 = arith.select %478, %422, %479 : vector<2x32xi1>, vector<2x32xf32>
    %481 = arith.addf %476, %480 : vector<2x32xf32>
    %482 = arith.index_cast %c3_i32 : i32 to index
    %c0_200 = arith.constant 0 : index
    %c0_201 = arith.constant 0 : index
    %483 = vector.load %arg5[%482, %c0_200, %c0_201] : memref<16x2x32xf32, #tpu.memory_space<vmem>>, vector<1x2x32xf32>
    %484 = vector.shape_cast %483 : vector<1x2x32xf32> to vector<2x32xf32>
    %485 = vector.shape_cast %481 : vector<2x32xf32> to vector<1x2x32xf32>
    tpu.vector_store %arg5[%482, %c0_200, %c0_201], %485 {strides = array<i32>} : memref<16x2x32xf32, #tpu.memory_space<vmem>>, vector<1x2x32xf32>,
    %486 = arith.index_cast %378 : i32 to index
    %c0_202 = arith.constant 0 : index
    %c0_203 = arith.constant 0 : index
    %487 = vector.load %arg5[%486, %c0_202, %c0_203] : memref<16x2x32xf32, #tpu.memory_space<vmem>>, vector<1x2x32xf32>
    %488 = vector.shape_cast %487 : vector<1x2x32xf32> to vector<2x32xf32>
    %cst_204 = arith.constant 0.000000e+00 : f32
    %489 = vector.shape_cast %457 : vector<2x1xi1> to vector<2x1xi1>
    %490 = vector.broadcast %489 : vector<2x1xi1> to vector<2x32xi1>
    %491 = vector.broadcast %cst_204 : f32 to vector<2x32xf32>
    %492 = arith.select %490, %447, %491 : vector<2x32xi1>, vector<2x32xf32>
    %493 = arith.addf %488, %492 : vector<2x32xf32>
    %494 = arith.index_cast %378 : i32 to index
    %c0_205 = arith.constant 0 : index
    %c0_206 = arith.constant 0 : index
    %495 = vector.load %arg5[%494, %c0_205, %c0_206] : memref<16x2x32xf32, #tpu.memory_space<vmem>>, vector<1x2x32xf32>
    %496 = vector.shape_cast %495 : vector<1x2x32xf32> to vector<2x32xf32>
    %497 = vector.shape_cast %493 : vector<2x32xf32> to vector<1x2x32xf32>
    tpu.vector_store %arg5[%494, %c0_205, %c0_206], %497 {strides = array<i32>} : memref<16x2x32xf32, #tpu.memory_space<vmem>>, vector<1x2x32xf32>,
    %c4_i32 = arith.constant 4 : i32
    %c15_i32_207 = arith.constant 15 : i32
    %498 = arith.subi %c15_i32_207, %c4_i32 : i32
    %c0_208 = arith.constant 0 : index
    %c0_209 = arith.constant 0 : index
    %499 = vector.load %arg9[%c0_208, %c0_209] : memref<2x32xf32, #tpu.memory_space<vmem>>, vector<2x32xf32>
    %c0_210 = arith.constant 0 : index
    %c0_211 = arith.constant 0 : index
    %500 = vector.load %arg10[%c0_210, %c0_211] : memref<2x32xf32, #tpu.memory_space<vmem>>, vector<2x32xf32>
    %c0_212 = arith.constant 0 : index
    %c0_213 = arith.constant 0 : index
    %501 = vector.load %arg11[%c0_212, %c0_213] : memref<2x32xf32, #tpu.memory_space<vmem>>, vector<2x32xf32>
    %c0_214 = arith.constant 0 : index
    %c0_215 = arith.constant 0 : index
    %502 = vector.load %arg12[%c0_214, %c0_215] : memref<2x32xf32, #tpu.memory_space<vmem>>, vector<2x32xf32>
    %503 = tpu.concatenate %499, %501 in 1 : vector<2x32xf32>, vector<2x32xf32> -> vector<2x64xf32>
    %c0_216 = arith.constant 0 : index
    %c0_217 = arith.constant 0 : index
    %504 = vector.load %arg2[%c0_216, %c0_217] : memref<64x256xf32, #tpu.memory_space<vmem>>, vector<64x256xf32>
    %cst_218 = arith.constant dense<0.000000e+00> : vector<2x256xf32>
    %505 = tpu.matmul %503, %504, %cst_218 {dimension_numbers = #tpu.dot_dimension_numbers<[1], [0], [0], [1], [0, 0, 1, 1], [], []>} : vector<2x64xf32>, vector<64x256xf32>, vector<2x256xf32> -> vector<2x256xf32>
    %506 = arith.index_cast %c4_i32 : i32 to index
    %c0_219 = arith.constant 0 : index
    %c0_220 = arith.constant 0 : index
    %507 = vector.load %arg8[%506, %c0_219, %c0_220] : memref<16x2x256xf32, #tpu.memory_space<vmem>>, vector<1x2x256xf32>
    %508 = vector.shape_cast %507 : vector<1x2x256xf32> to vector<2x256xf32>
    %509 = vector.extract_strided_slice %508 {offsets = [0, 0], sizes = [2, 128], strides = [1, 1]} : vector<2x256xf32> to vector<2x128xf32>
    %510 = vector.extract_strided_slice %505 {offsets = [0, 0], sizes = [2, 128], strides = [1, 1]} : vector<2x256xf32> to vector<2x128xf32>
    %511 = arith.addf %509, %510 : vector<2x128xf32>
    %512 = arith.index_cast %498 : i32 to index
    %c0_221 = arith.constant 0 : index
    %c0_222 = arith.constant 0 : index
    %513 = vector.load %arg8[%512, %c0_221, %c0_222] : memref<16x2x256xf32, #tpu.memory_space<vmem>>, vector<1x2x256xf32>
    %514 = vector.shape_cast %513 : vector<1x2x256xf32> to vector<2x256xf32>
    %515 = vector.extract_strided_slice %514 {offsets = [0, 128], sizes = [2, 128], strides = [1, 1]} : vector<2x256xf32> to vector<2x128xf32>
    %516 = vector.extract_strided_slice %505 {offsets = [0, 128], sizes = [2, 128], strides = [1, 1]} : vector<2x256xf32> to vector<2x128xf32>
    %517 = arith.addf %515, %516 : vector<2x128xf32>
    %518 = vector.extract_strided_slice %511 {offsets = [0, 0], sizes = [2, 32], strides = [1, 1]} : vector<2x128xf32> to vector<2x32xf32>
    %519 = arith.negf %518 : vector<2x32xf32>
    %520 = math.exp %519 : vector<2x32xf32>
    %cst_223 = arith.constant 1.000000e+00 : f32
    %521 = vector.broadcast %cst_223 : f32 to vector<2x32xf32>
    %522 = arith.addf %521, %520 : vector<2x32xf32>
    %523 = arith.divf %521, %522 : vector<2x32xf32>
    %524 = vector.extract_strided_slice %511 {offsets = [0, 32], sizes = [2, 32], strides = [1, 1]} : vector<2x128xf32> to vector<2x32xf32>
    %525 = arith.negf %524 : vector<2x32xf32>
    %526 = math.exp %525 : vector<2x32xf32>
    %cst_224 = arith.constant 1.000000e+00 : f32
    %527 = vector.broadcast %cst_224 : f32 to vector<2x32xf32>
    %528 = arith.addf %527, %526 : vector<2x32xf32>
    %529 = arith.divf %527, %528 : vector<2x32xf32>
    %530 = vector.extract_strided_slice %511 {offsets = [0, 64], sizes = [2, 32], strides = [1, 1]} : vector<2x128xf32> to vector<2x32xf32>
    %531 = math.tanh %530 : vector<2x32xf32>
    %532 = vector.extract_strided_slice %511 {offsets = [0, 96], sizes = [2, 32], strides = [1, 1]} : vector<2x128xf32> to vector<2x32xf32>
    %533 = arith.negf %532 : vector<2x32xf32>
    %534 = math.exp %533 : vector<2x32xf32>
    %cst_225 = arith.constant 1.000000e+00 : f32
    %535 = vector.broadcast %cst_225 : f32 to vector<2x32xf32>
    %536 = arith.addf %535, %534 : vector<2x32xf32>
    %537 = arith.divf %535, %536 : vector<2x32xf32>
    %538 = arith.mulf %529, %500 : vector<2x32xf32>
    %539 = arith.mulf %523, %531 : vector<2x32xf32>
    %540 = arith.addf %538, %539 : vector<2x32xf32>
    %541 = math.tanh %540 : vector<2x32xf32>
    %542 = arith.mulf %537, %541 : vector<2x32xf32>
    %543 = vector.extract_strided_slice %517 {offsets = [0, 0], sizes = [2, 32], strides = [1, 1]} : vector<2x128xf32> to vector<2x32xf32>
    %544 = arith.negf %543 : vector<2x32xf32>
    %545 = math.exp %544 : vector<2x32xf32>
    %cst_226 = arith.constant 1.000000e+00 : f32
    %546 = vector.broadcast %cst_226 : f32 to vector<2x32xf32>
    %547 = arith.addf %546, %545 : vector<2x32xf32>
    %548 = arith.divf %546, %547 : vector<2x32xf32>
    %549 = vector.extract_strided_slice %517 {offsets = [0, 32], sizes = [2, 32], strides = [1, 1]} : vector<2x128xf32> to vector<2x32xf32>
    %550 = arith.negf %549 : vector<2x32xf32>
    %551 = math.exp %550 : vector<2x32xf32>
    %cst_227 = arith.constant 1.000000e+00 : f32
    %552 = vector.broadcast %cst_227 : f32 to vector<2x32xf32>
    %553 = arith.addf %552, %551 : vector<2x32xf32>
    %554 = arith.divf %552, %553 : vector<2x32xf32>
    %555 = vector.extract_strided_slice %517 {offsets = [0, 64], sizes = [2, 32], strides = [1, 1]} : vector<2x128xf32> to vector<2x32xf32>
    %556 = math.tanh %555 : vector<2x32xf32>
    %557 = vector.extract_strided_slice %517 {offsets = [0, 96], sizes = [2, 32], strides = [1, 1]} : vector<2x128xf32> to vector<2x32xf32>
    %558 = arith.negf %557 : vector<2x32xf32>
    %559 = math.exp %558 : vector<2x32xf32>
    %cst_228 = arith.constant 1.000000e+00 : f32
    %560 = vector.broadcast %cst_228 : f32 to vector<2x32xf32>
    %561 = arith.addf %560, %559 : vector<2x32xf32>
    %562 = arith.divf %560, %561 : vector<2x32xf32>
    %563 = arith.mulf %554, %502 : vector<2x32xf32>
    %564 = arith.mulf %548, %556 : vector<2x32xf32>
    %565 = arith.addf %563, %564 : vector<2x32xf32>
    %566 = math.tanh %565 : vector<2x32xf32>
    %567 = arith.mulf %562, %566 : vector<2x32xf32>
    %568 = arith.index_cast %c4_i32 : i32 to index
    %c0_229 = arith.constant 0 : index
    %c0_230 = arith.constant 0 : index
    %569 = vector.load %arg4[%568, %c0_229, %c0_230] : memref<16x2x1xf32, #tpu.memory_space<vmem>>, vector<1x2x1xf32>
    %570 = vector.shape_cast %569 : vector<1x2x1xf32> to vector<2x1xf32>
    %cst_231 = arith.constant 0.000000e+00 : f32
    %571 = vector.broadcast %cst_231 : f32 to vector<2x1xf32>
    %572 = arith.cmpf ogt, %570, %571 : vector<2x1xf32>
    %573 = arith.index_cast %498 : i32 to index
    %c0_232 = arith.constant 0 : index
    %c0_233 = arith.constant 0 : index
    %574 = vector.load %arg4[%573, %c0_232, %c0_233] : memref<16x2x1xf32, #tpu.memory_space<vmem>>, vector<1x2x1xf32>
    %575 = vector.shape_cast %574 : vector<1x2x1xf32> to vector<2x1xf32>
    %cst_234 = arith.constant 0.000000e+00 : f32
    %576 = vector.broadcast %cst_234 : f32 to vector<2x1xf32>
    %577 = arith.cmpf ogt, %575, %576 : vector<2x1xf32>
    %578 = vector.shape_cast %572 : vector<2x1xi1> to vector<2x1xi1>
    %579 = vector.broadcast %578 : vector<2x1xi1> to vector<2x32xi1>
    %580 = arith.select %579, %542, %499 : vector<2x32xi1>, vector<2x32xf32>
    %c0_235 = arith.constant 0 : index
    %c0_236 = arith.constant 0 : index
    %581 = vector.load %arg9[%c0_235, %c0_236] : memref<2x32xf32, #tpu.memory_space<vmem>>, vector<2x32xf32>
    tpu.vector_store %arg9[%c0_235, %c0_236], %580 {strides = array<i32>} : memref<2x32xf32, #tpu.memory_space<vmem>>, vector<2x32xf32>,
    %582 = vector.shape_cast %572 : vector<2x1xi1> to vector<2x1xi1>
    %583 = vector.broadcast %582 : vector<2x1xi1> to vector<2x32xi1>
    %584 = arith.select %583, %540, %500 : vector<2x32xi1>, vector<2x32xf32>
    %c0_237 = arith.constant 0 : index
    %c0_238 = arith.constant 0 : index
    %585 = vector.load %arg10[%c0_237, %c0_238] : memref<2x32xf32, #tpu.memory_space<vmem>>, vector<2x32xf32>
    tpu.vector_store %arg10[%c0_237, %c0_238], %584 {strides = array<i32>} : memref<2x32xf32, #tpu.memory_space<vmem>>, vector<2x32xf32>,
    %586 = vector.shape_cast %577 : vector<2x1xi1> to vector<2x1xi1>
    %587 = vector.broadcast %586 : vector<2x1xi1> to vector<2x32xi1>
    %588 = arith.select %587, %567, %501 : vector<2x32xi1>, vector<2x32xf32>
    %c0_239 = arith.constant 0 : index
    %c0_240 = arith.constant 0 : index
    %589 = vector.load %arg11[%c0_239, %c0_240] : memref<2x32xf32, #tpu.memory_space<vmem>>, vector<2x32xf32>
    tpu.vector_store %arg11[%c0_239, %c0_240], %588 {strides = array<i32>} : memref<2x32xf32, #tpu.memory_space<vmem>>, vector<2x32xf32>,
    %590 = vector.shape_cast %577 : vector<2x1xi1> to vector<2x1xi1>
    %591 = vector.broadcast %590 : vector<2x1xi1> to vector<2x32xi1>
    %592 = arith.select %591, %565, %502 : vector<2x32xi1>, vector<2x32xf32>
    %c0_241 = arith.constant 0 : index
    %c0_242 = arith.constant 0 : index
    %593 = vector.load %arg12[%c0_241, %c0_242] : memref<2x32xf32, #tpu.memory_space<vmem>>, vector<2x32xf32>
    tpu.vector_store %arg12[%c0_241, %c0_242], %592 {strides = array<i32>} : memref<2x32xf32, #tpu.memory_space<vmem>>, vector<2x32xf32>,
    %594 = arith.index_cast %c4_i32 : i32 to index
    %c0_243 = arith.constant 0 : index
    %c0_244 = arith.constant 0 : index
    %595 = vector.load %arg5[%594, %c0_243, %c0_244] : memref<16x2x32xf32, #tpu.memory_space<vmem>>, vector<1x2x32xf32>
    %596 = vector.shape_cast %595 : vector<1x2x32xf32> to vector<2x32xf32>
    %cst_245 = arith.constant 0.000000e+00 : f32
    %597 = vector.shape_cast %572 : vector<2x1xi1> to vector<2x1xi1>
    %598 = vector.broadcast %597 : vector<2x1xi1> to vector<2x32xi1>
    %599 = vector.broadcast %cst_245 : f32 to vector<2x32xf32>
    %600 = arith.select %598, %542, %599 : vector<2x32xi1>, vector<2x32xf32>
    %601 = arith.addf %596, %600 : vector<2x32xf32>
    %602 = arith.index_cast %c4_i32 : i32 to index
    %c0_246 = arith.constant 0 : index
    %c0_247 = arith.constant 0 : index
    %603 = vector.load %arg5[%602, %c0_246, %c0_247] : memref<16x2x32xf32, #tpu.memory_space<vmem>>, vector<1x2x32xf32>
    %604 = vector.shape_cast %603 : vector<1x2x32xf32> to vector<2x32xf32>
    %605 = vector.shape_cast %601 : vector<2x32xf32> to vector<1x2x32xf32>
    tpu.vector_store %arg5[%602, %c0_246, %c0_247], %605 {strides = array<i32>} : memref<16x2x32xf32, #tpu.memory_space<vmem>>, vector<1x2x32xf32>,
    %606 = arith.index_cast %498 : i32 to index
    %c0_248 = arith.constant 0 : index
    %c0_249 = arith.constant 0 : index
    %607 = vector.load %arg5[%606, %c0_248, %c0_249] : memref<16x2x32xf32, #tpu.memory_space<vmem>>, vector<1x2x32xf32>
    %608 = vector.shape_cast %607 : vector<1x2x32xf32> to vector<2x32xf32>
    %cst_250 = arith.constant 0.000000e+00 : f32
    %609 = vector.shape_cast %577 : vector<2x1xi1> to vector<2x1xi1>
    %610 = vector.broadcast %609 : vector<2x1xi1> to vector<2x32xi1>
    %611 = vector.broadcast %cst_250 : f32 to vector<2x32xf32>
    %612 = arith.select %610, %567, %611 : vector<2x32xi1>, vector<2x32xf32>
    %613 = arith.addf %608, %612 : vector<2x32xf32>
    %614 = arith.index_cast %498 : i32 to index
    %c0_251 = arith.constant 0 : index
    %c0_252 = arith.constant 0 : index
    %615 = vector.load %arg5[%614, %c0_251, %c0_252] : memref<16x2x32xf32, #tpu.memory_space<vmem>>, vector<1x2x32xf32>
    %616 = vector.shape_cast %615 : vector<1x2x32xf32> to vector<2x32xf32>
    %617 = vector.shape_cast %613 : vector<2x32xf32> to vector<1x2x32xf32>
    tpu.vector_store %arg5[%614, %c0_251, %c0_252], %617 {strides = array<i32>} : memref<16x2x32xf32, #tpu.memory_space<vmem>>, vector<1x2x32xf32>,
    %c5_i32 = arith.constant 5 : i32
    %c15_i32_253 = arith.constant 15 : i32
    %618 = arith.subi %c15_i32_253, %c5_i32 : i32
    %c0_254 = arith.constant 0 : index
    %c0_255 = arith.constant 0 : index
    %619 = vector.load %arg9[%c0_254, %c0_255] : memref<2x32xf32, #tpu.memory_space<vmem>>, vector<2x32xf32>
    %c0_256 = arith.constant 0 : index
    %c0_257 = arith.constant 0 : index
    %620 = vector.load %arg10[%c0_256, %c0_257] : memref<2x32xf32, #tpu.memory_space<vmem>>, vector<2x32xf32>
    %c0_258 = arith.constant 0 : index
    %c0_259 = arith.constant 0 : index
    %621 = vector.load %arg11[%c0_258, %c0_259] : memref<2x32xf32, #tpu.memory_space<vmem>>, vector<2x32xf32>
    %c0_260 = arith.constant 0 : index
    %c0_261 = arith.constant 0 : index
    %622 = vector.load %arg12[%c0_260, %c0_261] : memref<2x32xf32, #tpu.memory_space<vmem>>, vector<2x32xf32>
    %623 = tpu.concatenate %619, %621 in 1 : vector<2x32xf32>, vector<2x32xf32> -> vector<2x64xf32>
    %c0_262 = arith.constant 0 : index
    %c0_263 = arith.constant 0 : index
    %624 = vector.load %arg2[%c0_262, %c0_263] : memref<64x256xf32, #tpu.memory_space<vmem>>, vector<64x256xf32>
    %cst_264 = arith.constant dense<0.000000e+00> : vector<2x256xf32>
    %625 = tpu.matmul %623, %624, %cst_264 {dimension_numbers = #tpu.dot_dimension_numbers<[1], [0], [0], [1], [0, 0, 1, 1], [], []>} : vector<2x64xf32>, vector<64x256xf32>, vector<2x256xf32> -> vector<2x256xf32>
    %626 = arith.index_cast %c5_i32 : i32 to index
    %c0_265 = arith.constant 0 : index
    %c0_266 = arith.constant 0 : index
    %627 = vector.load %arg8[%626, %c0_265, %c0_266] : memref<16x2x256xf32, #tpu.memory_space<vmem>>, vector<1x2x256xf32>
    %628 = vector.shape_cast %627 : vector<1x2x256xf32> to vector<2x256xf32>
    %629 = vector.extract_strided_slice %628 {offsets = [0, 0], sizes = [2, 128], strides = [1, 1]} : vector<2x256xf32> to vector<2x128xf32>
    %630 = vector.extract_strided_slice %625 {offsets = [0, 0], sizes = [2, 128], strides = [1, 1]} : vector<2x256xf32> to vector<2x128xf32>
    %631 = arith.addf %629, %630 : vector<2x128xf32>
    %632 = arith.index_cast %618 : i32 to index
    %c0_267 = arith.constant 0 : index
    %c0_268 = arith.constant 0 : index
    %633 = vector.load %arg8[%632, %c0_267, %c0_268] : memref<16x2x256xf32, #tpu.memory_space<vmem>>, vector<1x2x256xf32>
    %634 = vector.shape_cast %633 : vector<1x2x256xf32> to vector<2x256xf32>
    %635 = vector.extract_strided_slice %634 {offsets = [0, 128], sizes = [2, 128], strides = [1, 1]} : vector<2x256xf32> to vector<2x128xf32>
    %636 = vector.extract_strided_slice %625 {offsets = [0, 128], sizes = [2, 128], strides = [1, 1]} : vector<2x256xf32> to vector<2x128xf32>
    %637 = arith.addf %635, %636 : vector<2x128xf32>
    %638 = vector.extract_strided_slice %631 {offsets = [0, 0], sizes = [2, 32], strides = [1, 1]} : vector<2x128xf32> to vector<2x32xf32>
    %639 = arith.negf %638 : vector<2x32xf32>
    %640 = math.exp %639 : vector<2x32xf32>
    %cst_269 = arith.constant 1.000000e+00 : f32
    %641 = vector.broadcast %cst_269 : f32 to vector<2x32xf32>
    %642 = arith.addf %641, %640 : vector<2x32xf32>
    %643 = arith.divf %641, %642 : vector<2x32xf32>
    %644 = vector.extract_strided_slice %631 {offsets = [0, 32], sizes = [2, 32], strides = [1, 1]} : vector<2x128xf32> to vector<2x32xf32>
    %645 = arith.negf %644 : vector<2x32xf32>
    %646 = math.exp %645 : vector<2x32xf32>
    %cst_270 = arith.constant 1.000000e+00 : f32
    %647 = vector.broadcast %cst_270 : f32 to vector<2x32xf32>
    %648 = arith.addf %647, %646 : vector<2x32xf32>
    %649 = arith.divf %647, %648 : vector<2x32xf32>
    %650 = vector.extract_strided_slice %631 {offsets = [0, 64], sizes = [2, 32], strides = [1, 1]} : vector<2x128xf32> to vector<2x32xf32>
    %651 = math.tanh %650 : vector<2x32xf32>
    %652 = vector.extract_strided_slice %631 {offsets = [0, 96], sizes = [2, 32], strides = [1, 1]} : vector<2x128xf32> to vector<2x32xf32>
    %653 = arith.negf %652 : vector<2x32xf32>
    %654 = math.exp %653 : vector<2x32xf32>
    %cst_271 = arith.constant 1.000000e+00 : f32
    %655 = vector.broadcast %cst_271 : f32 to vector<2x32xf32>
    %656 = arith.addf %655, %654 : vector<2x32xf32>
    %657 = arith.divf %655, %656 : vector<2x32xf32>
    %658 = arith.mulf %649, %620 : vector<2x32xf32>
    %659 = arith.mulf %643, %651 : vector<2x32xf32>
    %660 = arith.addf %658, %659 : vector<2x32xf32>
    %661 = math.tanh %660 : vector<2x32xf32>
    %662 = arith.mulf %657, %661 : vector<2x32xf32>
    %663 = vector.extract_strided_slice %637 {offsets = [0, 0], sizes = [2, 32], strides = [1, 1]} : vector<2x128xf32> to vector<2x32xf32>
    %664 = arith.negf %663 : vector<2x32xf32>
    %665 = math.exp %664 : vector<2x32xf32>
    %cst_272 = arith.constant 1.000000e+00 : f32
    %666 = vector.broadcast %cst_272 : f32 to vector<2x32xf32>
    %667 = arith.addf %666, %665 : vector<2x32xf32>
    %668 = arith.divf %666, %667 : vector<2x32xf32>
    %669 = vector.extract_strided_slice %637 {offsets = [0, 32], sizes = [2, 32], strides = [1, 1]} : vector<2x128xf32> to vector<2x32xf32>
    %670 = arith.negf %669 : vector<2x32xf32>
    %671 = math.exp %670 : vector<2x32xf32>
    %cst_273 = arith.constant 1.000000e+00 : f32
    %672 = vector.broadcast %cst_273 : f32 to vector<2x32xf32>
    %673 = arith.addf %672, %671 : vector<2x32xf32>
    %674 = arith.divf %672, %673 : vector<2x32xf32>
    %675 = vector.extract_strided_slice %637 {offsets = [0, 64], sizes = [2, 32], strides = [1, 1]} : vector<2x128xf32> to vector<2x32xf32>
    %676 = math.tanh %675 : vector<2x32xf32>
    %677 = vector.extract_strided_slice %637 {offsets = [0, 96], sizes = [2, 32], strides = [1, 1]} : vector<2x128xf32> to vector<2x32xf32>
    %678 = arith.negf %677 : vector<2x32xf32>
    %679 = math.exp %678 : vector<2x32xf32>
    %cst_274 = arith.constant 1.000000e+00 : f32
    %680 = vector.broadcast %cst_274 : f32 to vector<2x32xf32>
    %681 = arith.addf %680, %679 : vector<2x32xf32>
    %682 = arith.divf %680, %681 : vector<2x32xf32>
    %683 = arith.mulf %674, %622 : vector<2x32xf32>
    %684 = arith.mulf %668, %676 : vector<2x32xf32>
    %685 = arith.addf %683, %684 : vector<2x32xf32>
    %686 = math.tanh %685 : vector<2x32xf32>
    %687 = arith.mulf %682, %686 : vector<2x32xf32>
    %688 = arith.index_cast %c5_i32 : i32 to index
    %c0_275 = arith.constant 0 : index
    %c0_276 = arith.constant 0 : index
    %689 = vector.load %arg4[%688, %c0_275, %c0_276] : memref<16x2x1xf32, #tpu.memory_space<vmem>>, vector<1x2x1xf32>
    %690 = vector.shape_cast %689 : vector<1x2x1xf32> to vector<2x1xf32>
    %cst_277 = arith.constant 0.000000e+00 : f32
    %691 = vector.broadcast %cst_277 : f32 to vector<2x1xf32>
    %692 = arith.cmpf ogt, %690, %691 : vector<2x1xf32>
    %693 = arith.index_cast %618 : i32 to index
    %c0_278 = arith.constant 0 : index
    %c0_279 = arith.constant 0 : index
    %694 = vector.load %arg4[%693, %c0_278, %c0_279] : memref<16x2x1xf32, #tpu.memory_space<vmem>>, vector<1x2x1xf32>
    %695 = vector.shape_cast %694 : vector<1x2x1xf32> to vector<2x1xf32>
    %cst_280 = arith.constant 0.000000e+00 : f32
    %696 = vector.broadcast %cst_280 : f32 to vector<2x1xf32>
    %697 = arith.cmpf ogt, %695, %696 : vector<2x1xf32>
    %698 = vector.shape_cast %692 : vector<2x1xi1> to vector<2x1xi1>
    %699 = vector.broadcast %698 : vector<2x1xi1> to vector<2x32xi1>
    %700 = arith.select %699, %662, %619 : vector<2x32xi1>, vector<2x32xf32>
    %c0_281 = arith.constant 0 : index
    %c0_282 = arith.constant 0 : index
    %701 = vector.load %arg9[%c0_281, %c0_282] : memref<2x32xf32, #tpu.memory_space<vmem>>, vector<2x32xf32>
    tpu.vector_store %arg9[%c0_281, %c0_282], %700 {strides = array<i32>} : memref<2x32xf32, #tpu.memory_space<vmem>>, vector<2x32xf32>,
    %702 = vector.shape_cast %692 : vector<2x1xi1> to vector<2x1xi1>
    %703 = vector.broadcast %702 : vector<2x1xi1> to vector<2x32xi1>
    %704 = arith.select %703, %660, %620 : vector<2x32xi1>, vector<2x32xf32>
    %c0_283 = arith.constant 0 : index
    %c0_284 = arith.constant 0 : index
    %705 = vector.load %arg10[%c0_283, %c0_284] : memref<2x32xf32, #tpu.memory_space<vmem>>, vector<2x32xf32>
    tpu.vector_store %arg10[%c0_283, %c0_284], %704 {strides = array<i32>} : memref<2x32xf32, #tpu.memory_space<vmem>>, vector<2x32xf32>,
    %706 = vector.shape_cast %697 : vector<2x1xi1> to vector<2x1xi1>
    %707 = vector.broadcast %706 : vector<2x1xi1> to vector<2x32xi1>
    %708 = arith.select %707, %687, %621 : vector<2x32xi1>, vector<2x32xf32>
    %c0_285 = arith.constant 0 : index
    %c0_286 = arith.constant 0 : index
    %709 = vector.load %arg11[%c0_285, %c0_286] : memref<2x32xf32, #tpu.memory_space<vmem>>, vector<2x32xf32>
    tpu.vector_store %arg11[%c0_285, %c0_286], %708 {strides = array<i32>} : memref<2x32xf32, #tpu.memory_space<vmem>>, vector<2x32xf32>,
    %710 = vector.shape_cast %697 : vector<2x1xi1> to vector<2x1xi1>
    %711 = vector.broadcast %710 : vector<2x1xi1> to vector<2x32xi1>
    %712 = arith.select %711, %685, %622 : vector<2x32xi1>, vector<2x32xf32>
    %c0_287 = arith.constant 0 : index
    %c0_288 = arith.constant 0 : index
    %713 = vector.load %arg12[%c0_287, %c0_288] : memref<2x32xf32, #tpu.memory_space<vmem>>, vector<2x32xf32>
    tpu.vector_store %arg12[%c0_287, %c0_288], %712 {strides = array<i32>} : memref<2x32xf32, #tpu.memory_space<vmem>>, vector<2x32xf32>,
    %714 = arith.index_cast %c5_i32 : i32 to index
    %c0_289 = arith.constant 0 : index
    %c0_290 = arith.constant 0 : index
    %715 = vector.load %arg5[%714, %c0_289, %c0_290] : memref<16x2x32xf32, #tpu.memory_space<vmem>>, vector<1x2x32xf32>
    %716 = vector.shape_cast %715 : vector<1x2x32xf32> to vector<2x32xf32>
    %cst_291 = arith.constant 0.000000e+00 : f32
    %717 = vector.shape_cast %692 : vector<2x1xi1> to vector<2x1xi1>
    %718 = vector.broadcast %717 : vector<2x1xi1> to vector<2x32xi1>
    %719 = vector.broadcast %cst_291 : f32 to vector<2x32xf32>
    %720 = arith.select %718, %662, %719 : vector<2x32xi1>, vector<2x32xf32>
    %721 = arith.addf %716, %720 : vector<2x32xf32>
    %722 = arith.index_cast %c5_i32 : i32 to index
    %c0_292 = arith.constant 0 : index
    %c0_293 = arith.constant 0 : index
    %723 = vector.load %arg5[%722, %c0_292, %c0_293] : memref<16x2x32xf32, #tpu.memory_space<vmem>>, vector<1x2x32xf32>
    %724 = vector.shape_cast %723 : vector<1x2x32xf32> to vector<2x32xf32>
    %725 = vector.shape_cast %721 : vector<2x32xf32> to vector<1x2x32xf32>
    tpu.vector_store %arg5[%722, %c0_292, %c0_293], %725 {strides = array<i32>} : memref<16x2x32xf32, #tpu.memory_space<vmem>>, vector<1x2x32xf32>,
    %726 = arith.index_cast %618 : i32 to index
    %c0_294 = arith.constant 0 : index
    %c0_295 = arith.constant 0 : index
    %727 = vector.load %arg5[%726, %c0_294, %c0_295] : memref<16x2x32xf32, #tpu.memory_space<vmem>>, vector<1x2x32xf32>
    %728 = vector.shape_cast %727 : vector<1x2x32xf32> to vector<2x32xf32>
    %cst_296 = arith.constant 0.000000e+00 : f32
    %729 = vector.shape_cast %697 : vector<2x1xi1> to vector<2x1xi1>
    %730 = vector.broadcast %729 : vector<2x1xi1> to vector<2x32xi1>
    %731 = vector.broadcast %cst_296 : f32 to vector<2x32xf32>
    %732 = arith.select %730, %687, %731 : vector<2x32xi1>, vector<2x32xf32>
    %733 = arith.addf %728, %732 : vector<2x32xf32>
    %734 = arith.index_cast %618 : i32 to index
    %c0_297 = arith.constant 0 : index
    %c0_298 = arith.constant 0 : index
    %735 = vector.load %arg5[%734, %c0_297, %c0_298] : memref<16x2x32xf32, #tpu.memory_space<vmem>>, vector<1x2x32xf32>
    %736 = vector.shape_cast %735 : vector<1x2x32xf32> to vector<2x32xf32>
    %737 = vector.shape_cast %733 : vector<2x32xf32> to vector<1x2x32xf32>
    tpu.vector_store %arg5[%734, %c0_297, %c0_298], %737 {strides = array<i32>} : memref<16x2x32xf32, #tpu.memory_space<vmem>>, vector<1x2x32xf32>,
    %c6_i32 = arith.constant 6 : i32
    %c15_i32_299 = arith.constant 15 : i32
    %738 = arith.subi %c15_i32_299, %c6_i32 : i32
    %c0_300 = arith.constant 0 : index
    %c0_301 = arith.constant 0 : index
    %739 = vector.load %arg9[%c0_300, %c0_301] : memref<2x32xf32, #tpu.memory_space<vmem>>, vector<2x32xf32>
    %c0_302 = arith.constant 0 : index
    %c0_303 = arith.constant 0 : index
    %740 = vector.load %arg10[%c0_302, %c0_303] : memref<2x32xf32, #tpu.memory_space<vmem>>, vector<2x32xf32>
    %c0_304 = arith.constant 0 : index
    %c0_305 = arith.constant 0 : index
    %741 = vector.load %arg11[%c0_304, %c0_305] : memref<2x32xf32, #tpu.memory_space<vmem>>, vector<2x32xf32>
    %c0_306 = arith.constant 0 : index
    %c0_307 = arith.constant 0 : index
    %742 = vector.load %arg12[%c0_306, %c0_307] : memref<2x32xf32, #tpu.memory_space<vmem>>, vector<2x32xf32>
    %743 = tpu.concatenate %739, %741 in 1 : vector<2x32xf32>, vector<2x32xf32> -> vector<2x64xf32>
    %c0_308 = arith.constant 0 : index
    %c0_309 = arith.constant 0 : index
    %744 = vector.load %arg2[%c0_308, %c0_309] : memref<64x256xf32, #tpu.memory_space<vmem>>, vector<64x256xf32>
    %cst_310 = arith.constant dense<0.000000e+00> : vector<2x256xf32>
    %745 = tpu.matmul %743, %744, %cst_310 {dimension_numbers = #tpu.dot_dimension_numbers<[1], [0], [0], [1], [0, 0, 1, 1], [], []>} : vector<2x64xf32>, vector<64x256xf32>, vector<2x256xf32> -> vector<2x256xf32>
    %746 = arith.index_cast %c6_i32 : i32 to index
    %c0_311 = arith.constant 0 : index
    %c0_312 = arith.constant 0 : index
    %747 = vector.load %arg8[%746, %c0_311, %c0_312] : memref<16x2x256xf32, #tpu.memory_space<vmem>>, vector<1x2x256xf32>
    %748 = vector.shape_cast %747 : vector<1x2x256xf32> to vector<2x256xf32>
    %749 = vector.extract_strided_slice %748 {offsets = [0, 0], sizes = [2, 128], strides = [1, 1]} : vector<2x256xf32> to vector<2x128xf32>
    %750 = vector.extract_strided_slice %745 {offsets = [0, 0], sizes = [2, 128], strides = [1, 1]} : vector<2x256xf32> to vector<2x128xf32>
    %751 = arith.addf %749, %750 : vector<2x128xf32>
    %752 = arith.index_cast %738 : i32 to index
    %c0_313 = arith.constant 0 : index
    %c0_314 = arith.constant 0 : index
    %753 = vector.load %arg8[%752, %c0_313, %c0_314] : memref<16x2x256xf32, #tpu.memory_space<vmem>>, vector<1x2x256xf32>
    %754 = vector.shape_cast %753 : vector<1x2x256xf32> to vector<2x256xf32>
    %755 = vector.extract_strided_slice %754 {offsets = [0, 128], sizes = [2, 128], strides = [1, 1]} : vector<2x256xf32> to vector<2x128xf32>
    %756 = vector.extract_strided_slice %745 {offsets = [0, 128], sizes = [2, 128], strides = [1, 1]} : vector<2x256xf32> to vector<2x128xf32>
    %757 = arith.addf %755, %756 : vector<2x128xf32>
    %758 = vector.extract_strided_slice %751 {offsets = [0, 0], sizes = [2, 32], strides = [1, 1]} : vector<2x128xf32> to vector<2x32xf32>
    %759 = arith.negf %758 : vector<2x32xf32>
    %760 = math.exp %759 : vector<2x32xf32>
    %cst_315 = arith.constant 1.000000e+00 : f32
    %761 = vector.broadcast %cst_315 : f32 to vector<2x32xf32>
    %762 = arith.addf %761, %760 : vector<2x32xf32>
    %763 = arith.divf %761, %762 : vector<2x32xf32>
    %764 = vector.extract_strided_slice %751 {offsets = [0, 32], sizes = [2, 32], strides = [1, 1]} : vector<2x128xf32> to vector<2x32xf32>
    %765 = arith.negf %764 : vector<2x32xf32>
    %766 = math.exp %765 : vector<2x32xf32>
    %cst_316 = arith.constant 1.000000e+00 : f32
    %767 = vector.broadcast %cst_316 : f32 to vector<2x32xf32>
    %768 = arith.addf %767, %766 : vector<2x32xf32>
    %769 = arith.divf %767, %768 : vector<2x32xf32>
    %770 = vector.extract_strided_slice %751 {offsets = [0, 64], sizes = [2, 32], strides = [1, 1]} : vector<2x128xf32> to vector<2x32xf32>
    %771 = math.tanh %770 : vector<2x32xf32>
    %772 = vector.extract_strided_slice %751 {offsets = [0, 96], sizes = [2, 32], strides = [1, 1]} : vector<2x128xf32> to vector<2x32xf32>
    %773 = arith.negf %772 : vector<2x32xf32>
    %774 = math.exp %773 : vector<2x32xf32>
    %cst_317 = arith.constant 1.000000e+00 : f32
    %775 = vector.broadcast %cst_317 : f32 to vector<2x32xf32>
    %776 = arith.addf %775, %774 : vector<2x32xf32>
    %777 = arith.divf %775, %776 : vector<2x32xf32>
    %778 = arith.mulf %769, %740 : vector<2x32xf32>
    %779 = arith.mulf %763, %771 : vector<2x32xf32>
    %780 = arith.addf %778, %779 : vector<2x32xf32>
    %781 = math.tanh %780 : vector<2x32xf32>
    %782 = arith.mulf %777, %781 : vector<2x32xf32>
    %783 = vector.extract_strided_slice %757 {offsets = [0, 0], sizes = [2, 32], strides = [1, 1]} : vector<2x128xf32> to vector<2x32xf32>
    %784 = arith.negf %783 : vector<2x32xf32>
    %785 = math.exp %784 : vector<2x32xf32>
    %cst_318 = arith.constant 1.000000e+00 : f32
    %786 = vector.broadcast %cst_318 : f32 to vector<2x32xf32>
    %787 = arith.addf %786, %785 : vector<2x32xf32>
    %788 = arith.divf %786, %787 : vector<2x32xf32>
    %789 = vector.extract_strided_slice %757 {offsets = [0, 32], sizes = [2, 32], strides = [1, 1]} : vector<2x128xf32> to vector<2x32xf32>
    %790 = arith.negf %789 : vector<2x32xf32>
    %791 = math.exp %790 : vector<2x32xf32>
    %cst_319 = arith.constant 1.000000e+00 : f32
    %792 = vector.broadcast %cst_319 : f32 to vector<2x32xf32>
    %793 = arith.addf %792, %791 : vector<2x32xf32>
    %794 = arith.divf %792, %793 : vector<2x32xf32>
    %795 = vector.extract_strided_slice %757 {offsets = [0, 64], sizes = [2, 32], strides = [1, 1]} : vector<2x128xf32> to vector<2x32xf32>
    %796 = math.tanh %795 : vector<2x32xf32>
    %797 = vector.extract_strided_slice %757 {offsets = [0, 96], sizes = [2, 32], strides = [1, 1]} : vector<2x128xf32> to vector<2x32xf32>
    %798 = arith.negf %797 : vector<2x32xf32>
    %799 = math.exp %798 : vector<2x32xf32>
    %cst_320 = arith.constant 1.000000e+00 : f32
    %800 = vector.broadcast %cst_320 : f32 to vector<2x32xf32>
    %801 = arith.addf %800, %799 : vector<2x32xf32>
    %802 = arith.divf %800, %801 : vector<2x32xf32>
    %803 = arith.mulf %794, %742 : vector<2x32xf32>
    %804 = arith.mulf %788, %796 : vector<2x32xf32>
    %805 = arith.addf %803, %804 : vector<2x32xf32>
    %806 = math.tanh %805 : vector<2x32xf32>
    %807 = arith.mulf %802, %806 : vector<2x32xf32>
    %808 = arith.index_cast %c6_i32 : i32 to index
    %c0_321 = arith.constant 0 : index
    %c0_322 = arith.constant 0 : index
    %809 = vector.load %arg4[%808, %c0_321, %c0_322] : memref<16x2x1xf32, #tpu.memory_space<vmem>>, vector<1x2x1xf32>
    %810 = vector.shape_cast %809 : vector<1x2x1xf32> to vector<2x1xf32>
    %cst_323 = arith.constant 0.000000e+00 : f32
    %811 = vector.broadcast %cst_323 : f32 to vector<2x1xf32>
    %812 = arith.cmpf ogt, %810, %811 : vector<2x1xf32>
    %813 = arith.index_cast %738 : i32 to index
    %c0_324 = arith.constant 0 : index
    %c0_325 = arith.constant 0 : index
    %814 = vector.load %arg4[%813, %c0_324, %c0_325] : memref<16x2x1xf32, #tpu.memory_space<vmem>>, vector<1x2x1xf32>
    %815 = vector.shape_cast %814 : vector<1x2x1xf32> to vector<2x1xf32>
    %cst_326 = arith.constant 0.000000e+00 : f32
    %816 = vector.broadcast %cst_326 : f32 to vector<2x1xf32>
    %817 = arith.cmpf ogt, %815, %816 : vector<2x1xf32>
    %818 = vector.shape_cast %812 : vector<2x1xi1> to vector<2x1xi1>
    %819 = vector.broadcast %818 : vector<2x1xi1> to vector<2x32xi1>
    %820 = arith.select %819, %782, %739 : vector<2x32xi1>, vector<2x32xf32>
    %c0_327 = arith.constant 0 : index
    %c0_328 = arith.constant 0 : index
    %821 = vector.load %arg9[%c0_327, %c0_328] : memref<2x32xf32, #tpu.memory_space<vmem>>, vector<2x32xf32>
    tpu.vector_store %arg9[%c0_327, %c0_328], %820 {strides = array<i32>} : memref<2x32xf32, #tpu.memory_space<vmem>>, vector<2x32xf32>,
    %822 = vector.shape_cast %812 : vector<2x1xi1> to vector<2x1xi1>
    %823 = vector.broadcast %822 : vector<2x1xi1> to vector<2x32xi1>
    %824 = arith.select %823, %780, %740 : vector<2x32xi1>, vector<2x32xf32>
    %c0_329 = arith.constant 0 : index
    %c0_330 = arith.constant 0 : index
    %825 = vector.load %arg10[%c0_329, %c0_330] : memref<2x32xf32, #tpu.memory_space<vmem>>, vector<2x32xf32>
    tpu.vector_store %arg10[%c0_329, %c0_330], %824 {strides = array<i32>} : memref<2x32xf32, #tpu.memory_space<vmem>>, vector<2x32xf32>,
    %826 = vector.shape_cast %817 : vector<2x1xi1> to vector<2x1xi1>
    %827 = vector.broadcast %826 : vector<2x1xi1> to vector<2x32xi1>
    %828 = arith.select %827, %807, %741 : vector<2x32xi1>, vector<2x32xf32>
    %c0_331 = arith.constant 0 : index
    %c0_332 = arith.constant 0 : index
    %829 = vector.load %arg11[%c0_331, %c0_332] : memref<2x32xf32, #tpu.memory_space<vmem>>, vector<2x32xf32>
    tpu.vector_store %arg11[%c0_331, %c0_332], %828 {strides = array<i32>} : memref<2x32xf32, #tpu.memory_space<vmem>>, vector<2x32xf32>,
    %830 = vector.shape_cast %817 : vector<2x1xi1> to vector<2x1xi1>
    %831 = vector.broadcast %830 : vector<2x1xi1> to vector<2x32xi1>
    %832 = arith.select %831, %805, %742 : vector<2x32xi1>, vector<2x32xf32>
    %c0_333 = arith.constant 0 : index
    %c0_334 = arith.constant 0 : index
    %833 = vector.load %arg12[%c0_333, %c0_334] : memref<2x32xf32, #tpu.memory_space<vmem>>, vector<2x32xf32>
    tpu.vector_store %arg12[%c0_333, %c0_334], %832 {strides = array<i32>} : memref<2x32xf32, #tpu.memory_space<vmem>>, vector<2x32xf32>,
    %834 = arith.index_cast %c6_i32 : i32 to index
    %c0_335 = arith.constant 0 : index
    %c0_336 = arith.constant 0 : index
    %835 = vector.load %arg5[%834, %c0_335, %c0_336] : memref<16x2x32xf32, #tpu.memory_space<vmem>>, vector<1x2x32xf32>
    %836 = vector.shape_cast %835 : vector<1x2x32xf32> to vector<2x32xf32>
    %cst_337 = arith.constant 0.000000e+00 : f32
    %837 = vector.shape_cast %812 : vector<2x1xi1> to vector<2x1xi1>
    %838 = vector.broadcast %837 : vector<2x1xi1> to vector<2x32xi1>
    %839 = vector.broadcast %cst_337 : f32 to vector<2x32xf32>
    %840 = arith.select %838, %782, %839 : vector<2x32xi1>, vector<2x32xf32>
    %841 = arith.addf %836, %840 : vector<2x32xf32>
    %842 = arith.index_cast %c6_i32 : i32 to index
    %c0_338 = arith.constant 0 : index
    %c0_339 = arith.constant 0 : index
    %843 = vector.load %arg5[%842, %c0_338, %c0_339] : memref<16x2x32xf32, #tpu.memory_space<vmem>>, vector<1x2x32xf32>
    %844 = vector.shape_cast %843 : vector<1x2x32xf32> to vector<2x32xf32>
    %845 = vector.shape_cast %841 : vector<2x32xf32> to vector<1x2x32xf32>
    tpu.vector_store %arg5[%842, %c0_338, %c0_339], %845 {strides = array<i32>} : memref<16x2x32xf32, #tpu.memory_space<vmem>>, vector<1x2x32xf32>,
    %846 = arith.index_cast %738 : i32 to index
    %c0_340 = arith.constant 0 : index
    %c0_341 = arith.constant 0 : index
    %847 = vector.load %arg5[%846, %c0_340, %c0_341] : memref<16x2x32xf32, #tpu.memory_space<vmem>>, vector<1x2x32xf32>
    %848 = vector.shape_cast %847 : vector<1x2x32xf32> to vector<2x32xf32>
    %cst_342 = arith.constant 0.000000e+00 : f32
    %849 = vector.shape_cast %817 : vector<2x1xi1> to vector<2x1xi1>
    %850 = vector.broadcast %849 : vector<2x1xi1> to vector<2x32xi1>
    %851 = vector.broadcast %cst_342 : f32 to vector<2x32xf32>
    %852 = arith.select %850, %807, %851 : vector<2x32xi1>, vector<2x32xf32>
    %853 = arith.addf %848, %852 : vector<2x32xf32>
    %854 = arith.index_cast %738 : i32 to index
    %c0_343 = arith.constant 0 : index
    %c0_344 = arith.constant 0 : index
    %855 = vector.load %arg5[%854, %c0_343, %c0_344] : memref<16x2x32xf32, #tpu.memory_space<vmem>>, vector<1x2x32xf32>
    %856 = vector.shape_cast %855 : vector<1x2x32xf32> to vector<2x32xf32>
    %857 = vector.shape_cast %853 : vector<2x32xf32> to vector<1x2x32xf32>
    tpu.vector_store %arg5[%854, %c0_343, %c0_344], %857 {strides = array<i32>} : memref<16x2x32xf32, #tpu.memory_space<vmem>>, vector<1x2x32xf32>,
    %c7_i32 = arith.constant 7 : i32
    %c15_i32_345 = arith.constant 15 : i32
    %858 = arith.subi %c15_i32_345, %c7_i32 : i32
    %c0_346 = arith.constant 0 : index
    %c0_347 = arith.constant 0 : index
    %859 = vector.load %arg9[%c0_346, %c0_347] : memref<2x32xf32, #tpu.memory_space<vmem>>, vector<2x32xf32>
    %c0_348 = arith.constant 0 : index
    %c0_349 = arith.constant 0 : index
    %860 = vector.load %arg10[%c0_348, %c0_349] : memref<2x32xf32, #tpu.memory_space<vmem>>, vector<2x32xf32>
    %c0_350 = arith.constant 0 : index
    %c0_351 = arith.constant 0 : index
    %861 = vector.load %arg11[%c0_350, %c0_351] : memref<2x32xf32, #tpu.memory_space<vmem>>, vector<2x32xf32>
    %c0_352 = arith.constant 0 : index
    %c0_353 = arith.constant 0 : index
    %862 = vector.load %arg12[%c0_352, %c0_353] : memref<2x32xf32, #tpu.memory_space<vmem>>, vector<2x32xf32>
    %863 = tpu.concatenate %859, %861 in 1 : vector<2x32xf32>, vector<2x32xf32> -> vector<2x64xf32>
    %c0_354 = arith.constant 0 : index
    %c0_355 = arith.constant 0 : index
    %864 = vector.load %arg2[%c0_354, %c0_355] : memref<64x256xf32, #tpu.memory_space<vmem>>, vector<64x256xf32>
    %cst_356 = arith.constant dense<0.000000e+00> : vector<2x256xf32>
    %865 = tpu.matmul %863, %864, %cst_356 {dimension_numbers = #tpu.dot_dimension_numbers<[1], [0], [0], [1], [0, 0, 1, 1], [], []>} : vector<2x64xf32>, vector<64x256xf32>, vector<2x256xf32> -> vector<2x256xf32>
    %866 = arith.index_cast %c7_i32 : i32 to index
    %c0_357 = arith.constant 0 : index
    %c0_358 = arith.constant 0 : index
    %867 = vector.load %arg8[%866, %c0_357, %c0_358] : memref<16x2x256xf32, #tpu.memory_space<vmem>>, vector<1x2x256xf32>
    %868 = vector.shape_cast %867 : vector<1x2x256xf32> to vector<2x256xf32>
    %869 = vector.extract_strided_slice %868 {offsets = [0, 0], sizes = [2, 128], strides = [1, 1]} : vector<2x256xf32> to vector<2x128xf32>
    %870 = vector.extract_strided_slice %865 {offsets = [0, 0], sizes = [2, 128], strides = [1, 1]} : vector<2x256xf32> to vector<2x128xf32>
    %871 = arith.addf %869, %870 : vector<2x128xf32>
    %872 = arith.index_cast %858 : i32 to index
    %c0_359 = arith.constant 0 : index
    %c0_360 = arith.constant 0 : index
    %873 = vector.load %arg8[%872, %c0_359, %c0_360] : memref<16x2x256xf32, #tpu.memory_space<vmem>>, vector<1x2x256xf32>
    %874 = vector.shape_cast %873 : vector<1x2x256xf32> to vector<2x256xf32>
    %875 = vector.extract_strided_slice %874 {offsets = [0, 128], sizes = [2, 128], strides = [1, 1]} : vector<2x256xf32> to vector<2x128xf32>
    %876 = vector.extract_strided_slice %865 {offsets = [0, 128], sizes = [2, 128], strides = [1, 1]} : vector<2x256xf32> to vector<2x128xf32>
    %877 = arith.addf %875, %876 : vector<2x128xf32>
    %878 = vector.extract_strided_slice %871 {offsets = [0, 0], sizes = [2, 32], strides = [1, 1]} : vector<2x128xf32> to vector<2x32xf32>
    %879 = arith.negf %878 : vector<2x32xf32>
    %880 = math.exp %879 : vector<2x32xf32>
    %cst_361 = arith.constant 1.000000e+00 : f32
    %881 = vector.broadcast %cst_361 : f32 to vector<2x32xf32>
    %882 = arith.addf %881, %880 : vector<2x32xf32>
    %883 = arith.divf %881, %882 : vector<2x32xf32>
    %884 = vector.extract_strided_slice %871 {offsets = [0, 32], sizes = [2, 32], strides = [1, 1]} : vector<2x128xf32> to vector<2x32xf32>
    %885 = arith.negf %884 : vector<2x32xf32>
    %886 = math.exp %885 : vector<2x32xf32>
    %cst_362 = arith.constant 1.000000e+00 : f32
    %887 = vector.broadcast %cst_362 : f32 to vector<2x32xf32>
    %888 = arith.addf %887, %886 : vector<2x32xf32>
    %889 = arith.divf %887, %888 : vector<2x32xf32>
    %890 = vector.extract_strided_slice %871 {offsets = [0, 64], sizes = [2, 32], strides = [1, 1]} : vector<2x128xf32> to vector<2x32xf32>
    %891 = math.tanh %890 : vector<2x32xf32>
    %892 = vector.extract_strided_slice %871 {offsets = [0, 96], sizes = [2, 32], strides = [1, 1]} : vector<2x128xf32> to vector<2x32xf32>
    %893 = arith.negf %892 : vector<2x32xf32>
    %894 = math.exp %893 : vector<2x32xf32>
    %cst_363 = arith.constant 1.000000e+00 : f32
    %895 = vector.broadcast %cst_363 : f32 to vector<2x32xf32>
    %896 = arith.addf %895, %894 : vector<2x32xf32>
    %897 = arith.divf %895, %896 : vector<2x32xf32>
    %898 = arith.mulf %889, %860 : vector<2x32xf32>
    %899 = arith.mulf %883, %891 : vector<2x32xf32>
    %900 = arith.addf %898, %899 : vector<2x32xf32>
    %901 = math.tanh %900 : vector<2x32xf32>
    %902 = arith.mulf %897, %901 : vector<2x32xf32>
    %903 = vector.extract_strided_slice %877 {offsets = [0, 0], sizes = [2, 32], strides = [1, 1]} : vector<2x128xf32> to vector<2x32xf32>
    %904 = arith.negf %903 : vector<2x32xf32>
    %905 = math.exp %904 : vector<2x32xf32>
    %cst_364 = arith.constant 1.000000e+00 : f32
    %906 = vector.broadcast %cst_364 : f32 to vector<2x32xf32>
    %907 = arith.addf %906, %905 : vector<2x32xf32>
    %908 = arith.divf %906, %907 : vector<2x32xf32>
    %909 = vector.extract_strided_slice %877 {offsets = [0, 32], sizes = [2, 32], strides = [1, 1]} : vector<2x128xf32> to vector<2x32xf32>
    %910 = arith.negf %909 : vector<2x32xf32>
    %911 = math.exp %910 : vector<2x32xf32>
    %cst_365 = arith.constant 1.000000e+00 : f32
    %912 = vector.broadcast %cst_365 : f32 to vector<2x32xf32>
    %913 = arith.addf %912, %911 : vector<2x32xf32>
    %914 = arith.divf %912, %913 : vector<2x32xf32>
    %915 = vector.extract_strided_slice %877 {offsets = [0, 64], sizes = [2, 32], strides = [1, 1]} : vector<2x128xf32> to vector<2x32xf32>
    %916 = math.tanh %915 : vector<2x32xf32>
    %917 = vector.extract_strided_slice %877 {offsets = [0, 96], sizes = [2, 32], strides = [1, 1]} : vector<2x128xf32> to vector<2x32xf32>
    %918 = arith.negf %917 : vector<2x32xf32>
    %919 = math.exp %918 : vector<2x32xf32>
    %cst_366 = arith.constant 1.000000e+00 : f32
    %920 = vector.broadcast %cst_366 : f32 to vector<2x32xf32>
    %921 = arith.addf %920, %919 : vector<2x32xf32>
    %922 = arith.divf %920, %921 : vector<2x32xf32>
    %923 = arith.mulf %914, %862 : vector<2x32xf32>
    %924 = arith.mulf %908, %916 : vector<2x32xf32>
    %925 = arith.addf %923, %924 : vector<2x32xf32>
    %926 = math.tanh %925 : vector<2x32xf32>
    %927 = arith.mulf %922, %926 : vector<2x32xf32>
    %928 = arith.index_cast %c7_i32 : i32 to index
    %c0_367 = arith.constant 0 : index
    %c0_368 = arith.constant 0 : index
    %929 = vector.load %arg4[%928, %c0_367, %c0_368] : memref<16x2x1xf32, #tpu.memory_space<vmem>>, vector<1x2x1xf32>
    %930 = vector.shape_cast %929 : vector<1x2x1xf32> to vector<2x1xf32>
    %cst_369 = arith.constant 0.000000e+00 : f32
    %931 = vector.broadcast %cst_369 : f32 to vector<2x1xf32>
    %932 = arith.cmpf ogt, %930, %931 : vector<2x1xf32>
    %933 = arith.index_cast %858 : i32 to index
    %c0_370 = arith.constant 0 : index
    %c0_371 = arith.constant 0 : index
    %934 = vector.load %arg4[%933, %c0_370, %c0_371] : memref<16x2x1xf32, #tpu.memory_space<vmem>>, vector<1x2x1xf32>
    %935 = vector.shape_cast %934 : vector<1x2x1xf32> to vector<2x1xf32>
    %cst_372 = arith.constant 0.000000e+00 : f32
    %936 = vector.broadcast %cst_372 : f32 to vector<2x1xf32>
    %937 = arith.cmpf ogt, %935, %936 : vector<2x1xf32>
    %938 = vector.shape_cast %932 : vector<2x1xi1> to vector<2x1xi1>
    %939 = vector.broadcast %938 : vector<2x1xi1> to vector<2x32xi1>
    %940 = arith.select %939, %902, %859 : vector<2x32xi1>, vector<2x32xf32>
    %c0_373 = arith.constant 0 : index
    %c0_374 = arith.constant 0 : index
    %941 = vector.load %arg9[%c0_373, %c0_374] : memref<2x32xf32, #tpu.memory_space<vmem>>, vector<2x32xf32>
    tpu.vector_store %arg9[%c0_373, %c0_374], %940 {strides = array<i32>} : memref<2x32xf32, #tpu.memory_space<vmem>>, vector<2x32xf32>,
    %942 = vector.shape_cast %932 : vector<2x1xi1> to vector<2x1xi1>
    %943 = vector.broadcast %942 : vector<2x1xi1> to vector<2x32xi1>
    %944 = arith.select %943, %900, %860 : vector<2x32xi1>, vector<2x32xf32>
    %c0_375 = arith.constant 0 : index
    %c0_376 = arith.constant 0 : index
    %945 = vector.load %arg10[%c0_375, %c0_376] : memref<2x32xf32, #tpu.memory_space<vmem>>, vector<2x32xf32>
    tpu.vector_store %arg10[%c0_375, %c0_376], %944 {strides = array<i32>} : memref<2x32xf32, #tpu.memory_space<vmem>>, vector<2x32xf32>,
    %946 = vector.shape_cast %937 : vector<2x1xi1> to vector<2x1xi1>
    %947 = vector.broadcast %946 : vector<2x1xi1> to vector<2x32xi1>
    %948 = arith.select %947, %927, %861 : vector<2x32xi1>, vector<2x32xf32>
    %c0_377 = arith.constant 0 : index
    %c0_378 = arith.constant 0 : index
    %949 = vector.load %arg11[%c0_377, %c0_378] : memref<2x32xf32, #tpu.memory_space<vmem>>, vector<2x32xf32>
    tpu.vector_store %arg11[%c0_377, %c0_378], %948 {strides = array<i32>} : memref<2x32xf32, #tpu.memory_space<vmem>>, vector<2x32xf32>,
    %950 = vector.shape_cast %937 : vector<2x1xi1> to vector<2x1xi1>
    %951 = vector.broadcast %950 : vector<2x1xi1> to vector<2x32xi1>
    %952 = arith.select %951, %925, %862 : vector<2x32xi1>, vector<2x32xf32>
    %c0_379 = arith.constant 0 : index
    %c0_380 = arith.constant 0 : index
    %953 = vector.load %arg12[%c0_379, %c0_380] : memref<2x32xf32, #tpu.memory_space<vmem>>, vector<2x32xf32>
    tpu.vector_store %arg12[%c0_379, %c0_380], %952 {strides = array<i32>} : memref<2x32xf32, #tpu.memory_space<vmem>>, vector<2x32xf32>,
    %954 = arith.index_cast %c7_i32 : i32 to index
    %c0_381 = arith.constant 0 : index
    %c0_382 = arith.constant 0 : index
    %955 = vector.load %arg5[%954, %c0_381, %c0_382] : memref<16x2x32xf32, #tpu.memory_space<vmem>>, vector<1x2x32xf32>
    %956 = vector.shape_cast %955 : vector<1x2x32xf32> to vector<2x32xf32>
    %cst_383 = arith.constant 0.000000e+00 : f32
    %957 = vector.shape_cast %932 : vector<2x1xi1> to vector<2x1xi1>
    %958 = vector.broadcast %957 : vector<2x1xi1> to vector<2x32xi1>
    %959 = vector.broadcast %cst_383 : f32 to vector<2x32xf32>
    %960 = arith.select %958, %902, %959 : vector<2x32xi1>, vector<2x32xf32>
    %961 = arith.addf %956, %960 : vector<2x32xf32>
    %962 = arith.index_cast %c7_i32 : i32 to index
    %c0_384 = arith.constant 0 : index
    %c0_385 = arith.constant 0 : index
    %963 = vector.load %arg5[%962, %c0_384, %c0_385] : memref<16x2x32xf32, #tpu.memory_space<vmem>>, vector<1x2x32xf32>
    %964 = vector.shape_cast %963 : vector<1x2x32xf32> to vector<2x32xf32>
    %965 = vector.shape_cast %961 : vector<2x32xf32> to vector<1x2x32xf32>
    tpu.vector_store %arg5[%962, %c0_384, %c0_385], %965 {strides = array<i32>} : memref<16x2x32xf32, #tpu.memory_space<vmem>>, vector<1x2x32xf32>,
    %966 = arith.index_cast %858 : i32 to index
    %c0_386 = arith.constant 0 : index
    %c0_387 = arith.constant 0 : index
    %967 = vector.load %arg5[%966, %c0_386, %c0_387] : memref<16x2x32xf32, #tpu.memory_space<vmem>>, vector<1x2x32xf32>
    %968 = vector.shape_cast %967 : vector<1x2x32xf32> to vector<2x32xf32>
    %cst_388 = arith.constant 0.000000e+00 : f32
    %969 = vector.shape_cast %937 : vector<2x1xi1> to vector<2x1xi1>
    %970 = vector.broadcast %969 : vector<2x1xi1> to vector<2x32xi1>
    %971 = vector.broadcast %cst_388 : f32 to vector<2x32xf32>
    %972 = arith.select %970, %927, %971 : vector<2x32xi1>, vector<2x32xf32>
    %973 = arith.addf %968, %972 : vector<2x32xf32>
    %974 = arith.index_cast %858 : i32 to index
    %c0_389 = arith.constant 0 : index
    %c0_390 = arith.constant 0 : index
    %975 = vector.load %arg5[%974, %c0_389, %c0_390] : memref<16x2x32xf32, #tpu.memory_space<vmem>>, vector<1x2x32xf32>
    %976 = vector.shape_cast %975 : vector<1x2x32xf32> to vector<2x32xf32>
    %977 = vector.shape_cast %973 : vector<2x32xf32> to vector<1x2x32xf32>
    tpu.vector_store %arg5[%974, %c0_389, %c0_390], %977 {strides = array<i32>} : memref<16x2x32xf32, #tpu.memory_space<vmem>>, vector<1x2x32xf32>,
    %c8_i32 = arith.constant 8 : i32
    %c15_i32_391 = arith.constant 15 : i32
    %978 = arith.subi %c15_i32_391, %c8_i32 : i32
    %c0_392 = arith.constant 0 : index
    %c0_393 = arith.constant 0 : index
    %979 = vector.load %arg9[%c0_392, %c0_393] : memref<2x32xf32, #tpu.memory_space<vmem>>, vector<2x32xf32>
    %c0_394 = arith.constant 0 : index
    %c0_395 = arith.constant 0 : index
    %980 = vector.load %arg10[%c0_394, %c0_395] : memref<2x32xf32, #tpu.memory_space<vmem>>, vector<2x32xf32>
    %c0_396 = arith.constant 0 : index
    %c0_397 = arith.constant 0 : index
    %981 = vector.load %arg11[%c0_396, %c0_397] : memref<2x32xf32, #tpu.memory_space<vmem>>, vector<2x32xf32>
    %c0_398 = arith.constant 0 : index
    %c0_399 = arith.constant 0 : index
    %982 = vector.load %arg12[%c0_398, %c0_399] : memref<2x32xf32, #tpu.memory_space<vmem>>, vector<2x32xf32>
    %983 = tpu.concatenate %979, %981 in 1 : vector<2x32xf32>, vector<2x32xf32> -> vector<2x64xf32>
    %c0_400 = arith.constant 0 : index
    %c0_401 = arith.constant 0 : index
    %984 = vector.load %arg2[%c0_400, %c0_401] : memref<64x256xf32, #tpu.memory_space<vmem>>, vector<64x256xf32>
    %cst_402 = arith.constant dense<0.000000e+00> : vector<2x256xf32>
    %985 = tpu.matmul %983, %984, %cst_402 {dimension_numbers = #tpu.dot_dimension_numbers<[1], [0], [0], [1], [0, 0, 1, 1], [], []>} : vector<2x64xf32>, vector<64x256xf32>, vector<2x256xf32> -> vector<2x256xf32>
    %986 = arith.index_cast %c8_i32 : i32 to index
    %c0_403 = arith.constant 0 : index
    %c0_404 = arith.constant 0 : index
    %987 = vector.load %arg8[%986, %c0_403, %c0_404] : memref<16x2x256xf32, #tpu.memory_space<vmem>>, vector<1x2x256xf32>
    %988 = vector.shape_cast %987 : vector<1x2x256xf32> to vector<2x256xf32>
    %989 = vector.extract_strided_slice %988 {offsets = [0, 0], sizes = [2, 128], strides = [1, 1]} : vector<2x256xf32> to vector<2x128xf32>
    %990 = vector.extract_strided_slice %985 {offsets = [0, 0], sizes = [2, 128], strides = [1, 1]} : vector<2x256xf32> to vector<2x128xf32>
    %991 = arith.addf %989, %990 : vector<2x128xf32>
    %992 = arith.index_cast %978 : i32 to index
    %c0_405 = arith.constant 0 : index
    %c0_406 = arith.constant 0 : index
    %993 = vector.load %arg8[%992, %c0_405, %c0_406] : memref<16x2x256xf32, #tpu.memory_space<vmem>>, vector<1x2x256xf32>
    %994 = vector.shape_cast %993 : vector<1x2x256xf32> to vector<2x256xf32>
    %995 = vector.extract_strided_slice %994 {offsets = [0, 128], sizes = [2, 128], strides = [1, 1]} : vector<2x256xf32> to vector<2x128xf32>
    %996 = vector.extract_strided_slice %985 {offsets = [0, 128], sizes = [2, 128], strides = [1, 1]} : vector<2x256xf32> to vector<2x128xf32>
    %997 = arith.addf %995, %996 : vector<2x128xf32>
    %998 = vector.extract_strided_slice %991 {offsets = [0, 0], sizes = [2, 32], strides = [1, 1]} : vector<2x128xf32> to vector<2x32xf32>
    %999 = arith.negf %998 : vector<2x32xf32>
    %1000 = math.exp %999 : vector<2x32xf32>
    %cst_407 = arith.constant 1.000000e+00 : f32
    %1001 = vector.broadcast %cst_407 : f32 to vector<2x32xf32>
    %1002 = arith.addf %1001, %1000 : vector<2x32xf32>
    %1003 = arith.divf %1001, %1002 : vector<2x32xf32>
    %1004 = vector.extract_strided_slice %991 {offsets = [0, 32], sizes = [2, 32], strides = [1, 1]} : vector<2x128xf32> to vector<2x32xf32>
    %1005 = arith.negf %1004 : vector<2x32xf32>
    %1006 = math.exp %1005 : vector<2x32xf32>
    %cst_408 = arith.constant 1.000000e+00 : f32
    %1007 = vector.broadcast %cst_408 : f32 to vector<2x32xf32>
    %1008 = arith.addf %1007, %1006 : vector<2x32xf32>
    %1009 = arith.divf %1007, %1008 : vector<2x32xf32>
    %1010 = vector.extract_strided_slice %991 {offsets = [0, 64], sizes = [2, 32], strides = [1, 1]} : vector<2x128xf32> to vector<2x32xf32>
    %1011 = math.tanh %1010 : vector<2x32xf32>
    %1012 = vector.extract_strided_slice %991 {offsets = [0, 96], sizes = [2, 32], strides = [1, 1]} : vector<2x128xf32> to vector<2x32xf32>
    %1013 = arith.negf %1012 : vector<2x32xf32>
    %1014 = math.exp %1013 : vector<2x32xf32>
    %cst_409 = arith.constant 1.000000e+00 : f32
    %1015 = vector.broadcast %cst_409 : f32 to vector<2x32xf32>
    %1016 = arith.addf %1015, %1014 : vector<2x32xf32>
    %1017 = arith.divf %1015, %1016 : vector<2x32xf32>
    %1018 = arith.mulf %1009, %980 : vector<2x32xf32>
    %1019 = arith.mulf %1003, %1011 : vector<2x32xf32>
    %1020 = arith.addf %1018, %1019 : vector<2x32xf32>
    %1021 = math.tanh %1020 : vector<2x32xf32>
    %1022 = arith.mulf %1017, %1021 : vector<2x32xf32>
    %1023 = vector.extract_strided_slice %997 {offsets = [0, 0], sizes = [2, 32], strides = [1, 1]} : vector<2x128xf32> to vector<2x32xf32>
    %1024 = arith.negf %1023 : vector<2x32xf32>
    %1025 = math.exp %1024 : vector<2x32xf32>
    %cst_410 = arith.constant 1.000000e+00 : f32
    %1026 = vector.broadcast %cst_410 : f32 to vector<2x32xf32>
    %1027 = arith.addf %1026, %1025 : vector<2x32xf32>
    %1028 = arith.divf %1026, %1027 : vector<2x32xf32>
    %1029 = vector.extract_strided_slice %997 {offsets = [0, 32], sizes = [2, 32], strides = [1, 1]} : vector<2x128xf32> to vector<2x32xf32>
    %1030 = arith.negf %1029 : vector<2x32xf32>
    %1031 = math.exp %1030 : vector<2x32xf32>
    %cst_411 = arith.constant 1.000000e+00 : f32
    %1032 = vector.broadcast %cst_411 : f32 to vector<2x32xf32>
    %1033 = arith.addf %1032, %1031 : vector<2x32xf32>
    %1034 = arith.divf %1032, %1033 : vector<2x32xf32>
    %1035 = vector.extract_strided_slice %997 {offsets = [0, 64], sizes = [2, 32], strides = [1, 1]} : vector<2x128xf32> to vector<2x32xf32>
    %1036 = math.tanh %1035 : vector<2x32xf32>
    %1037 = vector.extract_strided_slice %997 {offsets = [0, 96], sizes = [2, 32], strides = [1, 1]} : vector<2x128xf32> to vector<2x32xf32>
    %1038 = arith.negf %1037 : vector<2x32xf32>
    %1039 = math.exp %1038 : vector<2x32xf32>
    %cst_412 = arith.constant 1.000000e+00 : f32
    %1040 = vector.broadcast %cst_412 : f32 to vector<2x32xf32>
    %1041 = arith.addf %1040, %1039 : vector<2x32xf32>
    %1042 = arith.divf %1040, %1041 : vector<2x32xf32>
    %1043 = arith.mulf %1034, %982 : vector<2x32xf32>
    %1044 = arith.mulf %1028, %1036 : vector<2x32xf32>
    %1045 = arith.addf %1043, %1044 : vector<2x32xf32>
    %1046 = math.tanh %1045 : vector<2x32xf32>
    %1047 = arith.mulf %1042, %1046 : vector<2x32xf32>
    %1048 = arith.index_cast %c8_i32 : i32 to index
    %c0_413 = arith.constant 0 : index
    %c0_414 = arith.constant 0 : index
    %1049 = vector.load %arg4[%1048, %c0_413, %c0_414] : memref<16x2x1xf32, #tpu.memory_space<vmem>>, vector<1x2x1xf32>
    %1050 = vector.shape_cast %1049 : vector<1x2x1xf32> to vector<2x1xf32>
    %cst_415 = arith.constant 0.000000e+00 : f32
    %1051 = vector.broadcast %cst_415 : f32 to vector<2x1xf32>
    %1052 = arith.cmpf ogt, %1050, %1051 : vector<2x1xf32>
    %1053 = arith.index_cast %978 : i32 to index
    %c0_416 = arith.constant 0 : index
    %c0_417 = arith.constant 0 : index
    %1054 = vector.load %arg4[%1053, %c0_416, %c0_417] : memref<16x2x1xf32, #tpu.memory_space<vmem>>, vector<1x2x1xf32>
    %1055 = vector.shape_cast %1054 : vector<1x2x1xf32> to vector<2x1xf32>
    %cst_418 = arith.constant 0.000000e+00 : f32
    %1056 = vector.broadcast %cst_418 : f32 to vector<2x1xf32>
    %1057 = arith.cmpf ogt, %1055, %1056 : vector<2x1xf32>
    %1058 = vector.shape_cast %1052 : vector<2x1xi1> to vector<2x1xi1>
    %1059 = vector.broadcast %1058 : vector<2x1xi1> to vector<2x32xi1>
    %1060 = arith.select %1059, %1022, %979 : vector<2x32xi1>, vector<2x32xf32>
    %c0_419 = arith.constant 0 : index
    %c0_420 = arith.constant 0 : index
    %1061 = vector.load %arg9[%c0_419, %c0_420] : memref<2x32xf32, #tpu.memory_space<vmem>>, vector<2x32xf32>
    tpu.vector_store %arg9[%c0_419, %c0_420], %1060 {strides = array<i32>} : memref<2x32xf32, #tpu.memory_space<vmem>>, vector<2x32xf32>,
    %1062 = vector.shape_cast %1052 : vector<2x1xi1> to vector<2x1xi1>
    %1063 = vector.broadcast %1062 : vector<2x1xi1> to vector<2x32xi1>
    %1064 = arith.select %1063, %1020, %980 : vector<2x32xi1>, vector<2x32xf32>
    %c0_421 = arith.constant 0 : index
    %c0_422 = arith.constant 0 : index
    %1065 = vector.load %arg10[%c0_421, %c0_422] : memref<2x32xf32, #tpu.memory_space<vmem>>, vector<2x32xf32>
    tpu.vector_store %arg10[%c0_421, %c0_422], %1064 {strides = array<i32>} : memref<2x32xf32, #tpu.memory_space<vmem>>, vector<2x32xf32>,
    %1066 = vector.shape_cast %1057 : vector<2x1xi1> to vector<2x1xi1>
    %1067 = vector.broadcast %1066 : vector<2x1xi1> to vector<2x32xi1>
    %1068 = arith.select %1067, %1047, %981 : vector<2x32xi1>, vector<2x32xf32>
    %c0_423 = arith.constant 0 : index
    %c0_424 = arith.constant 0 : index
    %1069 = vector.load %arg11[%c0_423, %c0_424] : memref<2x32xf32, #tpu.memory_space<vmem>>, vector<2x32xf32>
    tpu.vector_store %arg11[%c0_423, %c0_424], %1068 {strides = array<i32>} : memref<2x32xf32, #tpu.memory_space<vmem>>, vector<2x32xf32>,
    %1070 = vector.shape_cast %1057 : vector<2x1xi1> to vector<2x1xi1>
    %1071 = vector.broadcast %1070 : vector<2x1xi1> to vector<2x32xi1>
    %1072 = arith.select %1071, %1045, %982 : vector<2x32xi1>, vector<2x32xf32>
    %c0_425 = arith.constant 0 : index
    %c0_426 = arith.constant 0 : index
    %1073 = vector.load %arg12[%c0_425, %c0_426] : memref<2x32xf32, #tpu.memory_space<vmem>>, vector<2x32xf32>
    tpu.vector_store %arg12[%c0_425, %c0_426], %1072 {strides = array<i32>} : memref<2x32xf32, #tpu.memory_space<vmem>>, vector<2x32xf32>,
    %1074 = arith.index_cast %c8_i32 : i32 to index
    %c0_427 = arith.constant 0 : index
    %c0_428 = arith.constant 0 : index
    %1075 = vector.load %arg5[%1074, %c0_427, %c0_428] : memref<16x2x32xf32, #tpu.memory_space<vmem>>, vector<1x2x32xf32>
    %1076 = vector.shape_cast %1075 : vector<1x2x32xf32> to vector<2x32xf32>
    %cst_429 = arith.constant 0.000000e+00 : f32
    %1077 = vector.shape_cast %1052 : vector<2x1xi1> to vector<2x1xi1>
    %1078 = vector.broadcast %1077 : vector<2x1xi1> to vector<2x32xi1>
    %1079 = vector.broadcast %cst_429 : f32 to vector<2x32xf32>
    %1080 = arith.select %1078, %1022, %1079 : vector<2x32xi1>, vector<2x32xf32>
    %1081 = arith.addf %1076, %1080 : vector<2x32xf32>
    %1082 = arith.index_cast %c8_i32 : i32 to index
    %c0_430 = arith.constant 0 : index
    %c0_431 = arith.constant 0 : index
    %1083 = vector.load %arg5[%1082, %c0_430, %c0_431] : memref<16x2x32xf32, #tpu.memory_space<vmem>>, vector<1x2x32xf32>
    %1084 = vector.shape_cast %1083 : vector<1x2x32xf32> to vector<2x32xf32>
    %1085 = vector.shape_cast %1081 : vector<2x32xf32> to vector<1x2x32xf32>
    tpu.vector_store %arg5[%1082, %c0_430, %c0_431], %1085 {strides = array<i32>} : memref<16x2x32xf32, #tpu.memory_space<vmem>>, vector<1x2x32xf32>,
    %1086 = arith.index_cast %978 : i32 to index
    %c0_432 = arith.constant 0 : index
    %c0_433 = arith.constant 0 : index
    %1087 = vector.load %arg5[%1086, %c0_432, %c0_433] : memref<16x2x32xf32, #tpu.memory_space<vmem>>, vector<1x2x32xf32>
    %1088 = vector.shape_cast %1087 : vector<1x2x32xf32> to vector<2x32xf32>
    %cst_434 = arith.constant 0.000000e+00 : f32
    %1089 = vector.shape_cast %1057 : vector<2x1xi1> to vector<2x1xi1>
    %1090 = vector.broadcast %1089 : vector<2x1xi1> to vector<2x32xi1>
    %1091 = vector.broadcast %cst_434 : f32 to vector<2x32xf32>
    %1092 = arith.select %1090, %1047, %1091 : vector<2x32xi1>, vector<2x32xf32>
    %1093 = arith.addf %1088, %1092 : vector<2x32xf32>
    %1094 = arith.index_cast %978 : i32 to index
    %c0_435 = arith.constant 0 : index
    %c0_436 = arith.constant 0 : index
    %1095 = vector.load %arg5[%1094, %c0_435, %c0_436] : memref<16x2x32xf32, #tpu.memory_space<vmem>>, vector<1x2x32xf32>
    %1096 = vector.shape_cast %1095 : vector<1x2x32xf32> to vector<2x32xf32>
    %1097 = vector.shape_cast %1093 : vector<2x32xf32> to vector<1x2x32xf32>
    tpu.vector_store %arg5[%1094, %c0_435, %c0_436], %1097 {strides = array<i32>} : memref<16x2x32xf32, #tpu.memory_space<vmem>>, vector<1x2x32xf32>,
    %c9_i32 = arith.constant 9 : i32
    %c15_i32_437 = arith.constant 15 : i32
    %1098 = arith.subi %c15_i32_437, %c9_i32 : i32
    %c0_438 = arith.constant 0 : index
    %c0_439 = arith.constant 0 : index
    %1099 = vector.load %arg9[%c0_438, %c0_439] : memref<2x32xf32, #tpu.memory_space<vmem>>, vector<2x32xf32>
    %c0_440 = arith.constant 0 : index
    %c0_441 = arith.constant 0 : index
    %1100 = vector.load %arg10[%c0_440, %c0_441] : memref<2x32xf32, #tpu.memory_space<vmem>>, vector<2x32xf32>
    %c0_442 = arith.constant 0 : index
    %c0_443 = arith.constant 0 : index
    %1101 = vector.load %arg11[%c0_442, %c0_443] : memref<2x32xf32, #tpu.memory_space<vmem>>, vector<2x32xf32>
    %c0_444 = arith.constant 0 : index
    %c0_445 = arith.constant 0 : index
    %1102 = vector.load %arg12[%c0_444, %c0_445] : memref<2x32xf32, #tpu.memory_space<vmem>>, vector<2x32xf32>
    %1103 = tpu.concatenate %1099, %1101 in 1 : vector<2x32xf32>, vector<2x32xf32> -> vector<2x64xf32>
    %c0_446 = arith.constant 0 : index
    %c0_447 = arith.constant 0 : index
    %1104 = vector.load %arg2[%c0_446, %c0_447] : memref<64x256xf32, #tpu.memory_space<vmem>>, vector<64x256xf32>
    %cst_448 = arith.constant dense<0.000000e+00> : vector<2x256xf32>
    %1105 = tpu.matmul %1103, %1104, %cst_448 {dimension_numbers = #tpu.dot_dimension_numbers<[1], [0], [0], [1], [0, 0, 1, 1], [], []>} : vector<2x64xf32>, vector<64x256xf32>, vector<2x256xf32> -> vector<2x256xf32>
    %1106 = arith.index_cast %c9_i32 : i32 to index
    %c0_449 = arith.constant 0 : index
    %c0_450 = arith.constant 0 : index
    %1107 = vector.load %arg8[%1106, %c0_449, %c0_450] : memref<16x2x256xf32, #tpu.memory_space<vmem>>, vector<1x2x256xf32>
    %1108 = vector.shape_cast %1107 : vector<1x2x256xf32> to vector<2x256xf32>
    %1109 = vector.extract_strided_slice %1108 {offsets = [0, 0], sizes = [2, 128], strides = [1, 1]} : vector<2x256xf32> to vector<2x128xf32>
    %1110 = vector.extract_strided_slice %1105 {offsets = [0, 0], sizes = [2, 128], strides = [1, 1]} : vector<2x256xf32> to vector<2x128xf32>
    %1111 = arith.addf %1109, %1110 : vector<2x128xf32>
    %1112 = arith.index_cast %1098 : i32 to index
    %c0_451 = arith.constant 0 : index
    %c0_452 = arith.constant 0 : index
    %1113 = vector.load %arg8[%1112, %c0_451, %c0_452] : memref<16x2x256xf32, #tpu.memory_space<vmem>>, vector<1x2x256xf32>
    %1114 = vector.shape_cast %1113 : vector<1x2x256xf32> to vector<2x256xf32>
    %1115 = vector.extract_strided_slice %1114 {offsets = [0, 128], sizes = [2, 128], strides = [1, 1]} : vector<2x256xf32> to vector<2x128xf32>
    %1116 = vector.extract_strided_slice %1105 {offsets = [0, 128], sizes = [2, 128], strides = [1, 1]} : vector<2x256xf32> to vector<2x128xf32>
    %1117 = arith.addf %1115, %1116 : vector<2x128xf32>
    %1118 = vector.extract_strided_slice %1111 {offsets = [0, 0], sizes = [2, 32], strides = [1, 1]} : vector<2x128xf32> to vector<2x32xf32>
    %1119 = arith.negf %1118 : vector<2x32xf32>
    %1120 = math.exp %1119 : vector<2x32xf32>
    %cst_453 = arith.constant 1.000000e+00 : f32
    %1121 = vector.broadcast %cst_453 : f32 to vector<2x32xf32>
    %1122 = arith.addf %1121, %1120 : vector<2x32xf32>
    %1123 = arith.divf %1121, %1122 : vector<2x32xf32>
    %1124 = vector.extract_strided_slice %1111 {offsets = [0, 32], sizes = [2, 32], strides = [1, 1]} : vector<2x128xf32> to vector<2x32xf32>
    %1125 = arith.negf %1124 : vector<2x32xf32>
    %1126 = math.exp %1125 : vector<2x32xf32>
    %cst_454 = arith.constant 1.000000e+00 : f32
    %1127 = vector.broadcast %cst_454 : f32 to vector<2x32xf32>
    %1128 = arith.addf %1127, %1126 : vector<2x32xf32>
    %1129 = arith.divf %1127, %1128 : vector<2x32xf32>
    %1130 = vector.extract_strided_slice %1111 {offsets = [0, 64], sizes = [2, 32], strides = [1, 1]} : vector<2x128xf32> to vector<2x32xf32>
    %1131 = math.tanh %1130 : vector<2x32xf32>
    %1132 = vector.extract_strided_slice %1111 {offsets = [0, 96], sizes = [2, 32], strides = [1, 1]} : vector<2x128xf32> to vector<2x32xf32>
    %1133 = arith.negf %1132 : vector<2x32xf32>
    %1134 = math.exp %1133 : vector<2x32xf32>
    %cst_455 = arith.constant 1.000000e+00 : f32
    %1135 = vector.broadcast %cst_455 : f32 to vector<2x32xf32>
    %1136 = arith.addf %1135, %1134 : vector<2x32xf32>
    %1137 = arith.divf %1135, %1136 : vector<2x32xf32>
    %1138 = arith.mulf %1129, %1100 : vector<2x32xf32>
    %1139 = arith.mulf %1123, %1131 : vector<2x32xf32>
    %1140 = arith.addf %1138, %1139 : vector<2x32xf32>
    %1141 = math.tanh %1140 : vector<2x32xf32>
    %1142 = arith.mulf %1137, %1141 : vector<2x32xf32>
    %1143 = vector.extract_strided_slice %1117 {offsets = [0, 0], sizes = [2, 32], strides = [1, 1]} : vector<2x128xf32> to vector<2x32xf32>
    %1144 = arith.negf %1143 : vector<2x32xf32>
    %1145 = math.exp %1144 : vector<2x32xf32>
    %cst_456 = arith.constant 1.000000e+00 : f32
    %1146 = vector.broadcast %cst_456 : f32 to vector<2x32xf32>
    %1147 = arith.addf %1146, %1145 : vector<2x32xf32>
    %1148 = arith.divf %1146, %1147 : vector<2x32xf32>
    %1149 = vector.extract_strided_slice %1117 {offsets = [0, 32], sizes = [2, 32], strides = [1, 1]} : vector<2x128xf32> to vector<2x32xf32>
    %1150 = arith.negf %1149 : vector<2x32xf32>
    %1151 = math.exp %1150 : vector<2x32xf32>
    %cst_457 = arith.constant 1.000000e+00 : f32
    %1152 = vector.broadcast %cst_457 : f32 to vector<2x32xf32>
    %1153 = arith.addf %1152, %1151 : vector<2x32xf32>
    %1154 = arith.divf %1152, %1153 : vector<2x32xf32>
    %1155 = vector.extract_strided_slice %1117 {offsets = [0, 64], sizes = [2, 32], strides = [1, 1]} : vector<2x128xf32> to vector<2x32xf32>
    %1156 = math.tanh %1155 : vector<2x32xf32>
    %1157 = vector.extract_strided_slice %1117 {offsets = [0, 96], sizes = [2, 32], strides = [1, 1]} : vector<2x128xf32> to vector<2x32xf32>
    %1158 = arith.negf %1157 : vector<2x32xf32>
    %1159 = math.exp %1158 : vector<2x32xf32>
    %cst_458 = arith.constant 1.000000e+00 : f32
    %1160 = vector.broadcast %cst_458 : f32 to vector<2x32xf32>
    %1161 = arith.addf %1160, %1159 : vector<2x32xf32>
    %1162 = arith.divf %1160, %1161 : vector<2x32xf32>
    %1163 = arith.mulf %1154, %1102 : vector<2x32xf32>
    %1164 = arith.mulf %1148, %1156 : vector<2x32xf32>
    %1165 = arith.addf %1163, %1164 : vector<2x32xf32>
    %1166 = math.tanh %1165 : vector<2x32xf32>
    %1167 = arith.mulf %1162, %1166 : vector<2x32xf32>
    %1168 = arith.index_cast %c9_i32 : i32 to index
    %c0_459 = arith.constant 0 : index
    %c0_460 = arith.constant 0 : index
    %1169 = vector.load %arg4[%1168, %c0_459, %c0_460] : memref<16x2x1xf32, #tpu.memory_space<vmem>>, vector<1x2x1xf32>
    %1170 = vector.shape_cast %1169 : vector<1x2x1xf32> to vector<2x1xf32>
    %cst_461 = arith.constant 0.000000e+00 : f32
    %1171 = vector.broadcast %cst_461 : f32 to vector<2x1xf32>
    %1172 = arith.cmpf ogt, %1170, %1171 : vector<2x1xf32>
    %1173 = arith.index_cast %1098 : i32 to index
    %c0_462 = arith.constant 0 : index
    %c0_463 = arith.constant 0 : index
    %1174 = vector.load %arg4[%1173, %c0_462, %c0_463] : memref<16x2x1xf32, #tpu.memory_space<vmem>>, vector<1x2x1xf32>
    %1175 = vector.shape_cast %1174 : vector<1x2x1xf32> to vector<2x1xf32>
    %cst_464 = arith.constant 0.000000e+00 : f32
    %1176 = vector.broadcast %cst_464 : f32 to vector<2x1xf32>
    %1177 = arith.cmpf ogt, %1175, %1176 : vector<2x1xf32>
    %1178 = vector.shape_cast %1172 : vector<2x1xi1> to vector<2x1xi1>
    %1179 = vector.broadcast %1178 : vector<2x1xi1> to vector<2x32xi1>
    %1180 = arith.select %1179, %1142, %1099 : vector<2x32xi1>, vector<2x32xf32>
    %c0_465 = arith.constant 0 : index
    %c0_466 = arith.constant 0 : index
    %1181 = vector.load %arg9[%c0_465, %c0_466] : memref<2x32xf32, #tpu.memory_space<vmem>>, vector<2x32xf32>
    tpu.vector_store %arg9[%c0_465, %c0_466], %1180 {strides = array<i32>} : memref<2x32xf32, #tpu.memory_space<vmem>>, vector<2x32xf32>,
    %1182 = vector.shape_cast %1172 : vector<2x1xi1> to vector<2x1xi1>
    %1183 = vector.broadcast %1182 : vector<2x1xi1> to vector<2x32xi1>
    %1184 = arith.select %1183, %1140, %1100 : vector<2x32xi1>, vector<2x32xf32>
    %c0_467 = arith.constant 0 : index
    %c0_468 = arith.constant 0 : index
    %1185 = vector.load %arg10[%c0_467, %c0_468] : memref<2x32xf32, #tpu.memory_space<vmem>>, vector<2x32xf32>
    tpu.vector_store %arg10[%c0_467, %c0_468], %1184 {strides = array<i32>} : memref<2x32xf32, #tpu.memory_space<vmem>>, vector<2x32xf32>,
    %1186 = vector.shape_cast %1177 : vector<2x1xi1> to vector<2x1xi1>
    %1187 = vector.broadcast %1186 : vector<2x1xi1> to vector<2x32xi1>
    %1188 = arith.select %1187, %1167, %1101 : vector<2x32xi1>, vector<2x32xf32>
    %c0_469 = arith.constant 0 : index
    %c0_470 = arith.constant 0 : index
    %1189 = vector.load %arg11[%c0_469, %c0_470] : memref<2x32xf32, #tpu.memory_space<vmem>>, vector<2x32xf32>
    tpu.vector_store %arg11[%c0_469, %c0_470], %1188 {strides = array<i32>} : memref<2x32xf32, #tpu.memory_space<vmem>>, vector<2x32xf32>,
    %1190 = vector.shape_cast %1177 : vector<2x1xi1> to vector<2x1xi1>
    %1191 = vector.broadcast %1190 : vector<2x1xi1> to vector<2x32xi1>
    %1192 = arith.select %1191, %1165, %1102 : vector<2x32xi1>, vector<2x32xf32>
    %c0_471 = arith.constant 0 : index
    %c0_472 = arith.constant 0 : index
    %1193 = vector.load %arg12[%c0_471, %c0_472] : memref<2x32xf32, #tpu.memory_space<vmem>>, vector<2x32xf32>
    tpu.vector_store %arg12[%c0_471, %c0_472], %1192 {strides = array<i32>} : memref<2x32xf32, #tpu.memory_space<vmem>>, vector<2x32xf32>,
    %1194 = arith.index_cast %c9_i32 : i32 to index
    %c0_473 = arith.constant 0 : index
    %c0_474 = arith.constant 0 : index
    %1195 = vector.load %arg5[%1194, %c0_473, %c0_474] : memref<16x2x32xf32, #tpu.memory_space<vmem>>, vector<1x2x32xf32>
    %1196 = vector.shape_cast %1195 : vector<1x2x32xf32> to vector<2x32xf32>
    %cst_475 = arith.constant 0.000000e+00 : f32
    %1197 = vector.shape_cast %1172 : vector<2x1xi1> to vector<2x1xi1>
    %1198 = vector.broadcast %1197 : vector<2x1xi1> to vector<2x32xi1>
    %1199 = vector.broadcast %cst_475 : f32 to vector<2x32xf32>
    %1200 = arith.select %1198, %1142, %1199 : vector<2x32xi1>, vector<2x32xf32>
    %1201 = arith.addf %1196, %1200 : vector<2x32xf32>
    %1202 = arith.index_cast %c9_i32 : i32 to index
    %c0_476 = arith.constant 0 : index
    %c0_477 = arith.constant 0 : index
    %1203 = vector.load %arg5[%1202, %c0_476, %c0_477] : memref<16x2x32xf32, #tpu.memory_space<vmem>>, vector<1x2x32xf32>
    %1204 = vector.shape_cast %1203 : vector<1x2x32xf32> to vector<2x32xf32>
    %1205 = vector.shape_cast %1201 : vector<2x32xf32> to vector<1x2x32xf32>
    tpu.vector_store %arg5[%1202, %c0_476, %c0_477], %1205 {strides = array<i32>} : memref<16x2x32xf32, #tpu.memory_space<vmem>>, vector<1x2x32xf32>,
    %1206 = arith.index_cast %1098 : i32 to index
    %c0_478 = arith.constant 0 : index
    %c0_479 = arith.constant 0 : index
    %1207 = vector.load %arg5[%1206, %c0_478, %c0_479] : memref<16x2x32xf32, #tpu.memory_space<vmem>>, vector<1x2x32xf32>
    %1208 = vector.shape_cast %1207 : vector<1x2x32xf32> to vector<2x32xf32>
    %cst_480 = arith.constant 0.000000e+00 : f32
    %1209 = vector.shape_cast %1177 : vector<2x1xi1> to vector<2x1xi1>
    %1210 = vector.broadcast %1209 : vector<2x1xi1> to vector<2x32xi1>
    %1211 = vector.broadcast %cst_480 : f32 to vector<2x32xf32>
    %1212 = arith.select %1210, %1167, %1211 : vector<2x32xi1>, vector<2x32xf32>
    %1213 = arith.addf %1208, %1212 : vector<2x32xf32>
    %1214 = arith.index_cast %1098 : i32 to index
    %c0_481 = arith.constant 0 : index
    %c0_482 = arith.constant 0 : index
    %1215 = vector.load %arg5[%1214, %c0_481, %c0_482] : memref<16x2x32xf32, #tpu.memory_space<vmem>>, vector<1x2x32xf32>
    %1216 = vector.shape_cast %1215 : vector<1x2x32xf32> to vector<2x32xf32>
    %1217 = vector.shape_cast %1213 : vector<2x32xf32> to vector<1x2x32xf32>
    tpu.vector_store %arg5[%1214, %c0_481, %c0_482], %1217 {strides = array<i32>} : memref<16x2x32xf32, #tpu.memory_space<vmem>>, vector<1x2x32xf32>,
    %c10_i32 = arith.constant 10 : i32
    %c15_i32_483 = arith.constant 15 : i32
    %1218 = arith.subi %c15_i32_483, %c10_i32 : i32
    %c0_484 = arith.constant 0 : index
    %c0_485 = arith.constant 0 : index
    %1219 = vector.load %arg9[%c0_484, %c0_485] : memref<2x32xf32, #tpu.memory_space<vmem>>, vector<2x32xf32>
    %c0_486 = arith.constant 0 : index
    %c0_487 = arith.constant 0 : index
    %1220 = vector.load %arg10[%c0_486, %c0_487] : memref<2x32xf32, #tpu.memory_space<vmem>>, vector<2x32xf32>
    %c0_488 = arith.constant 0 : index
    %c0_489 = arith.constant 0 : index
    %1221 = vector.load %arg11[%c0_488, %c0_489] : memref<2x32xf32, #tpu.memory_space<vmem>>, vector<2x32xf32>
    %c0_490 = arith.constant 0 : index
    %c0_491 = arith.constant 0 : index
    %1222 = vector.load %arg12[%c0_490, %c0_491] : memref<2x32xf32, #tpu.memory_space<vmem>>, vector<2x32xf32>
    %1223 = tpu.concatenate %1219, %1221 in 1 : vector<2x32xf32>, vector<2x32xf32> -> vector<2x64xf32>
    %c0_492 = arith.constant 0 : index
    %c0_493 = arith.constant 0 : index
    %1224 = vector.load %arg2[%c0_492, %c0_493] : memref<64x256xf32, #tpu.memory_space<vmem>>, vector<64x256xf32>
    %cst_494 = arith.constant dense<0.000000e+00> : vector<2x256xf32>
    %1225 = tpu.matmul %1223, %1224, %cst_494 {dimension_numbers = #tpu.dot_dimension_numbers<[1], [0], [0], [1], [0, 0, 1, 1], [], []>} : vector<2x64xf32>, vector<64x256xf32>, vector<2x256xf32> -> vector<2x256xf32>
    %1226 = arith.index_cast %c10_i32 : i32 to index
    %c0_495 = arith.constant 0 : index
    %c0_496 = arith.constant 0 : index
    %1227 = vector.load %arg8[%1226, %c0_495, %c0_496] : memref<16x2x256xf32, #tpu.memory_space<vmem>>, vector<1x2x256xf32>
    %1228 = vector.shape_cast %1227 : vector<1x2x256xf32> to vector<2x256xf32>
    %1229 = vector.extract_strided_slice %1228 {offsets = [0, 0], sizes = [2, 128], strides = [1, 1]} : vector<2x256xf32> to vector<2x128xf32>
    %1230 = vector.extract_strided_slice %1225 {offsets = [0, 0], sizes = [2, 128], strides = [1, 1]} : vector<2x256xf32> to vector<2x128xf32>
    %1231 = arith.addf %1229, %1230 : vector<2x128xf32>
    %1232 = arith.index_cast %1218 : i32 to index
    %c0_497 = arith.constant 0 : index
    %c0_498 = arith.constant 0 : index
    %1233 = vector.load %arg8[%1232, %c0_497, %c0_498] : memref<16x2x256xf32, #tpu.memory_space<vmem>>, vector<1x2x256xf32>
    %1234 = vector.shape_cast %1233 : vector<1x2x256xf32> to vector<2x256xf32>
    %1235 = vector.extract_strided_slice %1234 {offsets = [0, 128], sizes = [2, 128], strides = [1, 1]} : vector<2x256xf32> to vector<2x128xf32>
    %1236 = vector.extract_strided_slice %1225 {offsets = [0, 128], sizes = [2, 128], strides = [1, 1]} : vector<2x256xf32> to vector<2x128xf32>
    %1237 = arith.addf %1235, %1236 : vector<2x128xf32>
    %1238 = vector.extract_strided_slice %1231 {offsets = [0, 0], sizes = [2, 32], strides = [1, 1]} : vector<2x128xf32> to vector<2x32xf32>
    %1239 = arith.negf %1238 : vector<2x32xf32>
    %1240 = math.exp %1239 : vector<2x32xf32>
    %cst_499 = arith.constant 1.000000e+00 : f32
    %1241 = vector.broadcast %cst_499 : f32 to vector<2x32xf32>
    %1242 = arith.addf %1241, %1240 : vector<2x32xf32>
    %1243 = arith.divf %1241, %1242 : vector<2x32xf32>
    %1244 = vector.extract_strided_slice %1231 {offsets = [0, 32], sizes = [2, 32], strides = [1, 1]} : vector<2x128xf32> to vector<2x32xf32>
    %1245 = arith.negf %1244 : vector<2x32xf32>
    %1246 = math.exp %1245 : vector<2x32xf32>
    %cst_500 = arith.constant 1.000000e+00 : f32
    %1247 = vector.broadcast %cst_500 : f32 to vector<2x32xf32>
    %1248 = arith.addf %1247, %1246 : vector<2x32xf32>
    %1249 = arith.divf %1247, %1248 : vector<2x32xf32>
    %1250 = vector.extract_strided_slice %1231 {offsets = [0, 64], sizes = [2, 32], strides = [1, 1]} : vector<2x128xf32> to vector<2x32xf32>
    %1251 = math.tanh %1250 : vector<2x32xf32>
    %1252 = vector.extract_strided_slice %1231 {offsets = [0, 96], sizes = [2, 32], strides = [1, 1]} : vector<2x128xf32> to vector<2x32xf32>
    %1253 = arith.negf %1252 : vector<2x32xf32>
    %1254 = math.exp %1253 : vector<2x32xf32>
    %cst_501 = arith.constant 1.000000e+00 : f32
    %1255 = vector.broadcast %cst_501 : f32 to vector<2x32xf32>
    %1256 = arith.addf %1255, %1254 : vector<2x32xf32>
    %1257 = arith.divf %1255, %1256 : vector<2x32xf32>
    %1258 = arith.mulf %1249, %1220 : vector<2x32xf32>
    %1259 = arith.mulf %1243, %1251 : vector<2x32xf32>
    %1260 = arith.addf %1258, %1259 : vector<2x32xf32>
    %1261 = math.tanh %1260 : vector<2x32xf32>
    %1262 = arith.mulf %1257, %1261 : vector<2x32xf32>
    %1263 = vector.extract_strided_slice %1237 {offsets = [0, 0], sizes = [2, 32], strides = [1, 1]} : vector<2x128xf32> to vector<2x32xf32>
    %1264 = arith.negf %1263 : vector<2x32xf32>
    %1265 = math.exp %1264 : vector<2x32xf32>
    %cst_502 = arith.constant 1.000000e+00 : f32
    %1266 = vector.broadcast %cst_502 : f32 to vector<2x32xf32>
    %1267 = arith.addf %1266, %1265 : vector<2x32xf32>
    %1268 = arith.divf %1266, %1267 : vector<2x32xf32>
    %1269 = vector.extract_strided_slice %1237 {offsets = [0, 32], sizes = [2, 32], strides = [1, 1]} : vector<2x128xf32> to vector<2x32xf32>
    %1270 = arith.negf %1269 : vector<2x32xf32>
    %1271 = math.exp %1270 : vector<2x32xf32>
    %cst_503 = arith.constant 1.000000e+00 : f32
    %1272 = vector.broadcast %cst_503 : f32 to vector<2x32xf32>
    %1273 = arith.addf %1272, %1271 : vector<2x32xf32>
    %1274 = arith.divf %1272, %1273 : vector<2x32xf32>
    %1275 = vector.extract_strided_slice %1237 {offsets = [0, 64], sizes = [2, 32], strides = [1, 1]} : vector<2x128xf32> to vector<2x32xf32>
    %1276 = math.tanh %1275 : vector<2x32xf32>
    %1277 = vector.extract_strided_slice %1237 {offsets = [0, 96], sizes = [2, 32], strides = [1, 1]} : vector<2x128xf32> to vector<2x32xf32>
    %1278 = arith.negf %1277 : vector<2x32xf32>
    %1279 = math.exp %1278 : vector<2x32xf32>
    %cst_504 = arith.constant 1.000000e+00 : f32
    %1280 = vector.broadcast %cst_504 : f32 to vector<2x32xf32>
    %1281 = arith.addf %1280, %1279 : vector<2x32xf32>
    %1282 = arith.divf %1280, %1281 : vector<2x32xf32>
    %1283 = arith.mulf %1274, %1222 : vector<2x32xf32>
    %1284 = arith.mulf %1268, %1276 : vector<2x32xf32>
    %1285 = arith.addf %1283, %1284 : vector<2x32xf32>
    %1286 = math.tanh %1285 : vector<2x32xf32>
    %1287 = arith.mulf %1282, %1286 : vector<2x32xf32>
    %1288 = arith.index_cast %c10_i32 : i32 to index
    %c0_505 = arith.constant 0 : index
    %c0_506 = arith.constant 0 : index
    %1289 = vector.load %arg4[%1288, %c0_505, %c0_506] : memref<16x2x1xf32, #tpu.memory_space<vmem>>, vector<1x2x1xf32>
    %1290 = vector.shape_cast %1289 : vector<1x2x1xf32> to vector<2x1xf32>
    %cst_507 = arith.constant 0.000000e+00 : f32
    %1291 = vector.broadcast %cst_507 : f32 to vector<2x1xf32>
    %1292 = arith.cmpf ogt, %1290, %1291 : vector<2x1xf32>
    %1293 = arith.index_cast %1218 : i32 to index
    %c0_508 = arith.constant 0 : index
    %c0_509 = arith.constant 0 : index
    %1294 = vector.load %arg4[%1293, %c0_508, %c0_509] : memref<16x2x1xf32, #tpu.memory_space<vmem>>, vector<1x2x1xf32>
    %1295 = vector.shape_cast %1294 : vector<1x2x1xf32> to vector<2x1xf32>
    %cst_510 = arith.constant 0.000000e+00 : f32
    %1296 = vector.broadcast %cst_510 : f32 to vector<2x1xf32>
    %1297 = arith.cmpf ogt, %1295, %1296 : vector<2x1xf32>
    %1298 = vector.shape_cast %1292 : vector<2x1xi1> to vector<2x1xi1>
    %1299 = vector.broadcast %1298 : vector<2x1xi1> to vector<2x32xi1>
    %1300 = arith.select %1299, %1262, %1219 : vector<2x32xi1>, vector<2x32xf32>
    %c0_511 = arith.constant 0 : index
    %c0_512 = arith.constant 0 : index
    %1301 = vector.load %arg9[%c0_511, %c0_512] : memref<2x32xf32, #tpu.memory_space<vmem>>, vector<2x32xf32>
    tpu.vector_store %arg9[%c0_511, %c0_512], %1300 {strides = array<i32>} : memref<2x32xf32, #tpu.memory_space<vmem>>, vector<2x32xf32>,
    %1302 = vector.shape_cast %1292 : vector<2x1xi1> to vector<2x1xi1>
    %1303 = vector.broadcast %1302 : vector<2x1xi1> to vector<2x32xi1>
    %1304 = arith.select %1303, %1260, %1220 : vector<2x32xi1>, vector<2x32xf32>
    %c0_513 = arith.constant 0 : index
    %c0_514 = arith.constant 0 : index
    %1305 = vector.load %arg10[%c0_513, %c0_514] : memref<2x32xf32, #tpu.memory_space<vmem>>, vector<2x32xf32>
    tpu.vector_store %arg10[%c0_513, %c0_514], %1304 {strides = array<i32>} : memref<2x32xf32, #tpu.memory_space<vmem>>, vector<2x32xf32>,
    %1306 = vector.shape_cast %1297 : vector<2x1xi1> to vector<2x1xi1>
    %1307 = vector.broadcast %1306 : vector<2x1xi1> to vector<2x32xi1>
    %1308 = arith.select %1307, %1287, %1221 : vector<2x32xi1>, vector<2x32xf32>
    %c0_515 = arith.constant 0 : index
    %c0_516 = arith.constant 0 : index
    %1309 = vector.load %arg11[%c0_515, %c0_516] : memref<2x32xf32, #tpu.memory_space<vmem>>, vector<2x32xf32>
    tpu.vector_store %arg11[%c0_515, %c0_516], %1308 {strides = array<i32>} : memref<2x32xf32, #tpu.memory_space<vmem>>, vector<2x32xf32>,
    %1310 = vector.shape_cast %1297 : vector<2x1xi1> to vector<2x1xi1>
    %1311 = vector.broadcast %1310 : vector<2x1xi1> to vector<2x32xi1>
    %1312 = arith.select %1311, %1285, %1222 : vector<2x32xi1>, vector<2x32xf32>
    %c0_517 = arith.constant 0 : index
    %c0_518 = arith.constant 0 : index
    %1313 = vector.load %arg12[%c0_517, %c0_518] : memref<2x32xf32, #tpu.memory_space<vmem>>, vector<2x32xf32>
    tpu.vector_store %arg12[%c0_517, %c0_518], %1312 {strides = array<i32>} : memref<2x32xf32, #tpu.memory_space<vmem>>, vector<2x32xf32>,
    %1314 = arith.index_cast %c10_i32 : i32 to index
    %c0_519 = arith.constant 0 : index
    %c0_520 = arith.constant 0 : index
    %1315 = vector.load %arg5[%1314, %c0_519, %c0_520] : memref<16x2x32xf32, #tpu.memory_space<vmem>>, vector<1x2x32xf32>
    %1316 = vector.shape_cast %1315 : vector<1x2x32xf32> to vector<2x32xf32>
    %cst_521 = arith.constant 0.000000e+00 : f32
    %1317 = vector.shape_cast %1292 : vector<2x1xi1> to vector<2x1xi1>
    %1318 = vector.broadcast %1317 : vector<2x1xi1> to vector<2x32xi1>
    %1319 = vector.broadcast %cst_521 : f32 to vector<2x32xf32>
    %1320 = arith.select %1318, %1262, %1319 : vector<2x32xi1>, vector<2x32xf32>
    %1321 = arith.addf %1316, %1320 : vector<2x32xf32>
    %1322 = arith.index_cast %c10_i32 : i32 to index
    %c0_522 = arith.constant 0 : index
    %c0_523 = arith.constant 0 : index
    %1323 = vector.load %arg5[%1322, %c0_522, %c0_523] : memref<16x2x32xf32, #tpu.memory_space<vmem>>, vector<1x2x32xf32>
    %1324 = vector.shape_cast %1323 : vector<1x2x32xf32> to vector<2x32xf32>
    %1325 = vector.shape_cast %1321 : vector<2x32xf32> to vector<1x2x32xf32>
    tpu.vector_store %arg5[%1322, %c0_522, %c0_523], %1325 {strides = array<i32>} : memref<16x2x32xf32, #tpu.memory_space<vmem>>, vector<1x2x32xf32>,
    %1326 = arith.index_cast %1218 : i32 to index
    %c0_524 = arith.constant 0 : index
    %c0_525 = arith.constant 0 : index
    %1327 = vector.load %arg5[%1326, %c0_524, %c0_525] : memref<16x2x32xf32, #tpu.memory_space<vmem>>, vector<1x2x32xf32>
    %1328 = vector.shape_cast %1327 : vector<1x2x32xf32> to vector<2x32xf32>
    %cst_526 = arith.constant 0.000000e+00 : f32
    %1329 = vector.shape_cast %1297 : vector<2x1xi1> to vector<2x1xi1>
    %1330 = vector.broadcast %1329 : vector<2x1xi1> to vector<2x32xi1>
    %1331 = vector.broadcast %cst_526 : f32 to vector<2x32xf32>
    %1332 = arith.select %1330, %1287, %1331 : vector<2x32xi1>, vector<2x32xf32>
    %1333 = arith.addf %1328, %1332 : vector<2x32xf32>
    %1334 = arith.index_cast %1218 : i32 to index
    %c0_527 = arith.constant 0 : index
    %c0_528 = arith.constant 0 : index
    %1335 = vector.load %arg5[%1334, %c0_527, %c0_528] : memref<16x2x32xf32, #tpu.memory_space<vmem>>, vector<1x2x32xf32>
    %1336 = vector.shape_cast %1335 : vector<1x2x32xf32> to vector<2x32xf32>
    %1337 = vector.shape_cast %1333 : vector<2x32xf32> to vector<1x2x32xf32>
    tpu.vector_store %arg5[%1334, %c0_527, %c0_528], %1337 {strides = array<i32>} : memref<16x2x32xf32, #tpu.memory_space<vmem>>, vector<1x2x32xf32>,
    %c11_i32 = arith.constant 11 : i32
    %c15_i32_529 = arith.constant 15 : i32
    %1338 = arith.subi %c15_i32_529, %c11_i32 : i32
    %c0_530 = arith.constant 0 : index
    %c0_531 = arith.constant 0 : index
    %1339 = vector.load %arg9[%c0_530, %c0_531] : memref<2x32xf32, #tpu.memory_space<vmem>>, vector<2x32xf32>
    %c0_532 = arith.constant 0 : index
    %c0_533 = arith.constant 0 : index
    %1340 = vector.load %arg10[%c0_532, %c0_533] : memref<2x32xf32, #tpu.memory_space<vmem>>, vector<2x32xf32>
    %c0_534 = arith.constant 0 : index
    %c0_535 = arith.constant 0 : index
    %1341 = vector.load %arg11[%c0_534, %c0_535] : memref<2x32xf32, #tpu.memory_space<vmem>>, vector<2x32xf32>
    %c0_536 = arith.constant 0 : index
    %c0_537 = arith.constant 0 : index
    %1342 = vector.load %arg12[%c0_536, %c0_537] : memref<2x32xf32, #tpu.memory_space<vmem>>, vector<2x32xf32>
    %1343 = tpu.concatenate %1339, %1341 in 1 : vector<2x32xf32>, vector<2x32xf32> -> vector<2x64xf32>
    %c0_538 = arith.constant 0 : index
    %c0_539 = arith.constant 0 : index
    %1344 = vector.load %arg2[%c0_538, %c0_539] : memref<64x256xf32, #tpu.memory_space<vmem>>, vector<64x256xf32>
    %cst_540 = arith.constant dense<0.000000e+00> : vector<2x256xf32>
    %1345 = tpu.matmul %1343, %1344, %cst_540 {dimension_numbers = #tpu.dot_dimension_numbers<[1], [0], [0], [1], [0, 0, 1, 1], [], []>} : vector<2x64xf32>, vector<64x256xf32>, vector<2x256xf32> -> vector<2x256xf32>
    %1346 = arith.index_cast %c11_i32 : i32 to index
    %c0_541 = arith.constant 0 : index
    %c0_542 = arith.constant 0 : index
    %1347 = vector.load %arg8[%1346, %c0_541, %c0_542] : memref<16x2x256xf32, #tpu.memory_space<vmem>>, vector<1x2x256xf32>
    %1348 = vector.shape_cast %1347 : vector<1x2x256xf32> to vector<2x256xf32>
    %1349 = vector.extract_strided_slice %1348 {offsets = [0, 0], sizes = [2, 128], strides = [1, 1]} : vector<2x256xf32> to vector<2x128xf32>
    %1350 = vector.extract_strided_slice %1345 {offsets = [0, 0], sizes = [2, 128], strides = [1, 1]} : vector<2x256xf32> to vector<2x128xf32>
    %1351 = arith.addf %1349, %1350 : vector<2x128xf32>
    %1352 = arith.index_cast %1338 : i32 to index
    %c0_543 = arith.constant 0 : index
    %c0_544 = arith.constant 0 : index
    %1353 = vector.load %arg8[%1352, %c0_543, %c0_544] : memref<16x2x256xf32, #tpu.memory_space<vmem>>, vector<1x2x256xf32>
    %1354 = vector.shape_cast %1353 : vector<1x2x256xf32> to vector<2x256xf32>
    %1355 = vector.extract_strided_slice %1354 {offsets = [0, 128], sizes = [2, 128], strides = [1, 1]} : vector<2x256xf32> to vector<2x128xf32>
    %1356 = vector.extract_strided_slice %1345 {offsets = [0, 128], sizes = [2, 128], strides = [1, 1]} : vector<2x256xf32> to vector<2x128xf32>
    %1357 = arith.addf %1355, %1356 : vector<2x128xf32>
    %1358 = vector.extract_strided_slice %1351 {offsets = [0, 0], sizes = [2, 32], strides = [1, 1]} : vector<2x128xf32> to vector<2x32xf32>
    %1359 = arith.negf %1358 : vector<2x32xf32>
    %1360 = math.exp %1359 : vector<2x32xf32>
    %cst_545 = arith.constant 1.000000e+00 : f32
    %1361 = vector.broadcast %cst_545 : f32 to vector<2x32xf32>
    %1362 = arith.addf %1361, %1360 : vector<2x32xf32>
    %1363 = arith.divf %1361, %1362 : vector<2x32xf32>
    %1364 = vector.extract_strided_slice %1351 {offsets = [0, 32], sizes = [2, 32], strides = [1, 1]} : vector<2x128xf32> to vector<2x32xf32>
    %1365 = arith.negf %1364 : vector<2x32xf32>
    %1366 = math.exp %1365 : vector<2x32xf32>
    %cst_546 = arith.constant 1.000000e+00 : f32
    %1367 = vector.broadcast %cst_546 : f32 to vector<2x32xf32>
    %1368 = arith.addf %1367, %1366 : vector<2x32xf32>
    %1369 = arith.divf %1367, %1368 : vector<2x32xf32>
    %1370 = vector.extract_strided_slice %1351 {offsets = [0, 64], sizes = [2, 32], strides = [1, 1]} : vector<2x128xf32> to vector<2x32xf32>
    %1371 = math.tanh %1370 : vector<2x32xf32>
    %1372 = vector.extract_strided_slice %1351 {offsets = [0, 96], sizes = [2, 32], strides = [1, 1]} : vector<2x128xf32> to vector<2x32xf32>
    %1373 = arith.negf %1372 : vector<2x32xf32>
    %1374 = math.exp %1373 : vector<2x32xf32>
    %cst_547 = arith.constant 1.000000e+00 : f32
    %1375 = vector.broadcast %cst_547 : f32 to vector<2x32xf32>
    %1376 = arith.addf %1375, %1374 : vector<2x32xf32>
    %1377 = arith.divf %1375, %1376 : vector<2x32xf32>
    %1378 = arith.mulf %1369, %1340 : vector<2x32xf32>
    %1379 = arith.mulf %1363, %1371 : vector<2x32xf32>
    %1380 = arith.addf %1378, %1379 : vector<2x32xf32>
    %1381 = math.tanh %1380 : vector<2x32xf32>
    %1382 = arith.mulf %1377, %1381 : vector<2x32xf32>
    %1383 = vector.extract_strided_slice %1357 {offsets = [0, 0], sizes = [2, 32], strides = [1, 1]} : vector<2x128xf32> to vector<2x32xf32>
    %1384 = arith.negf %1383 : vector<2x32xf32>
    %1385 = math.exp %1384 : vector<2x32xf32>
    %cst_548 = arith.constant 1.000000e+00 : f32
    %1386 = vector.broadcast %cst_548 : f32 to vector<2x32xf32>
    %1387 = arith.addf %1386, %1385 : vector<2x32xf32>
    %1388 = arith.divf %1386, %1387 : vector<2x32xf32>
    %1389 = vector.extract_strided_slice %1357 {offsets = [0, 32], sizes = [2, 32], strides = [1, 1]} : vector<2x128xf32> to vector<2x32xf32>
    %1390 = arith.negf %1389 : vector<2x32xf32>
    %1391 = math.exp %1390 : vector<2x32xf32>
    %cst_549 = arith.constant 1.000000e+00 : f32
    %1392 = vector.broadcast %cst_549 : f32 to vector<2x32xf32>
    %1393 = arith.addf %1392, %1391 : vector<2x32xf32>
    %1394 = arith.divf %1392, %1393 : vector<2x32xf32>
    %1395 = vector.extract_strided_slice %1357 {offsets = [0, 64], sizes = [2, 32], strides = [1, 1]} : vector<2x128xf32> to vector<2x32xf32>
    %1396 = math.tanh %1395 : vector<2x32xf32>
    %1397 = vector.extract_strided_slice %1357 {offsets = [0, 96], sizes = [2, 32], strides = [1, 1]} : vector<2x128xf32> to vector<2x32xf32>
    %1398 = arith.negf %1397 : vector<2x32xf32>
    %1399 = math.exp %1398 : vector<2x32xf32>
    %cst_550 = arith.constant 1.000000e+00 : f32
    %1400 = vector.broadcast %cst_550 : f32 to vector<2x32xf32>
    %1401 = arith.addf %1400, %1399 : vector<2x32xf32>
    %1402 = arith.divf %1400, %1401 : vector<2x32xf32>
    %1403 = arith.mulf %1394, %1342 : vector<2x32xf32>
    %1404 = arith.mulf %1388, %1396 : vector<2x32xf32>
    %1405 = arith.addf %1403, %1404 : vector<2x32xf32>
    %1406 = math.tanh %1405 : vector<2x32xf32>
    %1407 = arith.mulf %1402, %1406 : vector<2x32xf32>
    %1408 = arith.index_cast %c11_i32 : i32 to index
    %c0_551 = arith.constant 0 : index
    %c0_552 = arith.constant 0 : index
    %1409 = vector.load %arg4[%1408, %c0_551, %c0_552] : memref<16x2x1xf32, #tpu.memory_space<vmem>>, vector<1x2x1xf32>
    %1410 = vector.shape_cast %1409 : vector<1x2x1xf32> to vector<2x1xf32>
    %cst_553 = arith.constant 0.000000e+00 : f32
    %1411 = vector.broadcast %cst_553 : f32 to vector<2x1xf32>
    %1412 = arith.cmpf ogt, %1410, %1411 : vector<2x1xf32>
    %1413 = arith.index_cast %1338 : i32 to index
    %c0_554 = arith.constant 0 : index
    %c0_555 = arith.constant 0 : index
    %1414 = vector.load %arg4[%1413, %c0_554, %c0_555] : memref<16x2x1xf32, #tpu.memory_space<vmem>>, vector<1x2x1xf32>
    %1415 = vector.shape_cast %1414 : vector<1x2x1xf32> to vector<2x1xf32>
    %cst_556 = arith.constant 0.000000e+00 : f32
    %1416 = vector.broadcast %cst_556 : f32 to vector<2x1xf32>
    %1417 = arith.cmpf ogt, %1415, %1416 : vector<2x1xf32>
    %1418 = vector.shape_cast %1412 : vector<2x1xi1> to vector<2x1xi1>
    %1419 = vector.broadcast %1418 : vector<2x1xi1> to vector<2x32xi1>
    %1420 = arith.select %1419, %1382, %1339 : vector<2x32xi1>, vector<2x32xf32>
    %c0_557 = arith.constant 0 : index
    %c0_558 = arith.constant 0 : index
    %1421 = vector.load %arg9[%c0_557, %c0_558] : memref<2x32xf32, #tpu.memory_space<vmem>>, vector<2x32xf32>
    tpu.vector_store %arg9[%c0_557, %c0_558], %1420 {strides = array<i32>} : memref<2x32xf32, #tpu.memory_space<vmem>>, vector<2x32xf32>,
    %1422 = vector.shape_cast %1412 : vector<2x1xi1> to vector<2x1xi1>
    %1423 = vector.broadcast %1422 : vector<2x1xi1> to vector<2x32xi1>
    %1424 = arith.select %1423, %1380, %1340 : vector<2x32xi1>, vector<2x32xf32>
    %c0_559 = arith.constant 0 : index
    %c0_560 = arith.constant 0 : index
    %1425 = vector.load %arg10[%c0_559, %c0_560] : memref<2x32xf32, #tpu.memory_space<vmem>>, vector<2x32xf32>
    tpu.vector_store %arg10[%c0_559, %c0_560], %1424 {strides = array<i32>} : memref<2x32xf32, #tpu.memory_space<vmem>>, vector<2x32xf32>,
    %1426 = vector.shape_cast %1417 : vector<2x1xi1> to vector<2x1xi1>
    %1427 = vector.broadcast %1426 : vector<2x1xi1> to vector<2x32xi1>
    %1428 = arith.select %1427, %1407, %1341 : vector<2x32xi1>, vector<2x32xf32>
    %c0_561 = arith.constant 0 : index
    %c0_562 = arith.constant 0 : index
    %1429 = vector.load %arg11[%c0_561, %c0_562] : memref<2x32xf32, #tpu.memory_space<vmem>>, vector<2x32xf32>
    tpu.vector_store %arg11[%c0_561, %c0_562], %1428 {strides = array<i32>} : memref<2x32xf32, #tpu.memory_space<vmem>>, vector<2x32xf32>,
    %1430 = vector.shape_cast %1417 : vector<2x1xi1> to vector<2x1xi1>
    %1431 = vector.broadcast %1430 : vector<2x1xi1> to vector<2x32xi1>
    %1432 = arith.select %1431, %1405, %1342 : vector<2x32xi1>, vector<2x32xf32>
    %c0_563 = arith.constant 0 : index
    %c0_564 = arith.constant 0 : index
    %1433 = vector.load %arg12[%c0_563, %c0_564] : memref<2x32xf32, #tpu.memory_space<vmem>>, vector<2x32xf32>
    tpu.vector_store %arg12[%c0_563, %c0_564], %1432 {strides = array<i32>} : memref<2x32xf32, #tpu.memory_space<vmem>>, vector<2x32xf32>,
    %1434 = arith.index_cast %c11_i32 : i32 to index
    %c0_565 = arith.constant 0 : index
    %c0_566 = arith.constant 0 : index
    %1435 = vector.load %arg5[%1434, %c0_565, %c0_566] : memref<16x2x32xf32, #tpu.memory_space<vmem>>, vector<1x2x32xf32>
    %1436 = vector.shape_cast %1435 : vector<1x2x32xf32> to vector<2x32xf32>
    %cst_567 = arith.constant 0.000000e+00 : f32
    %1437 = vector.shape_cast %1412 : vector<2x1xi1> to vector<2x1xi1>
    %1438 = vector.broadcast %1437 : vector<2x1xi1> to vector<2x32xi1>
    %1439 = vector.broadcast %cst_567 : f32 to vector<2x32xf32>
    %1440 = arith.select %1438, %1382, %1439 : vector<2x32xi1>, vector<2x32xf32>
    %1441 = arith.addf %1436, %1440 : vector<2x32xf32>
    %1442 = arith.index_cast %c11_i32 : i32 to index
    %c0_568 = arith.constant 0 : index
    %c0_569 = arith.constant 0 : index
    %1443 = vector.load %arg5[%1442, %c0_568, %c0_569] : memref<16x2x32xf32, #tpu.memory_space<vmem>>, vector<1x2x32xf32>
    %1444 = vector.shape_cast %1443 : vector<1x2x32xf32> to vector<2x32xf32>
    %1445 = vector.shape_cast %1441 : vector<2x32xf32> to vector<1x2x32xf32>
    tpu.vector_store %arg5[%1442, %c0_568, %c0_569], %1445 {strides = array<i32>} : memref<16x2x32xf32, #tpu.memory_space<vmem>>, vector<1x2x32xf32>,
    %1446 = arith.index_cast %1338 : i32 to index
    %c0_570 = arith.constant 0 : index
    %c0_571 = arith.constant 0 : index
    %1447 = vector.load %arg5[%1446, %c0_570, %c0_571] : memref<16x2x32xf32, #tpu.memory_space<vmem>>, vector<1x2x32xf32>
    %1448 = vector.shape_cast %1447 : vector<1x2x32xf32> to vector<2x32xf32>
    %cst_572 = arith.constant 0.000000e+00 : f32
    %1449 = vector.shape_cast %1417 : vector<2x1xi1> to vector<2x1xi1>
    %1450 = vector.broadcast %1449 : vector<2x1xi1> to vector<2x32xi1>
    %1451 = vector.broadcast %cst_572 : f32 to vector<2x32xf32>
    %1452 = arith.select %1450, %1407, %1451 : vector<2x32xi1>, vector<2x32xf32>
    %1453 = arith.addf %1448, %1452 : vector<2x32xf32>
    %1454 = arith.index_cast %1338 : i32 to index
    %c0_573 = arith.constant 0 : index
    %c0_574 = arith.constant 0 : index
    %1455 = vector.load %arg5[%1454, %c0_573, %c0_574] : memref<16x2x32xf32, #tpu.memory_space<vmem>>, vector<1x2x32xf32>
    %1456 = vector.shape_cast %1455 : vector<1x2x32xf32> to vector<2x32xf32>
    %1457 = vector.shape_cast %1453 : vector<2x32xf32> to vector<1x2x32xf32>
    tpu.vector_store %arg5[%1454, %c0_573, %c0_574], %1457 {strides = array<i32>} : memref<16x2x32xf32, #tpu.memory_space<vmem>>, vector<1x2x32xf32>,
    %c12_i32 = arith.constant 12 : i32
    %c15_i32_575 = arith.constant 15 : i32
    %1458 = arith.subi %c15_i32_575, %c12_i32 : i32
    %c0_576 = arith.constant 0 : index
    %c0_577 = arith.constant 0 : index
    %1459 = vector.load %arg9[%c0_576, %c0_577] : memref<2x32xf32, #tpu.memory_space<vmem>>, vector<2x32xf32>
    %c0_578 = arith.constant 0 : index
    %c0_579 = arith.constant 0 : index
    %1460 = vector.load %arg10[%c0_578, %c0_579] : memref<2x32xf32, #tpu.memory_space<vmem>>, vector<2x32xf32>
    %c0_580 = arith.constant 0 : index
    %c0_581 = arith.constant 0 : index
    %1461 = vector.load %arg11[%c0_580, %c0_581] : memref<2x32xf32, #tpu.memory_space<vmem>>, vector<2x32xf32>
    %c0_582 = arith.constant 0 : index
    %c0_583 = arith.constant 0 : index
    %1462 = vector.load %arg12[%c0_582, %c0_583] : memref<2x32xf32, #tpu.memory_space<vmem>>, vector<2x32xf32>
    %1463 = tpu.concatenate %1459, %1461 in 1 : vector<2x32xf32>, vector<2x32xf32> -> vector<2x64xf32>
    %c0_584 = arith.constant 0 : index
    %c0_585 = arith.constant 0 : index
    %1464 = vector.load %arg2[%c0_584, %c0_585] : memref<64x256xf32, #tpu.memory_space<vmem>>, vector<64x256xf32>
    %cst_586 = arith.constant dense<0.000000e+00> : vector<2x256xf32>
    %1465 = tpu.matmul %1463, %1464, %cst_586 {dimension_numbers = #tpu.dot_dimension_numbers<[1], [0], [0], [1], [0, 0, 1, 1], [], []>} : vector<2x64xf32>, vector<64x256xf32>, vector<2x256xf32> -> vector<2x256xf32>
    %1466 = arith.index_cast %c12_i32 : i32 to index
    %c0_587 = arith.constant 0 : index
    %c0_588 = arith.constant 0 : index
    %1467 = vector.load %arg8[%1466, %c0_587, %c0_588] : memref<16x2x256xf32, #tpu.memory_space<vmem>>, vector<1x2x256xf32>
    %1468 = vector.shape_cast %1467 : vector<1x2x256xf32> to vector<2x256xf32>
    %1469 = vector.extract_strided_slice %1468 {offsets = [0, 0], sizes = [2, 128], strides = [1, 1]} : vector<2x256xf32> to vector<2x128xf32>
    %1470 = vector.extract_strided_slice %1465 {offsets = [0, 0], sizes = [2, 128], strides = [1, 1]} : vector<2x256xf32> to vector<2x128xf32>
    %1471 = arith.addf %1469, %1470 : vector<2x128xf32>
    %1472 = arith.index_cast %1458 : i32 to index
    %c0_589 = arith.constant 0 : index
    %c0_590 = arith.constant 0 : index
    %1473 = vector.load %arg8[%1472, %c0_589, %c0_590] : memref<16x2x256xf32, #tpu.memory_space<vmem>>, vector<1x2x256xf32>
    %1474 = vector.shape_cast %1473 : vector<1x2x256xf32> to vector<2x256xf32>
    %1475 = vector.extract_strided_slice %1474 {offsets = [0, 128], sizes = [2, 128], strides = [1, 1]} : vector<2x256xf32> to vector<2x128xf32>
    %1476 = vector.extract_strided_slice %1465 {offsets = [0, 128], sizes = [2, 128], strides = [1, 1]} : vector<2x256xf32> to vector<2x128xf32>
    %1477 = arith.addf %1475, %1476 : vector<2x128xf32>
    %1478 = vector.extract_strided_slice %1471 {offsets = [0, 0], sizes = [2, 32], strides = [1, 1]} : vector<2x128xf32> to vector<2x32xf32>
    %1479 = arith.negf %1478 : vector<2x32xf32>
    %1480 = math.exp %1479 : vector<2x32xf32>
    %cst_591 = arith.constant 1.000000e+00 : f32
    %1481 = vector.broadcast %cst_591 : f32 to vector<2x32xf32>
    %1482 = arith.addf %1481, %1480 : vector<2x32xf32>
    %1483 = arith.divf %1481, %1482 : vector<2x32xf32>
    %1484 = vector.extract_strided_slice %1471 {offsets = [0, 32], sizes = [2, 32], strides = [1, 1]} : vector<2x128xf32> to vector<2x32xf32>
    %1485 = arith.negf %1484 : vector<2x32xf32>
    %1486 = math.exp %1485 : vector<2x32xf32>
    %cst_592 = arith.constant 1.000000e+00 : f32
    %1487 = vector.broadcast %cst_592 : f32 to vector<2x32xf32>
    %1488 = arith.addf %1487, %1486 : vector<2x32xf32>
    %1489 = arith.divf %1487, %1488 : vector<2x32xf32>
    %1490 = vector.extract_strided_slice %1471 {offsets = [0, 64], sizes = [2, 32], strides = [1, 1]} : vector<2x128xf32> to vector<2x32xf32>
    %1491 = math.tanh %1490 : vector<2x32xf32>
    %1492 = vector.extract_strided_slice %1471 {offsets = [0, 96], sizes = [2, 32], strides = [1, 1]} : vector<2x128xf32> to vector<2x32xf32>
    %1493 = arith.negf %1492 : vector<2x32xf32>
    %1494 = math.exp %1493 : vector<2x32xf32>
    %cst_593 = arith.constant 1.000000e+00 : f32
    %1495 = vector.broadcast %cst_593 : f32 to vector<2x32xf32>
    %1496 = arith.addf %1495, %1494 : vector<2x32xf32>
    %1497 = arith.divf %1495, %1496 : vector<2x32xf32>
    %1498 = arith.mulf %1489, %1460 : vector<2x32xf32>
    %1499 = arith.mulf %1483, %1491 : vector<2x32xf32>
    %1500 = arith.addf %1498, %1499 : vector<2x32xf32>
    %1501 = math.tanh %1500 : vector<2x32xf32>
    %1502 = arith.mulf %1497, %1501 : vector<2x32xf32>
    %1503 = vector.extract_strided_slice %1477 {offsets = [0, 0], sizes = [2, 32], strides = [1, 1]} : vector<2x128xf32> to vector<2x32xf32>
    %1504 = arith.negf %1503 : vector<2x32xf32>
    %1505 = math.exp %1504 : vector<2x32xf32>
    %cst_594 = arith.constant 1.000000e+00 : f32
    %1506 = vector.broadcast %cst_594 : f32 to vector<2x32xf32>
    %1507 = arith.addf %1506, %1505 : vector<2x32xf32>
    %1508 = arith.divf %1506, %1507 : vector<2x32xf32>
    %1509 = vector.extract_strided_slice %1477 {offsets = [0, 32], sizes = [2, 32], strides = [1, 1]} : vector<2x128xf32> to vector<2x32xf32>
    %1510 = arith.negf %1509 : vector<2x32xf32>
    %1511 = math.exp %1510 : vector<2x32xf32>
    %cst_595 = arith.constant 1.000000e+00 : f32
    %1512 = vector.broadcast %cst_595 : f32 to vector<2x32xf32>
    %1513 = arith.addf %1512, %1511 : vector<2x32xf32>
    %1514 = arith.divf %1512, %1513 : vector<2x32xf32>
    %1515 = vector.extract_strided_slice %1477 {offsets = [0, 64], sizes = [2, 32], strides = [1, 1]} : vector<2x128xf32> to vector<2x32xf32>
    %1516 = math.tanh %1515 : vector<2x32xf32>
    %1517 = vector.extract_strided_slice %1477 {offsets = [0, 96], sizes = [2, 32], strides = [1, 1]} : vector<2x128xf32> to vector<2x32xf32>
    %1518 = arith.negf %1517 : vector<2x32xf32>
    %1519 = math.exp %1518 : vector<2x32xf32>
    %cst_596 = arith.constant 1.000000e+00 : f32
    %1520 = vector.broadcast %cst_596 : f32 to vector<2x32xf32>
    %1521 = arith.addf %1520, %1519 : vector<2x32xf32>
    %1522 = arith.divf %1520, %1521 : vector<2x32xf32>
    %1523 = arith.mulf %1514, %1462 : vector<2x32xf32>
    %1524 = arith.mulf %1508, %1516 : vector<2x32xf32>
    %1525 = arith.addf %1523, %1524 : vector<2x32xf32>
    %1526 = math.tanh %1525 : vector<2x32xf32>
    %1527 = arith.mulf %1522, %1526 : vector<2x32xf32>
    %1528 = arith.index_cast %c12_i32 : i32 to index
    %c0_597 = arith.constant 0 : index
    %c0_598 = arith.constant 0 : index
    %1529 = vector.load %arg4[%1528, %c0_597, %c0_598] : memref<16x2x1xf32, #tpu.memory_space<vmem>>, vector<1x2x1xf32>
    %1530 = vector.shape_cast %1529 : vector<1x2x1xf32> to vector<2x1xf32>
    %cst_599 = arith.constant 0.000000e+00 : f32
    %1531 = vector.broadcast %cst_599 : f32 to vector<2x1xf32>
    %1532 = arith.cmpf ogt, %1530, %1531 : vector<2x1xf32>
    %1533 = arith.index_cast %1458 : i32 to index
    %c0_600 = arith.constant 0 : index
    %c0_601 = arith.constant 0 : index
    %1534 = vector.load %arg4[%1533, %c0_600, %c0_601] : memref<16x2x1xf32, #tpu.memory_space<vmem>>, vector<1x2x1xf32>
    %1535 = vector.shape_cast %1534 : vector<1x2x1xf32> to vector<2x1xf32>
    %cst_602 = arith.constant 0.000000e+00 : f32
    %1536 = vector.broadcast %cst_602 : f32 to vector<2x1xf32>
    %1537 = arith.cmpf ogt, %1535, %1536 : vector<2x1xf32>
    %1538 = vector.shape_cast %1532 : vector<2x1xi1> to vector<2x1xi1>
    %1539 = vector.broadcast %1538 : vector<2x1xi1> to vector<2x32xi1>
    %1540 = arith.select %1539, %1502, %1459 : vector<2x32xi1>, vector<2x32xf32>
    %c0_603 = arith.constant 0 : index
    %c0_604 = arith.constant 0 : index
    %1541 = vector.load %arg9[%c0_603, %c0_604] : memref<2x32xf32, #tpu.memory_space<vmem>>, vector<2x32xf32>
    tpu.vector_store %arg9[%c0_603, %c0_604], %1540 {strides = array<i32>} : memref<2x32xf32, #tpu.memory_space<vmem>>, vector<2x32xf32>,
    %1542 = vector.shape_cast %1532 : vector<2x1xi1> to vector<2x1xi1>
    %1543 = vector.broadcast %1542 : vector<2x1xi1> to vector<2x32xi1>
    %1544 = arith.select %1543, %1500, %1460 : vector<2x32xi1>, vector<2x32xf32>
    %c0_605 = arith.constant 0 : index
    %c0_606 = arith.constant 0 : index
    %1545 = vector.load %arg10[%c0_605, %c0_606] : memref<2x32xf32, #tpu.memory_space<vmem>>, vector<2x32xf32>
    tpu.vector_store %arg10[%c0_605, %c0_606], %1544 {strides = array<i32>} : memref<2x32xf32, #tpu.memory_space<vmem>>, vector<2x32xf32>,
    %1546 = vector.shape_cast %1537 : vector<2x1xi1> to vector<2x1xi1>
    %1547 = vector.broadcast %1546 : vector<2x1xi1> to vector<2x32xi1>
    %1548 = arith.select %1547, %1527, %1461 : vector<2x32xi1>, vector<2x32xf32>
    %c0_607 = arith.constant 0 : index
    %c0_608 = arith.constant 0 : index
    %1549 = vector.load %arg11[%c0_607, %c0_608] : memref<2x32xf32, #tpu.memory_space<vmem>>, vector<2x32xf32>
    tpu.vector_store %arg11[%c0_607, %c0_608], %1548 {strides = array<i32>} : memref<2x32xf32, #tpu.memory_space<vmem>>, vector<2x32xf32>,
    %1550 = vector.shape_cast %1537 : vector<2x1xi1> to vector<2x1xi1>
    %1551 = vector.broadcast %1550 : vector<2x1xi1> to vector<2x32xi1>
    %1552 = arith.select %1551, %1525, %1462 : vector<2x32xi1>, vector<2x32xf32>
    %c0_609 = arith.constant 0 : index
    %c0_610 = arith.constant 0 : index
    %1553 = vector.load %arg12[%c0_609, %c0_610] : memref<2x32xf32, #tpu.memory_space<vmem>>, vector<2x32xf32>
    tpu.vector_store %arg12[%c0_609, %c0_610], %1552 {strides = array<i32>} : memref<2x32xf32, #tpu.memory_space<vmem>>, vector<2x32xf32>,
    %1554 = arith.index_cast %c12_i32 : i32 to index
    %c0_611 = arith.constant 0 : index
    %c0_612 = arith.constant 0 : index
    %1555 = vector.load %arg5[%1554, %c0_611, %c0_612] : memref<16x2x32xf32, #tpu.memory_space<vmem>>, vector<1x2x32xf32>
    %1556 = vector.shape_cast %1555 : vector<1x2x32xf32> to vector<2x32xf32>
    %cst_613 = arith.constant 0.000000e+00 : f32
    %1557 = vector.shape_cast %1532 : vector<2x1xi1> to vector<2x1xi1>
    %1558 = vector.broadcast %1557 : vector<2x1xi1> to vector<2x32xi1>
    %1559 = vector.broadcast %cst_613 : f32 to vector<2x32xf32>
    %1560 = arith.select %1558, %1502, %1559 : vector<2x32xi1>, vector<2x32xf32>
    %1561 = arith.addf %1556, %1560 : vector<2x32xf32>
    %1562 = arith.index_cast %c12_i32 : i32 to index
    %c0_614 = arith.constant 0 : index
    %c0_615 = arith.constant 0 : index
    %1563 = vector.load %arg5[%1562, %c0_614, %c0_615] : memref<16x2x32xf32, #tpu.memory_space<vmem>>, vector<1x2x32xf32>
    %1564 = vector.shape_cast %1563 : vector<1x2x32xf32> to vector<2x32xf32>
    %1565 = vector.shape_cast %1561 : vector<2x32xf32> to vector<1x2x32xf32>
    tpu.vector_store %arg5[%1562, %c0_614, %c0_615], %1565 {strides = array<i32>} : memref<16x2x32xf32, #tpu.memory_space<vmem>>, vector<1x2x32xf32>,
    %1566 = arith.index_cast %1458 : i32 to index
    %c0_616 = arith.constant 0 : index
    %c0_617 = arith.constant 0 : index
    %1567 = vector.load %arg5[%1566, %c0_616, %c0_617] : memref<16x2x32xf32, #tpu.memory_space<vmem>>, vector<1x2x32xf32>
    %1568 = vector.shape_cast %1567 : vector<1x2x32xf32> to vector<2x32xf32>
    %cst_618 = arith.constant 0.000000e+00 : f32
    %1569 = vector.shape_cast %1537 : vector<2x1xi1> to vector<2x1xi1>
    %1570 = vector.broadcast %1569 : vector<2x1xi1> to vector<2x32xi1>
    %1571 = vector.broadcast %cst_618 : f32 to vector<2x32xf32>
    %1572 = arith.select %1570, %1527, %1571 : vector<2x32xi1>, vector<2x32xf32>
    %1573 = arith.addf %1568, %1572 : vector<2x32xf32>
    %1574 = arith.index_cast %1458 : i32 to index
    %c0_619 = arith.constant 0 : index
    %c0_620 = arith.constant 0 : index
    %1575 = vector.load %arg5[%1574, %c0_619, %c0_620] : memref<16x2x32xf32, #tpu.memory_space<vmem>>, vector<1x2x32xf32>
    %1576 = vector.shape_cast %1575 : vector<1x2x32xf32> to vector<2x32xf32>
    %1577 = vector.shape_cast %1573 : vector<2x32xf32> to vector<1x2x32xf32>
    tpu.vector_store %arg5[%1574, %c0_619, %c0_620], %1577 {strides = array<i32>} : memref<16x2x32xf32, #tpu.memory_space<vmem>>, vector<1x2x32xf32>,
    %c13_i32 = arith.constant 13 : i32
    %c15_i32_621 = arith.constant 15 : i32
    %1578 = arith.subi %c15_i32_621, %c13_i32 : i32
    %c0_622 = arith.constant 0 : index
    %c0_623 = arith.constant 0 : index
    %1579 = vector.load %arg9[%c0_622, %c0_623] : memref<2x32xf32, #tpu.memory_space<vmem>>, vector<2x32xf32>
    %c0_624 = arith.constant 0 : index
    %c0_625 = arith.constant 0 : index
    %1580 = vector.load %arg10[%c0_624, %c0_625] : memref<2x32xf32, #tpu.memory_space<vmem>>, vector<2x32xf32>
    %c0_626 = arith.constant 0 : index
    %c0_627 = arith.constant 0 : index
    %1581 = vector.load %arg11[%c0_626, %c0_627] : memref<2x32xf32, #tpu.memory_space<vmem>>, vector<2x32xf32>
    %c0_628 = arith.constant 0 : index
    %c0_629 = arith.constant 0 : index
    %1582 = vector.load %arg12[%c0_628, %c0_629] : memref<2x32xf32, #tpu.memory_space<vmem>>, vector<2x32xf32>
    %1583 = tpu.concatenate %1579, %1581 in 1 : vector<2x32xf32>, vector<2x32xf32> -> vector<2x64xf32>
    %c0_630 = arith.constant 0 : index
    %c0_631 = arith.constant 0 : index
    %1584 = vector.load %arg2[%c0_630, %c0_631] : memref<64x256xf32, #tpu.memory_space<vmem>>, vector<64x256xf32>
    %cst_632 = arith.constant dense<0.000000e+00> : vector<2x256xf32>
    %1585 = tpu.matmul %1583, %1584, %cst_632 {dimension_numbers = #tpu.dot_dimension_numbers<[1], [0], [0], [1], [0, 0, 1, 1], [], []>} : vector<2x64xf32>, vector<64x256xf32>, vector<2x256xf32> -> vector<2x256xf32>
    %1586 = arith.index_cast %c13_i32 : i32 to index
    %c0_633 = arith.constant 0 : index
    %c0_634 = arith.constant 0 : index
    %1587 = vector.load %arg8[%1586, %c0_633, %c0_634] : memref<16x2x256xf32, #tpu.memory_space<vmem>>, vector<1x2x256xf32>
    %1588 = vector.shape_cast %1587 : vector<1x2x256xf32> to vector<2x256xf32>
    %1589 = vector.extract_strided_slice %1588 {offsets = [0, 0], sizes = [2, 128], strides = [1, 1]} : vector<2x256xf32> to vector<2x128xf32>
    %1590 = vector.extract_strided_slice %1585 {offsets = [0, 0], sizes = [2, 128], strides = [1, 1]} : vector<2x256xf32> to vector<2x128xf32>
    %1591 = arith.addf %1589, %1590 : vector<2x128xf32>
    %1592 = arith.index_cast %1578 : i32 to index
    %c0_635 = arith.constant 0 : index
    %c0_636 = arith.constant 0 : index
    %1593 = vector.load %arg8[%1592, %c0_635, %c0_636] : memref<16x2x256xf32, #tpu.memory_space<vmem>>, vector<1x2x256xf32>
    %1594 = vector.shape_cast %1593 : vector<1x2x256xf32> to vector<2x256xf32>
    %1595 = vector.extract_strided_slice %1594 {offsets = [0, 128], sizes = [2, 128], strides = [1, 1]} : vector<2x256xf32> to vector<2x128xf32>
    %1596 = vector.extract_strided_slice %1585 {offsets = [0, 128], sizes = [2, 128], strides = [1, 1]} : vector<2x256xf32> to vector<2x128xf32>
    %1597 = arith.addf %1595, %1596 : vector<2x128xf32>
    %1598 = vector.extract_strided_slice %1591 {offsets = [0, 0], sizes = [2, 32], strides = [1, 1]} : vector<2x128xf32> to vector<2x32xf32>
    %1599 = arith.negf %1598 : vector<2x32xf32>
    %1600 = math.exp %1599 : vector<2x32xf32>
    %cst_637 = arith.constant 1.000000e+00 : f32
    %1601 = vector.broadcast %cst_637 : f32 to vector<2x32xf32>
    %1602 = arith.addf %1601, %1600 : vector<2x32xf32>
    %1603 = arith.divf %1601, %1602 : vector<2x32xf32>
    %1604 = vector.extract_strided_slice %1591 {offsets = [0, 32], sizes = [2, 32], strides = [1, 1]} : vector<2x128xf32> to vector<2x32xf32>
    %1605 = arith.negf %1604 : vector<2x32xf32>
    %1606 = math.exp %1605 : vector<2x32xf32>
    %cst_638 = arith.constant 1.000000e+00 : f32
    %1607 = vector.broadcast %cst_638 : f32 to vector<2x32xf32>
    %1608 = arith.addf %1607, %1606 : vector<2x32xf32>
    %1609 = arith.divf %1607, %1608 : vector<2x32xf32>
    %1610 = vector.extract_strided_slice %1591 {offsets = [0, 64], sizes = [2, 32], strides = [1, 1]} : vector<2x128xf32> to vector<2x32xf32>
    %1611 = math.tanh %1610 : vector<2x32xf32>
    %1612 = vector.extract_strided_slice %1591 {offsets = [0, 96], sizes = [2, 32], strides = [1, 1]} : vector<2x128xf32> to vector<2x32xf32>
    %1613 = arith.negf %1612 : vector<2x32xf32>
    %1614 = math.exp %1613 : vector<2x32xf32>
    %cst_639 = arith.constant 1.000000e+00 : f32
    %1615 = vector.broadcast %cst_639 : f32 to vector<2x32xf32>
    %1616 = arith.addf %1615, %1614 : vector<2x32xf32>
    %1617 = arith.divf %1615, %1616 : vector<2x32xf32>
    %1618 = arith.mulf %1609, %1580 : vector<2x32xf32>
    %1619 = arith.mulf %1603, %1611 : vector<2x32xf32>
    %1620 = arith.addf %1618, %1619 : vector<2x32xf32>
    %1621 = math.tanh %1620 : vector<2x32xf32>
    %1622 = arith.mulf %1617, %1621 : vector<2x32xf32>
    %1623 = vector.extract_strided_slice %1597 {offsets = [0, 0], sizes = [2, 32], strides = [1, 1]} : vector<2x128xf32> to vector<2x32xf32>
    %1624 = arith.negf %1623 : vector<2x32xf32>
    %1625 = math.exp %1624 : vector<2x32xf32>
    %cst_640 = arith.constant 1.000000e+00 : f32
    %1626 = vector.broadcast %cst_640 : f32 to vector<2x32xf32>
    %1627 = arith.addf %1626, %1625 : vector<2x32xf32>
    %1628 = arith.divf %1626, %1627 : vector<2x32xf32>
    %1629 = vector.extract_strided_slice %1597 {offsets = [0, 32], sizes = [2, 32], strides = [1, 1]} : vector<2x128xf32> to vector<2x32xf32>
    %1630 = arith.negf %1629 : vector<2x32xf32>
    %1631 = math.exp %1630 : vector<2x32xf32>
    %cst_641 = arith.constant 1.000000e+00 : f32
    %1632 = vector.broadcast %cst_641 : f32 to vector<2x32xf32>
    %1633 = arith.addf %1632, %1631 : vector<2x32xf32>
    %1634 = arith.divf %1632, %1633 : vector<2x32xf32>
    %1635 = vector.extract_strided_slice %1597 {offsets = [0, 64], sizes = [2, 32], strides = [1, 1]} : vector<2x128xf32> to vector<2x32xf32>
    %1636 = math.tanh %1635 : vector<2x32xf32>
    %1637 = vector.extract_strided_slice %1597 {offsets = [0, 96], sizes = [2, 32], strides = [1, 1]} : vector<2x128xf32> to vector<2x32xf32>
    %1638 = arith.negf %1637 : vector<2x32xf32>
    %1639 = math.exp %1638 : vector<2x32xf32>
    %cst_642 = arith.constant 1.000000e+00 : f32
    %1640 = vector.broadcast %cst_642 : f32 to vector<2x32xf32>
    %1641 = arith.addf %1640, %1639 : vector<2x32xf32>
    %1642 = arith.divf %1640, %1641 : vector<2x32xf32>
    %1643 = arith.mulf %1634, %1582 : vector<2x32xf32>
    %1644 = arith.mulf %1628, %1636 : vector<2x32xf32>
    %1645 = arith.addf %1643, %1644 : vector<2x32xf32>
    %1646 = math.tanh %1645 : vector<2x32xf32>
    %1647 = arith.mulf %1642, %1646 : vector<2x32xf32>
    %1648 = arith.index_cast %c13_i32 : i32 to index
    %c0_643 = arith.constant 0 : index
    %c0_644 = arith.constant 0 : index
    %1649 = vector.load %arg4[%1648, %c0_643, %c0_644] : memref<16x2x1xf32, #tpu.memory_space<vmem>>, vector<1x2x1xf32>
    %1650 = vector.shape_cast %1649 : vector<1x2x1xf32> to vector<2x1xf32>
    %cst_645 = arith.constant 0.000000e+00 : f32
    %1651 = vector.broadcast %cst_645 : f32 to vector<2x1xf32>
    %1652 = arith.cmpf ogt, %1650, %1651 : vector<2x1xf32>
    %1653 = arith.index_cast %1578 : i32 to index
    %c0_646 = arith.constant 0 : index
    %c0_647 = arith.constant 0 : index
    %1654 = vector.load %arg4[%1653, %c0_646, %c0_647] : memref<16x2x1xf32, #tpu.memory_space<vmem>>, vector<1x2x1xf32>
    %1655 = vector.shape_cast %1654 : vector<1x2x1xf32> to vector<2x1xf32>
    %cst_648 = arith.constant 0.000000e+00 : f32
    %1656 = vector.broadcast %cst_648 : f32 to vector<2x1xf32>
    %1657 = arith.cmpf ogt, %1655, %1656 : vector<2x1xf32>
    %1658 = vector.shape_cast %1652 : vector<2x1xi1> to vector<2x1xi1>
    %1659 = vector.broadcast %1658 : vector<2x1xi1> to vector<2x32xi1>
    %1660 = arith.select %1659, %1622, %1579 : vector<2x32xi1>, vector<2x32xf32>
    %c0_649 = arith.constant 0 : index
    %c0_650 = arith.constant 0 : index
    %1661 = vector.load %arg9[%c0_649, %c0_650] : memref<2x32xf32, #tpu.memory_space<vmem>>, vector<2x32xf32>
    tpu.vector_store %arg9[%c0_649, %c0_650], %1660 {strides = array<i32>} : memref<2x32xf32, #tpu.memory_space<vmem>>, vector<2x32xf32>,
    %1662 = vector.shape_cast %1652 : vector<2x1xi1> to vector<2x1xi1>
    %1663 = vector.broadcast %1662 : vector<2x1xi1> to vector<2x32xi1>
    %1664 = arith.select %1663, %1620, %1580 : vector<2x32xi1>, vector<2x32xf32>
    %c0_651 = arith.constant 0 : index
    %c0_652 = arith.constant 0 : index
    %1665 = vector.load %arg10[%c0_651, %c0_652] : memref<2x32xf32, #tpu.memory_space<vmem>>, vector<2x32xf32>
    tpu.vector_store %arg10[%c0_651, %c0_652], %1664 {strides = array<i32>} : memref<2x32xf32, #tpu.memory_space<vmem>>, vector<2x32xf32>,
    %1666 = vector.shape_cast %1657 : vector<2x1xi1> to vector<2x1xi1>
    %1667 = vector.broadcast %1666 : vector<2x1xi1> to vector<2x32xi1>
    %1668 = arith.select %1667, %1647, %1581 : vector<2x32xi1>, vector<2x32xf32>
    %c0_653 = arith.constant 0 : index
    %c0_654 = arith.constant 0 : index
    %1669 = vector.load %arg11[%c0_653, %c0_654] : memref<2x32xf32, #tpu.memory_space<vmem>>, vector<2x32xf32>
    tpu.vector_store %arg11[%c0_653, %c0_654], %1668 {strides = array<i32>} : memref<2x32xf32, #tpu.memory_space<vmem>>, vector<2x32xf32>,
    %1670 = vector.shape_cast %1657 : vector<2x1xi1> to vector<2x1xi1>
    %1671 = vector.broadcast %1670 : vector<2x1xi1> to vector<2x32xi1>
    %1672 = arith.select %1671, %1645, %1582 : vector<2x32xi1>, vector<2x32xf32>
    %c0_655 = arith.constant 0 : index
    %c0_656 = arith.constant 0 : index
    %1673 = vector.load %arg12[%c0_655, %c0_656] : memref<2x32xf32, #tpu.memory_space<vmem>>, vector<2x32xf32>
    tpu.vector_store %arg12[%c0_655, %c0_656], %1672 {strides = array<i32>} : memref<2x32xf32, #tpu.memory_space<vmem>>, vector<2x32xf32>,
    %1674 = arith.index_cast %c13_i32 : i32 to index
    %c0_657 = arith.constant 0 : index
    %c0_658 = arith.constant 0 : index
    %1675 = vector.load %arg5[%1674, %c0_657, %c0_658] : memref<16x2x32xf32, #tpu.memory_space<vmem>>, vector<1x2x32xf32>
    %1676 = vector.shape_cast %1675 : vector<1x2x32xf32> to vector<2x32xf32>
    %cst_659 = arith.constant 0.000000e+00 : f32
    %1677 = vector.shape_cast %1652 : vector<2x1xi1> to vector<2x1xi1>
    %1678 = vector.broadcast %1677 : vector<2x1xi1> to vector<2x32xi1>
    %1679 = vector.broadcast %cst_659 : f32 to vector<2x32xf32>
    %1680 = arith.select %1678, %1622, %1679 : vector<2x32xi1>, vector<2x32xf32>
    %1681 = arith.addf %1676, %1680 : vector<2x32xf32>
    %1682 = arith.index_cast %c13_i32 : i32 to index
    %c0_660 = arith.constant 0 : index
    %c0_661 = arith.constant 0 : index
    %1683 = vector.load %arg5[%1682, %c0_660, %c0_661] : memref<16x2x32xf32, #tpu.memory_space<vmem>>, vector<1x2x32xf32>
    %1684 = vector.shape_cast %1683 : vector<1x2x32xf32> to vector<2x32xf32>
    %1685 = vector.shape_cast %1681 : vector<2x32xf32> to vector<1x2x32xf32>
    tpu.vector_store %arg5[%1682, %c0_660, %c0_661], %1685 {strides = array<i32>} : memref<16x2x32xf32, #tpu.memory_space<vmem>>, vector<1x2x32xf32>,
    %1686 = arith.index_cast %1578 : i32 to index
    %c0_662 = arith.constant 0 : index
    %c0_663 = arith.constant 0 : index
    %1687 = vector.load %arg5[%1686, %c0_662, %c0_663] : memref<16x2x32xf32, #tpu.memory_space<vmem>>, vector<1x2x32xf32>
    %1688 = vector.shape_cast %1687 : vector<1x2x32xf32> to vector<2x32xf32>
    %cst_664 = arith.constant 0.000000e+00 : f32
    %1689 = vector.shape_cast %1657 : vector<2x1xi1> to vector<2x1xi1>
    %1690 = vector.broadcast %1689 : vector<2x1xi1> to vector<2x32xi1>
    %1691 = vector.broadcast %cst_664 : f32 to vector<2x32xf32>
    %1692 = arith.select %1690, %1647, %1691 : vector<2x32xi1>, vector<2x32xf32>
    %1693 = arith.addf %1688, %1692 : vector<2x32xf32>
    %1694 = arith.index_cast %1578 : i32 to index
    %c0_665 = arith.constant 0 : index
    %c0_666 = arith.constant 0 : index
    %1695 = vector.load %arg5[%1694, %c0_665, %c0_666] : memref<16x2x32xf32, #tpu.memory_space<vmem>>, vector<1x2x32xf32>
    %1696 = vector.shape_cast %1695 : vector<1x2x32xf32> to vector<2x32xf32>
    %1697 = vector.shape_cast %1693 : vector<2x32xf32> to vector<1x2x32xf32>
    tpu.vector_store %arg5[%1694, %c0_665, %c0_666], %1697 {strides = array<i32>} : memref<16x2x32xf32, #tpu.memory_space<vmem>>, vector<1x2x32xf32>,
    %c14_i32 = arith.constant 14 : i32
    %c15_i32_667 = arith.constant 15 : i32
    %1698 = arith.subi %c15_i32_667, %c14_i32 : i32
    %c0_668 = arith.constant 0 : index
    %c0_669 = arith.constant 0 : index
    %1699 = vector.load %arg9[%c0_668, %c0_669] : memref<2x32xf32, #tpu.memory_space<vmem>>, vector<2x32xf32>
    %c0_670 = arith.constant 0 : index
    %c0_671 = arith.constant 0 : index
    %1700 = vector.load %arg10[%c0_670, %c0_671] : memref<2x32xf32, #tpu.memory_space<vmem>>, vector<2x32xf32>
    %c0_672 = arith.constant 0 : index
    %c0_673 = arith.constant 0 : index
    %1701 = vector.load %arg11[%c0_672, %c0_673] : memref<2x32xf32, #tpu.memory_space<vmem>>, vector<2x32xf32>
    %c0_674 = arith.constant 0 : index
    %c0_675 = arith.constant 0 : index
    %1702 = vector.load %arg12[%c0_674, %c0_675] : memref<2x32xf32, #tpu.memory_space<vmem>>, vector<2x32xf32>
    %1703 = tpu.concatenate %1699, %1701 in 1 : vector<2x32xf32>, vector<2x32xf32> -> vector<2x64xf32>
    %c0_676 = arith.constant 0 : index
    %c0_677 = arith.constant 0 : index
    %1704 = vector.load %arg2[%c0_676, %c0_677] : memref<64x256xf32, #tpu.memory_space<vmem>>, vector<64x256xf32>
    %cst_678 = arith.constant dense<0.000000e+00> : vector<2x256xf32>
    %1705 = tpu.matmul %1703, %1704, %cst_678 {dimension_numbers = #tpu.dot_dimension_numbers<[1], [0], [0], [1], [0, 0, 1, 1], [], []>} : vector<2x64xf32>, vector<64x256xf32>, vector<2x256xf32> -> vector<2x256xf32>
    %1706 = arith.index_cast %c14_i32 : i32 to index
    %c0_679 = arith.constant 0 : index
    %c0_680 = arith.constant 0 : index
    %1707 = vector.load %arg8[%1706, %c0_679, %c0_680] : memref<16x2x256xf32, #tpu.memory_space<vmem>>, vector<1x2x256xf32>
    %1708 = vector.shape_cast %1707 : vector<1x2x256xf32> to vector<2x256xf32>
    %1709 = vector.extract_strided_slice %1708 {offsets = [0, 0], sizes = [2, 128], strides = [1, 1]} : vector<2x256xf32> to vector<2x128xf32>
    %1710 = vector.extract_strided_slice %1705 {offsets = [0, 0], sizes = [2, 128], strides = [1, 1]} : vector<2x256xf32> to vector<2x128xf32>
    %1711 = arith.addf %1709, %1710 : vector<2x128xf32>
    %1712 = arith.index_cast %1698 : i32 to index
    %c0_681 = arith.constant 0 : index
    %c0_682 = arith.constant 0 : index
    %1713 = vector.load %arg8[%1712, %c0_681, %c0_682] : memref<16x2x256xf32, #tpu.memory_space<vmem>>, vector<1x2x256xf32>
    %1714 = vector.shape_cast %1713 : vector<1x2x256xf32> to vector<2x256xf32>
    %1715 = vector.extract_strided_slice %1714 {offsets = [0, 128], sizes = [2, 128], strides = [1, 1]} : vector<2x256xf32> to vector<2x128xf32>
    %1716 = vector.extract_strided_slice %1705 {offsets = [0, 128], sizes = [2, 128], strides = [1, 1]} : vector<2x256xf32> to vector<2x128xf32>
    %1717 = arith.addf %1715, %1716 : vector<2x128xf32>
    %1718 = vector.extract_strided_slice %1711 {offsets = [0, 0], sizes = [2, 32], strides = [1, 1]} : vector<2x128xf32> to vector<2x32xf32>
    %1719 = arith.negf %1718 : vector<2x32xf32>
    %1720 = math.exp %1719 : vector<2x32xf32>
    %cst_683 = arith.constant 1.000000e+00 : f32
    %1721 = vector.broadcast %cst_683 : f32 to vector<2x32xf32>
    %1722 = arith.addf %1721, %1720 : vector<2x32xf32>
    %1723 = arith.divf %1721, %1722 : vector<2x32xf32>
    %1724 = vector.extract_strided_slice %1711 {offsets = [0, 32], sizes = [2, 32], strides = [1, 1]} : vector<2x128xf32> to vector<2x32xf32>
    %1725 = arith.negf %1724 : vector<2x32xf32>
    %1726 = math.exp %1725 : vector<2x32xf32>
    %cst_684 = arith.constant 1.000000e+00 : f32
    %1727 = vector.broadcast %cst_684 : f32 to vector<2x32xf32>
    %1728 = arith.addf %1727, %1726 : vector<2x32xf32>
    %1729 = arith.divf %1727, %1728 : vector<2x32xf32>
    %1730 = vector.extract_strided_slice %1711 {offsets = [0, 64], sizes = [2, 32], strides = [1, 1]} : vector<2x128xf32> to vector<2x32xf32>
    %1731 = math.tanh %1730 : vector<2x32xf32>
    %1732 = vector.extract_strided_slice %1711 {offsets = [0, 96], sizes = [2, 32], strides = [1, 1]} : vector<2x128xf32> to vector<2x32xf32>
    %1733 = arith.negf %1732 : vector<2x32xf32>
    %1734 = math.exp %1733 : vector<2x32xf32>
    %cst_685 = arith.constant 1.000000e+00 : f32
    %1735 = vector.broadcast %cst_685 : f32 to vector<2x32xf32>
    %1736 = arith.addf %1735, %1734 : vector<2x32xf32>
    %1737 = arith.divf %1735, %1736 : vector<2x32xf32>
    %1738 = arith.mulf %1729, %1700 : vector<2x32xf32>
    %1739 = arith.mulf %1723, %1731 : vector<2x32xf32>
    %1740 = arith.addf %1738, %1739 : vector<2x32xf32>
    %1741 = math.tanh %1740 : vector<2x32xf32>
    %1742 = arith.mulf %1737, %1741 : vector<2x32xf32>
    %1743 = vector.extract_strided_slice %1717 {offsets = [0, 0], sizes = [2, 32], strides = [1, 1]} : vector<2x128xf32> to vector<2x32xf32>
    %1744 = arith.negf %1743 : vector<2x32xf32>
    %1745 = math.exp %1744 : vector<2x32xf32>
    %cst_686 = arith.constant 1.000000e+00 : f32
    %1746 = vector.broadcast %cst_686 : f32 to vector<2x32xf32>
    %1747 = arith.addf %1746, %1745 : vector<2x32xf32>
    %1748 = arith.divf %1746, %1747 : vector<2x32xf32>
    %1749 = vector.extract_strided_slice %1717 {offsets = [0, 32], sizes = [2, 32], strides = [1, 1]} : vector<2x128xf32> to vector<2x32xf32>
    %1750 = arith.negf %1749 : vector<2x32xf32>
    %1751 = math.exp %1750 : vector<2x32xf32>
    %cst_687 = arith.constant 1.000000e+00 : f32
    %1752 = vector.broadcast %cst_687 : f32 to vector<2x32xf32>
    %1753 = arith.addf %1752, %1751 : vector<2x32xf32>
    %1754 = arith.divf %1752, %1753 : vector<2x32xf32>
    %1755 = vector.extract_strided_slice %1717 {offsets = [0, 64], sizes = [2, 32], strides = [1, 1]} : vector<2x128xf32> to vector<2x32xf32>
    %1756 = math.tanh %1755 : vector<2x32xf32>
    %1757 = vector.extract_strided_slice %1717 {offsets = [0, 96], sizes = [2, 32], strides = [1, 1]} : vector<2x128xf32> to vector<2x32xf32>
    %1758 = arith.negf %1757 : vector<2x32xf32>
    %1759 = math.exp %1758 : vector<2x32xf32>
    %cst_688 = arith.constant 1.000000e+00 : f32
    %1760 = vector.broadcast %cst_688 : f32 to vector<2x32xf32>
    %1761 = arith.addf %1760, %1759 : vector<2x32xf32>
    %1762 = arith.divf %1760, %1761 : vector<2x32xf32>
    %1763 = arith.mulf %1754, %1702 : vector<2x32xf32>
    %1764 = arith.mulf %1748, %1756 : vector<2x32xf32>
    %1765 = arith.addf %1763, %1764 : vector<2x32xf32>
    %1766 = math.tanh %1765 : vector<2x32xf32>
    %1767 = arith.mulf %1762, %1766 : vector<2x32xf32>
    %1768 = arith.index_cast %c14_i32 : i32 to index
    %c0_689 = arith.constant 0 : index
    %c0_690 = arith.constant 0 : index
    %1769 = vector.load %arg4[%1768, %c0_689, %c0_690] : memref<16x2x1xf32, #tpu.memory_space<vmem>>, vector<1x2x1xf32>
    %1770 = vector.shape_cast %1769 : vector<1x2x1xf32> to vector<2x1xf32>
    %cst_691 = arith.constant 0.000000e+00 : f32
    %1771 = vector.broadcast %cst_691 : f32 to vector<2x1xf32>
    %1772 = arith.cmpf ogt, %1770, %1771 : vector<2x1xf32>
    %1773 = arith.index_cast %1698 : i32 to index
    %c0_692 = arith.constant 0 : index
    %c0_693 = arith.constant 0 : index
    %1774 = vector.load %arg4[%1773, %c0_692, %c0_693] : memref<16x2x1xf32, #tpu.memory_space<vmem>>, vector<1x2x1xf32>
    %1775 = vector.shape_cast %1774 : vector<1x2x1xf32> to vector<2x1xf32>
    %cst_694 = arith.constant 0.000000e+00 : f32
    %1776 = vector.broadcast %cst_694 : f32 to vector<2x1xf32>
    %1777 = arith.cmpf ogt, %1775, %1776 : vector<2x1xf32>
    %1778 = vector.shape_cast %1772 : vector<2x1xi1> to vector<2x1xi1>
    %1779 = vector.broadcast %1778 : vector<2x1xi1> to vector<2x32xi1>
    %1780 = arith.select %1779, %1742, %1699 : vector<2x32xi1>, vector<2x32xf32>
    %c0_695 = arith.constant 0 : index
    %c0_696 = arith.constant 0 : index
    %1781 = vector.load %arg9[%c0_695, %c0_696] : memref<2x32xf32, #tpu.memory_space<vmem>>, vector<2x32xf32>
    tpu.vector_store %arg9[%c0_695, %c0_696], %1780 {strides = array<i32>} : memref<2x32xf32, #tpu.memory_space<vmem>>, vector<2x32xf32>,
    %1782 = vector.shape_cast %1772 : vector<2x1xi1> to vector<2x1xi1>
    %1783 = vector.broadcast %1782 : vector<2x1xi1> to vector<2x32xi1>
    %1784 = arith.select %1783, %1740, %1700 : vector<2x32xi1>, vector<2x32xf32>
    %c0_697 = arith.constant 0 : index
    %c0_698 = arith.constant 0 : index
    %1785 = vector.load %arg10[%c0_697, %c0_698] : memref<2x32xf32, #tpu.memory_space<vmem>>, vector<2x32xf32>
    tpu.vector_store %arg10[%c0_697, %c0_698], %1784 {strides = array<i32>} : memref<2x32xf32, #tpu.memory_space<vmem>>, vector<2x32xf32>,
    %1786 = vector.shape_cast %1777 : vector<2x1xi1> to vector<2x1xi1>
    %1787 = vector.broadcast %1786 : vector<2x1xi1> to vector<2x32xi1>
    %1788 = arith.select %1787, %1767, %1701 : vector<2x32xi1>, vector<2x32xf32>
    %c0_699 = arith.constant 0 : index
    %c0_700 = arith.constant 0 : index
    %1789 = vector.load %arg11[%c0_699, %c0_700] : memref<2x32xf32, #tpu.memory_space<vmem>>, vector<2x32xf32>
    tpu.vector_store %arg11[%c0_699, %c0_700], %1788 {strides = array<i32>} : memref<2x32xf32, #tpu.memory_space<vmem>>, vector<2x32xf32>,
    %1790 = vector.shape_cast %1777 : vector<2x1xi1> to vector<2x1xi1>
    %1791 = vector.broadcast %1790 : vector<2x1xi1> to vector<2x32xi1>
    %1792 = arith.select %1791, %1765, %1702 : vector<2x32xi1>, vector<2x32xf32>
    %c0_701 = arith.constant 0 : index
    %c0_702 = arith.constant 0 : index
    %1793 = vector.load %arg12[%c0_701, %c0_702] : memref<2x32xf32, #tpu.memory_space<vmem>>, vector<2x32xf32>
    tpu.vector_store %arg12[%c0_701, %c0_702], %1792 {strides = array<i32>} : memref<2x32xf32, #tpu.memory_space<vmem>>, vector<2x32xf32>,
    %1794 = arith.index_cast %c14_i32 : i32 to index
    %c0_703 = arith.constant 0 : index
    %c0_704 = arith.constant 0 : index
    %1795 = vector.load %arg5[%1794, %c0_703, %c0_704] : memref<16x2x32xf32, #tpu.memory_space<vmem>>, vector<1x2x32xf32>
    %1796 = vector.shape_cast %1795 : vector<1x2x32xf32> to vector<2x32xf32>
    %cst_705 = arith.constant 0.000000e+00 : f32
    %1797 = vector.shape_cast %1772 : vector<2x1xi1> to vector<2x1xi1>
    %1798 = vector.broadcast %1797 : vector<2x1xi1> to vector<2x32xi1>
    %1799 = vector.broadcast %cst_705 : f32 to vector<2x32xf32>
    %1800 = arith.select %1798, %1742, %1799 : vector<2x32xi1>, vector<2x32xf32>
    %1801 = arith.addf %1796, %1800 : vector<2x32xf32>
    %1802 = arith.index_cast %c14_i32 : i32 to index
    %c0_706 = arith.constant 0 : index
    %c0_707 = arith.constant 0 : index
    %1803 = vector.load %arg5[%1802, %c0_706, %c0_707] : memref<16x2x32xf32, #tpu.memory_space<vmem>>, vector<1x2x32xf32>
    %1804 = vector.shape_cast %1803 : vector<1x2x32xf32> to vector<2x32xf32>
    %1805 = vector.shape_cast %1801 : vector<2x32xf32> to vector<1x2x32xf32>
    tpu.vector_store %arg5[%1802, %c0_706, %c0_707], %1805 {strides = array<i32>} : memref<16x2x32xf32, #tpu.memory_space<vmem>>, vector<1x2x32xf32>,
    %1806 = arith.index_cast %1698 : i32 to index
    %c0_708 = arith.constant 0 : index
    %c0_709 = arith.constant 0 : index
    %1807 = vector.load %arg5[%1806, %c0_708, %c0_709] : memref<16x2x32xf32, #tpu.memory_space<vmem>>, vector<1x2x32xf32>
    %1808 = vector.shape_cast %1807 : vector<1x2x32xf32> to vector<2x32xf32>
    %cst_710 = arith.constant 0.000000e+00 : f32
    %1809 = vector.shape_cast %1777 : vector<2x1xi1> to vector<2x1xi1>
    %1810 = vector.broadcast %1809 : vector<2x1xi1> to vector<2x32xi1>
    %1811 = vector.broadcast %cst_710 : f32 to vector<2x32xf32>
    %1812 = arith.select %1810, %1767, %1811 : vector<2x32xi1>, vector<2x32xf32>
    %1813 = arith.addf %1808, %1812 : vector<2x32xf32>
    %1814 = arith.index_cast %1698 : i32 to index
    %c0_711 = arith.constant 0 : index
    %c0_712 = arith.constant 0 : index
    %1815 = vector.load %arg5[%1814, %c0_711, %c0_712] : memref<16x2x32xf32, #tpu.memory_space<vmem>>, vector<1x2x32xf32>
    %1816 = vector.shape_cast %1815 : vector<1x2x32xf32> to vector<2x32xf32>
    %1817 = vector.shape_cast %1813 : vector<2x32xf32> to vector<1x2x32xf32>
    tpu.vector_store %arg5[%1814, %c0_711, %c0_712], %1817 {strides = array<i32>} : memref<16x2x32xf32, #tpu.memory_space<vmem>>, vector<1x2x32xf32>,
    %c15_i32_713 = arith.constant 15 : i32
    %c15_i32_714 = arith.constant 15 : i32
    %1818 = arith.subi %c15_i32_714, %c15_i32_713 : i32
    %c0_715 = arith.constant 0 : index
    %c0_716 = arith.constant 0 : index
    %1819 = vector.load %arg9[%c0_715, %c0_716] : memref<2x32xf32, #tpu.memory_space<vmem>>, vector<2x32xf32>
    %c0_717 = arith.constant 0 : index
    %c0_718 = arith.constant 0 : index
    %1820 = vector.load %arg10[%c0_717, %c0_718] : memref<2x32xf32, #tpu.memory_space<vmem>>, vector<2x32xf32>
    %c0_719 = arith.constant 0 : index
    %c0_720 = arith.constant 0 : index
    %1821 = vector.load %arg11[%c0_719, %c0_720] : memref<2x32xf32, #tpu.memory_space<vmem>>, vector<2x32xf32>
    %c0_721 = arith.constant 0 : index
    %c0_722 = arith.constant 0 : index
    %1822 = vector.load %arg12[%c0_721, %c0_722] : memref<2x32xf32, #tpu.memory_space<vmem>>, vector<2x32xf32>
    %1823 = tpu.concatenate %1819, %1821 in 1 : vector<2x32xf32>, vector<2x32xf32> -> vector<2x64xf32>
    %c0_723 = arith.constant 0 : index
    %c0_724 = arith.constant 0 : index
    %1824 = vector.load %arg2[%c0_723, %c0_724] : memref<64x256xf32, #tpu.memory_space<vmem>>, vector<64x256xf32>
    %cst_725 = arith.constant dense<0.000000e+00> : vector<2x256xf32>
    %1825 = tpu.matmul %1823, %1824, %cst_725 {dimension_numbers = #tpu.dot_dimension_numbers<[1], [0], [0], [1], [0, 0, 1, 1], [], []>} : vector<2x64xf32>, vector<64x256xf32>, vector<2x256xf32> -> vector<2x256xf32>
    %1826 = arith.index_cast %c15_i32_713 : i32 to index
    %c0_726 = arith.constant 0 : index
    %c0_727 = arith.constant 0 : index
    %1827 = vector.load %arg8[%1826, %c0_726, %c0_727] : memref<16x2x256xf32, #tpu.memory_space<vmem>>, vector<1x2x256xf32>
    %1828 = vector.shape_cast %1827 : vector<1x2x256xf32> to vector<2x256xf32>
    %1829 = vector.extract_strided_slice %1828 {offsets = [0, 0], sizes = [2, 128], strides = [1, 1]} : vector<2x256xf32> to vector<2x128xf32>
    %1830 = vector.extract_strided_slice %1825 {offsets = [0, 0], sizes = [2, 128], strides = [1, 1]} : vector<2x256xf32> to vector<2x128xf32>
    %1831 = arith.addf %1829, %1830 : vector<2x128xf32>
    %1832 = arith.index_cast %1818 : i32 to index
    %c0_728 = arith.constant 0 : index
    %c0_729 = arith.constant 0 : index
    %1833 = vector.load %arg8[%1832, %c0_728, %c0_729] : memref<16x2x256xf32, #tpu.memory_space<vmem>>, vector<1x2x256xf32>
    %1834 = vector.shape_cast %1833 : vector<1x2x256xf32> to vector<2x256xf32>
    %1835 = vector.extract_strided_slice %1834 {offsets = [0, 128], sizes = [2, 128], strides = [1, 1]} : vector<2x256xf32> to vector<2x128xf32>
    %1836 = vector.extract_strided_slice %1825 {offsets = [0, 128], sizes = [2, 128], strides = [1, 1]} : vector<2x256xf32> to vector<2x128xf32>
    %1837 = arith.addf %1835, %1836 : vector<2x128xf32>
    %1838 = vector.extract_strided_slice %1831 {offsets = [0, 0], sizes = [2, 32], strides = [1, 1]} : vector<2x128xf32> to vector<2x32xf32>
    %1839 = arith.negf %1838 : vector<2x32xf32>
    %1840 = math.exp %1839 : vector<2x32xf32>
    %cst_730 = arith.constant 1.000000e+00 : f32
    %1841 = vector.broadcast %cst_730 : f32 to vector<2x32xf32>
    %1842 = arith.addf %1841, %1840 : vector<2x32xf32>
    %1843 = arith.divf %1841, %1842 : vector<2x32xf32>
    %1844 = vector.extract_strided_slice %1831 {offsets = [0, 32], sizes = [2, 32], strides = [1, 1]} : vector<2x128xf32> to vector<2x32xf32>
    %1845 = arith.negf %1844 : vector<2x32xf32>
    %1846 = math.exp %1845 : vector<2x32xf32>
    %cst_731 = arith.constant 1.000000e+00 : f32
    %1847 = vector.broadcast %cst_731 : f32 to vector<2x32xf32>
    %1848 = arith.addf %1847, %1846 : vector<2x32xf32>
    %1849 = arith.divf %1847, %1848 : vector<2x32xf32>
    %1850 = vector.extract_strided_slice %1831 {offsets = [0, 64], sizes = [2, 32], strides = [1, 1]} : vector<2x128xf32> to vector<2x32xf32>
    %1851 = math.tanh %1850 : vector<2x32xf32>
    %1852 = vector.extract_strided_slice %1831 {offsets = [0, 96], sizes = [2, 32], strides = [1, 1]} : vector<2x128xf32> to vector<2x32xf32>
    %1853 = arith.negf %1852 : vector<2x32xf32>
    %1854 = math.exp %1853 : vector<2x32xf32>
    %cst_732 = arith.constant 1.000000e+00 : f32
    %1855 = vector.broadcast %cst_732 : f32 to vector<2x32xf32>
    %1856 = arith.addf %1855, %1854 : vector<2x32xf32>
    %1857 = arith.divf %1855, %1856 : vector<2x32xf32>
    %1858 = arith.mulf %1849, %1820 : vector<2x32xf32>
    %1859 = arith.mulf %1843, %1851 : vector<2x32xf32>
    %1860 = arith.addf %1858, %1859 : vector<2x32xf32>
    %1861 = math.tanh %1860 : vector<2x32xf32>
    %1862 = arith.mulf %1857, %1861 : vector<2x32xf32>
    %1863 = vector.extract_strided_slice %1837 {offsets = [0, 0], sizes = [2, 32], strides = [1, 1]} : vector<2x128xf32> to vector<2x32xf32>
    %1864 = arith.negf %1863 : vector<2x32xf32>
    %1865 = math.exp %1864 : vector<2x32xf32>
    %cst_733 = arith.constant 1.000000e+00 : f32
    %1866 = vector.broadcast %cst_733 : f32 to vector<2x32xf32>
    %1867 = arith.addf %1866, %1865 : vector<2x32xf32>
    %1868 = arith.divf %1866, %1867 : vector<2x32xf32>
    %1869 = vector.extract_strided_slice %1837 {offsets = [0, 32], sizes = [2, 32], strides = [1, 1]} : vector<2x128xf32> to vector<2x32xf32>
    %1870 = arith.negf %1869 : vector<2x32xf32>
    %1871 = math.exp %1870 : vector<2x32xf32>
    %cst_734 = arith.constant 1.000000e+00 : f32
    %1872 = vector.broadcast %cst_734 : f32 to vector<2x32xf32>
    %1873 = arith.addf %1872, %1871 : vector<2x32xf32>
    %1874 = arith.divf %1872, %1873 : vector<2x32xf32>
    %1875 = vector.extract_strided_slice %1837 {offsets = [0, 64], sizes = [2, 32], strides = [1, 1]} : vector<2x128xf32> to vector<2x32xf32>
    %1876 = math.tanh %1875 : vector<2x32xf32>
    %1877 = vector.extract_strided_slice %1837 {offsets = [0, 96], sizes = [2, 32], strides = [1, 1]} : vector<2x128xf32> to vector<2x32xf32>
    %1878 = arith.negf %1877 : vector<2x32xf32>
    %1879 = math.exp %1878 : vector<2x32xf32>
    %cst_735 = arith.constant 1.000000e+00 : f32
    %1880 = vector.broadcast %cst_735 : f32 to vector<2x32xf32>
    %1881 = arith.addf %1880, %1879 : vector<2x32xf32>
    %1882 = arith.divf %1880, %1881 : vector<2x32xf32>
    %1883 = arith.mulf %1874, %1822 : vector<2x32xf32>
    %1884 = arith.mulf %1868, %1876 : vector<2x32xf32>
    %1885 = arith.addf %1883, %1884 : vector<2x32xf32>
    %1886 = math.tanh %1885 : vector<2x32xf32>
    %1887 = arith.mulf %1882, %1886 : vector<2x32xf32>
    %1888 = arith.index_cast %c15_i32_713 : i32 to index
    %c0_736 = arith.constant 0 : index
    %c0_737 = arith.constant 0 : index
    %1889 = vector.load %arg4[%1888, %c0_736, %c0_737] : memref<16x2x1xf32, #tpu.memory_space<vmem>>, vector<1x2x1xf32>
    %1890 = vector.shape_cast %1889 : vector<1x2x1xf32> to vector<2x1xf32>
    %cst_738 = arith.constant 0.000000e+00 : f32
    %1891 = vector.broadcast %cst_738 : f32 to vector<2x1xf32>
    %1892 = arith.cmpf ogt, %1890, %1891 : vector<2x1xf32>
    %1893 = arith.index_cast %1818 : i32 to index
    %c0_739 = arith.constant 0 : index
    %c0_740 = arith.constant 0 : index
    %1894 = vector.load %arg4[%1893, %c0_739, %c0_740] : memref<16x2x1xf32, #tpu.memory_space<vmem>>, vector<1x2x1xf32>
    %1895 = vector.shape_cast %1894 : vector<1x2x1xf32> to vector<2x1xf32>
    %cst_741 = arith.constant 0.000000e+00 : f32
    %1896 = vector.broadcast %cst_741 : f32 to vector<2x1xf32>
    %1897 = arith.cmpf ogt, %1895, %1896 : vector<2x1xf32>
    %1898 = vector.shape_cast %1892 : vector<2x1xi1> to vector<2x1xi1>
    %1899 = vector.broadcast %1898 : vector<2x1xi1> to vector<2x32xi1>
    %1900 = arith.select %1899, %1862, %1819 : vector<2x32xi1>, vector<2x32xf32>
    %c0_742 = arith.constant 0 : index
    %c0_743 = arith.constant 0 : index
    %1901 = vector.load %arg9[%c0_742, %c0_743] : memref<2x32xf32, #tpu.memory_space<vmem>>, vector<2x32xf32>
    tpu.vector_store %arg9[%c0_742, %c0_743], %1900 {strides = array<i32>} : memref<2x32xf32, #tpu.memory_space<vmem>>, vector<2x32xf32>,
    %1902 = vector.shape_cast %1892 : vector<2x1xi1> to vector<2x1xi1>
    %1903 = vector.broadcast %1902 : vector<2x1xi1> to vector<2x32xi1>
    %1904 = arith.select %1903, %1860, %1820 : vector<2x32xi1>, vector<2x32xf32>
    %c0_744 = arith.constant 0 : index
    %c0_745 = arith.constant 0 : index
    %1905 = vector.load %arg10[%c0_744, %c0_745] : memref<2x32xf32, #tpu.memory_space<vmem>>, vector<2x32xf32>
    tpu.vector_store %arg10[%c0_744, %c0_745], %1904 {strides = array<i32>} : memref<2x32xf32, #tpu.memory_space<vmem>>, vector<2x32xf32>,
    %1906 = vector.shape_cast %1897 : vector<2x1xi1> to vector<2x1xi1>
    %1907 = vector.broadcast %1906 : vector<2x1xi1> to vector<2x32xi1>
    %1908 = arith.select %1907, %1887, %1821 : vector<2x32xi1>, vector<2x32xf32>
    %c0_746 = arith.constant 0 : index
    %c0_747 = arith.constant 0 : index
    %1909 = vector.load %arg11[%c0_746, %c0_747] : memref<2x32xf32, #tpu.memory_space<vmem>>, vector<2x32xf32>
    tpu.vector_store %arg11[%c0_746, %c0_747], %1908 {strides = array<i32>} : memref<2x32xf32, #tpu.memory_space<vmem>>, vector<2x32xf32>,
    %1910 = vector.shape_cast %1897 : vector<2x1xi1> to vector<2x1xi1>
    %1911 = vector.broadcast %1910 : vector<2x1xi1> to vector<2x32xi1>
    %1912 = arith.select %1911, %1885, %1822 : vector<2x32xi1>, vector<2x32xf32>
    %c0_748 = arith.constant 0 : index
    %c0_749 = arith.constant 0 : index
    %1913 = vector.load %arg12[%c0_748, %c0_749] : memref<2x32xf32, #tpu.memory_space<vmem>>, vector<2x32xf32>
    tpu.vector_store %arg12[%c0_748, %c0_749], %1912 {strides = array<i32>} : memref<2x32xf32, #tpu.memory_space<vmem>>, vector<2x32xf32>,
    %1914 = arith.index_cast %c15_i32_713 : i32 to index
    %c0_750 = arith.constant 0 : index
    %c0_751 = arith.constant 0 : index
    %1915 = vector.load %arg5[%1914, %c0_750, %c0_751] : memref<16x2x32xf32, #tpu.memory_space<vmem>>, vector<1x2x32xf32>
    %1916 = vector.shape_cast %1915 : vector<1x2x32xf32> to vector<2x32xf32>
    %cst_752 = arith.constant 0.000000e+00 : f32
    %1917 = vector.shape_cast %1892 : vector<2x1xi1> to vector<2x1xi1>
    %1918 = vector.broadcast %1917 : vector<2x1xi1> to vector<2x32xi1>
    %1919 = vector.broadcast %cst_752 : f32 to vector<2x32xf32>
    %1920 = arith.select %1918, %1862, %1919 : vector<2x32xi1>, vector<2x32xf32>
    %1921 = arith.addf %1916, %1920 : vector<2x32xf32>
    %1922 = arith.index_cast %c15_i32_713 : i32 to index
    %c0_753 = arith.constant 0 : index
    %c0_754 = arith.constant 0 : index
    %1923 = vector.load %arg5[%1922, %c0_753, %c0_754] : memref<16x2x32xf32, #tpu.memory_space<vmem>>, vector<1x2x32xf32>
    %1924 = vector.shape_cast %1923 : vector<1x2x32xf32> to vector<2x32xf32>
    %1925 = vector.shape_cast %1921 : vector<2x32xf32> to vector<1x2x32xf32>
    tpu.vector_store %arg5[%1922, %c0_753, %c0_754], %1925 {strides = array<i32>} : memref<16x2x32xf32, #tpu.memory_space<vmem>>, vector<1x2x32xf32>,
    %1926 = arith.index_cast %1818 : i32 to index
    %c0_755 = arith.constant 0 : index
    %c0_756 = arith.constant 0 : index
    %1927 = vector.load %arg5[%1926, %c0_755, %c0_756] : memref<16x2x32xf32, #tpu.memory_space<vmem>>, vector<1x2x32xf32>
    %1928 = vector.shape_cast %1927 : vector<1x2x32xf32> to vector<2x32xf32>
    %cst_757 = arith.constant 0.000000e+00 : f32
    %1929 = vector.shape_cast %1897 : vector<2x1xi1> to vector<2x1xi1>
    %1930 = vector.broadcast %1929 : vector<2x1xi1> to vector<2x32xi1>
    %1931 = vector.broadcast %cst_757 : f32 to vector<2x32xf32>
    %1932 = arith.select %1930, %1887, %1931 : vector<2x32xi1>, vector<2x32xf32>
    %1933 = arith.addf %1928, %1932 : vector<2x32xf32>
    %1934 = arith.index_cast %1818 : i32 to index
    %c0_758 = arith.constant 0 : index
    %c0_759 = arith.constant 0 : index
    %1935 = vector.load %arg5[%1934, %c0_758, %c0_759] : memref<16x2x32xf32, #tpu.memory_space<vmem>>, vector<1x2x32xf32>
    %1936 = vector.shape_cast %1935 : vector<1x2x32xf32> to vector<2x32xf32>
    %1937 = vector.shape_cast %1933 : vector<2x32xf32> to vector<1x2x32xf32>
    tpu.vector_store %arg5[%1934, %c0_758, %c0_759], %1937 {strides = array<i32>} : memref<16x2x32xf32, #tpu.memory_space<vmem>>, vector<1x2x32xf32>,
    %c16_i32 = arith.constant 16 : i32
    %c0_760 = arith.constant 0 : index
    %c0_761 = arith.constant 0 : index
    %1938 = vector.load %arg11[%c0_760, %c0_761] : memref<2x32xf32, #tpu.memory_space<vmem>>, vector<2x32xf32>
    %c0_762 = arith.constant 0 : index
    %c0_763 = arith.constant 0 : index
    %1939 = vector.load %arg6[%c0_762, %c0_763] : memref<2x32xf32, #tpu.memory_space<vmem>>, vector<2x32xf32>
    tpu.vector_store %arg6[%c0_762, %c0_763], %1938 {strides = array<i32>} : memref<2x32xf32, #tpu.memory_space<vmem>>, vector<2x32xf32>,
    %c0_764 = arith.constant 0 : index
    %c0_765 = arith.constant 0 : index
    %1940 = vector.load %arg12[%c0_764, %c0_765] : memref<2x32xf32, #tpu.memory_space<vmem>>, vector<2x32xf32>
    %c0_766 = arith.constant 0 : index
    %c0_767 = arith.constant 0 : index
    %1941 = vector.load %arg7[%c0_766, %c0_767] : memref<2x32xf32, #tpu.memory_space<vmem>>, vector<2x32xf32>
    tpu.vector_store %arg7[%c0_766, %c0_767], %1940 {strides = array<i32>} : memref<2x32xf32, #tpu.memory_space<vmem>>, vector<2x32xf32>,
    return
  }
}

</mosaic_0001>

<bundles_post_ra>
// kernel: seq2seq_forward.3
= control target key start
LH: loop header
LB: loop body
LE: loop exit
PB: predicated region body
PF: predicated region fallthrough
CT: control target
= control target key end

     0   :  { %vm100_vm0 = vcmask 254976   ;;  %vm47_vm1 = vcmask 130048   ;;  %s1525_s0 = inlined_call_operand.vmem [shape: f32[16,16], index: 0, kind: input, shape index: {}]   ;;  %s1526_s1 = inlined_call_operand.vmem [shape: f32[16,128], index: 1, kind: input, shape index: {}]   ;;  %s1527_s2 = inlined_call_operand.vmem [shape: f32[32,128], index: 2, kind: input, shape index: {}]   ;;  %s1528_s3 = inlined_call_operand.vmem [shape: f32[1,128], index: 3, kind: input, shape index: {}]   ;;  %s1529_s4 = inlined_call_operand.vmem [shape: f32[2,32], index: 4, kind: input, shape index: {}]   ;;  %s1530_s5 = inlined_call_operand.vmem [shape: f32[2,32], index: 5, kind: input, shape index: {}]   ;;  %s1531_s6 = inlined_call_operand.vmem [shape: f32[2,16,32], index: 6, kind: input, shape index: {}]   ;;  %s1532_s7 = inlined_call_operand.vmem [shape: f32[2,1,16], index: 7, kind: input, shape index: {}]   ;;  %s1533_s8 = inlined_call_operand.vmem [shape: f32[64,32], index: 8, kind: input, shape index: {}]   ;;  %s1534_s9 = inlined_call_operand.vmem [shape: f32[32,128], index: 9, kind: input, shape index: {}]   ;;  %s1535_s10 = inlined_call_operand.vmem [shape: f32[1,128], index: 10, kind: input, shape index: {}]   ;;  %s1536_s11 = inlined_call_operand.hbm [shape: f32[2,8,128], index: 11, kind: output, shape index: {}]  }
   0x1   :  { %v42_v0 = vld [vmem:[%s1526_s1 + $0x8] sm:$0xff]  ;;  %v41_v1 = vld [vmem:[%s1526_s1] sm:$0xff]  ;;  %v110_v3 = vld [vmem:[%s1527_s2 + $0x18] sm:$0xff] }
   0x2   :  { %68 = vmatpush.msra.mxu0 %v42_v0  ;;  %v39_v2 = vld [vmem:[%s1525_s0] sm:$0xff]  ;;  %v109_v4 = vld [vmem:[%s1527_s2 + $0x10] sm:$0xff]  ;;  %127 = vmatpush.msra.mxu1 %v110_v3  ;;  %v108_v6 = vld [vmem:[%s1527_s2 + $0x8] sm:$0xff] }
   0x3   :  { %v99_v5 = vld [vmem:[%s1529_s4] sm:$0x3]  ;;  %296 = vmatpush.msra.mxu3 %v110_v3  ;;  %466 = vmatpush.msra.mxu2 %v110_v3 }
   0x4   :  { %69 = vmatpush.msra.mxu0 %v41_v1  ;;  %101 = vst.msk [vmem:[#allocation3] sm:$0x3] %vm100_vm0, %v99_v5  ;;  %128 = vmatpush.msra.mxu1 %v109_v4 }
   0x5   :  { %1090 = vmatmul.msk.f32.vlgmr.msra.gmra.mxu0 %vm47_vm1, %v39_v2 }
   0x6   :  { %16 = vsyncpa [#allocation7], 0  ;;  %v107_v7 = vld [vmem:[%s1527_s2] sm:$0xff]  ;;  %211 = vmatpush.msrb.mxu0 %v110_v3  ;;  %297 = vmatpush.msra.mxu3 %v109_v4  ;;  %vm111_vm2 = vcmask 261120   ;;  %s1239_s15 = smov 96   ;;  %v40_v43 = vld [vmem:[%s1525_s0 + $0x8] sm:$0xff] }
   0x7   :  { %129 = vmatpush.msra.mxu1 %v108_v6  ;;  %467 = vmatpush.msra.mxu2 %v109_v4  ;;  %v102_v9 = vld [vmem:[%s1530_s5] sm:$0x3]  ;;  %s1237_s5 = smov 64   ;;  %s1078_s28 = sshll.u32 %s1536_s11, 4  ;;  %s1079_s28 = int_to_ptr.hbm [resolvable:$true] %s1078_s28 }
   0x8   :  { %212 = vmatpush.msrb.mxu0 %v109_v4  ;;  %298 = vmatpush.msra.mxu3 %v108_v6  ;;  %103 = vst.msk [vmem:[#allocation4] sm:$0x3] %vm100_vm0, %v102_v9  ;;  %v1338_v10 = vld [vmem:[%s1528_s3] ss:$0 sm:$0xff]  ;;  %s1238_s3 = smov 32   ;;  %s1242_s1 = smov 128  }
   0x9   :  { %130 = vmatpush.msra.mxu1 %v107_v7  ;;  %468 = vmatpush.msra.mxu2 %v108_v6  ;;  %s1243_s29 = smov 8  }
   0xa   :  { %213 = vmatpush.msrb.mxu0 %v108_v6  ;;  %299 = vmatpush.msra.mxu3 %v107_v7 }
   0xb   :  { %v104_v8 = vld [vmem:[#allocation3] sm:$0x3]  ;;  %381 = vmatpush.msrb.mxu1 %v110_v3  ;;  %469 = vmatpush.msra.mxu2 %v107_v7 }
   0xc   :  { %1092 = vmatmul.msk.f32.vlgmr.msra.gmra.mxu1 %vm111_vm2, %v104_v8  ;;  %214 = vmatpush.msrb.mxu0 %v107_v7 }
   0xd   :  { %382 = vmatpush.msrb.mxu1 %v109_v4  ;;  %551 = vmatpush.msrb.mxu3 %v110_v3 }
   0xe   :  { %636 = vmatpush.msra.mxu0 %v110_v3 }
   0xf   :  { %383 = vmatpush.msrb.mxu1 %v108_v6  ;;  %552 = vmatpush.msrb.mxu3 %v109_v4  ;;  %v105_v20 = vld [vmem:[#allocation4] sm:$0x3] }
  0x10   :  { %637 = vmatpush.msra.mxu0 %v109_v4 }
  0x11   :  { %384 = vmatpush.msrb.mxu1 %v107_v7  ;;  %553 = vmatpush.msrb.mxu3 %v108_v6 }
  0x12   :  { %638 = vmatpush.msra.mxu0 %v108_v6 }
  0x13   :  { %721 = vmatpush.msra.mxu1 %v110_v3  ;;  %554 = vmatpush.msrb.mxu3 %v107_v7 }
  0x14   :  { %639 = vmatpush.msra.mxu0 %v107_v7 }
  0x15   :  { %722 = vmatpush.msra.mxu1 %v109_v4  ;;  %1091 = vmatmul.msk.f32.gmra.mxu0 %vm47_vm1, %v40_v43 }
  0x17   :  { %723 = vmatpush.msra.mxu1 %v108_v6 }
  0x19   :  { %724 = vmatpush.msra.mxu1 %v107_v7 }
  0x82   :  { %v71_v11 = vpop.f32.mrf.mxu0 }
  0x83   :  { %v72_v12 = vadd.f32 %v1338_v10, %v71_v11 }
  0x85   :  { %v79_v13 = vrot.slane %v72_v12, 2  ;;  %v80_v14 = vrot.slane %v72_v12, 4  ;;  %v81_v15 = vrot.slane %v72_v12, 6  ;;  %91 = vst [vmem:[#allocation2] sm:$0x3] %v72_v12 }
  0x87   :  { %92 = vst [vmem:[#allocation2 + $0x2] sm:$0x3] %v79_v13 }
  0x88   :  { %93 = vst [vmem:[#allocation2 + $0x4] sm:$0x3] %v80_v14 }
  0x89   :  { %94 = vst [vmem:[#allocation2 + $0x6] sm:$0x3] %v81_v15  ;;  %v132_v16 = vpop.f32.mrf.mxu1 }
  0x8c   :  { %v106_v17 = vld [vmem:[#allocation2] sm:$0x3] }
  0x8d   :  { %v135_v18 = vadd.f32 %v132_v16, %v106_v17 }
  0x8e   :  { %v191_v53 = vld [vmem:[#allocation2 + $0x2] sm:$0x3] }
  0x8f   :  { %1135 = vtanh.f32 %v135_v18  ;;  %v1093_v21 = vmul.f32 -1.442695, %v135_v18 }
  0x91   :  { %1137 = vpow2.f32 %v1093_v21 }
  0x92   :  { %v74_v48 = vpop.f32.mrf.mxu0 }
  0x93   :  { %v75_v49 = vadd.f32 %v1338_v10, %v74_v48 }
  0x95   :  { %v1136_v19 = vpop.eup %1135  ;;  %v82_v50 = vrot.slane %v75_v49, 2  ;;  %v83_v51 = vrot.slane %v75_v49, 4  ;;  %v84_v52 = vrot.slane %v75_v49, 6  ;;  %95 = vst [vmem:[#allocation2 + $0x8] sm:$0x3] %v75_v49 }
  0x96   :  { %162 = vrot.lane.b32.xlu0 %v1136_v19, %s1237_s5  ;;  %v276_v19 = vld [vmem:[#allocation2 + $0x4] sm:$0x3]  ;;  %v361_v49 = vld [vmem:[#allocation2 + $0x6] sm:$0x3] }
  0x97   :  { %v1138_v22 = vpop.eup %1137  ;;  %96 = vst [vmem:[#allocation2 + $0xa] sm:$0x3] %v82_v50 }
  0x98   :  { %v139_v23 = vadd.f32 1.0, %v1138_v22  ;;  %97 = vst [vmem:[#allocation2 + $0xc] sm:$0x3] %v83_v51 }
  0x99   :  { %98 = vst [vmem:[#allocation2 + $0xe] sm:$0x3] %v84_v52 }
  0x9a   :  { %1139 = vrcp.f32 %v139_v23  ;;  %v151_v29 = vand.u32 2147483648, %v139_v23  ;;  %vm145_vm4 = vweird.f32 %v139_v23  ;;  %v149_v30 = vand.u32 2147483647, %v139_v23 }
  0x9c   :  { %v152_v32 = vor.u32 1.1754944e-38, %v151_v29  ;;  %vm150_vm6 = vcmp.eq.f32.partialorder %v149_v30, 8.507059e+37 }
  0x9e   :  { %157 = vrot.lane.b32.xlu0 %v105_v20, %s1238_s3 }
  0xa0   :  { %v1140_v24 = vpop.eup %1139 }
  0xa1   :  { %v141_v25 = vmul.f32 %v1140_v24, %v139_v23  ;;  %vm146_vm3 = vweird.f32 %v1140_v24 }
  0xa2   :  { %vm147_vm5 = vmor %vm145_vm4, %vm146_vm3 }
  0xa3   :  { %v142_v26 = vsub.f32 1.0, %v141_v25 }
  0xa5   :  { %v143_v27 = vmul.f32 %v1140_v24, %v142_v26 }
  0xa7   :  { %v144_v28 = vadd.f32 %v1140_v24, %v143_v27 }
  0xa9   :  { %v148_v31 = vsel %vm147_vm5, %v1140_v24, %v144_v28 }
  0xaa   :  { %v153_v34 = vsel %vm150_vm6, %v152_v32, %v148_v31 }
 0x108   :  { %v163_v33 = vpop.permute.xlu0 %162 }
 0x109   :  { %v165_v35 = vmul.f32 %v163_v33, %v153_v34 }
 0x10b   :  { %167 = vrot.lane.b32.xlu1 %v165_v35, %s1238_s3 }
 0x110   :  { %v158_v36 = vpop.permute.xlu0 %157 }
 0x111   :  { %v160_v37 = vmul.f32 %v158_v36, %v153_v34 }
 0x17d   :  { %v168_v38 = vpop.permute.xlu1 %167 }
 0x17e   :  { %v170_v39 = vadd.f32 %v168_v38, %v160_v37 }
 0x180   :  { %1141 = vtanh.f32 %v170_v39 }
 0x186   :  { %v1142_v40 = vpop.eup %1141 }
 0x187   :  { %173 = vrot.lane.b32.xlu1 %v1142_v40, %s1237_s5 }
 0x1f9   :  { %v174_v41 = vpop.permute.xlu1 %173 }
 0x1fa   :  { %v176_v42 = vmul.f32 %v174_v41, %v153_v34 }
 0x1fc   :  { %178 = vrot.lane.b32.xlu2 %v176_v42, %s1238_s3 }
 0x204   :  { %184 = vrot.lane.b32.xlu2 %v170_v39, %s1239_s15 }
 0x256   :  { %v179_v44 = vpop.permute.xlu2 %178 }
 0x257   :  { %181 = vst.msk [vmem:[#allocation5] sm:$0x3] %vm100_vm0, %v179_v44 }
 0x258   :  { %182 = vst.msk [vmem:[#allocation3] sm:$0x3] %vm100_vm0, %v179_v44 }
 0x25e   :  { %v185_v45 = vpop.permute.xlu2 %184 }
 0x25f   :  { %187 = vst.msk [vmem:[#allocation4] sm:$0x3] %vm100_vm0, %v185_v45  ;;  %v188_v46 = vld [vmem:[#allocation3] sm:$0x3] }
 0x260   :  { %1094 = vmatmul.msk.f32.vlgmr.msrb.gmra.mxu0 %vm111_vm2, %v188_v46 }
 0x266   :  { %v189_v47 = vld [vmem:[#allocation4] sm:$0x3] }
 0x267   :  { %241 = vrot.lane.b32.xlu1 %v189_v47, %s1238_s3 }
 0x2d9   :  { %v242_v8 = vpop.permute.xlu1 %241 }
 0x2dd   :  { %v216_v54 = vpop.f32.mrf.mxu0 }
 0x2de   :  { %v219_v55 = vadd.f32 %v216_v54, %v191_v53 }
 0x2e0   :  { %1143 = vtanh.f32 %v219_v55  ;;  %v1095_v57 = vmul.f32 -1.442695, %v219_v55 }
 0x2e2   :  { %1145 = vpow2.f32 %v1095_v57 }
 0x2e6   :  { %v1144_v56 = vpop.eup %1143 }
 0x2e7   :  { %246 = vrot.lane.b32.xlu0 %v1144_v56, %s1237_s5 }
 0x2e8   :  { %v1146_v58 = vpop.eup %1145 }
 0x2e9   :  { %v223_v59 = vadd.f32 1.0, %v1146_v58 }
 0x2eb   :  { %1147 = vrcp.f32 %v223_v59  ;;  %v235_v1 = vand.u32 2147483648, %v223_v59  ;;  %vm229_vm8 = vweird.f32 %v223_v59  ;;  %v233_v2 = vand.u32 2147483647, %v223_v59 }
 0x2ed   :  { %v236_v4 = vor.u32 1.1754944e-38, %v235_v1  ;;  %vm234_vm10 = vcmp.eq.f32.partialorder %v233_v2, 8.507059e+37 }
 0x2f1   :  { %v1148_v60 = vpop.eup %1147 }
 0x2f2   :  { %v225_v61 = vmul.f32 %v1148_v60, %v223_v59  ;;  %vm230_vm7 = vweird.f32 %v1148_v60 }
 0x2f3   :  { %vm231_vm9 = vmor %vm229_vm8, %vm230_vm7 }
 0x2f4   :  { %v226_v62 = vsub.f32 1.0, %v225_v61 }
 0x2f6   :  { %v227_v63 = vmul.f32 %v1148_v60, %v226_v62 }
 0x2f8   :  { %v228_v0 = vadd.f32 %v1148_v60, %v227_v63 }
 0x2fa   :  { %v232_v3 = vsel %vm231_vm9, %v1148_v60, %v228_v0 }
 0x2fb   :  { %v237_v6 = vsel %vm234_vm10, %v236_v4, %v232_v3 }
 0x2fc   :  { %v244_v9 = vmul.f32 %v242_v8, %v237_v6 }
 0x359   :  { %v247_v5 = vpop.permute.xlu0 %246 }
 0x35a   :  { %v249_v7 = vmul.f32 %v247_v5, %v237_v6 }
 0x35c   :  { %251 = vrot.lane.b32.xlu2 %v249_v7, %s1238_s3 }
 0x3b6   :  { %v252_v10 = vpop.permute.xlu2 %251 }
 0x3b7   :  { %v254_v11 = vadd.f32 %v252_v10, %v244_v9 }
 0x3b9   :  { %1149 = vtanh.f32 %v254_v11  ;;  %269 = vrot.lane.b32.xlu2 %v254_v11, %s1239_s15 }
 0x3bf   :  { %v1150_v12 = vpop.eup %1149 }
 0x3c0   :  { %257 = vrot.lane.b32.xlu0 %v1150_v12, %s1237_s5 }
 0x413   :  { %v270_v13 = vpop.permute.xlu2 %269 }
 0x414   :  { %272 = vst.msk [vmem:[#allocation4] sm:$0x3] %vm100_vm0, %v270_v13 }
 0x41b   :  { %v274_v16 = vld [vmem:[#allocation4] sm:$0x3] }
 0x432   :  { %v258_v14 = vpop.permute.xlu0 %257 }
 0x433   :  { %v260_v15 = vmul.f32 %v258_v14, %v237_v6 }
 0x435   :  { %262 = vrot.lane.b32.xlu1 %v260_v15, %s1238_s3  ;;  %v446_v15 = vld [vmem:[#allocation2 + $0x8] sm:$0x3] }
 0x43d   :  { %326 = vrot.lane.b32.xlu1 %v274_v16, %s1238_s3 }
 0x4a7   :  { %v263_v17 = vpop.permute.xlu1 %262 }
 0x4a8   :  { %266 = vst.msk [vmem:[#allocation5 + $0x2] sm:$0x3] %vm100_vm0, %v263_v17 }
 0x4a9   :  { %267 = vst.msk [vmem:[#allocation3] sm:$0x3] %vm100_vm0, %v263_v17 }
 0x4af   :  { %v327_v38 = vpop.permute.xlu1 %326 }
 0x4b0   :  { %v273_v18 = vld [vmem:[#allocation3] sm:$0x3] }
 0x4b1   :  { %1096 = vmatmul.msk.f32.vlgmr.msra.gmra.mxu3 %vm111_vm2, %v273_v18 }
 0x534   :  { %v301_v20 = vpop.f32.mrf.mxu3 }
 0x535   :  { %v304_v21 = vadd.f32 %v301_v20, %v276_v19 }
 0x537   :  { %1151 = vtanh.f32 %v304_v21  ;;  %v1097_v23 = vmul.f32 -1.442695, %v304_v21 }
 0x539   :  { %1153 = vpow2.f32 %v1097_v23 }
 0x53d   :  { %v1152_v22 = vpop.eup %1151 }
 0x53e   :  { %331 = vrot.lane.b32.xlu0 %v1152_v22, %s1237_s5 }
 0x53f   :  { %v1154_v24 = vpop.eup %1153 }
 0x540   :  { %v308_v25 = vadd.f32 1.0, %v1154_v24 }
 0x542   :  { %1155 = vrcp.f32 %v308_v25  ;;  %v320_v31 = vand.u32 2147483648, %v308_v25  ;;  %vm314_vm12 = vweird.f32 %v308_v25  ;;  %v318_v32 = vand.u32 2147483647, %v308_v25 }
 0x544   :  { %v321_v34 = vor.u32 1.1754944e-38, %v320_v31  ;;  %vm319_vm14 = vcmp.eq.f32.partialorder %v318_v32, 8.507059e+37 }
 0x548   :  { %v1156_v26 = vpop.eup %1155 }
 0x549   :  { %v310_v27 = vmul.f32 %v1156_v26, %v308_v25  ;;  %vm315_vm11 = vweird.f32 %v1156_v26 }
 0x54a   :  { %vm316_vm13 = vmor %vm314_vm12, %vm315_vm11 }
 0x54b   :  { %v311_v28 = vsub.f32 1.0, %v310_v27 }
 0x54d   :  { %v312_v29 = vmul.f32 %v1156_v26, %v311_v28 }
 0x54f   :  { %v313_v30 = vadd.f32 %v1156_v26, %v312_v29 }
 0x551   :  { %v317_v33 = vsel %vm316_vm13, %v1156_v26, %v313_v30 }
 0x552   :  { %v322_v36 = vsel %vm319_vm14, %v321_v34, %v317_v33 }
 0x553   :  { %v329_v39 = vmul.f32 %v327_v38, %v322_v36 }
 0x5b0   :  { %v332_v35 = vpop.permute.xlu0 %331 }
 0x5b1   :  { %v334_v37 = vmul.f32 %v332_v35, %v322_v36 }
 0x5b3   :  { %336 = vrot.lane.b32.xlu2 %v334_v37, %s1238_s3 }
 0x60d   :  { %v337_v40 = vpop.permute.xlu2 %336 }
 0x60e   :  { %v339_v41 = vadd.f32 %v337_v40, %v329_v39 }
 0x610   :  { %1157 = vtanh.f32 %v339_v41  ;;  %354 = vrot.lane.b32.xlu2 %v339_v41, %s1239_s15 }
 0x616   :  { %v1158_v42 = vpop.eup %1157 }
 0x617   :  { %342 = vrot.lane.b32.xlu0 %v1158_v42, %s1237_s5 }
 0x66a   :  { %v355_v43 = vpop.permute.xlu2 %354 }
 0x66b   :  { %357 = vst.msk [vmem:[#allocation4] sm:$0x3] %vm100_vm0, %v355_v43 }
 0x672   :  { %v359_v46 = vld [vmem:[#allocation4] sm:$0x3] }
 0x689   :  { %v343_v44 = vpop.permute.xlu0 %342 }
 0x68a   :  { %v345_v45 = vmul.f32 %v343_v44, %v322_v36 }
 0x68c   :  { %347 = vrot.lane.b32.xlu1 %v345_v45, %s1238_s3  ;;  %v531_v45 = vld [vmem:[#allocation2 + $0xa] sm:$0x3] }
 0x694   :  { %411 = vrot.lane.b32.xlu1 %v359_v46, %s1238_s3 }
 0x6fe   :  { %v348_v47 = vpop.permute.xlu1 %347 }
 0x6ff   :  { %351 = vst.msk [vmem:[#allocation5 + $0x4] sm:$0x3] %vm100_vm0, %v348_v47 }
 0x700   :  { %352 = vst.msk [vmem:[#allocation3] sm:$0x3] %vm100_vm0, %v348_v47 }
 0x706   :  { %v412_v4 = vpop.permute.xlu1 %411 }
 0x707   :  { %v358_v48 = vld [vmem:[#allocation3] sm:$0x3] }
 0x708   :  { %1098 = vmatmul.msk.f32.vlgmr.msrb.gmra.mxu1 %vm111_vm2, %v358_v48 }
 0x785   :  { %v386_v50 = vpop.f32.mrf.mxu1 }
 0x786   :  { %v389_v51 = vadd.f32 %v386_v50, %v361_v49 }
 0x788   :  { %1159 = vtanh.f32 %v389_v51  ;;  %v1099_v53 = vmul.f32 -1.442695, %v389_v51 }
 0x78a   :  { %1161 = vpow2.f32 %v1099_v53 }
 0x78e   :  { %v1160_v52 = vpop.eup %1159 }
 0x78f   :  { %416 = vrot.lane.b32.xlu0 %v1160_v52, %s1237_s5 }
 0x790   :  { %v1162_v54 = vpop.eup %1161 }
 0x791   :  { %v393_v55 = vadd.f32 1.0, %v1162_v54 }
 0x793   :  { %1163 = vrcp.f32 %v393_v55  ;;  %v405_v61 = vand.u32 2147483648, %v393_v55  ;;  %vm399_vm3 = vweird.f32 %v393_v55  ;;  %v403_v62 = vand.u32 2147483647, %v393_v55 }
 0x795   :  { %v406_v0 = vor.u32 1.1754944e-38, %v405_v61  ;;  %vm404_vm5 = vcmp.eq.f32.partialorder %v403_v62, 8.507059e+37 }
 0x799   :  { %v1164_v56 = vpop.eup %1163 }
 0x79a   :  { %v395_v57 = vmul.f32 %v1164_v56, %v393_v55  ;;  %vm400_vm15 = vweird.f32 %v1164_v56 }
 0x79b   :  { %vm401_vm4 = vmor %vm399_vm3, %vm400_vm15 }
 0x79c   :  { %v396_v58 = vsub.f32 1.0, %v395_v57 }
 0x79e   :  { %v397_v59 = vmul.f32 %v1164_v56, %v396_v58 }
 0x7a0   :  { %v398_v60 = vadd.f32 %v1164_v56, %v397_v59 }
 0x7a2   :  { %v402_v63 = vsel %vm401_vm4, %v1164_v56, %v398_v60 }
 0x7a3   :  { %v407_v2 = vsel %vm404_vm5, %v406_v0, %v402_v63 }
 0x7a4   :  { %v414_v5 = vmul.f32 %v412_v4, %v407_v2 }
 0x801   :  { %v417_v1 = vpop.permute.xlu0 %416 }
 0x802   :  { %v419_v3 = vmul.f32 %v417_v1, %v407_v2 }
 0x804   :  { %421 = vrot.lane.b32.xlu2 %v419_v3, %s1238_s3 }
 0x85e   :  { %v422_v6 = vpop.permute.xlu2 %421 }
 0x85f   :  { %v424_v7 = vadd.f32 %v422_v6, %v414_v5 }
 0x861   :  { %1165 = vtanh.f32 %v424_v7  ;;  %439 = vrot.lane.b32.xlu2 %v424_v7, %s1239_s15 }
 0x867   :  { %v1166_v8 = vpop.eup %1165 }
 0x868   :  { %427 = vrot.lane.b32.xlu0 %v1166_v8, %s1237_s5 }
 0x8bb   :  { %v440_v9 = vpop.permute.xlu2 %439 }
 0x8bc   :  { %442 = vst.msk [vmem:[#allocation4] sm:$0x3] %vm100_vm0, %v440_v9 }
 0x8c3   :  { %v444_v12 = vld [vmem:[#allocation4] sm:$0x3] }
 0x8da   :  { %v428_v10 = vpop.permute.xlu0 %427 }
 0x8db   :  { %v430_v11 = vmul.f32 %v428_v10, %v407_v2 }
 0x8dd   :  { %432 = vrot.lane.b32.xlu1 %v430_v11, %s1238_s3  ;;  %v616_v11 = vld [vmem:[#allocation2 + $0xc] sm:$0x3] }
 0x8e5   :  { %496 = vrot.lane.b32.xlu1 %v444_v12, %s1238_s3 }
 0x94f   :  { %v433_v13 = vpop.permute.xlu1 %432 }
 0x950   :  { %436 = vst.msk [vmem:[#allocation5 + $0x6] sm:$0x3] %vm100_vm0, %v433_v13 }
 0x951   :  { %437 = vst.msk [vmem:[#allocation3] sm:$0x3] %vm100_vm0, %v433_v13 }
 0x957   :  { %v497_v34 = vpop.permute.xlu1 %496 }
 0x958   :  { %v443_v14 = vld [vmem:[#allocation3] sm:$0x3] }
 0x959   :  { %1100 = vmatmul.msk.f32.vlgmr.msra.gmra.mxu2 %vm111_vm2, %v443_v14 }
 0x9dc   :  { %v471_v16 = vpop.f32.mrf.mxu2 }
 0x9dd   :  { %v474_v17 = vadd.f32 %v471_v16, %v446_v15 }
 0x9df   :  { %1167 = vtanh.f32 %v474_v17  ;;  %v1101_v19 = vmul.f32 -1.442695, %v474_v17 }
 0x9e1   :  { %1169 = vpow2.f32 %v1101_v19 }
 0x9e5   :  { %v1168_v18 = vpop.eup %1167 }
 0x9e6   :  { %501 = vrot.lane.b32.xlu0 %v1168_v18, %s1237_s5 }
 0x9e7   :  { %v1170_v20 = vpop.eup %1169 }
 0x9e8   :  { %v478_v21 = vadd.f32 1.0, %v1170_v20 }
 0x9ea   :  { %1171 = vrcp.f32 %v478_v21  ;;  %v490_v27 = vand.u32 2147483648, %v478_v21  ;;  %vm484_vm7 = vweird.f32 %v478_v21  ;;  %v488_v28 = vand.u32 2147483647, %v478_v21 }
 0x9ec   :  { %v491_v30 = vor.u32 1.1754944e-38, %v490_v27  ;;  %vm489_vm9 = vcmp.eq.f32.partialorder %v488_v28, 8.507059e+37 }
 0x9f0   :  { %v1172_v22 = vpop.eup %1171 }
 0x9f1   :  { %v480_v23 = vmul.f32 %v1172_v22, %v478_v21  ;;  %vm485_vm6 = vweird.f32 %v1172_v22 }
 0x9f2   :  { %vm486_vm8 = vmor %vm484_vm7, %vm485_vm6 }
 0x9f3   :  { %v481_v24 = vsub.f32 1.0, %v480_v23 }
 0x9f5   :  { %v482_v25 = vmul.f32 %v1172_v22, %v481_v24 }
 0x9f7   :  { %v483_v26 = vadd.f32 %v1172_v22, %v482_v25 }
 0x9f9   :  { %v487_v29 = vsel %vm486_vm8, %v1172_v22, %v483_v26 }
 0x9fa   :  { %v492_v32 = vsel %vm489_vm9, %v491_v30, %v487_v29  ;;  %vm815_vm9 = vcmask 1042434  }
 0x9fb   :  { %v499_v35 = vmul.f32 %v497_v34, %v492_v32 }
 0xa58   :  { %v502_v31 = vpop.permute.xlu0 %501 }
 0xa59   :  { %v504_v33 = vmul.f32 %v502_v31, %v492_v32 }
 0xa5b   :  { %506 = vrot.lane.b32.xlu2 %v504_v33, %s1238_s3 }
 0xab5   :  { %v507_v36 = vpop.permute.xlu2 %506 }
 0xab6   :  { %v509_v37 = vadd.f32 %v507_v36, %v499_v35 }
 0xab8   :  { %1173 = vtanh.f32 %v509_v37  ;;  %524 = vrot.lane.b32.xlu2 %v509_v37, %s1239_s15 }
 0xabe   :  { %v1174_v38 = vpop.eup %1173 }
 0xabf   :  { %512 = vrot.lane.b32.xlu0 %v1174_v38, %s1237_s5 }
 0xb12   :  { %v525_v39 = vpop.permute.xlu2 %524 }
 0xb13   :  { %527 = vst.msk [vmem:[#allocation4] sm:$0x3] %vm100_vm0, %v525_v39 }
 0xb1a   :  { %v529_v42 = vld [vmem:[#allocation4] sm:$0x3] }
 0xb31   :  { %v513_v40 = vpop.permute.xlu0 %512 }
 0xb32   :  { %v515_v41 = vmul.f32 %v513_v40, %v492_v32 }
 0xb34   :  { %517 = vrot.lane.b32.xlu1 %v515_v41, %s1238_s3  ;;  %v701_v41 = vld [vmem:[#allocation2 + $0xe] sm:$0x3] }
 0xb3c   :  { %581 = vrot.lane.b32.xlu1 %v529_v42, %s1238_s3 }
 0xba6   :  { %v518_v43 = vpop.permute.xlu1 %517 }
 0xba7   :  { %521 = vst.msk [vmem:[#allocation5 + $0x8] sm:$0x3] %vm100_vm0, %v518_v43 }
 0xba8   :  { %522 = vst.msk [vmem:[#allocation3] sm:$0x3] %vm100_vm0, %v518_v43 }
 0xbae   :  { %v582_v0 = vpop.permute.xlu1 %581 }
 0xbaf   :  { %v528_v44 = vld [vmem:[#allocation3] sm:$0x3] }
 0xbb0   :  { %1102 = vmatmul.msk.f32.vlgmr.msrb.gmra.mxu3 %vm111_vm2, %v528_v44 }
 0xc33   :  { %v556_v46 = vpop.f32.mrf.mxu3 }
 0xc34   :  { %v559_v47 = vadd.f32 %v556_v46, %v531_v45 }
 0xc36   :  { %1175 = vtanh.f32 %v559_v47  ;;  %v1103_v49 = vmul.f32 -1.442695, %v559_v47 }
 0xc38   :  { %1177 = vpow2.f32 %v1103_v49 }
 0xc3c   :  { %v1176_v48 = vpop.eup %1175 }
 0xc3d   :  { %586 = vrot.lane.b32.xlu0 %v1176_v48, %s1237_s5 }
 0xc3e   :  { %v1178_v50 = vpop.eup %1177 }
 0xc3f   :  { %v563_v51 = vadd.f32 1.0, %v1178_v50 }
 0xc41   :  { %1179 = vrcp.f32 %v563_v51  ;;  %v575_v57 = vand.u32 2147483648, %v563_v51  ;;  %vm569_vm11 = vweird.f32 %v563_v51  ;;  %v573_v58 = vand.u32 2147483647, %v563_v51 }
 0xc43   :  { %v576_v60 = vor.u32 1.1754944e-38, %v575_v57  ;;  %vm574_vm13 = vcmp.eq.f32.partialorder %v573_v58, 8.507059e+37 }
 0xc47   :  { %v1180_v52 = vpop.eup %1179 }
 0xc48   :  { %v565_v53 = vmul.f32 %v1180_v52, %v563_v51  ;;  %vm570_vm10 = vweird.f32 %v1180_v52 }
 0xc49   :  { %vm571_vm12 = vmor %vm569_vm11, %vm570_vm10  ;;  %vm812_vm10 = vcmask 1041409   ;;  %vm818_vm11 = vcmask 1043459  }
 0xc4a   :  { %v566_v54 = vsub.f32 1.0, %v565_v53 }
 0xc4c   :  { %v567_v55 = vmul.f32 %v1180_v52, %v566_v54 }
 0xc4e   :  { %v568_v56 = vadd.f32 %v1180_v52, %v567_v55 }
 0xc50   :  { %v572_v59 = vsel %vm571_vm12, %v1180_v52, %v568_v56  ;;  %vm821_vm12 = vcmask 1044484  }
 0xc51   :  { %v577_v62 = vsel %vm574_vm13, %v576_v60, %v572_v59  ;;  %vm824_vm13 = vcmask 1045509  }
 0xc52   :  { %v584_v1 = vmul.f32 %v582_v0, %v577_v62 }
 0xcaf   :  { %v587_v61 = vpop.permute.xlu0 %586 }
 0xcb0   :  { %v589_v63 = vmul.f32 %v587_v61, %v577_v62 }
 0xcb2   :  { %591 = vrot.lane.b32.xlu2 %v589_v63, %s1238_s3 }
 0xd0c   :  { %v592_v2 = vpop.permute.xlu2 %591 }
 0xd0d   :  { %v594_v3 = vadd.f32 %v592_v2, %v584_v1 }
 0xd0f   :  { %1181 = vtanh.f32 %v594_v3  ;;  %609 = vrot.lane.b32.xlu2 %v594_v3, %s1239_s15  ;;  %v792_v3 = vld [vmem:[%s1531_s6 + $0x8] sm:$0xff] }
 0xd10   :  { %1108 = vmatpush.xpose.msk.msrb.mxu2 %vm111_vm2, %v792_v3  ;;  %952 = vmatpush.msrb.mxu0 %v792_v3 }
 0xd15   :  { %v1182_v4 = vpop.eup %1181 }
 0xd16   :  { %597 = vrot.lane.b32.xlu0 %v1182_v4, %s1237_s5  ;;  %v794_v4 = vld [vmem:[%s1531_s6 + $0x18] sm:$0xff] }
 0xd17   :  { %1117 = vmatpush.xpose.msk.msra.mxu3 %vm111_vm2, %v794_v4  ;;  %975 = vmatpush.msrb.mxu1 %v794_v4 }
 0xd69   :  { %v610_v5 = vpop.permute.xlu2 %609 }
 0xd6a   :  { %612 = vst.msk [vmem:[#allocation4] sm:$0x3] %vm100_vm0, %v610_v5  ;;  %v791_v5 = vld [vmem:[%s1531_s6] sm:$0xff] }
 0xd6b   :  { %953 = vmatpush.msrb.mxu0 %v791_v5  ;;  %1109 = vmatpush.xpose.msk.msrb.mxu2 %vm111_vm2, %v791_v5 }
 0xd71   :  { %v614_v8 = vld [vmem:[#allocation4] sm:$0x3] }
 0xd88   :  { %v598_v6 = vpop.permute.xlu0 %597 }
 0xd89   :  { %v600_v7 = vmul.f32 %v598_v6, %v577_v62  ;;  %v793_v6 = vld [vmem:[%s1531_s6 + $0x10] sm:$0xff] }
 0xd8a   :  { %976 = vmatpush.msrb.mxu1 %v793_v6  ;;  %1118 = vmatpush.xpose.msk.msra.mxu3 %vm111_vm2, %v793_v6 }
 0xd8b   :  { %602 = vrot.lane.b32.xlu1 %v600_v7, %s1238_s3  ;;  %v784_v7 = vld [vmem:[#allocation5 + $0x2] sm:$0x3] }
 0xd93   :  { %666 = vrot.lane.b32.xlu1 %v614_v8, %s1238_s3  ;;  %v785_v8 = vld [vmem:[#allocation5 + $0x4] sm:$0x3] }
 0xdfd   :  { %v603_v9 = vpop.permute.xlu1 %602 }
 0xdfe   :  { %606 = vst.msk [vmem:[#allocation5 + $0xa] sm:$0x3] %vm100_vm0, %v603_v9 }
 0xdff   :  { %607 = vst.msk [vmem:[#allocation3] sm:$0x3] %vm100_vm0, %v603_v9 }
 0xe05   :  { %v667_v30 = vpop.permute.xlu1 %666 }
 0xe06   :  { %v613_v10 = vld [vmem:[#allocation3] sm:$0x3] }
 0xe07   :  { %1104 = vmatmul.msk.f32.vlgmr.msra.gmra.mxu0 %vm111_vm2, %v613_v10  ;;  %v783_v10 = vld [vmem:[#allocation5] sm:$0x3] }
 0xe84   :  { %v641_v12 = vpop.f32.mrf.mxu0 }
 0xe85   :  { %v644_v13 = vadd.f32 %v641_v12, %v616_v11  ;;  %v786_v11 = vld [vmem:[#allocation5 + $0x6] sm:$0x3]  ;;  %v787_v12 = vld [vmem:[#allocation5 + $0x8] sm:$0x3] }
 0xe87   :  { %1183 = vtanh.f32 %v644_v13  ;;  %v1105_v15 = vmul.f32 -1.442695, %v644_v13  ;;  %v811_v13 = vrot.slane %v784_v7, 7 }
 0xe89   :  { %1185 = vpow2.f32 %v1105_v15  ;;  %v814_v15 = vrot.slane %v785_v8, 6 }
 0xe8d   :  { %v1184_v14 = vpop.eup %1183 }
 0xe8e   :  { %671 = vrot.lane.b32.xlu0 %v1184_v14, %s1237_s5  ;;  %v788_v14 = vld [vmem:[#allocation5 + $0xa] sm:$0x3] }
 0xe8f   :  { %v1186_v16 = vpop.eup %1185 }
 0xe90   :  { %v648_v17 = vadd.f32 1.0, %v1186_v16 }
 0xe92   :  { %1187 = vrcp.f32 %v648_v17  ;;  %v660_v23 = vand.u32 2147483648, %v648_v17  ;;  %vm654_vm15 = vweird.f32 %v648_v17  ;;  %v658_v24 = vand.u32 2147483647, %v648_v17 }
 0xe94   :  { %v661_v26 = vor.u32 1.1754944e-38, %v660_v23  ;;  %vm659_vm4 = vcmp.eq.f32.partialorder %v658_v24, 8.507059e+37  ;;  %v1113_v23 = vrot.slane %v786_v11, 6 }
 0xe98   :  { %v1188_v18 = vpop.eup %1187 }
 0xe99   :  { %v650_v19 = vmul.f32 %v1188_v18, %v648_v17  ;;  %vm655_vm14 = vweird.f32 %v1188_v18  ;;  %v803_v17 = vrot.slane %v783_v10, 1 }
 0xe9a   :  { %vm656_vm3 = vmor %vm654_vm15, %vm655_vm14  ;;  %vm827_vm14 = vcmask 1046534   ;;  %vm829_vm15 = vcmask 1047559  }
 0xe9b   :  { %v651_v20 = vsub.f32 1.0, %v650_v19  ;;  %v820_v19 = vrot.slane %v787_v12, 4 }
 0xe9d   :  { %v652_v21 = vmul.f32 %v1188_v18, %v651_v20  ;;  %v1112_v20 = vrot.slane %v785_v8, 7 }
 0xe9f   :  { %v653_v22 = vadd.f32 %v1188_v18, %v652_v21  ;;  %v813_v21 = vsel %vm812_vm10, %v811_v13, %v783_v10  ;;  %v997_v13 = vld [vmem:[%s1533_s8 + $0x20] sm:$0xff] }
 0xea0   :  { %v816_v24 = vsel %vm815_vm9, %v814_v15, %v813_v21  ;;  %v995_v15 = vld [vmem:[%s1533_s8 + $0x10] sm:$0xff] }
 0xea1   :  { %v657_v25 = vsel %vm656_vm3, %v1188_v18, %v653_v22  ;;  %v817_v18 = vrot.slane %v786_v11, 5  ;;  %v823_v22 = vrot.slane %v788_v14, 3  ;;  %v1000_v11 = vld [vmem:[%s1533_s8 + $0x38] sm:$0xff] }
 0xea2   :  { %v662_v28 = vsel %vm659_vm4, %v661_v26, %v657_v25  ;;  %v1114_v26 = vrot.slane %v787_v12, 5  ;;  %1016 = vmatpush.msra.mxu2 %v1000_v11  ;;  %v998_v12 = vld [vmem:[%s1533_s8 + $0x28] sm:$0xff] }
 0xea3   :  { %v669_v31 = vmul.f32 %v667_v30, %v662_v28 }
 0xf00   :  { %v672_v27 = vpop.permute.xlu0 %671 }
 0xf01   :  { %v674_v29 = vmul.f32 %v672_v27, %v662_v28  ;;  %v819_v27 = vsel %vm818_vm11, %v817_v18, %v816_v24  ;;  %v1036_v24 = vld [vmem:[%s1534_s9 + $0x18] sm:$0xff] }
 0xf02   :  { %1059 = vmatpush.msrb.mxu3 %v1036_v24 }
 0xf03   :  { %676 = vrot.lane.b32.xlu2 %v674_v29, %s1238_s3  ;;  %v860_v29 = vsel %vm812_vm10, %v784_v7, %v803_v17 }
 0xf5d   :  { %v677_v32 = vpop.permute.xlu2 %676 }
 0xf5e   :  { %v679_v33 = vadd.f32 %v677_v32, %v669_v31  ;;  %v822_v31 = vsel %vm821_vm12, %v820_v19, %v819_v27  ;;  %v993_v19 = vld [vmem:[%s1533_s8] sm:$0xff] }
 0xf5f   :  { %v1033_v27 = vld [vmem:[%s1534_s9] sm:$0xff] }
 0xf60   :  { %1189 = vtanh.f32 %v679_v33  ;;  %694 = vrot.lane.b32.xlu2 %v679_v33, %s1239_s15  ;;  %v862_v33 = vsel %vm815_vm9, %v1112_v20, %v860_v29 }
 0xf66   :  { %v1190_v34 = vpop.eup %1189 }
 0xf67   :  { %682 = vrot.lane.b32.xlu0 %v1190_v34, %s1237_s5 }
 0xfba   :  { %v695_v35 = vpop.permute.xlu2 %694 }
 0xfbb   :  { %697 = vst.msk [vmem:[#allocation4] sm:$0x3] %vm100_vm0, %v695_v35  ;;  %v825_v35 = vsel %vm824_vm13, %v823_v22, %v822_v31 }
 0xfc2   :  { %v699_v38 = vld [vmem:[#allocation4] sm:$0x3] }
 0xfd9   :  { %v683_v36 = vpop.permute.xlu0 %682 }
 0xfda   :  { %v685_v37 = vmul.f32 %v683_v36, %v662_v28  ;;  %v1115_v28 = vrot.slane %v788_v14, 4  ;;  %v864_v36 = vsel %vm818_vm11, %v1113_v23, %v862_v33  ;;  %v996_v14 = vld [vmem:[%s1533_s8 + $0x18] sm:$0xff] }
 0xfdc   :  { %687 = vrot.lane.b32.xlu1 %v685_v37, %s1238_s3 }
 0xfe4   :  { %751 = vrot.lane.b32.xlu1 %v699_v38, %s1238_s3  ;;  %v866_v38 = vsel %vm821_vm12, %v1114_v26, %v864_v36  ;;  %v1034_v26 = vld [vmem:[%s1534_s9 + $0x8] sm:$0xff] }
0x104e   :  { %v688_v39 = vpop.permute.xlu1 %687 }
0x104f   :  { %691 = vst.msk [vmem:[#allocation5 + $0xc] sm:$0x3] %vm100_vm0, %v688_v39 }
0x1050   :  { %692 = vst.msk [vmem:[#allocation3] sm:$0x3] %vm100_vm0, %v688_v39 }
0x1056   :  { %v752_v60 = vpop.permute.xlu1 %751  ;;  %v789_v16 = vld [vmem:[#allocation5 + $0xc] sm:$0x3] }
0x1057   :  { %v698_v40 = vld [vmem:[#allocation3] sm:$0x3]  ;;  %v826_v25 = vrot.slane %v789_v16, 2  ;;  %v1116_v32 = vrot.slane %v789_v16, 3  ;;  %v994_v16 = vld [vmem:[%s1533_s8 + $0x8] sm:$0xff] }
0x1058   :  { %1106 = vmatmul.msk.f32.vlgmr.msra.gmra.mxu1 %vm111_vm2, %v698_v40 }
0x1059   :  { %v828_v37 = vsel %vm827_vm14, %v826_v25, %v825_v35  ;;  %v1035_v25 = vld [vmem:[%s1534_s9 + $0x10] sm:$0xff]  ;;  %s1241_s9 = smov [#allocation6]  }
0x105a   :  { %1060 = vmatpush.msrb.mxu3 %v1035_v25  ;;  %s1076_s26 = sshll.u32 %s1241_s9, 4  ;;  %s1077_s26 = int_to_ptr.vmem [resolvable:$true] %s1076_s26 }
0x105c   :  { %1061 = vmatpush.msrb.mxu3 %v1034_v26 }
0x105e   :  { %1062 = vmatpush.msrb.mxu3 %v1033_v27 }
0x10d5   :  { %v726_v42 = vpop.f32.mrf.mxu1 }
0x10d6   :  { %v729_v43 = vadd.f32 %v726_v42, %v701_v41  ;;  %v868_v41 = vsel %vm824_vm13, %v1115_v28, %v866_v38 }
0x10d7   :  { %v870_v42 = vsel %vm827_vm14, %v1116_v32, %v868_v41  ;;  %v1134_v32 = vld [vmem:[%s1535_s10] ss:$0 sm:$0xff] }
0x10d8   :  { %1191 = vtanh.f32 %v729_v43  ;;  %v1107_v45 = vmul.f32 -1.442695, %v729_v43 }
0x10da   :  { %1193 = vpow2.f32 %v1107_v45  ;;  %v902_v45 = vld [vmem:[%s1532_s7 + $0x1] sm:$0x1] }
0x10db   :  { %vm904_vm4 = vcmp.gt.f32.partialorder %v902_v45, 0.0 }
0x10de   :  { %v1192_v44 = vpop.eup %1191 }
0x10df   :  { %756 = vrot.lane.b32.xlu0 %v1192_v44, %s1237_s5  ;;  %v901_v44 = vld [vmem:[%s1532_s7] sm:$0x1] }
0x10e0   :  { %v1194_v46 = vpop.eup %1193  ;;  %vm903_vm3 = vcmp.gt.f32.partialorder %v901_v44, 0.0 }
0x10e1   :  { %v733_v47 = vadd.f32 1.0, %v1194_v46  ;;  %v1240_v46 = vmov 0  }
0x10e3   :  { %1195 = vrcp.f32 %v733_v47  ;;  %v745_v53 = vand.u32 2147483648, %v733_v47  ;;  %vm739_vm6 = vweird.f32 %v733_v47  ;;  %v743_v54 = vand.u32 2147483647, %v733_v47 }
0x10e5   :  { %v746_v56 = vor.u32 1.1754944e-38, %v745_v53  ;;  %vm744_vm8 = vcmp.eq.f32.partialorder %v743_v54, 8.507059e+37 }
0x10e9   :  { %v1196_v48 = vpop.eup %1195 }
0x10ea   :  { %v735_v49 = vmul.f32 %v1196_v48, %v733_v47  ;;  %vm740_vm5 = vweird.f32 %v1196_v48  ;;  %v905_v47 = vsel %vm903_vm3, 1, %v1240_v46 }
0x10eb   :  { %vm741_vm7 = vmor %vm739_vm6, %vm740_vm5 }
0x10ec   :  { %v736_v50 = vsub.f32 1.0, %v735_v49  ;;  %v907_v49 = vperm.slane %v905_v47, 0 }
0x10ee   :  { %v737_v51 = vmul.f32 %v1196_v48, %v736_v50  ;;  %vm909_vm5 = vcmp.eq.s32.totalorder %v907_v49, 1 }
0x10f0   :  { %v738_v52 = vadd.f32 %v1196_v48, %v737_v51 }
0x10f2   :  { %v742_v55 = vsel %vm741_vm7, %v1196_v48, %v738_v52  ;;  %v906_v48 = vsel %vm904_vm4, 1, %v1240_v46 }
0x10f3   :  { %v747_v58 = vsel %vm744_vm8, %v746_v56, %v742_v55  ;;  %v908_v50 = vperm.slane %v906_v48, 0 }
0x10f4   :  { %v754_v61 = vmul.f32 %v752_v60, %v747_v58 }
0x10f5   :  { %vm910_vm6 = vcmp.eq.s32.totalorder %v908_v50, 1 }
0x1151   :  { %v757_v57 = vpop.permute.xlu0 %756 }
0x1152   :  { %v759_v59 = vmul.f32 %v757_v57, %v747_v58 }
0x1154   :  { %761 = vrot.lane.b32.xlu2 %v759_v59, %s1238_s3 }
0x11ae   :  { %v762_v62 = vpop.permute.xlu2 %761 }
0x11af   :  { %v1419_v63 = vadd.f32 %v762_v62, %v754_v61 }
0x11b1   :  { %1197 = vtanh.f32 %v1419_v63 }
0x11b7   :  { %v1198_v0 = vpop.eup %1197 }
0x11b8   :  { %767 = vrot.lane.b32.xlu0 %v1198_v0, %s1237_s5 }
0x122a   :  { %v768_v1 = vpop.permute.xlu0 %767 }
0x122b   :  { %v770_v2 = vmul.f32 %v768_v1, %v747_v58 }
0x122d   :  { %772 = vrot.lane.b32.xlu1 %v770_v2, %s1238_s3 }
0x129f   :  { %v773_v9 = vpop.permute.xlu1 %772 }
0x12a0   :  { %776 = vst.msk [vmem:[#allocation5 + $0xe] sm:$0x3] %vm100_vm0, %v773_v9 }
0x12a1   :  { %777 = vst.msk [vmem:[#allocation3] sm:$0x3] %vm100_vm0, %v773_v9 }
0x12a7   :  { %v790_v30 = vld [vmem:[#allocation5 + $0xe] sm:$0x3] }
0x12a8   :  { %v810_v34 = vrot.slane %v790_v30, 1 }
0x12aa   :  { %v1450_v39 = vsel %vm829_vm15, %v810_v34, %v828_v37  ;;  %v871_v40 = vrot.slane %v810_v34, 1 }
0x12ab   :  { %1110 = vmatmul.msk.f32.vlgmr.msrb.gmra.mxu2 %vm111_vm2, %v1450_v39 }
0x12ac   :  { %v1456_v43 = vsel %vm829_vm15, %v871_v40, %v870_v42 }
0x12ad   :  { %1119 = vmatmul.msk.f32.vlgmr.msra.gmra.mxu3 %vm111_vm2, %v1456_v43 }
0x132e   :  { %v856_v51 = vpop.f32.mrf.mxu2 }
0x132f   :  { %v911_v52 = vsel %vm909_vm5, %v856_v51, -1e+09 }
0x1330   :  { %v898_v53 = vpop.f32.mrf.mxu3  ;;  %v913_v54 = vsel %vm47_vm1, %v911_v52, -inf }
0x1331   :  { %v912_v55 = vsel %vm910_vm6, %v898_v53, -1e+09  ;;  %914 = vmax.xlane.f32.xlu2 %v913_v54 }
0x1332   :  { %v916_v56 = vsel %vm47_vm1, %v912_v55, -inf }
0x1333   :  { %917 = vmax.xlane.f32.xlu0 %v916_v56 }
0x13a4   :  { %v915_v57 = vpop.xlane.xlu2 %914 }
0x13a5   :  { %v919_v58 = vsub.f32 %v911_v52, %v915_v57 }
0x13a6   :  { %v918_v59 = vpop.xlane.xlu0 %917 }
0x13a7   :  { %v921_v60 = vmul.f32 1.442695, %v919_v58  ;;  %v920_v61 = vsub.f32 %v912_v55, %v918_v59 }
0x13a9   :  { %1199 = vpow2.f32 %v921_v60  ;;  %v923_v62 = vmul.f32 1.442695, %v920_v61 }
0x13ab   :  { %1201 = vpow2.f32 %v923_v62 }
0x13af   :  { %v1200_v0 = vpop.eup %1199 }
0x13b0   :  { %v925_v1 = vsel %vm47_vm1, %v1200_v0, 0.0 }
0x13b1   :  { %v1202_v2 = vpop.eup %1201  ;;  %926 = vadd.xlane.f32.xlu1 %v925_v1 }
0x13b2   :  { %v928_v3 = vsel %vm47_vm1, %v1202_v2, 0.0 }
0x13b3   :  { %929 = vadd.xlane.f32.xlu2 %v928_v3 }
0x13ca   :  { %779 = vrot.lane.b32.xlu1 %v1419_v63, %s1239_s15  ;;  %v999_v63 = vld [vmem:[%s1533_s8 + $0x30] sm:$0xff] }
0x13cb   :  { %1017 = vmatpush.msra.mxu2 %v999_v63 }
0x13cd   :  { %1018 = vmatpush.msra.mxu2 %v998_v12 }
0x13cf   :  { %1019 = vmatpush.msra.mxu2 %v997_v13 }
0x13d1   :  { %1020 = vmatpush.msra.mxu2 %v996_v14 }
0x13d3   :  { %1021 = vmatpush.msra.mxu2 %v995_v15 }
0x13d5   :  { %1022 = vmatpush.msra.mxu2 %v994_v16 }
0x13d7   :  { %1023 = vmatpush.msra.mxu2 %v993_v19 }
0x1424   :  { %v927_v4 = vpop.xlane.xlu1 %926 }
0x1425   :  { %1203 = vrcp.f32 %v927_v4 }
0x1426   :  { %v930_v5 = vpop.xlane.xlu2 %929 }
0x1427   :  { %1205 = vrcp.f32 %v930_v5 }
0x142b   :  { %v1204_v6 = vpop.eup %1203 }
0x142c   :  { %v933_v7 = vmul.f32 %v1204_v6, %v1200_v0 }
0x142d   :  { %v1206_v8 = vpop.eup %1205 }
0x142e   :  { %v934_v9 = vmul.f32 %v1206_v8, %v1202_v2  ;;  %1120 = vmatmul.msk.f32.vlgmr.msrb.gmra.mxu0 %vm47_vm1, %v933_v7 }
0x1430   :  { %1121 = vmatmul.msk.f32.vlgmr.msrb.gmra.mxu1 %vm47_vm1, %v934_v9 }
0x143c   :  { %v780_v10 = vpop.permute.xlu1 %779 }
0x143d   :  { %782 = vst.msk [vmem:[#allocation4] sm:$0x3] %vm100_vm0, %v780_v10  ;;  %vm1001_vm0 = vcmask 523264  }
0x14ab   :  { %v955_v17 = vpop.f32.mrf.mxu0 }
0x14ac   :  { %985 = vrot.lane.b32.xlu2 %v955_v17, %s1238_s3 }
0x14ad   :  { %v978_v18 = vpop.f32.mrf.mxu1 }
0x14ae   :  { %987 = vrot.lane.b32.xlu0 %v978_v18, %s1238_s3 }
0x1506   :  { %v986_v20 = vpop.permute.xlu2 %985 }
0x1507   :  { %v991_v21 = vsel %vm111_vm2, %v1450_v39, %v986_v20 }
0x1508   :  { %1122 = vmatmul.msk.f32.vlgmr.msra.gmra.mxu2 %vm1001_vm0, %v991_v21 }
0x1520   :  { %v988_v22 = vpop.permute.xlu0 %987 }
0x1521   :  { %v992_v23 = vsel %vm111_vm2, %v1456_v43, %v988_v22 }
0x1522   :  { %1123 = vmatmul.msk.f32.gmra.mxu2 %vm1001_vm0, %v992_v23 }
0x158b   :  { %v1025_v28 = vpop.f32.mrf.mxu2 }
0x158c   :  { %1207 = vtanh.f32 %v1025_v28 }
0x1592   :  { %v1208_v29 = vpop.eup %1207 }
0x1593   :  { %1124 = vmatmul.msk.f32.vlgmr.msrb.gmra.mxu3 %vm111_vm2, %v1208_v29 }
0x15a5   :  { %v1028_v30 = vpop.f32.mrf.mxu2 }
0x15a6   :  { %1209 = vtanh.f32 %v1028_v30 }
0x15ac   :  { %v1210_v31 = vpop.eup %1209 }
0x15ad   :  { %1125 = vmatmul.msk.f32.gmra.mxu3 %vm111_vm2, %v1210_v31 }
0x1616   :  { %v1064_v33 = vpop.f32.mrf.mxu3 }
0x1617   :  { %v1065_v34 = vadd.f32 %v1134_v32, %v1064_v33 }
0x1619   :  { %1070 = vst [vmem:[#allocation6] sm:$0xff] %v1065_v34 }
0x1630   :  { %v1067_v35 = vpop.f32.mrf.mxu3 }
0x1631   :  { %v1068_v36 = vadd.f32 %v1134_v32, %v1067_v35 }
0x1633   :  { %1071 = vst [vmem:[#allocation6 + $0x8] sm:$0xff] %v1068_v36 }
0x1634   :  { %1084 = dma.vmem_to_hbm [thread:$0]  %s1077_s26, 256, %s1079_s28, [#allocation7], %s1242_s1, %s1242_s1, %s1243_s29  }
0x1635   :  { %1235 = dma.done.wait [#allocation7], 256  }
0x1636   :  { %1236 = vsyncadd [#allocation7], 4294967040 }
0x1637   :  { %1089 = vsyncpa [#allocation7], 1 }

// kernel: seq2seq_forward.2
= control target key start
LH: loop header
LB: loop body
LE: loop exit
PB: predicated region body
PF: predicated region fallthrough
CT: control target
= control target key end

     0   :  { %vm184_vm0 = vcmask 254976   ;;  %v6043_v0 = vmov 0.0   ;;  %vm37_vm1 = vcmask 130048   ;;  %s4231_s22 = smov 32   ;;  %vm213_vm2 = vcmask 261120   ;;  %s4234_s8 = smov 96   ;;  %s6022_s1 = inlined_call_operand.vmem [shape: f32[16,256], index: 1, kind: input, shape index: {}]   ;;  %s6023_s0 = inlined_call_operand.vmem [shape: f32[32,16], index: 0, kind: input, shape index: {}]   ;;  %s6024_s2 = inlined_call_operand.vmem [shape: f32[64,256], index: 2, kind: input, shape index: {}]   ;;  %s6025_s3 = inlined_call_operand.vmem [shape: f32[1,256], index: 3, kind: input, shape index: {}]   ;;  %s6026_s4 = inlined_call_operand.vmem [shape: f32[16,2,1], index: 4, kind: input, shape index: {}]   ;;  %s6027_s5 = inlined_call_operand.vmem [shape: f32[16,2,32], index: 5, kind: output, shape index: {0}]   ;;  %s6028_s6 = inlined_call_operand.vmem [shape: f32[2,32], index: 6, kind: output, shape index: {1}]   ;;  %s6029_s7 = inlined_call_operand.vmem [shape: f32[2,32], index: 7, kind: output, shape index: {2}]  }
   0x1   :  { %187 = vst.msk [vmem:[#allocation5] sm:$0x3] %vm184_vm0, %v6043_v0  ;;  %v30_v1 = vld [vmem:[%s6022_s1 + $0x18] sm:$0xff]  ;;  %v29_v2 = vld [vmem:[%s6022_s1 + $0x10] sm:$0xff]  ;;  %v28_v3 = vld [vmem:[%s6022_s1 + $0x8] sm:$0xff]  ;;  %vm231_vm3 = vcmask 523264  }
   0x2   :  { %185 = vst.msk [vmem:[#allocation3] sm:$0x3] %vm184_vm0, %v6043_v0  ;;  %93 = vmatpush.msra.mxu1 %v30_v1  ;;  %64 = vmatpush.msra.mxu0 %v29_v2  ;;  %v23_v4 = vld [vmem:[%s6023_s0] sm:$0xff]  ;;  %v229_v6 = vld [vmem:[%s6024_s2 + $0x70] sm:$0xff]  ;;  %v230_v7 = vld [vmem:[%s6024_s2 + $0x78] sm:$0xff]  ;;  %vm120_vm4 = vcmask 1041408  }
   0x3   :  { %v27_v5 = vld [vmem:[%s6022_s1] sm:$0xff]  ;;  %186 = vst.msk [vmem:[#allocation4] sm:$0x3] %vm184_vm0, %v6043_v0  ;;  %v228_v9 = vld [vmem:[%s6024_s2 + $0x68] sm:$0xff]  ;;  %243 = vmatpush.msra.mxu2 %v229_v6  ;;  %263 = vmatpush.msra.mxu3 %v230_v7  ;;  %v225_v10 = vld [vmem:[%s6024_s2 + $0x50] sm:$0xff]  ;;  %vm122_vm5 = vcmask 1043458  }
   0x4   :  { %188 = vst.msk [vmem:[#allocation6] sm:$0x3] %vm184_vm0, %v6043_v0  ;;  %94 = vmatpush.msra.mxu1 %v28_v3  ;;  %65 = vmatpush.msra.mxu0 %v27_v5  ;;  %v227_v8 = vld [vmem:[%s6024_s2 + $0x60] sm:$0xff]  ;;  %v226_v11 = vld [vmem:[%s6024_s2 + $0x58] sm:$0xff]  ;;  %v224_v14 = vld [vmem:[%s6024_s2 + $0x48] sm:$0xff]  ;;  %vm125_vm6 = vcmask 1045508  }
   0x5   :  { %3808 = vmatmul.msk.f32.vlgmr.msra.gmra.mxu1 %vm37_vm1, %v23_v4  ;;  %3804 = vmatmul.msk.f32.vlgmr.msra.gmra.mxu0 %vm37_vm1, %v23_v4  ;;  %v223_v13 = vld [vmem:[%s6024_s2 + $0x40] sm:$0xff]  ;;  %v24_v15 = vld [vmem:[%s6023_s0 + $0x8] sm:$0xff]  ;;  %v221_v16 = vld [vmem:[%s6024_s2 + $0x30] sm:$0xff]  ;;  %vm128_vm7 = vcmask 1045504  }
   0x6   :  { %714 = vmatpush.msrb.mxu1 %v230_v7  ;;  %694 = vmatpush.msrb.mxu0 %v229_v6  ;;  %v222_v17 = vld [vmem:[%s6024_s2 + $0x38] sm:$0xff]  ;;  %v219_v18 = vld [vmem:[%s6024_s2 + $0x20] sm:$0xff]  ;;  %v220_v19 = vld [vmem:[%s6024_s2 + $0x28] sm:$0xff] }
   0x7   :  { %244 = vmatpush.msra.mxu2 %v227_v8  ;;  %264 = vmatpush.msra.mxu3 %v228_v9  ;;  %v217_v20 = vld [vmem:[%s6024_s2 + $0x10] sm:$0xff]  ;;  %v218_v21 = vld [vmem:[%s6024_s2 + $0x18] sm:$0xff]  ;;  %v215_v24 = vld [vmem:[%s6024_s2] sm:$0xff] }
   0x8   :  { %v4318_v12 = vld [vmem:[#allocation5] sm:$0x3]  ;;  %715 = vmatpush.msrb.mxu1 %v228_v9  ;;  %695 = vmatpush.msrb.mxu0 %v227_v8  ;;  %v25_v22 = vld [vmem:[%s6023_s0 + $0x10] sm:$0xff]  ;;  %v26_v23 = vld [vmem:[%s6023_s0 + $0x18] sm:$0xff] }
   0x9   :  { %210 = vrot.lane.b32.xlu0 %v4318_v12, %s4231_s22  ;;  %245 = vmatpush.msra.mxu2 %v225_v10  ;;  %v216_v25 = vld [vmem:[%s6024_s2 + $0x8] sm:$0xff]  ;;  %v31_v29 = vld [vmem:[%s6025_s3] sm:$0x3]  ;;  %s4232_s3 = smov 64  }
   0xa   :  { %265 = vmatpush.msra.mxu3 %v226_v11  ;;  %716 = vmatpush.msrb.mxu1 %v226_v11  ;;  %v4367_v26 = vld [vmem:[#allocation3] sm:$0x3]  ;;  %v34_v30 = vperm.slane %v31_v29, 1  ;;  %v33_v31 = vperm.slane %v31_v29, 0 }
   0xb   :  { %246 = vmatpush.msra.mxu2 %v223_v13  ;;  %696 = vmatpush.msrb.mxu0 %v225_v10 }
   0xc   :  { %266 = vmatpush.msra.mxu3 %v224_v14  ;;  %717 = vmatpush.msrb.mxu1 %v224_v14 }
   0xd   :  { %3809 = vmatmul.msk.f32.gmra.mxu1 %vm37_vm1, %v24_v15  ;;  %3805 = vmatmul.msk.f32.gmra.mxu0 %vm37_vm1, %v24_v15 }
   0xe   :  { %247 = vmatpush.msra.mxu2 %v221_v16  ;;  %267 = vmatpush.msra.mxu3 %v222_v17 }
   0xf   :  { %718 = vmatpush.msrb.mxu1 %v222_v17  ;;  %697 = vmatpush.msrb.mxu0 %v223_v13 }
  0x10   :  { %248 = vmatpush.msra.mxu2 %v219_v18  ;;  %268 = vmatpush.msra.mxu3 %v220_v19 }
  0x11   :  { %719 = vmatpush.msrb.mxu1 %v220_v19  ;;  %698 = vmatpush.msrb.mxu0 %v221_v16 }
  0x12   :  { %249 = vmatpush.msra.mxu2 %v217_v20  ;;  %269 = vmatpush.msra.mxu3 %v218_v21 }
  0x13   :  { %720 = vmatpush.msrb.mxu1 %v218_v21  ;;  %699 = vmatpush.msrb.mxu0 %v219_v18 }
  0x14   :  { %250 = vmatpush.msra.mxu2 %v215_v24  ;;  %270 = vmatpush.msra.mxu3 %v216_v25 }
  0x15   :  { %3810 = vmatmul.msk.f32.gmra.mxu1 %vm37_vm1, %v25_v22  ;;  %3806 = vmatmul.msk.f32.gmra.mxu0 %vm37_vm1, %v25_v22 }
  0x16   :  { %700 = vmatpush.msrb.mxu0 %v217_v20  ;;  %467 = vmatpush.msrb.mxu2 %v229_v6 }
  0x17   :  { %487 = vmatpush.msrb.mxu3 %v230_v7  ;;  %721 = vmatpush.msrb.mxu1 %v216_v25 }
  0x18   :  { %701 = vmatpush.msrb.mxu0 %v215_v24  ;;  %468 = vmatpush.msrb.mxu2 %v227_v8 }
  0x19   :  { %488 = vmatpush.msrb.mxu3 %v228_v9 }
  0x1a   :  { %469 = vmatpush.msrb.mxu2 %v225_v10 }
  0x1b   :  { %489 = vmatpush.msrb.mxu3 %v226_v11 }
  0x1c   :  { %470 = vmatpush.msrb.mxu2 %v223_v13 }
  0x1d   :  { %3811 = vmatmul.msk.f32.gmra.mxu1 %vm37_vm1, %v26_v23  ;;  %3807 = vmatmul.msk.f32.gmra.mxu0 %vm37_vm1, %v26_v23 }
  0x1e   :  { %490 = vmatpush.msrb.mxu3 %v224_v14  ;;  %471 = vmatpush.msrb.mxu2 %v221_v16 }
  0x20   :  { %491 = vmatpush.msrb.mxu3 %v222_v17  ;;  %472 = vmatpush.msrb.mxu2 %v219_v18 }
  0x22   :  { %492 = vmatpush.msrb.mxu3 %v220_v19  ;;  %473 = vmatpush.msrb.mxu2 %v217_v20 }
  0x24   :  { %493 = vmatpush.msrb.mxu3 %v218_v21  ;;  %474 = vmatpush.msrb.mxu2 %v215_v24 }
  0x26   :  { %494 = vmatpush.msrb.mxu3 %v216_v25 }
  0x7b   :  { %v211_v27 = vpop.permute.xlu0 %210 }
  0x7c   :  { %v214_v28 = vsel %vm213_vm2, %v4367_v26, %v211_v27 }
  0x7d   :  { %3812 = vmatmul.msk.f32.vlgmr.msra.gmra.mxu2 %vm231_vm3, %v214_v28  ;;  %3813 = vmatmul.msk.f32.vlgmr.msra.gmra.mxu3 %vm231_vm3, %v214_v28  ;;  %v4394_v28 = vld [vmem:[#allocation4] sm:$0x3] }
  0x82   :  { %v96_v32 = vpop.f32.mrf.mxu1  ;;  %v67_v33 = vpop.f32.mrf.mxu0 }
  0x83   :  { %v97_v34 = vadd.f32 %v96_v32, %v34_v30  ;;  %v68_v35 = vadd.f32 %v67_v33, %v33_v31 }
  0x85   :  { %v116_v36 = vrot.slane %v97_v34, 6 }
  0x87   :  { %v121_v37 = vsel %vm120_vm4, %v68_v35, %v116_v36  ;;  %v123_v38 = vsel %vm122_vm5, %v68_v35, %v116_v36  ;;  %v126_v39 = vsel %vm125_vm6, %v68_v35, %v116_v36  ;;  %v129_v40 = vsel %vm128_vm7, %v116_v36, %v68_v35 }
  0x88   :  { %v124_v41 = vrot.slane %v123_v38, 2  ;;  %v127_v42 = vrot.slane %v126_v39, 4  ;;  %v130_v43 = vrot.slane %v129_v40, 6  ;;  %168 = vst [vmem:[#allocation2] sm:$0xf] %v121_v37 }
  0x8a   :  { %169 = vst [vmem:[#allocation2 + $0x4] sm:$0xf] %v124_v41  ;;  %v99_v44 = vpop.f32.mrf.mxu1  ;;  %v70_v45 = vpop.f32.mrf.mxu0 }
  0x8b   :  { %170 = vst [vmem:[#allocation2 + $0x8] sm:$0xf] %v127_v42  ;;  %v100_v46 = vadd.f32 %v99_v44, %v34_v30  ;;  %v71_v47 = vadd.f32 %v70_v45, %v33_v31 }
  0x8c   :  { %171 = vst [vmem:[#allocation2 + $0xc] sm:$0xf] %v130_v43 }
  0x8d   :  { %v117_v48 = vrot.slane %v100_v46, 6 }
  0x8f   :  { %v131_v49 = vsel %vm120_vm4, %v71_v47, %v117_v48  ;;  %v132_v50 = vsel %vm122_vm5, %v71_v47, %v117_v48  ;;  %v134_v51 = vsel %vm125_vm6, %v71_v47, %v117_v48  ;;  %v136_v52 = vsel %vm128_vm7, %v117_v48, %v71_v47  ;;  %v275_v21 = vld [vmem:[#allocation2] sm:$0xf] }
  0x90   :  { %v133_v53 = vrot.slane %v132_v50, 2  ;;  %v135_v54 = vrot.slane %v134_v51, 4  ;;  %v137_v55 = vrot.slane %v136_v52, 6  ;;  %172 = vst [vmem:[#allocation2 + $0x10] sm:$0xf] %v131_v49 }
  0x92   :  { %173 = vst [vmem:[#allocation2 + $0x14] sm:$0xf] %v133_v53  ;;  %v102_v56 = vpop.f32.mrf.mxu1  ;;  %v73_v57 = vpop.f32.mrf.mxu0 }
  0x93   :  { %174 = vst [vmem:[#allocation2 + $0x18] sm:$0xf] %v135_v54  ;;  %v103_v58 = vadd.f32 %v102_v56, %v34_v30  ;;  %v74_v59 = vadd.f32 %v73_v57, %v33_v31 }
  0x94   :  { %175 = vst [vmem:[#allocation2 + $0x1c] sm:$0xf] %v137_v55 }
  0x95   :  { %v118_v60 = vrot.slane %v103_v58, 6 }
  0x97   :  { %v138_v61 = vsel %vm120_vm4, %v74_v59, %v118_v60  ;;  %v139_v62 = vsel %vm122_vm5, %v74_v59, %v118_v60  ;;  %v141_v63 = vsel %vm125_vm6, %v74_v59, %v118_v60  ;;  %v143_v1 = vsel %vm128_vm7, %v118_v60, %v74_v59  ;;  %v4400_v59 = vld [vmem:[#allocation6] sm:$0x3] }
  0x98   :  { %v140_v2 = vrot.slane %v139_v62, 2  ;;  %v142_v3 = vrot.slane %v141_v63, 4  ;;  %v144_v4 = vrot.slane %v143_v1, 6  ;;  %176 = vst [vmem:[#allocation2 + $0x20] sm:$0xf] %v138_v61 }
  0x9a   :  { %177 = vst [vmem:[#allocation2 + $0x24] sm:$0xf] %v140_v2  ;;  %v105_v5 = vpop.f32.mrf.mxu1  ;;  %v76_v6 = vpop.f32.mrf.mxu0 }
  0x9b   :  { %178 = vst [vmem:[#allocation2 + $0x28] sm:$0xf] %v142_v3  ;;  %v106_v7 = vadd.f32 %v105_v5, %v34_v30  ;;  %v77_v8 = vadd.f32 %v76_v6, %v33_v31 }
  0x9c   :  { %179 = vst [vmem:[#allocation2 + $0x2c] sm:$0xf] %v144_v4 }
  0x9d   :  { %v119_v9 = vrot.slane %v106_v7, 6  ;;  %v3816_v7 = vld [vmem:[%s6026_s4 + $0x1e] sm:$0x3] }
  0x9e   :  { %vm369_vm1 = vcmp.gt.f32.partialorder %v3816_v7, 0.0 }
  0x9f   :  { %v145_v10 = vsel %vm120_vm4, %v77_v8, %v119_v9  ;;  %v146_v11 = vsel %vm122_vm5, %v77_v8, %v119_v9  ;;  %v148_v13 = vsel %vm125_vm6, %v77_v8, %v119_v9  ;;  %v150_v14 = vsel %vm128_vm7, %v119_v9, %v77_v8 }
  0xa0   :  { %v147_v15 = vrot.slane %v146_v11, 2  ;;  %v149_v16 = vrot.slane %v148_v13, 4  ;;  %v151_v17 = vrot.slane %v150_v14, 6  ;;  %180 = vst [vmem:[#allocation2 + $0x30] sm:$0xf] %v145_v10  ;;  %v6047_v8 = vmov 0  }
  0xa1   :  { %3971 = vset.pattern.permute.xlu0 %v6047_v8  ;;  %v391_v9 = vsel %vm369_vm1, 1, %v6047_v8  ;;  %3972 = vset.pattern.permute.xlu2 %v6047_v8  ;;  %v365_v13 = vld [vmem:[%s6026_s4] sm:$0x3] }
  0xa2   :  { %181 = vst [vmem:[#allocation2 + $0x34] sm:$0xf] %v147_v15  ;;  %3973 = vset.pattern.permute.xlu1 %v6047_v8  ;;  %vm366_vm4 = vcmp.gt.f32.partialorder %v365_v13, 0.0 }
  0xa3   :  { %182 = vst [vmem:[#allocation2 + $0x38] sm:$0xf] %v149_v16  ;;  %v370_v15 = vsel %vm366_vm4, 1, %v6047_v8 }
  0xa4   :  { %183 = vst [vmem:[#allocation2 + $0x3c] sm:$0xf] %v151_v17 }
  0xab   :  { %v278_v18 = vld [vmem:[#allocation2 + $0x3c] sm:$0xf] }
  0xac   :  { %v280_v19 = vrot.slane %v278_v18, 2 }
 0x100   :  { %v252_v20 = vpop.f32.mrf.mxu2  ;;  %v272_v22 = vpop.f32.mrf.mxu3 }
 0x101   :  { %v276_v23 = vadd.f32 %v275_v21, %v252_v20  ;;  %v282_v24 = vadd.f32 %v280_v19, %v272_v22 }
 0x103   :  { %3974 = vtanh.f32 %v276_v23  ;;  %v3814_v29 = vmul.f32 -1.442695, %v276_v23  ;;  %v3815_v30 = vmul.f32 -1.442695, %v282_v24 }
 0x104   :  { %3976 = vtanh.f32 %v282_v24 }
 0x105   :  { %3978 = vpow2.f32 %v3814_v29 }
 0x106   :  { %3980 = vpow2.f32 %v3815_v30 }
 0x109   :  { %v3975_v25 = vpop.eup %3974 }
 0x10a   :  { %v3977_v27 = vpop.eup %3976  ;;  %309 = vrot.lane.b32.xlu0 %v3975_v25, %s4232_s3 }
 0x10b   :  { %350 = vrot.lane.b32.xlu1 %v3977_v27, %s4232_s3  ;;  %v3979_v31 = vpop.eup %3978 }
 0x10c   :  { %v3981_v32 = vpop.eup %3980  ;;  %v286_v33 = vadd.f32 1.0, %v3979_v31 }
 0x10d   :  { %v327_v34 = vadd.f32 1.0, %v3981_v32 }
 0x10e   :  { %3982 = vrcp.f32 %v286_v33  ;;  %v298_v45 = vand.u32 2147483648, %v286_v33  ;;  %vm292_vm10 = vweird.f32 %v286_v33  ;;  %v296_v47 = vand.u32 2147483647, %v286_v33 }
 0x10f   :  { %3984 = vrcp.f32 %v327_v34  ;;  %v339_v46 = vand.u32 2147483648, %v327_v34  ;;  %vm333_vm11 = vweird.f32 %v327_v34  ;;  %v337_v48 = vand.u32 2147483647, %v327_v34 }
 0x110   :  { %v299_v51 = vor.u32 1.1754944e-38, %v298_v45  ;;  %vm297_vm14 = vcmp.eq.f32.partialorder %v296_v47, 8.507059e+37 }
 0x111   :  { %v340_v52 = vor.u32 1.1754944e-38, %v339_v46  ;;  %vm338_vm15 = vcmp.eq.f32.partialorder %v337_v48, 8.507059e+37 }
 0x113   :  { %304 = vrot.lane.b32.xlu1 %v4394_v28, %s4231_s22 }
 0x114   :  { %v3983_v35 = vpop.eup %3982 }
 0x115   :  { %v3985_v36 = vpop.eup %3984  ;;  %v288_v37 = vmul.f32 %v3983_v35, %v286_v33  ;;  %vm293_vm8 = vweird.f32 %v3983_v35 }
 0x116   :  { %v329_v38 = vmul.f32 %v3985_v36, %v327_v34  ;;  %vm334_vm9 = vweird.f32 %v3985_v36  ;;  %vm294_vm12 = vmor %vm292_vm10, %vm293_vm8 }
 0x117   :  { %v289_v39 = vsub.f32 1.0, %v288_v37  ;;  %vm335_vm13 = vmor %vm333_vm11, %vm334_vm9 }
 0x118   :  { %v330_v40 = vsub.f32 1.0, %v329_v38  ;;  %v500_v38 = vld [vmem:[#allocation2 + $0x4] sm:$0xf] }
 0x119   :  { %v290_v41 = vmul.f32 %v3983_v35, %v289_v39 }
 0x11a   :  { %v331_v42 = vmul.f32 %v3985_v36, %v330_v40 }
 0x11b   :  { %v291_v43 = vadd.f32 %v3983_v35, %v290_v41 }
 0x11c   :  { %v332_v44 = vadd.f32 %v3985_v36, %v331_v42 }
 0x11d   :  { %v295_v49 = vsel %vm294_vm12, %v3983_v35, %v291_v43  ;;  %v503_v35 = vld [vmem:[#allocation2 + $0x38] sm:$0xf] }
 0x11e   :  { %v336_v50 = vsel %vm335_vm13, %v3985_v36, %v332_v44  ;;  %v300_v54 = vsel %vm297_vm14, %v299_v51, %v295_v49  ;;  %v505_v36 = vrot.slane %v503_v35, 2 }
 0x11f   :  { %v341_v56 = vsel %vm338_vm15, %v340_v52, %v336_v50 }
 0x17c   :  { %v310_v53 = vpop.permute.xlu0 %309 }
 0x17d   :  { %v351_v55 = vpop.permute.xlu1 %350  ;;  %v312_v57 = vmul.f32 %v310_v53, %v300_v54 }
 0x17e   :  { %v353_v58 = vmul.f32 %v351_v55, %v341_v56 }
 0x17f   :  { %314 = vrot.lane.b32.xlu2 %v312_v57, %s4231_s22 }
 0x180   :  { %355 = vrot.lane.b32.xlu0 %v353_v58, %s4231_s22 }
 0x185   :  { %v305_v60 = vpop.permute.xlu1 %304 }
 0x186   :  { %v307_v61 = vmul.f32 %v305_v60, %v300_v54 }
 0x187   :  { %345 = vrot.lane.b32.xlu2 %v4400_v59, %s4231_s22 }
 0x188   :  { %393 = vperm.xlu0 %3971, %v391_v9  }
 0x1d9   :  { %v315_v62 = vpop.permute.xlu2 %314 }
 0x1da   :  { %v317_v63 = vadd.f32 %v315_v62, %v307_v61 }
 0x1dc   :  { %3986 = vtanh.f32 %v317_v63 }
 0x1e1   :  { %v346_v2 = vpop.permute.xlu2 %345 }
 0x1e2   :  { %v3987_v1 = vpop.eup %3986  ;;  %v348_v3 = vmul.f32 %v346_v2, %v341_v56 }
 0x1e3   :  { %320 = vrot.lane.b32.xlu1 %v3987_v1, %s4232_s3 }
 0x1f2   :  { %v356_v4 = vpop.permute.xlu0 %355 }
 0x1f3   :  { %v358_v5 = vadd.f32 %v356_v4, %v348_v3 }
 0x1f5   :  { %3988 = vtanh.f32 %v358_v5 }
 0x1fa   :  { %v4422_v22 = vpop.permute.xlu0 %393 }
 0x1fb   :  { %v3989_v6 = vpop.eup %3988  ;;  %vm395_vm6 = vcmp.eq.s32.totalorder %v4422_v22, 1 }
 0x1fc   :  { %361 = vrot.lane.b32.xlu2 %v3989_v6, %s4232_s3 }
 0x204   :  { %372 = vperm.xlu2 %3972, %v370_v15  }
 0x255   :  { %v321_v10 = vpop.permute.xlu1 %320 }
 0x256   :  { %v323_v11 = vmul.f32 %v321_v10, %v300_v54  ;;  %v362_v16 = vpop.permute.xlu2 %361 }
 0x257   :  { %v364_v17 = vmul.f32 %v362_v16, %v341_v56 }
 0x258   :  { %376 = vst [vmem:[#allocation1] ss:$4 sm:$0xff] %v323_v11 }
 0x25e   :  { %v4424_v23 = vpop.permute.xlu2 %372 }
 0x25f   :  { %v377_v14 = vld.sshfl [vmem:[#allocation1] sm:$0xff pattern:$0x73625140]  ;;  %vm374_vm5 = vcmp.eq.s32.totalorder %v4424_v23, 1 }
 0x260   :  { %384 = vst [vmem:[#allocation1] ss:$4 sm:$0xff] %v317_v63  ;;  %v3726_v23 = vld [vmem:[%s6026_s4] sm:$0x3] }
 0x267   :  { %v385_v18 = vld.sshfl [vmem:[#allocation1] sm:$0xff pattern:$0x73625140] }
 0x268   :  { %397 = vst [vmem:[#allocation1] ss:$4 sm:$0xff] %v364_v17  ;;  %386 = vrot.lane.b32.xlu0 %v385_v18, %s4234_s8 }
 0x26f   :  { %v398_v19 = vld.sshfl [vmem:[#allocation1] sm:$0xff pattern:$0x73625140] }
 0x270   :  { %405 = vst [vmem:[#allocation1] ss:$4 sm:$0xff] %v358_v5  ;;  %399 = vrot.lane.b32.xlu1 %v398_v19, %s4231_s22 }
 0x277   :  { %v406_v20 = vld.sshfl [vmem:[#allocation1] sm:$0xff pattern:$0x73625140] }
 0x278   :  { %413 = vst [vmem:[#allocation1] ss:$4 sm:$0xff] %v323_v11  ;;  %378 = vrot.lane.b32.xlu1 %v377_v14, %s4231_s22 }
 0x27f   :  { %v4420_v21 = vld.sshfl [vmem:[#allocation1] sm:$0xff pattern:$0x73625140] }
 0x280   :  { %423 = vst [vmem:[#allocation1] ss:$4 sm:$0xff] %v364_v17 }
 0x287   :  { %v4477_v35 = vld.sshfl [vmem:[#allocation1] sm:$0xff pattern:$0x73625140] }
 0x2da   :  { %v387_v24 = vpop.permute.xlu0 %386 }
 0x2db   :  { %v389_v25 = vsel %vm374_vm5, %v387_v24, %v4394_v28 }
 0x2dc   :  { %390 = vst.msk [vmem:[#allocation4] sm:$0x3] %vm184_vm0, %v389_v25 }
 0x2e2   :  { %v400_v27 = vpop.permute.xlu1 %399 }
 0x2e3   :  { %v402_v29 = vsel %vm395_vm6, %v400_v27, %v4318_v12  ;;  %v4457_v44 = vld [vmem:[#allocation4] sm:$0x3] }
 0x2e4   :  { %403 = vst.msk [vmem:[#allocation5] sm:$0x3] %vm184_vm0, %v402_v29 }
 0x2ea   :  { %v379_v30 = vpop.permute.xlu1 %378 }
 0x2eb   :  { %v4436_v31 = vld [vmem:[#allocation5] sm:$0x3]  ;;  %v381_v32 = vsel %vm374_vm5, %v379_v30, %v4367_v26  ;;  %v3823_v30 = vld [vmem:[%s6026_s4 + $0x2] sm:$0x3] }
 0x2ec   :  { %382 = vst.msk [vmem:[#allocation3] sm:$0x3] %vm184_vm0, %v381_v32  ;;  %436 = vrot.lane.b32.xlu2 %v4436_v31, %s4231_s22  ;;  %vm592_vm15 = vcmp.gt.f32.partialorder %v3823_v30, 0.0 }
 0x2ed   :  { %v596_v32 = vsel %vm592_vm15, 1, %v6047_v8 }
 0x2f3   :  { %v4445_v28 = vld [vmem:[#allocation3] sm:$0x3] }
 0x2f4   :  { %407 = vrot.lane.b32.xlu2 %v406_v20, %s4234_s8 }
 0x346   :  { %v437_v33 = vpop.permute.xlu2 %436 }
 0x347   :  { %v439_v12 = vsel %vm213_vm2, %v4445_v28, %v437_v33  ;;  %v3824_v33 = vld [vmem:[%s6026_s4 + $0x1c] sm:$0x3] }
 0x348   :  { %3819 = vmatmul.msk.f32.vlgmr.msrb.gmra.mxu2 %vm231_vm3, %v439_v12  ;;  %3820 = vmatmul.msk.f32.vlgmr.msrb.gmra.mxu3 %vm231_vm3, %v439_v12  ;;  %vm595_vm1 = vcmp.gt.f32.partialorder %v3824_v33, 0.0 }
 0x349   :  { %v617_v12 = vsel %vm595_vm1, 1, %v6047_v8 }
 0x34e   :  { %v408_v34 = vpop.permute.xlu2 %407 }
 0x34f   :  { %v410_v26 = vsel %vm395_vm6, %v408_v34, %v4400_v59 }
 0x350   :  { %411 = vst.msk [vmem:[#allocation6] sm:$0x3] %vm184_vm0, %v410_v26 }
 0x357   :  { %v4459_v45 = vld [vmem:[#allocation6] sm:$0x3] }
 0x3cb   :  { %v476_v37 = vpop.f32.mrf.mxu2  ;;  %v496_v39 = vpop.f32.mrf.mxu3 }
 0x3cc   :  { %v501_v40 = vadd.f32 %v500_v38, %v476_v37  ;;  %v507_v41 = vadd.f32 %v505_v36, %v496_v39 }
 0x3ce   :  { %3990 = vtanh.f32 %v501_v40  ;;  %v3821_v46 = vmul.f32 -1.442695, %v501_v40  ;;  %v3822_v47 = vmul.f32 -1.442695, %v507_v41 }
 0x3cf   :  { %3992 = vtanh.f32 %v507_v41 }
 0x3d0   :  { %3994 = vpow2.f32 %v3821_v46 }
 0x3d1   :  { %3996 = vpow2.f32 %v3822_v47 }
 0x3d4   :  { %v3991_v42 = vpop.eup %3990 }
 0x3d5   :  { %v3993_v43 = vpop.eup %3992  ;;  %534 = vrot.lane.b32.xlu1 %v3991_v42, %s4232_s3 }
 0x3d6   :  { %575 = vrot.lane.b32.xlu0 %v3993_v43, %s4232_s3  ;;  %v3995_v48 = vpop.eup %3994 }
 0x3d7   :  { %v3997_v49 = vpop.eup %3996  ;;  %v511_v50 = vadd.f32 1.0, %v3995_v48 }
 0x3d8   :  { %v552_v51 = vadd.f32 1.0, %v3997_v49 }
 0x3d9   :  { %3998 = vrcp.f32 %v511_v50  ;;  %v523_v62 = vand.u32 2147483648, %v511_v50  ;;  %vm517_vm9 = vweird.f32 %v511_v50  ;;  %v521_v1 = vand.u32 2147483647, %v511_v50 }
 0x3da   :  { %4000 = vrcp.f32 %v552_v51  ;;  %v564_v63 = vand.u32 2147483648, %v552_v51  ;;  %vm558_vm10 = vweird.f32 %v552_v51  ;;  %v562_v2 = vand.u32 2147483647, %v552_v51 }
 0x3db   :  { %v524_v5 = vor.u32 1.1754944e-38, %v523_v62  ;;  %vm522_vm13 = vcmp.eq.f32.partialorder %v521_v1, 8.507059e+37 }
 0x3dc   :  { %v565_v6 = vor.u32 1.1754944e-38, %v564_v63  ;;  %vm563_vm14 = vcmp.eq.f32.partialorder %v562_v2, 8.507059e+37 }
 0x3dd   :  { %529 = vrot.lane.b32.xlu1 %v4457_v44, %s4231_s22 }
 0x3de   :  { %570 = vrot.lane.b32.xlu0 %v4459_v45, %s4231_s22 }
 0x3df   :  { %v3999_v52 = vpop.eup %3998 }
 0x3e0   :  { %v4001_v53 = vpop.eup %4000  ;;  %v513_v54 = vmul.f32 %v3999_v52, %v511_v50  ;;  %vm518_vm7 = vweird.f32 %v3999_v52 }
 0x3e1   :  { %v554_v55 = vmul.f32 %v4001_v53, %v552_v51  ;;  %vm559_vm8 = vweird.f32 %v4001_v53  ;;  %vm519_vm11 = vmor %vm517_vm9, %vm518_vm7 }
 0x3e2   :  { %v514_v56 = vsub.f32 1.0, %v513_v54  ;;  %vm560_vm12 = vmor %vm558_vm10, %vm559_vm8 }
 0x3e3   :  { %v555_v57 = vsub.f32 1.0, %v554_v55 }
 0x3e4   :  { %v515_v58 = vmul.f32 %v3999_v52, %v514_v56  ;;  %v730_v56 = vld [vmem:[#allocation2 + $0x34] sm:$0xf] }
 0x3e5   :  { %v556_v59 = vmul.f32 %v4001_v53, %v555_v57  ;;  %v732_v57 = vrot.slane %v730_v56, 2  ;;  %v3833_v56 = vld [vmem:[%s6026_s4 + $0x4] sm:$0x3] }
 0x3e6   :  { %v516_v60 = vadd.f32 %v3999_v52, %v515_v58 }
 0x3e7   :  { %v557_v61 = vadd.f32 %v4001_v53, %v556_v59  ;;  %v727_v59 = vld [vmem:[#allocation2 + $0x8] sm:$0xf] }
 0x3e8   :  { %v520_v3 = vsel %vm519_vm11, %v3999_v52, %v516_v60 }
 0x3e9   :  { %v561_v4 = vsel %vm560_vm12, %v4001_v53, %v557_v61  ;;  %v525_v9 = vsel %vm522_vm13, %v524_v5, %v520_v3 }
 0x3ea   :  { %v566_v11 = vsel %vm563_vm14, %v565_v6, %v561_v4 }
 0x447   :  { %v535_v7 = vpop.permute.xlu1 %534 }
 0x448   :  { %v576_v10 = vpop.permute.xlu0 %575  ;;  %v537_v13 = vmul.f32 %v535_v7, %v525_v9 }
 0x449   :  { %v578_v14 = vmul.f32 %v576_v10, %v566_v11 }
 0x44a   :  { %539 = vrot.lane.b32.xlu2 %v537_v13, %s4231_s22 }
 0x44b   :  { %580 = vrot.lane.b32.xlu1 %v578_v14, %s4231_s22 }
 0x44f   :  { %v530_v15 = vpop.permute.xlu1 %529 }
 0x450   :  { %v532_v16 = vmul.f32 %v530_v15, %v525_v9  ;;  %v571_v20 = vpop.permute.xlu0 %570 }
 0x451   :  { %v573_v24 = vmul.f32 %v571_v20, %v566_v11 }
 0x453   :  { %619 = vperm.xlu1 %3973, %v617_v12  }
 0x4a4   :  { %v540_v17 = vpop.permute.xlu2 %539 }
 0x4a5   :  { %v542_v18 = vadd.f32 %v540_v17, %v532_v16 }
 0x4a7   :  { %4002 = vtanh.f32 %v542_v18 }
 0x4ad   :  { %v4003_v19 = vpop.eup %4002 }
 0x4ae   :  { %545 = vrot.lane.b32.xlu2 %v4003_v19, %s4232_s3 }
 0x4bd   :  { %v581_v25 = vpop.permute.xlu1 %580 }
 0x4be   :  { %v583_v27 = vadd.f32 %v581_v25, %v573_v24 }
 0x4c0   :  { %4004 = vtanh.f32 %v583_v27 }
 0x4c5   :  { %v4484_v43 = vpop.permute.xlu1 %619 }
 0x4c6   :  { %v4005_v29 = vpop.eup %4004  ;;  %vm621_vm7 = vcmp.eq.s32.totalorder %v4484_v43, 1 }
 0x4c7   :  { %586 = vrot.lane.b32.xlu0 %v4005_v29, %s4232_s3 }
 0x4cf   :  { %598 = vperm.xlu0 %3971, %v596_v32  }
 0x508   :  { %v546_v34 = vpop.permute.xlu2 %545 }
 0x509   :  { %v548_v26 = vmul.f32 %v546_v34, %v525_v9 }
 0x50b   :  { %602 = vst [vmem:[#allocation1] ss:$4 sm:$0xff] %v548_v26 }
 0x512   :  { %v603_v36 = vld.sshfl [vmem:[#allocation1] sm:$0xff pattern:$0x73625140] }
 0x513   :  { %610 = vst [vmem:[#allocation1] ss:$4 sm:$0xff] %v542_v18  ;;  %604 = vrot.lane.b32.xlu1 %v603_v36, %s4231_s22 }
 0x51a   :  { %v611_v37 = vld.sshfl [vmem:[#allocation1] sm:$0xff pattern:$0x73625140] }
 0x51b   :  { %612 = vrot.lane.b32.xlu0 %v611_v37, %s4234_s8 }
 0x539   :  { %v587_v38 = vpop.permute.xlu0 %586 }
 0x53a   :  { %v589_v39 = vmul.f32 %v587_v38, %v566_v11 }
 0x53c   :  { %623 = vst [vmem:[#allocation1] ss:$4 sm:$0xff] %v589_v39 }
 0x541   :  { %v4486_v46 = vpop.permute.xlu0 %598 }
 0x542   :  { %vm600_vm4 = vcmp.eq.s32.totalorder %v4486_v46, 1 }
 0x543   :  { %v624_v40 = vld.sshfl [vmem:[#allocation1] sm:$0xff pattern:$0x73625140] }
 0x544   :  { %631 = vst [vmem:[#allocation1] ss:$4 sm:$0xff] %v583_v27  ;;  %625 = vrot.lane.b32.xlu2 %v624_v40, %s4231_s22  ;;  %v3834_v40 = vld [vmem:[%s6026_s4 + $0x1a] sm:$0x3] }
 0x545   :  { %vm822_vm1 = vcmp.gt.f32.partialorder %v3834_v40, 0.0  ;;  %v957_v40 = vld [vmem:[#allocation2 + $0x30] sm:$0xf] }
 0x54b   :  { %v632_v41 = vld.sshfl [vmem:[#allocation1] sm:$0xff pattern:$0x73625140] }
 0x54c   :  { %640 = vst [vmem:[#allocation1] ss:$4 sm:$0xff] %v548_v26 }
 0x553   :  { %v4482_v42 = vld.sshfl [vmem:[#allocation1] sm:$0xff pattern:$0x73625140] }
 0x554   :  { %650 = vst [vmem:[#allocation1] ss:$4 sm:$0xff] %v589_v39 }
 0x585   :  { %v605_v47 = vpop.permute.xlu1 %604 }
 0x586   :  { %v607_v48 = vsel %vm600_vm4, %v605_v47, %v4445_v28 }
 0x587   :  { %608 = vst.msk [vmem:[#allocation3] sm:$0x3] %vm184_vm0, %v607_v48 }
 0x58d   :  { %v613_v49 = vpop.permute.xlu0 %612 }
 0x58e   :  { %v615_v50 = vsel %vm600_vm4, %v613_v49, %v4457_v44  ;;  %v4507_v28 = vld [vmem:[#allocation3] sm:$0x3] }
 0x58f   :  { %616 = vst.msk [vmem:[#allocation4] sm:$0x3] %vm184_vm0, %v615_v50 }
 0x596   :  { %v4519_v2 = vld [vmem:[#allocation4] sm:$0x3] }
 0x59e   :  { %v626_v51 = vpop.permute.xlu2 %625 }
 0x59f   :  { %v628_v52 = vsel %vm621_vm7, %v626_v51, %v4436_v31 }
 0x5a0   :  { %629 = vst.msk [vmem:[#allocation5] sm:$0x3] %vm184_vm0, %v628_v52 }
 0x5a7   :  { %v4502_v53 = vld [vmem:[#allocation5] sm:$0x3] }
 0x5a8   :  { %663 = vrot.lane.b32.xlu2 %v4502_v53, %s4231_s22 }
 0x5b0   :  { %633 = vrot.lane.b32.xlu2 %v632_v41, %s4234_s8  ;;  %v844_v41 = vsel %vm822_vm1, 1, %v6047_v8 }
 0x602   :  { %v664_v44 = vpop.permute.xlu2 %663 }
 0x603   :  { %v666_v54 = vsel %vm213_vm2, %v4507_v28, %v664_v44 }
 0x604   :  { %3829 = vmatmul.msk.f32.vlgmr.msrb.gmra.mxu0 %vm231_vm3, %v666_v54  ;;  %3830 = vmatmul.msk.f32.vlgmr.msrb.gmra.mxu1 %vm231_vm3, %v666_v54 }
 0x60a   :  { %v634_v31 = vpop.permute.xlu2 %633 }
 0x60b   :  { %v636_v55 = vsel %vm621_vm7, %v634_v31, %v4459_v45 }
 0x60c   :  { %637 = vst.msk [vmem:[#allocation6] sm:$0x3] %vm184_vm0, %v636_v55 }
 0x613   :  { %v4521_v45 = vld [vmem:[#allocation6] sm:$0x3] }
 0x681   :  { %v703_v58 = vpop.f32.mrf.mxu0  ;;  %v723_v60 = vpop.f32.mrf.mxu1 }
 0x682   :  { %v728_v61 = vadd.f32 %v727_v59, %v703_v58  ;;  %v734_v62 = vadd.f32 %v732_v57, %v723_v60  ;;  %v4539_v60 = vld.sshfl [vmem:[#allocation1] sm:$0xff pattern:$0x73625140] }
 0x684   :  { %4006 = vtanh.f32 %v728_v61  ;;  %v3831_v3 = vmul.f32 -1.442695, %v728_v61  ;;  %v3832_v4 = vmul.f32 -1.442695, %v734_v62 }
 0x685   :  { %4008 = vtanh.f32 %v734_v62 }
 0x686   :  { %4010 = vpow2.f32 %v3831_v3 }
 0x687   :  { %4012 = vpow2.f32 %v3832_v4 }
 0x68a   :  { %v4007_v63 = vpop.eup %4006 }
 0x68b   :  { %v4009_v1 = vpop.eup %4008  ;;  %761 = vrot.lane.b32.xlu1 %v4007_v63, %s4232_s3 }
 0x68c   :  { %802 = vrot.lane.b32.xlu0 %v4009_v1, %s4232_s3  ;;  %v4011_v5 = vpop.eup %4010 }
 0x68d   :  { %v4013_v6 = vpop.eup %4012  ;;  %v738_v7 = vadd.f32 1.0, %v4011_v5 }
 0x68e   :  { %v779_v9 = vadd.f32 1.0, %v4013_v6 }
 0x68f   :  { %4014 = vrcp.f32 %v738_v7  ;;  %v750_v24 = vand.u32 2147483648, %v738_v7  ;;  %vm744_vm10 = vweird.f32 %v738_v7  ;;  %v748_v27 = vand.u32 2147483647, %v738_v7 }
 0x690   :  { %4016 = vrcp.f32 %v779_v9  ;;  %v791_v25 = vand.u32 2147483648, %v779_v9  ;;  %vm785_vm11 = vweird.f32 %v779_v9  ;;  %v789_v29 = vand.u32 2147483647, %v779_v9 }
 0x691   :  { %v751_v33 = vor.u32 1.1754944e-38, %v750_v24  ;;  %vm749_vm14 = vcmp.eq.f32.partialorder %v748_v27, 8.507059e+37  ;;  %v901_v24 = vld [vmem:[%s6024_s2 + $0x38] sm:$0xff]  ;;  %v899_v27 = vld [vmem:[%s6024_s2 + $0x28] sm:$0xff] }
 0x692   :  { %v792_v12 = vor.u32 1.1754944e-38, %v791_v25  ;;  %vm790_vm15 = vcmp.eq.f32.partialorder %v789_v29, 8.507059e+37  ;;  %v898_v25 = vld [vmem:[%s6024_s2 + $0x20] sm:$0xff]  ;;  %v896_v29 = vld [vmem:[%s6024_s2 + $0x10] sm:$0xff] }
 0x693   :  { %756 = vrot.lane.b32.xlu1 %v4519_v2, %s4231_s22 }
 0x694   :  { %797 = vrot.lane.b32.xlu0 %v4521_v45, %s4231_s22 }
 0x695   :  { %v4015_v10 = vpop.eup %4014 }
 0x696   :  { %v4017_v11 = vpop.eup %4016  ;;  %v740_v13 = vmul.f32 %v4015_v10, %v738_v7  ;;  %vm745_vm8 = vweird.f32 %v4015_v10 }
 0x697   :  { %v781_v14 = vmul.f32 %v4017_v11, %v779_v9  ;;  %vm786_vm9 = vweird.f32 %v4017_v11  ;;  %vm746_vm12 = vmor %vm744_vm10, %vm745_vm8  ;;  %vm819_vm8 = vcmp.gt.f32.partialorder %v3833_v56, 0.0 }
 0x698   :  { %v741_v15 = vsub.f32 1.0, %v740_v13  ;;  %vm787_vm13 = vmor %vm785_vm11, %vm786_vm9  ;;  %v823_v57 = vsel %vm819_vm8, 1, %v6047_v8 }
 0x699   :  { %v782_v16 = vsub.f32 1.0, %v781_v14  ;;  %v908_v14 = vld [vmem:[%s6024_s2 + $0x70] sm:$0xff] }
 0x69a   :  { %v742_v17 = vmul.f32 %v4015_v10, %v741_v15  ;;  %v909_v15 = vld [vmem:[%s6024_s2 + $0x78] sm:$0xff]  ;;  %921 = vmatpush.msra.mxu2 %v908_v14  ;;  %1148 = vmatpush.msra.mxu0 %v908_v14 }
 0x69b   :  { %v783_v18 = vmul.f32 %v4017_v11, %v782_v16  ;;  %941 = vmatpush.msra.mxu3 %v909_v15  ;;  %v904_v16 = vld [vmem:[%s6024_s2 + $0x50] sm:$0xff]  ;;  %1168 = vmatpush.msra.mxu1 %v909_v15 }
 0x69c   :  { %v743_v19 = vadd.f32 %v4015_v10, %v742_v17  ;;  %v905_v17 = vld [vmem:[%s6024_s2 + $0x58] sm:$0xff] }
 0x69d   :  { %v784_v20 = vadd.f32 %v4017_v11, %v783_v18  ;;  %v902_v18 = vld [vmem:[%s6024_s2 + $0x40] sm:$0xff] }
 0x69e   :  { %v747_v30 = vsel %vm746_vm12, %v4015_v10, %v743_v19  ;;  %v903_v19 = vld [vmem:[%s6024_s2 + $0x48] sm:$0xff] }
 0x69f   :  { %v788_v32 = vsel %vm787_vm13, %v4017_v11, %v784_v20  ;;  %v752_v26 = vsel %vm749_vm14, %v751_v33, %v747_v30  ;;  %v900_v20 = vld [vmem:[%s6024_s2 + $0x30] sm:$0xff]  ;;  %v897_v30 = vld [vmem:[%s6024_s2 + $0x18] sm:$0xff] }
 0x6a0   :  { %v793_v37 = vsel %vm790_vm15, %v792_v12, %v788_v32 }
 0x6fd   :  { %v762_v34 = vpop.permute.xlu1 %761 }
 0x6fe   :  { %v803_v36 = vpop.permute.xlu0 %802  ;;  %v764_v38 = vmul.f32 %v762_v34, %v752_v26  ;;  %v894_v34 = vld [vmem:[%s6024_s2] sm:$0xff] }
 0x6ff   :  { %v805_v39 = vmul.f32 %v803_v36, %v793_v37 }
 0x700   :  { %766 = vrot.lane.b32.xlu2 %v764_v38, %s4231_s22 }
 0x701   :  { %807 = vrot.lane.b32.xlu1 %v805_v39, %s4231_s22 }
 0x705   :  { %v757_v47 = vpop.permute.xlu1 %756 }
 0x706   :  { %v759_v48 = vmul.f32 %v757_v47, %v752_v26  ;;  %v798_v52 = vpop.permute.xlu0 %797 }
 0x707   :  { %v800_v44 = vmul.f32 %v798_v52, %v793_v37 }
 0x709   :  { %846 = vperm.xlu1 %3973, %v844_v41   ;;  %v959_v41 = vrot.slane %v957_v40, 2 }
 0x75a   :  { %v767_v49 = vpop.permute.xlu2 %766 }
 0x75b   :  { %v769_v50 = vadd.f32 %v767_v49, %v759_v48  ;;  %v954_v48 = vld [vmem:[#allocation2 + $0xc] sm:$0xf] }
 0x75d   :  { %4018 = vtanh.f32 %v769_v50 }
 0x763   :  { %v4019_v51 = vpop.eup %4018 }
 0x764   :  { %772 = vrot.lane.b32.xlu2 %v4019_v51, %s4232_s3 }
 0x773   :  { %v808_v54 = vpop.permute.xlu1 %807 }
 0x774   :  { %v810_v31 = vadd.f32 %v808_v54, %v800_v44 }
 0x776   :  { %4020 = vtanh.f32 %v810_v31 }
 0x77b   :  { %v4546_v6 = vpop.permute.xlu1 %846 }
 0x77c   :  { %v4021_v55 = vpop.eup %4020  ;;  %vm848_vm10 = vcmp.eq.s32.totalorder %v4546_v6, 1  ;;  %v3963_v6 = vld [vmem:[%s6026_s4 + $0x1e] sm:$0x3] }
 0x77d   :  { %813 = vrot.lane.b32.xlu0 %v4021_v55, %s4232_s3 }
 0x785   :  { %825 = vperm.xlu0 %3971, %v823_v57  }
 0x7be   :  { %v773_v58 = vpop.permute.xlu2 %772 }
 0x7bf   :  { %v775_v59 = vmul.f32 %v773_v58, %v752_v26  ;;  %v895_v26 = vld [vmem:[%s6024_s2 + $0x8] sm:$0xff] }
 0x7c1   :  { %829 = vst [vmem:[#allocation1] ss:$4 sm:$0xff] %v775_v59 }
 0x7c8   :  { %v830_v61 = vld.sshfl [vmem:[#allocation1] sm:$0xff pattern:$0x73625140] }
 0x7c9   :  { %837 = vst [vmem:[#allocation1] ss:$4 sm:$0xff] %v769_v50  ;;  %831 = vrot.lane.b32.xlu1 %v830_v61, %s4231_s22 }
 0x7d0   :  { %v838_v62 = vld.sshfl [vmem:[#allocation1] sm:$0xff pattern:$0x73625140] }
 0x7d1   :  { %839 = vrot.lane.b32.xlu0 %v838_v62, %s4234_s8 }
 0x7ef   :  { %v814_v63 = vpop.permute.xlu0 %813 }
 0x7f0   :  { %v816_v1 = vmul.f32 %v814_v63, %v793_v37 }
 0x7f2   :  { %850 = vst [vmem:[#allocation1] ss:$4 sm:$0xff] %v816_v1 }
 0x7f7   :  { %v4548_v7 = vpop.permute.xlu0 %825 }
 0x7f8   :  { %vm6030_vm9 = vcmp.eq.s32.totalorder %v4548_v7, 1 }
 0x7f9   :  { %v851_v3 = vld.sshfl [vmem:[#allocation1] sm:$0xff pattern:$0x73625140] }
 0x7fa   :  { %858 = vst [vmem:[#allocation1] ss:$4 sm:$0xff] %v810_v31  ;;  %852 = vrot.lane.b32.xlu2 %v851_v3, %s4231_s22 }
 0x801   :  { %v859_v4 = vld.sshfl [vmem:[#allocation1] sm:$0xff pattern:$0x73625140] }
 0x802   :  { %867 = vst [vmem:[#allocation1] ss:$4 sm:$0xff] %v775_v59 }
 0x809   :  { %v4544_v5 = vld.sshfl [vmem:[#allocation1] sm:$0xff pattern:$0x73625140] }
 0x80a   :  { %877 = vst [vmem:[#allocation1] ss:$4 sm:$0xff] %v816_v1 }
 0x83b   :  { %v832_v9 = vpop.permute.xlu1 %831 }
 0x83c   :  { %v834_v10 = vsel %vm6030_vm9, %v832_v9, %v4507_v28  ;;  %v906_v28 = vld [vmem:[%s6024_s2 + $0x60] sm:$0xff] }
 0x83d   :  { %835 = vst.msk [vmem:[#allocation3] sm:$0x3] %vm184_vm0, %v834_v10  ;;  %922 = vmatpush.msra.mxu2 %v906_v28  ;;  %1149 = vmatpush.msra.mxu0 %v906_v28 }
 0x83f   :  { %923 = vmatpush.msra.mxu2 %v904_v16  ;;  %1150 = vmatpush.msra.mxu0 %v904_v16 }
 0x841   :  { %924 = vmatpush.msra.mxu2 %v902_v18  ;;  %1151 = vmatpush.msra.mxu0 %v902_v18 }
 0x843   :  { %v840_v11 = vpop.permute.xlu0 %839  ;;  %925 = vmatpush.msra.mxu2 %v900_v20  ;;  %1152 = vmatpush.msra.mxu0 %v900_v20 }
 0x844   :  { %v842_v13 = vsel %vm6030_vm9, %v840_v11, %v4519_v2  ;;  %v907_v2 = vld [vmem:[%s6024_s2 + $0x68] sm:$0xff] }
 0x845   :  { %843 = vst.msk [vmem:[#allocation4] sm:$0x3] %vm184_vm0, %v842_v13  ;;  %942 = vmatpush.msra.mxu3 %v907_v2  ;;  %1169 = vmatpush.msra.mxu1 %v907_v2 }
 0x846   :  { %926 = vmatpush.msra.mxu2 %v898_v25  ;;  %1153 = vmatpush.msra.mxu0 %v898_v25 }
 0x847   :  { %943 = vmatpush.msra.mxu3 %v905_v17  ;;  %1170 = vmatpush.msra.mxu1 %v905_v17 }
 0x848   :  { %927 = vmatpush.msra.mxu2 %v896_v29  ;;  %1154 = vmatpush.msra.mxu0 %v896_v29 }
 0x849   :  { %944 = vmatpush.msra.mxu3 %v903_v19  ;;  %1171 = vmatpush.msra.mxu1 %v903_v19 }
 0x84a   :  { %928 = vmatpush.msra.mxu2 %v894_v34  ;;  %1155 = vmatpush.msra.mxu0 %v894_v34 }
 0x84b   :  { %945 = vmatpush.msra.mxu3 %v901_v24  ;;  %1172 = vmatpush.msra.mxu1 %v901_v24 }
 0x84c   :  { %1375 = vmatpush.msrb.mxu2 %v908_v14  ;;  %1602 = vmatpush.msrb.mxu0 %v908_v14  ;;  %v4629_v54 = vld [vmem:[#allocation4] sm:$0x3] }
 0x84d   :  { %946 = vmatpush.msra.mxu3 %v899_v27  ;;  %1173 = vmatpush.msra.mxu1 %v899_v27 }
 0x84e   :  { %1376 = vmatpush.msrb.mxu2 %v906_v28  ;;  %1603 = vmatpush.msrb.mxu0 %v906_v28 }
 0x84f   :  { %947 = vmatpush.msra.mxu3 %v897_v30  ;;  %1174 = vmatpush.msra.mxu1 %v897_v30 }
 0x850   :  { %1377 = vmatpush.msrb.mxu2 %v904_v16  ;;  %1604 = vmatpush.msrb.mxu0 %v904_v16 }
 0x851   :  { %948 = vmatpush.msra.mxu3 %v895_v26  ;;  %1175 = vmatpush.msra.mxu1 %v895_v26 }
 0x852   :  { %1378 = vmatpush.msrb.mxu2 %v902_v18  ;;  %1605 = vmatpush.msrb.mxu0 %v902_v18 }
 0x853   :  { %1395 = vmatpush.msrb.mxu3 %v909_v15  ;;  %1622 = vmatpush.msrb.mxu1 %v909_v15 }
 0x854   :  { %v853_v32 = vpop.permute.xlu2 %852  ;;  %1379 = vmatpush.msrb.mxu2 %v900_v20  ;;  %1606 = vmatpush.msrb.mxu0 %v900_v20 }
 0x855   :  { %v855_v33 = vsel %vm848_vm10, %v853_v32, %v4502_v53  ;;  %1396 = vmatpush.msrb.mxu3 %v907_v2  ;;  %1623 = vmatpush.msrb.mxu1 %v907_v2  ;;  %v4617_v53 = vld [vmem:[#allocation3] sm:$0x3]  ;;  %v3844_v32 = vld [vmem:[%s6026_s4 + $0x18] sm:$0x3] }
 0x856   :  { %856 = vst.msk [vmem:[#allocation5] sm:$0x3] %vm184_vm0, %v855_v33  ;;  %1380 = vmatpush.msrb.mxu2 %v898_v25  ;;  %1607 = vmatpush.msrb.mxu0 %v898_v25 }
 0x857   :  { %1397 = vmatpush.msrb.mxu3 %v905_v17  ;;  %1624 = vmatpush.msrb.mxu1 %v905_v17 }
 0x858   :  { %1381 = vmatpush.msrb.mxu2 %v896_v29  ;;  %1608 = vmatpush.msrb.mxu0 %v896_v29 }
 0x859   :  { %1398 = vmatpush.msrb.mxu3 %v903_v19  ;;  %1625 = vmatpush.msrb.mxu1 %v903_v19 }
 0x85a   :  { %1382 = vmatpush.msrb.mxu2 %v894_v34  ;;  %1609 = vmatpush.msrb.mxu0 %v894_v34 }
 0x85b   :  { %1399 = vmatpush.msrb.mxu3 %v901_v24  ;;  %1626 = vmatpush.msrb.mxu1 %v901_v24 }
 0x85d   :  { %v4606_v12 = vld [vmem:[#allocation5] sm:$0x3]  ;;  %1400 = vmatpush.msrb.mxu3 %v899_v27  ;;  %1627 = vmatpush.msrb.mxu1 %v899_v27 }
 0x85e   :  { %890 = vrot.lane.b32.xlu2 %v4606_v12, %s4231_s22 }
 0x85f   :  { %1401 = vmatpush.msrb.mxu3 %v897_v30  ;;  %1628 = vmatpush.msrb.mxu1 %v897_v30 }
 0x861   :  { %1402 = vmatpush.msrb.mxu3 %v895_v26  ;;  %1629 = vmatpush.msrb.mxu1 %v895_v26 }
 0x866   :  { %860 = vrot.lane.b32.xlu2 %v859_v4, %s4234_s8 }
 0x8b8   :  { %v891_v36 = vpop.permute.xlu2 %890 }
 0x8b9   :  { %v893_v37 = vsel %vm213_vm2, %v4617_v53, %v891_v36 }
 0x8ba   :  { %3839 = vmatmul.msk.f32.vlgmr.msra.gmra.mxu2 %vm231_vm3, %v893_v37  ;;  %3840 = vmatmul.msk.f32.vlgmr.msra.gmra.mxu3 %vm231_vm3, %v893_v37 }
 0x8c0   :  { %v861_v38 = vpop.permute.xlu2 %860 }
 0x8c1   :  { %v863_v39 = vsel %vm848_vm10, %v861_v38, %v4521_v45 }
 0x8c2   :  { %864 = vst.msk [vmem:[#allocation6] sm:$0x3] %vm184_vm0, %v863_v39 }
 0x8c9   :  { %v4631_v45 = vld [vmem:[#allocation6] sm:$0x3] }
 0x93d   :  { %v930_v47 = vpop.f32.mrf.mxu2  ;;  %v950_v49 = vpop.f32.mrf.mxu3 }
 0x93e   :  { %v955_v50 = vadd.f32 %v954_v48, %v930_v47  ;;  %v961_v51 = vadd.f32 %v959_v41, %v950_v49  ;;  %v3843_v49 = vld [vmem:[%s6026_s4 + $0x6] sm:$0x3] }
 0x940   :  { %4022 = vtanh.f32 %v955_v50  ;;  %v3841_v31 = vmul.f32 -1.442695, %v955_v50  ;;  %v3842_v55 = vmul.f32 -1.442695, %v961_v51 }
 0x941   :  { %4024 = vtanh.f32 %v961_v51 }
 0x942   :  { %4026 = vpow2.f32 %v3841_v31 }
 0x943   :  { %4028 = vpow2.f32 %v3842_v55 }
 0x946   :  { %v4023_v52 = vpop.eup %4022 }
 0x947   :  { %v4025_v44 = vpop.eup %4024  ;;  %988 = vrot.lane.b32.xlu1 %v4023_v52, %s4232_s3 }
 0x948   :  { %1029 = vrot.lane.b32.xlu0 %v4025_v44, %s4232_s3  ;;  %v4027_v56 = vpop.eup %4026  ;;  %v4649_v44 = vld.sshfl [vmem:[#allocation1] sm:$0xff pattern:$0x73625140] }
 0x949   :  { %v4029_v57 = vpop.eup %4028  ;;  %v965_v58 = vadd.f32 1.0, %v4027_v56 }
 0x94a   :  { %v1006_v59 = vadd.f32 1.0, %v4029_v57 }
 0x94b   :  { %4030 = vrcp.f32 %v965_v58  ;;  %v977_v14 = vand.u32 2147483648, %v965_v58  ;;  %vm971_vm13 = vweird.f32 %v965_v58  ;;  %v975_v28 = vand.u32 2147483647, %v965_v58 }
 0x94c   :  { %4032 = vrcp.f32 %v1006_v59  ;;  %v1018_v15 = vand.u32 2147483648, %v1006_v59  ;;  %vm1012_vm14 = vweird.f32 %v1006_v59  ;;  %v1016_v2 = vand.u32 2147483647, %v1006_v59 }
 0x94d   :  { %v978_v18 = vor.u32 1.1754944e-38, %v977_v14  ;;  %vm976_vm8 = vcmp.eq.f32.partialorder %v975_v28, 8.507059e+37  ;;  %v1184_v28 = vld [vmem:[#allocation2 + $0x2c] sm:$0xf] }
 0x94e   :  { %v1019_v19 = vor.u32 1.1754944e-38, %v1018_v15  ;;  %vm1017_vm9 = vcmp.eq.f32.partialorder %v1016_v2, 8.507059e+37  ;;  %v1186_v2 = vrot.slane %v1184_v28, 2 }
 0x94f   :  { %983 = vrot.lane.b32.xlu1 %v4629_v54, %s4231_s22 }
 0x950   :  { %1024 = vrot.lane.b32.xlu0 %v4631_v45, %s4231_s22 }
 0x951   :  { %v4031_v61 = vpop.eup %4030 }
 0x952   :  { %v4033_v62 = vpop.eup %4032  ;;  %v967_v63 = vmul.f32 %v4031_v61, %v965_v58  ;;  %vm972_vm11 = vweird.f32 %v4031_v61 }
 0x953   :  { %v1008_v1 = vmul.f32 %v4033_v62, %v1006_v59  ;;  %vm1013_vm12 = vweird.f32 %v4033_v62  ;;  %vm973_vm15 = vmor %vm971_vm13, %vm972_vm11  ;;  %vm1049_vm11 = vcmp.gt.f32.partialorder %v3844_v32, 0.0 }
 0x954   :  { %v968_v3 = vsub.f32 1.0, %v967_v63  ;;  %vm1014_vm1 = vmor %vm1012_vm14, %vm1013_vm12  ;;  %v1071_v33 = vsel %vm1049_vm11, 1, %v6047_v8 }
 0x955   :  { %v1009_v4 = vsub.f32 1.0, %v1008_v1 }
 0x956   :  { %v969_v9 = vmul.f32 %v4031_v61, %v968_v3 }
 0x957   :  { %v1010_v10 = vmul.f32 %v4033_v62, %v1009_v4 }
 0x958   :  { %v970_v11 = vadd.f32 %v4031_v61, %v969_v9 }
 0x959   :  { %v1011_v13 = vadd.f32 %v4033_v62, %v1010_v10 }
 0x95a   :  { %v974_v16 = vsel %vm973_vm15, %v4031_v61, %v970_v11 }
 0x95b   :  { %v1015_v17 = vsel %vm1014_vm1, %v4033_v62, %v1011_v13  ;;  %v979_v24 = vsel %vm976_vm8, %v978_v18, %v974_v16 }
 0x95c   :  { %v1020_v27 = vsel %vm1017_vm9, %v1019_v19, %v1015_v17  ;;  %vm1046_vm9 = vcmp.gt.f32.partialorder %v3843_v49, 0.0  ;;  %v1181_v17 = vld [vmem:[#allocation2 + $0x10] sm:$0xf] }
 0x95d   :  { %v1050_v50 = vsel %vm1046_vm9, 1, %v6047_v8 }
 0x9b9   :  { %v989_v20 = vpop.permute.xlu1 %988 }
 0x9ba   :  { %v1030_v25 = vpop.permute.xlu0 %1029  ;;  %v991_v29 = vmul.f32 %v989_v20, %v979_v24 }
 0x9bb   :  { %v1032_v30 = vmul.f32 %v1030_v25, %v1020_v27 }
 0x9bc   :  { %993 = vrot.lane.b32.xlu2 %v991_v29, %s4231_s22 }
 0x9bd   :  { %1034 = vrot.lane.b32.xlu1 %v1032_v30, %s4231_s22 }
 0x9c1   :  { %v984_v34 = vpop.permute.xlu1 %983 }
 0x9c2   :  { %v986_v26 = vmul.f32 %v984_v34, %v979_v24  ;;  %v1025_v39 = vpop.permute.xlu0 %1024 }
 0x9c3   :  { %v1027_v40 = vmul.f32 %v1025_v39, %v1020_v27 }
 0x9c5   :  { %1073 = vperm.xlu1 %3973, %v1071_v33  }
 0xa16   :  { %v994_v36 = vpop.permute.xlu2 %993 }
 0xa17   :  { %v996_v37 = vadd.f32 %v994_v36, %v986_v26 }
 0xa19   :  { %4034 = vtanh.f32 %v996_v37 }
 0xa1f   :  { %v4035_v38 = vpop.eup %4034 }
 0xa20   :  { %999 = vrot.lane.b32.xlu2 %v4035_v38, %s4232_s3 }
 0xa2f   :  { %v1035_v41 = vpop.permute.xlu1 %1034 }
 0xa30   :  { %v1037_v47 = vadd.f32 %v1035_v41, %v1027_v40 }
 0xa32   :  { %4036 = vtanh.f32 %v1037_v47 }
 0xa37   :  { %v4656_v62 = vpop.permute.xlu1 %1073 }
 0xa38   :  { %v4037_v48 = vpop.eup %4036  ;;  %vm6031_vm13 = vcmp.eq.s32.totalorder %v4656_v62, 1 }
 0xa39   :  { %1040 = vrot.lane.b32.xlu0 %v4037_v48, %s4232_s3 }
 0xa41   :  { %1052 = vperm.xlu0 %3971, %v1050_v50  }
 0xa7a   :  { %v1000_v51 = vpop.permute.xlu2 %999 }
 0xa7b   :  { %v1002_v52 = vmul.f32 %v1000_v51, %v979_v24 }
 0xa7d   :  { %1056 = vst [vmem:[#allocation1] ss:$4 sm:$0xff] %v1002_v52 }
 0xa84   :  { %v1057_v31 = vld.sshfl [vmem:[#allocation1] sm:$0xff pattern:$0x73625140] }
 0xa85   :  { %1064 = vst [vmem:[#allocation1] ss:$4 sm:$0xff] %v996_v37  ;;  %1058 = vrot.lane.b32.xlu1 %v1057_v31, %s4231_s22 }
 0xa8c   :  { %v1065_v55 = vld.sshfl [vmem:[#allocation1] sm:$0xff pattern:$0x73625140] }
 0xa8d   :  { %1066 = vrot.lane.b32.xlu0 %v1065_v55, %s4234_s8 }
 0xaab   :  { %v1041_v56 = vpop.permute.xlu0 %1040 }
 0xaac   :  { %v1043_v57 = vmul.f32 %v1041_v56, %v1020_v27 }
 0xaae   :  { %1077 = vst [vmem:[#allocation1] ss:$4 sm:$0xff] %v1043_v57 }
 0xab3   :  { %v4658_v63 = vpop.permute.xlu0 %1052 }
 0xab4   :  { %vm6032_vm12 = vcmp.eq.s32.totalorder %v4658_v63, 1 }
 0xab5   :  { %v1078_v58 = vld.sshfl [vmem:[#allocation1] sm:$0xff pattern:$0x73625140] }
 0xab6   :  { %1085 = vst [vmem:[#allocation1] ss:$4 sm:$0xff] %v1037_v47  ;;  %1079 = vrot.lane.b32.xlu2 %v1078_v58, %s4231_s22 }
 0xabd   :  { %v1086_v59 = vld.sshfl [vmem:[#allocation1] sm:$0xff pattern:$0x73625140] }
 0xabe   :  { %1094 = vst [vmem:[#allocation1] ss:$4 sm:$0xff] %v1002_v52 }
 0xac5   :  { %v4654_v61 = vld.sshfl [vmem:[#allocation1] sm:$0xff pattern:$0x73625140] }
 0xac6   :  { %1104 = vst [vmem:[#allocation1] ss:$4 sm:$0xff] %v1043_v57 }
 0xaf7   :  { %v1059_v1 = vpop.permute.xlu1 %1058 }
 0xaf8   :  { %v1061_v3 = vsel %vm6032_vm12, %v1059_v1, %v4617_v53 }
 0xaf9   :  { %1062 = vst.msk [vmem:[#allocation3] sm:$0x3] %vm184_vm0, %v1061_v3 }
 0xaff   :  { %v1067_v4 = vpop.permute.xlu0 %1066 }
 0xb00   :  { %v1069_v9 = vsel %vm6032_vm12, %v1067_v4, %v4629_v54  ;;  %v4679_v53 = vld [vmem:[#allocation3] sm:$0x3] }
 0xb01   :  { %1070 = vst.msk [vmem:[#allocation4] sm:$0x3] %vm184_vm0, %v1069_v9 }
 0xb08   :  { %v4691_v27 = vld [vmem:[#allocation4] sm:$0x3] }
 0xb10   :  { %v1080_v10 = vpop.permute.xlu2 %1079 }
 0xb11   :  { %v1082_v11 = vsel %vm6031_vm13, %v1080_v10, %v4606_v12 }
 0xb12   :  { %1083 = vst.msk [vmem:[#allocation5] sm:$0x3] %vm184_vm0, %v1082_v11 }
 0xb19   :  { %v4674_v13 = vld [vmem:[#allocation5] sm:$0x3] }
 0xb1a   :  { %1117 = vrot.lane.b32.xlu2 %v4674_v13, %s4231_s22 }
 0xb22   :  { %1087 = vrot.lane.b32.xlu2 %v1086_v59, %s4234_s8 }
 0xb74   :  { %v1118_v54 = vpop.permute.xlu2 %1117 }
 0xb75   :  { %v1120_v14 = vsel %vm213_vm2, %v4679_v53, %v1118_v54  ;;  %v3854_v54 = vld [vmem:[%s6026_s4 + $0x16] sm:$0x3] }
 0xb76   :  { %3849 = vmatmul.msk.f32.vlgmr.msra.gmra.mxu0 %vm231_vm3, %v1120_v14  ;;  %3850 = vmatmul.msk.f32.vlgmr.msra.gmra.mxu1 %vm231_vm3, %v1120_v14 }
 0xb7c   :  { %v1088_v12 = vpop.permute.xlu2 %1087 }
 0xb7d   :  { %v1090_v15 = vsel %vm6031_vm13, %v1088_v12, %v4631_v45 }
 0xb7e   :  { %1091 = vst.msk [vmem:[#allocation6] sm:$0x3] %vm184_vm0, %v1090_v15 }
 0xb85   :  { %v4693_v45 = vld [vmem:[#allocation6] sm:$0x3] }
 0xbf3   :  { %v1157_v16 = vpop.f32.mrf.mxu0  ;;  %v1177_v18 = vpop.f32.mrf.mxu1 }
 0xbf4   :  { %v1182_v19 = vadd.f32 %v1181_v17, %v1157_v16  ;;  %v1188_v20 = vadd.f32 %v1186_v2, %v1177_v18 }
 0xbf6   :  { %4038 = vtanh.f32 %v1182_v19  ;;  %v3851_v29 = vmul.f32 -1.442695, %v1182_v19  ;;  %v3852_v30 = vmul.f32 -1.442695, %v1188_v20 }
 0xbf7   :  { %4040 = vtanh.f32 %v1188_v20 }
 0xbf8   :  { %4042 = vpow2.f32 %v3851_v29 }
 0xbf9   :  { %4044 = vpow2.f32 %v3852_v30 }
 0xbfc   :  { %v4039_v24 = vpop.eup %4038 }
 0xbfd   :  { %v4041_v25 = vpop.eup %4040  ;;  %1215 = vrot.lane.b32.xlu1 %v4039_v24, %s4232_s3 }
 0xbfe   :  { %1256 = vrot.lane.b32.xlu0 %v4041_v25, %s4232_s3  ;;  %v4043_v32 = vpop.eup %4042  ;;  %v3853_v25 = vld [vmem:[%s6026_s4 + $0x8] sm:$0x3] }
 0xbff   :  { %v4045_v33 = vpop.eup %4044  ;;  %v1192_v34 = vadd.f32 1.0, %v4043_v32 }
 0xc00   :  { %v1233_v26 = vadd.f32 1.0, %v4045_v33  ;;  %v4711_v33 = vld.sshfl [vmem:[#allocation1] sm:$0xff pattern:$0x73625140] }
 0xc01   :  { %4046 = vrcp.f32 %v1192_v34  ;;  %v1204_v51 = vand.u32 2147483648, %v1192_v34  ;;  %vm1198_vm1 = vweird.f32 %v1192_v34  ;;  %v1202_v31 = vand.u32 2147483647, %v1192_v34 }
 0xc02   :  { %4048 = vrcp.f32 %v1233_v26  ;;  %v1245_v52 = vand.u32 2147483648, %v1233_v26  ;;  %vm1239_vm8 = vweird.f32 %v1233_v26  ;;  %v1243_v55 = vand.u32 2147483647, %v1233_v26 }
 0xc03   :  { %v1205_v58 = vor.u32 1.1754944e-38, %v1204_v51  ;;  %vm1203_vm13 = vcmp.eq.f32.partialorder %v1202_v31, 8.507059e+37 }
 0xc04   :  { %v1246_v59 = vor.u32 1.1754944e-38, %v1245_v52  ;;  %vm1244_vm12 = vcmp.eq.f32.partialorder %v1243_v55, 8.507059e+37 }
 0xc05   :  { %1210 = vrot.lane.b32.xlu1 %v4691_v27, %s4231_s22 }
 0xc06   :  { %1251 = vrot.lane.b32.xlu0 %v4693_v45, %s4231_s22 }
 0xc07   :  { %v4047_v36 = vpop.eup %4046 }
 0xc08   :  { %v4049_v37 = vpop.eup %4048  ;;  %v1194_v38 = vmul.f32 %v4047_v36, %v1192_v34  ;;  %vm1199_vm14 = vweird.f32 %v4047_v36 }
 0xc09   :  { %v1235_v39 = vmul.f32 %v4049_v37, %v1233_v26  ;;  %vm1240_vm15 = vweird.f32 %v4049_v37  ;;  %vm1200_vm11 = vmor %vm1198_vm1, %vm1199_vm14  ;;  %vm1276_vm14 = vcmp.gt.f32.partialorder %v3854_v54, 0.0 }
 0xc0a   :  { %v1195_v40 = vsub.f32 1.0, %v1194_v38  ;;  %vm1241_vm9 = vmor %vm1239_vm8, %vm1240_vm15  ;;  %v1298_v14 = vsel %vm1276_vm14, 1, %v6047_v8 }
 0xc0b   :  { %v1236_v41 = vsub.f32 1.0, %v1235_v39 }
 0xc0c   :  { %v1196_v47 = vmul.f32 %v4047_v36, %v1195_v40 }
 0xc0d   :  { %v1237_v48 = vmul.f32 %v4049_v37, %v1236_v41 }
 0xc0e   :  { %v1197_v49 = vadd.f32 %v4047_v36, %v1196_v47 }
 0xc0f   :  { %v1238_v50 = vadd.f32 %v4049_v37, %v1237_v48 }
 0xc10   :  { %v1201_v56 = vsel %vm1200_vm11, %v4047_v36, %v1197_v49 }
 0xc11   :  { %v1242_v57 = vsel %vm1241_vm9, %v4049_v37, %v1238_v50  ;;  %v1206_v3 = vsel %vm1203_vm13, %v1205_v58, %v1201_v56  ;;  %v1411_v58 = vld [vmem:[#allocation2 + $0x28] sm:$0xf] }
 0xc12   :  { %v1247_v9 = vsel %vm1244_vm12, %v1246_v59, %v1242_v57  ;;  %vm1273_vm12 = vcmp.gt.f32.partialorder %v3853_v25, 0.0  ;;  %v1413_v59 = vrot.slane %v1411_v58, 2  ;;  %v3864_v58 = vld [vmem:[%s6026_s4 + $0x14] sm:$0x3] }
 0xc13   :  { %v1277_v29 = vsel %vm1273_vm12, 1, %v6047_v8 }
 0xc6f   :  { %v1216_v1 = vpop.permute.xlu1 %1215 }
 0xc70   :  { %v1257_v4 = vpop.permute.xlu0 %1256  ;;  %v1218_v10 = vmul.f32 %v1216_v1, %v1206_v3 }
 0xc71   :  { %v1259_v11 = vmul.f32 %v1257_v4, %v1247_v9 }
 0xc72   :  { %1220 = vrot.lane.b32.xlu2 %v1218_v10, %s4231_s22 }
 0xc73   :  { %1261 = vrot.lane.b32.xlu1 %v1259_v11, %s4231_s22 }
 0xc77   :  { %v1211_v12 = vpop.permute.xlu1 %1210 }
 0xc78   :  { %v1213_v15 = vmul.f32 %v1211_v12, %v1206_v3  ;;  %v1252_v17 = vpop.permute.xlu0 %1251 }
 0xc79   :  { %v1254_v18 = vmul.f32 %v1252_v17, %v1247_v9 }
 0xc7b   :  { %1300 = vperm.xlu1 %3973, %v1298_v14  }
 0xccc   :  { %v1221_v28 = vpop.permute.xlu2 %1220 }
 0xccd   :  { %v1223_v2 = vadd.f32 %v1221_v28, %v1213_v15 }
 0xccf   :  { %4050 = vtanh.f32 %v1223_v2 }
 0xcd5   :  { %v4051_v16 = vpop.eup %4050 }
 0xcd6   :  { %1226 = vrot.lane.b32.xlu2 %v4051_v16, %s4232_s3 }
 0xce5   :  { %v1262_v19 = vpop.permute.xlu1 %1261 }
 0xce6   :  { %v1264_v20 = vadd.f32 %v1262_v19, %v1254_v18 }
 0xce8   :  { %4052 = vtanh.f32 %v1264_v20 }
 0xced   :  { %v4718_v41 = vpop.permute.xlu1 %1300 }
 0xcee   :  { %v4053_v24 = vpop.eup %4052  ;;  %vm6034_vm15 = vcmp.eq.s32.totalorder %v4718_v41, 1 }
 0xcef   :  { %1267 = vrot.lane.b32.xlu0 %v4053_v24, %s4232_s3 }
 0xcf7   :  { %1279 = vperm.xlu0 %3971, %v1277_v29  }
 0xd30   :  { %v1227_v30 = vpop.permute.xlu2 %1226 }
 0xd31   :  { %v1229_v32 = vmul.f32 %v1227_v30, %v1206_v3  ;;  %v1408_v3 = vld [vmem:[#allocation2 + $0x14] sm:$0xf] }
 0xd33   :  { %1283 = vst [vmem:[#allocation1] ss:$4 sm:$0xff] %v1229_v32 }
 0xd3a   :  { %v1284_v34 = vld.sshfl [vmem:[#allocation1] sm:$0xff pattern:$0x73625140] }
 0xd3b   :  { %1291 = vst [vmem:[#allocation1] ss:$4 sm:$0xff] %v1223_v2  ;;  %1285 = vrot.lane.b32.xlu1 %v1284_v34, %s4231_s22 }
 0xd42   :  { %v1292_v26 = vld.sshfl [vmem:[#allocation1] sm:$0xff pattern:$0x73625140] }
 0xd43   :  { %1293 = vrot.lane.b32.xlu0 %v1292_v26, %s4234_s8 }
 0xd61   :  { %v1268_v36 = vpop.permute.xlu0 %1267 }
 0xd62   :  { %v1270_v37 = vmul.f32 %v1268_v36, %v1247_v9 }
 0xd64   :  { %1304 = vst [vmem:[#allocation1] ss:$4 sm:$0xff] %v1270_v37 }
 0xd69   :  { %v4720_v47 = vpop.permute.xlu0 %1279 }
 0xd6a   :  { %6075 = vst [vmem:[#allocation7_spill] sm:$0xff] %v4720_v47  ;;  %vm6033_vm13 = vcmp.eq.s32.totalorder %v4720_v47, 1 }
 0xd6b   :  { %v1305_v38 = vld.sshfl [vmem:[#allocation1] sm:$0xff pattern:$0x73625140] }
 0xd6c   :  { %1312 = vst [vmem:[#allocation1] ss:$4 sm:$0xff] %v1264_v20  ;;  %1306 = vrot.lane.b32.xlu2 %v1305_v38, %s4231_s22 }
 0xd73   :  { %v1313_v39 = vld.sshfl [vmem:[#allocation1] sm:$0xff pattern:$0x73625140] }
 0xd74   :  { %1321 = vst [vmem:[#allocation1] ss:$4 sm:$0xff] %v1229_v32 }
 0xd7b   :  { %v4716_v40 = vld.sshfl [vmem:[#allocation1] sm:$0xff pattern:$0x73625140] }
 0xd7c   :  { %1331 = vst [vmem:[#allocation1] ss:$4 sm:$0xff] %v1270_v37 }
 0xdad   :  { %v1286_v48 = vpop.permute.xlu1 %1285 }
 0xdae   :  { %v1288_v49 = vsel %vm6033_vm13, %v1286_v48, %v4679_v53 }
 0xdaf   :  { %1289 = vst.msk [vmem:[#allocation3] sm:$0x3] %vm184_vm0, %v1288_v49 }
 0xdb5   :  { %v1294_v50 = vpop.permute.xlu0 %1293 }
 0xdb6   :  { %v1296_v51 = vsel %vm6033_vm13, %v1294_v50, %v4691_v27  ;;  %v4741_v53 = vld [vmem:[#allocation3] sm:$0x3] }
 0xdb7   :  { %1297 = vst.msk [vmem:[#allocation4] sm:$0x3] %vm184_vm0, %v1296_v51 }
 0xdbe   :  { %v4753_v14 = vld [vmem:[#allocation4] sm:$0x3] }
 0xdc6   :  { %v1307_v52 = vpop.permute.xlu2 %1306 }
 0xdc7   :  { %v1309_v31 = vsel %vm6034_vm15, %v1307_v52, %v4674_v13 }
 0xdc8   :  { %1310 = vst.msk [vmem:[#allocation5] sm:$0x3] %vm184_vm0, %v1309_v31 }
 0xdcf   :  { %v4736_v55 = vld [vmem:[#allocation5] sm:$0x3] }
 0xdd0   :  { %1344 = vrot.lane.b32.xlu2 %v4736_v55, %s4231_s22 }
 0xdd8   :  { %1314 = vrot.lane.b32.xlu2 %v1313_v39, %s4234_s8 }
 0xe2a   :  { %v1345_v27 = vpop.permute.xlu2 %1344 }
 0xe2b   :  { %v1347_v56 = vsel %vm213_vm2, %v4741_v53, %v1345_v27 }
 0xe2c   :  { %3859 = vmatmul.msk.f32.vlgmr.msrb.gmra.mxu2 %vm231_vm3, %v1347_v56  ;;  %3860 = vmatmul.msk.f32.vlgmr.msrb.gmra.mxu3 %vm231_vm3, %v1347_v56 }
 0xe32   :  { %v1315_v13 = vpop.permute.xlu2 %1314 }
 0xe33   :  { %v1317_v57 = vsel %vm6034_vm15, %v1315_v13, %v4693_v45 }
 0xe34   :  { %1318 = vst.msk [vmem:[#allocation6] sm:$0x3] %vm184_vm0, %v1317_v57 }
 0xe3b   :  { %v4757_v45 = vld [vmem:[#allocation6] sm:$0x3] }
 0xeaf   :  { %v1384_v1 = vpop.f32.mrf.mxu2  ;;  %v1404_v4 = vpop.f32.mrf.mxu3 }
 0xeb0   :  { %v1409_v9 = vadd.f32 %v1408_v3, %v1384_v1  ;;  %v1415_v10 = vadd.f32 %v1413_v59, %v1404_v4 }
 0xeb2   :  { %4054 = vtanh.f32 %v1409_v9  ;;  %v3861_v12 = vmul.f32 -1.442695, %v1409_v9  ;;  %v3862_v15 = vmul.f32 -1.442695, %v1415_v10 }
 0xeb3   :  { %4056 = vtanh.f32 %v1415_v10 }
 0xeb4   :  { %4058 = vpow2.f32 %v3861_v12 }
 0xeb5   :  { %4060 = vpow2.f32 %v3862_v15 }
 0xeb8   :  { %v4055_v11 = vpop.eup %4054 }
 0xeb9   :  { %v4057_v54 = vpop.eup %4056  ;;  %1442 = vrot.lane.b32.xlu1 %v4055_v11, %s4232_s3 }
 0xeba   :  { %1483 = vrot.lane.b32.xlu0 %v4057_v54, %s4232_s3  ;;  %v4059_v28 = vpop.eup %4058 }
 0xebb   :  { %v4061_v2 = vpop.eup %4060  ;;  %v1419_v16 = vadd.f32 1.0, %v4059_v28 }
 0xebc   :  { %v1460_v17 = vadd.f32 1.0, %v4061_v2  ;;  %v3863_v2 = vld [vmem:[%s6026_s4 + $0xa] sm:$0x3] }
 0xebd   :  { %4062 = vrcp.f32 %v1419_v16  ;;  %v1431_v36 = vand.u32 2147483648, %v1419_v16  ;;  %vm1425_vm11 = vweird.f32 %v1419_v16  ;;  %v1429_v38 = vand.u32 2147483647, %v1419_v16 }
 0xebe   :  { %4064 = vrcp.f32 %v1460_v17  ;;  %v1472_v37 = vand.u32 2147483648, %v1460_v17  ;;  %vm1466_vm9 = vweird.f32 %v1460_v17  ;;  %v1470_v39 = vand.u32 2147483647, %v1460_v17 }
 0xebf   :  { %v1432_v50 = vor.u32 1.1754944e-38, %v1431_v36  ;;  %vm1430_vm13 = vcmp.eq.f32.partialorder %v1429_v38, 8.507059e+37 }
 0xec0   :  { %v1473_v51 = vor.u32 1.1754944e-38, %v1472_v37  ;;  %vm1471_vm15 = vcmp.eq.f32.partialorder %v1470_v39, 8.507059e+37 }
 0xec1   :  { %1437 = vrot.lane.b32.xlu1 %v4753_v14, %s4231_s22 }
 0xec2   :  { %1478 = vrot.lane.b32.xlu0 %v4757_v45, %s4231_s22 }
 0xec3   :  { %v4063_v18 = vpop.eup %4062 }
 0xec4   :  { %v4065_v19 = vpop.eup %4064  ;;  %v1421_v20 = vmul.f32 %v4063_v18, %v1419_v16  ;;  %vm1426_vm1 = vweird.f32 %v4063_v18 }
 0xec5   :  { %v1462_v24 = vmul.f32 %v4065_v19, %v1460_v17  ;;  %vm1467_vm8 = vweird.f32 %v4065_v19  ;;  %vm1427_vm14 = vmor %vm1425_vm11, %vm1426_vm1  ;;  %vm1503_vm1 = vcmp.gt.f32.partialorder %v3864_v58, 0.0 }
 0xec6   :  { %v1422_v25 = vsub.f32 1.0, %v1421_v20  ;;  %vm1468_vm12 = vmor %vm1466_vm9, %vm1467_vm8  ;;  %v1525_v59 = vsel %vm1503_vm1, 1, %v6047_v8 }
 0xec7   :  { %v1463_v29 = vsub.f32 1.0, %v1462_v24 }
 0xec8   :  { %v1423_v30 = vmul.f32 %v4063_v18, %v1422_v25 }
 0xec9   :  { %v1464_v32 = vmul.f32 %v4065_v19, %v1463_v29 }
 0xeca   :  { %v1424_v34 = vadd.f32 %v4063_v18, %v1423_v30 }
 0xecb   :  { %v1465_v26 = vadd.f32 %v4065_v19, %v1464_v32 }
 0xecc   :  { %v1428_v48 = vsel %vm1427_vm14, %v4063_v18, %v1424_v34 }
 0xecd   :  { %v1469_v49 = vsel %vm1468_vm12, %v4065_v19, %v1465_v26  ;;  %v1433_v31 = vsel %vm1430_vm13, %v1432_v50, %v1428_v48  ;;  %vm1500_vm13 = vcmp.gt.f32.partialorder %v3863_v2, 0.0  ;;  %v4773_v19 = vld.sshfl [vmem:[#allocation1] sm:$0xff pattern:$0x73625140] }
 0xece   :  { %v1474_v56 = vsel %vm1471_vm15, %v1473_v51, %v1469_v49  ;;  %v1504_v16 = vsel %vm1500_vm13, 1, %v6047_v8 }
 0xf2b   :  { %v1443_v52 = vpop.permute.xlu1 %1442 }
 0xf2c   :  { %v1484_v27 = vpop.permute.xlu0 %1483  ;;  %v1445_v13 = vmul.f32 %v1443_v52, %v1433_v31 }
 0xf2d   :  { %v1486_v57 = vmul.f32 %v1484_v27, %v1474_v56  ;;  %v1638_v27 = vld [vmem:[#allocation2 + $0x24] sm:$0xf] }
 0xf2e   :  { %1447 = vrot.lane.b32.xlu2 %v1445_v13, %s4231_s22 }
 0xf2f   :  { %1488 = vrot.lane.b32.xlu1 %v1486_v57, %s4231_s22  ;;  %v1635_v57 = vld [vmem:[#allocation2 + $0x18] sm:$0xf] }
 0xf33   :  { %v1438_v1 = vpop.permute.xlu1 %1437 }
 0xf34   :  { %v1440_v3 = vmul.f32 %v1438_v1, %v1433_v31  ;;  %v1479_v11 = vpop.permute.xlu0 %1478 }
 0xf35   :  { %v1481_v54 = vmul.f32 %v1479_v11, %v1474_v56 }
 0xf37   :  { %1527 = vperm.xlu1 %3973, %v1525_v59  }
 0xf88   :  { %v1448_v4 = vpop.permute.xlu2 %1447 }
 0xf89   :  { %v1450_v9 = vadd.f32 %v1448_v4, %v1440_v3 }
 0xf8b   :  { %4066 = vtanh.f32 %v1450_v9 }
 0xf91   :  { %v4067_v10 = vpop.eup %4066 }
 0xf92   :  { %1453 = vrot.lane.b32.xlu2 %v4067_v10, %s4232_s3 }
 0xfa1   :  { %v1489_v12 = vpop.permute.xlu1 %1488 }
 0xfa2   :  { %v1491_v15 = vadd.f32 %v1489_v12, %v1481_v54 }
 0xfa4   :  { %4068 = vtanh.f32 %v1491_v15 }
 0xfa9   :  { %v4780_v26 = vpop.permute.xlu1 %1527 }
 0xfaa   :  { %v4069_v28 = vpop.eup %4068  ;;  %6076 = vst [vmem:[#allocation8_spill] sm:$0xff] %v4780_v26  ;;  %vm6035_vm8 = vcmp.eq.s32.totalorder %v4780_v26, 1 }
 0xfab   :  { %1494 = vrot.lane.b32.xlu0 %v4069_v28, %s4232_s3 }
 0xfb3   :  { %1506 = vperm.xlu0 %3971, %v1504_v16  }
 0xfec   :  { %v1454_v17 = vpop.permute.xlu2 %1453 }
 0xfed   :  { %v1456_v18 = vmul.f32 %v1454_v17, %v1433_v31 }
 0xfef   :  { %1510 = vst [vmem:[#allocation1] ss:$4 sm:$0xff] %v1456_v18 }
 0xff6   :  { %v1511_v20 = vld.sshfl [vmem:[#allocation1] sm:$0xff pattern:$0x73625140] }
 0xff7   :  { %1518 = vst [vmem:[#allocation1] ss:$4 sm:$0xff] %v1450_v9  ;;  %1512 = vrot.lane.b32.xlu1 %v1511_v20, %s4231_s22 }
 0xffe   :  { %v1519_v24 = vld.sshfl [vmem:[#allocation1] sm:$0xff pattern:$0x73625140] }
 0xfff   :  { %1520 = vrot.lane.b32.xlu0 %v1519_v24, %s4234_s8 }
0x101d   :  { %v1495_v25 = vpop.permute.xlu0 %1494 }
0x101e   :  { %v1497_v29 = vmul.f32 %v1495_v25, %v1474_v56  ;;  %v1640_v56 = vrot.slane %v1638_v27, 2 }
0x1020   :  { %1531 = vst [vmem:[#allocation1] ss:$4 sm:$0xff] %v1497_v29 }
0x1025   :  { %v4782_v36 = vpop.permute.xlu0 %1506 }
0x1026   :  { %6077 = vst [vmem:[#allocation9_spill] sm:$0xff] %v4782_v36  ;;  %vm6036_vm15 = vcmp.eq.s32.totalorder %v4782_v36, 1 }
0x1027   :  { %v1532_v30 = vld.sshfl [vmem:[#allocation1] sm:$0xff pattern:$0x73625140] }
0x1028   :  { %1539 = vst [vmem:[#allocation1] ss:$4 sm:$0xff] %v1491_v15  ;;  %1533 = vrot.lane.b32.xlu2 %v1532_v30, %s4231_s22 }
0x102f   :  { %v1540_v32 = vld.sshfl [vmem:[#allocation1] sm:$0xff pattern:$0x73625140] }
0x1030   :  { %1548 = vst [vmem:[#allocation1] ss:$4 sm:$0xff] %v1456_v18 }
0x1037   :  { %v4778_v34 = vld.sshfl [vmem:[#allocation1] sm:$0xff pattern:$0x73625140] }
0x1038   :  { %1558 = vst [vmem:[#allocation1] ss:$4 sm:$0xff] %v1497_v29 }
0x1069   :  { %v1513_v37 = vpop.permute.xlu1 %1512 }
0x106a   :  { %v1515_v38 = vsel %vm6036_vm15, %v1513_v37, %v4741_v53 }
0x106b   :  { %1516 = vst.msk [vmem:[#allocation3] sm:$0x3] %vm184_vm0, %v1515_v38 }
0x1071   :  { %v1521_v39 = vpop.permute.xlu0 %1520 }
0x1072   :  { %v1523_v48 = vsel %vm6036_vm15, %v1521_v39, %v4753_v14  ;;  %v4803_v53 = vld [vmem:[#allocation3] sm:$0x3] }
0x1073   :  { %1524 = vst.msk [vmem:[#allocation4] sm:$0x3] %vm184_vm0, %v1523_v48 }
0x107a   :  { %v4815_v9 = vld [vmem:[#allocation4] sm:$0x3] }
0x1082   :  { %v1534_v49 = vpop.permute.xlu2 %1533 }
0x1083   :  { %v1536_v50 = vsel %vm6035_vm8, %v1534_v49, %v4736_v55 }
0x1084   :  { %1537 = vst.msk [vmem:[#allocation5] sm:$0x3] %vm184_vm0, %v1536_v50 }
0x108b   :  { %v4798_v51 = vld [vmem:[#allocation5] sm:$0x3] }
0x108c   :  { %1571 = vrot.lane.b32.xlu2 %v4798_v51, %s4231_s22 }
0x1094   :  { %1541 = vrot.lane.b32.xlu2 %v1540_v32, %s4234_s8 }
0x10e6   :  { %v1572_v14 = vpop.permute.xlu2 %1571 }
0x10e7   :  { %v1574_v52 = vsel %vm213_vm2, %v4803_v53, %v1572_v14 }
0x10e8   :  { %3869 = vmatmul.msk.f32.vlgmr.msrb.gmra.mxu0 %vm231_vm3, %v1574_v52  ;;  %3870 = vmatmul.msk.f32.vlgmr.msrb.gmra.mxu1 %vm231_vm3, %v1574_v52 }
0x10ee   :  { %v1542_v55 = vpop.permute.xlu2 %1541 }
0x10ef   :  { %v1544_v31 = vsel %vm6035_vm8, %v1542_v55, %v4757_v45 }
0x10f0   :  { %1545 = vst.msk [vmem:[#allocation6] sm:$0x3] %vm184_vm0, %v1544_v31 }
0x10f7   :  { %v4819_v45 = vld [vmem:[#allocation6] sm:$0x3] }
0x1165   :  { %v1611_v13 = vpop.f32.mrf.mxu0  ;;  %v1631_v58 = vpop.f32.mrf.mxu1 }
0x1166   :  { %v1636_v59 = vadd.f32 %v1635_v57, %v1611_v13  ;;  %v1642_v1 = vadd.f32 %v1640_v56, %v1631_v58  ;;  %v3874_v58 = vld [vmem:[%s6026_s4 + $0x12] sm:$0x3] }
0x1168   :  { %4070 = vtanh.f32 %v1636_v59  ;;  %v3871_v10 = vmul.f32 -1.442695, %v1636_v59  ;;  %v3872_v11 = vmul.f32 -1.442695, %v1642_v1 }
0x1169   :  { %4072 = vtanh.f32 %v1642_v1 }
0x116a   :  { %4074 = vpow2.f32 %v3871_v10 }
0x116b   :  { %4076 = vpow2.f32 %v3872_v11 }
0x116e   :  { %v4071_v3 = vpop.eup %4070 }
0x116f   :  { %v4073_v4 = vpop.eup %4072  ;;  %1669 = vrot.lane.b32.xlu1 %v4071_v3, %s4232_s3 }
0x1170   :  { %1710 = vrot.lane.b32.xlu0 %v4073_v4, %s4232_s3  ;;  %v4075_v54 = vpop.eup %4074 }
0x1171   :  { %v4077_v12 = vpop.eup %4076  ;;  %v1646_v15 = vadd.f32 1.0, %v4075_v54 }
0x1172   :  { %v1687_v28 = vadd.f32 1.0, %v4077_v12 }
0x1173   :  { %4078 = vrcp.f32 %v1646_v15  ;;  %v1658_v37 = vand.u32 2147483648, %v1646_v15  ;;  %vm1652_vm14 = vweird.f32 %v1646_v15  ;;  %v1656_v39 = vand.u32 2147483647, %v1646_v15 }
0x1174   :  { %4080 = vrcp.f32 %v1687_v28  ;;  %v1699_v38 = vand.u32 2147483648, %v1687_v28  ;;  %vm1693_vm12 = vweird.f32 %v1687_v28  ;;  %v1697_v48 = vand.u32 2147483647, %v1687_v28 }
0x1175   :  { %v1659_v14 = vor.u32 1.1754944e-38, %v1658_v37  ;;  %vm1657_vm8 = vcmp.eq.f32.partialorder %v1656_v39, 8.507059e+37 }
0x1176   :  { %v1700_v52 = vor.u32 1.1754944e-38, %v1699_v38  ;;  %vm1698_vm15 = vcmp.eq.f32.partialorder %v1697_v48, 8.507059e+37 }
0x1177   :  { %1664 = vrot.lane.b32.xlu1 %v4815_v9, %s4231_s22 }
0x1178   :  { %1705 = vrot.lane.b32.xlu0 %v4819_v45, %s4231_s22 }
0x1179   :  { %v4079_v2 = vpop.eup %4078 }
0x117a   :  { %v4081_v16 = vpop.eup %4080  ;;  %v1648_v17 = vmul.f32 %v4079_v2, %v1646_v15  ;;  %vm1653_vm11 = vweird.f32 %v4079_v2 }
0x117b   :  { %v1689_v18 = vmul.f32 %v4081_v16, %v1687_v28  ;;  %vm1694_vm9 = vweird.f32 %v4081_v16  ;;  %vm1654_vm1 = vmor %vm1652_vm14, %vm1653_vm11  ;;  %vm1730_vm11 = vcmp.gt.f32.partialorder %v3874_v58, 0.0  ;;  %v1811_v58 = vld [vmem:[%s6024_s2 + $0x48] sm:$0xff] }
0x117c   :  { %v1649_v20 = vsub.f32 1.0, %v1648_v17  ;;  %vm1695_vm13 = vmor %vm1693_vm12, %vm1694_vm9  ;;  %v1752_v59 = vsel %vm1730_vm11, 1, %v6047_v8 }
0x117d   :  { %v1690_v24 = vsub.f32 1.0, %v1689_v18 }
0x117e   :  { %v1650_v25 = vmul.f32 %v4079_v2, %v1649_v20 }
0x117f   :  { %v1691_v29 = vmul.f32 %v4081_v16, %v1690_v24  ;;  %v4835_v24 = vld.sshfl [vmem:[#allocation1] sm:$0xff pattern:$0x73625140] }
0x1180   :  { %v1651_v30 = vadd.f32 %v4079_v2, %v1650_v25 }
0x1181   :  { %v1692_v32 = vadd.f32 %v4081_v16, %v1691_v29 }
0x1182   :  { %v1655_v49 = vsel %vm1654_vm1, %v4079_v2, %v1651_v30 }
0x1183   :  { %v1696_v50 = vsel %vm1695_vm13, %v4081_v16, %v1692_v32  ;;  %v1660_v31 = vsel %vm1657_vm8, %v1659_v14, %v1655_v49  ;;  %v3873_v16 = vld [vmem:[%s6026_s4 + $0xc] sm:$0x3] }
0x1184   :  { %v1701_v56 = vsel %vm1698_vm15, %v1700_v52, %v1696_v50  ;;  %vm1727_vm15 = vcmp.gt.f32.partialorder %v3873_v16, 0.0 }
0x1185   :  { %v1731_v17 = vsel %vm1727_vm15, 1, %v6047_v8 }
0x11e1   :  { %v1670_v55 = vpop.permute.xlu1 %1669 }
0x11e2   :  { %v1711_v27 = vpop.permute.xlu0 %1710  ;;  %v1672_v13 = vmul.f32 %v1670_v55, %v1660_v31 }
0x11e3   :  { %v1713_v57 = vmul.f32 %v1711_v27, %v1701_v56  ;;  %v1817_v27 = vld [vmem:[%s6024_s2 + $0x78] sm:$0xff] }
0x11e4   :  { %1674 = vrot.lane.b32.xlu2 %v1672_v13, %s4231_s22  ;;  %1849 = vmatpush.msra.mxu3 %v1817_v27  ;;  %v1813_v13 = vld [vmem:[%s6024_s2 + $0x58] sm:$0xff] }
0x11e5   :  { %1715 = vrot.lane.b32.xlu1 %v1713_v57, %s4231_s22  ;;  %2076 = vmatpush.msra.mxu1 %v1817_v27  ;;  %v1810_v57 = vld [vmem:[%s6024_s2 + $0x40] sm:$0xff] }
0x11e9   :  { %v1665_v1 = vpop.permute.xlu1 %1664 }
0x11ea   :  { %v1667_v3 = vmul.f32 %v1665_v1, %v1660_v31  ;;  %v1706_v54 = vpop.permute.xlu0 %1705  ;;  %v1809_v1 = vld [vmem:[%s6024_s2 + $0x38] sm:$0xff] }
0x11eb   :  { %v1708_v12 = vmul.f32 %v1706_v54, %v1701_v56 }
0x11ed   :  { %1754 = vperm.xlu1 %3973, %v1752_v59   ;;  %v1808_v59 = vld [vmem:[%s6024_s2 + $0x30] sm:$0xff] }
0x123e   :  { %v1675_v4 = vpop.permute.xlu2 %1674 }
0x123f   :  { %v1677_v10 = vadd.f32 %v1675_v4, %v1667_v3  ;;  %v1806_v3 = vld [vmem:[%s6024_s2 + $0x20] sm:$0xff]  ;;  %v1807_v4 = vld [vmem:[%s6024_s2 + $0x28] sm:$0xff] }
0x1241   :  { %4082 = vtanh.f32 %v1677_v10 }
0x1247   :  { %v4083_v11 = vpop.eup %4082 }
0x1248   :  { %1680 = vrot.lane.b32.xlu2 %v4083_v11, %s4232_s3  ;;  %v1805_v11 = vld [vmem:[%s6024_s2 + $0x18] sm:$0xff] }
0x1257   :  { %v1716_v15 = vpop.permute.xlu1 %1715 }
0x1258   :  { %v1718_v28 = vadd.f32 %v1716_v15, %v1708_v12 }
0x125a   :  { %4084 = vtanh.f32 %v1718_v28 }
0x125f   :  { %v4842_v48 = vpop.permute.xlu1 %1754 }
0x1260   :  { %v4085_v2 = vpop.eup %4084  ;;  %6078 = vst [vmem:[#allocation10_spill] sm:$0xff] %v4842_v48  ;;  %vm6037_vm9 = vcmp.eq.s32.totalorder %v4842_v48, 1 }
0x1261   :  { %1721 = vrot.lane.b32.xlu0 %v4085_v2, %s4232_s3  ;;  %v1803_v2 = vld [vmem:[%s6024_s2 + $0x8] sm:$0xff] }
0x1269   :  { %1733 = vperm.xlu0 %3971, %v1731_v17  }
0x12a2   :  { %v1681_v18 = vpop.permute.xlu2 %1680 }
0x12a3   :  { %v1683_v20 = vmul.f32 %v1681_v18, %v1660_v31  ;;  %v1816_v31 = vld [vmem:[%s6024_s2 + $0x70] sm:$0xff] }
0x12a4   :  { %1829 = vmatpush.msra.mxu2 %v1816_v31  ;;  %2056 = vmatpush.msra.mxu0 %v1816_v31 }
0x12a5   :  { %1737 = vst [vmem:[#allocation1] ss:$4 sm:$0xff] %v1683_v20 }
0x12ac   :  { %v1738_v25 = vld.sshfl [vmem:[#allocation1] sm:$0xff pattern:$0x73625140] }
0x12ad   :  { %1745 = vst [vmem:[#allocation1] ss:$4 sm:$0xff] %v1677_v10  ;;  %1739 = vrot.lane.b32.xlu1 %v1738_v25, %s4231_s22  ;;  %v1804_v10 = vld [vmem:[%s6024_s2 + $0x10] sm:$0xff]  ;;  %v1865_v25 = vld [vmem:[#allocation2 + $0x20] sm:$0xf] }
0x12b4   :  { %v1746_v29 = vld.sshfl [vmem:[#allocation1] sm:$0xff pattern:$0x73625140] }
0x12b5   :  { %1747 = vrot.lane.b32.xlu0 %v1746_v29, %s4234_s8  ;;  %v1867_v29 = vrot.slane %v1865_v25, 2 }
0x12d3   :  { %v1722_v30 = vpop.permute.xlu0 %1721 }
0x12d4   :  { %v1724_v32 = vmul.f32 %v1722_v30, %v1701_v56  ;;  %v1812_v56 = vld [vmem:[%s6024_s2 + $0x50] sm:$0xff] }
0x12d6   :  { %1758 = vst [vmem:[#allocation1] ss:$4 sm:$0xff] %v1724_v32 }
0x12db   :  { %v4844_v49 = vpop.permute.xlu0 %1733 }
0x12dc   :  { %vm6038_vm8 = vcmp.eq.s32.totalorder %v4844_v49, 1 }
0x12dd   :  { %v1759_v37 = vld.sshfl [vmem:[#allocation1] sm:$0xff pattern:$0x73625140] }
0x12de   :  { %1766 = vst [vmem:[#allocation1] ss:$4 sm:$0xff] %v1718_v28  ;;  %1760 = vrot.lane.b32.xlu2 %v1759_v37, %s4231_s22  ;;  %v1802_v28 = vld [vmem:[%s6024_s2] sm:$0xff] }
0x12e5   :  { %v1767_v38 = vld.sshfl [vmem:[#allocation1] sm:$0xff pattern:$0x73625140] }
0x12e6   :  { %1775 = vst [vmem:[#allocation1] ss:$4 sm:$0xff] %v1683_v20 }
0x12ed   :  { %v4840_v39 = vld.sshfl [vmem:[#allocation1] sm:$0xff pattern:$0x73625140] }
0x12ee   :  { %1785 = vst [vmem:[#allocation1] ss:$4 sm:$0xff] %v1724_v32  ;;  %v1862_v32 = vld [vmem:[#allocation2 + $0x1c] sm:$0xf] }
0x131f   :  { %v1740_v50 = vpop.permute.xlu1 %1739 }
0x1320   :  { %v1742_v14 = vsel %vm6038_vm8, %v1740_v50, %v4803_v53  ;;  %v1814_v53 = vld [vmem:[%s6024_s2 + $0x60] sm:$0xff] }
0x1321   :  { %1743 = vst.msk [vmem:[#allocation3] sm:$0x3] %vm184_vm0, %v1742_v14  ;;  %1830 = vmatpush.msra.mxu2 %v1814_v53  ;;  %2057 = vmatpush.msra.mxu0 %v1814_v53 }
0x1323   :  { %1831 = vmatpush.msra.mxu2 %v1812_v56  ;;  %2058 = vmatpush.msra.mxu0 %v1812_v56 }
0x1325   :  { %1832 = vmatpush.msra.mxu2 %v1810_v57  ;;  %2059 = vmatpush.msra.mxu0 %v1810_v57 }
0x1327   :  { %v1748_v52 = vpop.permute.xlu0 %1747  ;;  %1833 = vmatpush.msra.mxu2 %v1808_v59  ;;  %2060 = vmatpush.msra.mxu0 %v1808_v59 }
0x1328   :  { %v1750_v55 = vsel %vm6038_vm8, %v1748_v52, %v4815_v9  ;;  %v1815_v9 = vld [vmem:[%s6024_s2 + $0x68] sm:$0xff] }
0x1329   :  { %1751 = vst.msk [vmem:[#allocation4] sm:$0x3] %vm184_vm0, %v1750_v55  ;;  %1850 = vmatpush.msra.mxu3 %v1815_v9  ;;  %2077 = vmatpush.msra.mxu1 %v1815_v9 }
0x132a   :  { %1834 = vmatpush.msra.mxu2 %v1806_v3  ;;  %2061 = vmatpush.msra.mxu0 %v1806_v3 }
0x132b   :  { %1851 = vmatpush.msra.mxu3 %v1813_v13  ;;  %2078 = vmatpush.msra.mxu1 %v1813_v13 }
0x132c   :  { %1835 = vmatpush.msra.mxu2 %v1804_v10  ;;  %2062 = vmatpush.msra.mxu0 %v1804_v10 }
0x132d   :  { %1852 = vmatpush.msra.mxu3 %v1811_v58  ;;  %2079 = vmatpush.msra.mxu1 %v1811_v58 }
0x132e   :  { %1836 = vmatpush.msra.mxu2 %v1802_v28  ;;  %2063 = vmatpush.msra.mxu0 %v1802_v28 }
0x132f   :  { %1853 = vmatpush.msra.mxu3 %v1809_v1  ;;  %2080 = vmatpush.msra.mxu1 %v1809_v1 }
0x1330   :  { %2277 = vmatpush.msrb.mxu2 %v1816_v31  ;;  %2498 = vmatpush.msrb.mxu0 %v1816_v31  ;;  %v4925_v55 = vld [vmem:[#allocation4] sm:$0x3] }
0x1331   :  { %1854 = vmatpush.msra.mxu3 %v1807_v4  ;;  %2081 = vmatpush.msra.mxu1 %v1807_v4 }
0x1332   :  { %2278 = vmatpush.msrb.mxu2 %v1814_v53  ;;  %2499 = vmatpush.msrb.mxu0 %v1814_v53 }
0x1333   :  { %1855 = vmatpush.msra.mxu3 %v1805_v11  ;;  %2082 = vmatpush.msra.mxu1 %v1805_v11 }
0x1334   :  { %2279 = vmatpush.msrb.mxu2 %v1812_v56  ;;  %2500 = vmatpush.msrb.mxu0 %v1812_v56 }
0x1335   :  { %1856 = vmatpush.msra.mxu3 %v1803_v2  ;;  %2083 = vmatpush.msra.mxu1 %v1803_v2 }
0x1336   :  { %2280 = vmatpush.msrb.mxu2 %v1810_v57  ;;  %2501 = vmatpush.msrb.mxu0 %v1810_v57 }
0x1337   :  { %2297 = vmatpush.msrb.mxu3 %v1817_v27  ;;  %2518 = vmatpush.msrb.mxu1 %v1817_v27 }
0x1338   :  { %v1761_v54 = vpop.permute.xlu2 %1760  ;;  %2281 = vmatpush.msrb.mxu2 %v1808_v59  ;;  %2502 = vmatpush.msrb.mxu0 %v1808_v59 }
0x1339   :  { %v1763_v12 = vsel %vm6037_vm9, %v1761_v54, %v4798_v51  ;;  %2298 = vmatpush.msrb.mxu3 %v1815_v9  ;;  %2519 = vmatpush.msrb.mxu1 %v1815_v9  ;;  %v4913_v51 = vld [vmem:[#allocation3] sm:$0x3] }
0x133a   :  { %1764 = vst.msk [vmem:[#allocation5] sm:$0x3] %vm184_vm0, %v1763_v12  ;;  %2282 = vmatpush.msrb.mxu2 %v1806_v3  ;;  %2503 = vmatpush.msrb.mxu0 %v1806_v3 }
0x133b   :  { %2299 = vmatpush.msrb.mxu3 %v1813_v13  ;;  %2520 = vmatpush.msrb.mxu1 %v1813_v13 }
0x133c   :  { %2283 = vmatpush.msrb.mxu2 %v1804_v10  ;;  %2504 = vmatpush.msrb.mxu0 %v1804_v10 }
0x133d   :  { %2300 = vmatpush.msrb.mxu3 %v1811_v58  ;;  %2521 = vmatpush.msrb.mxu1 %v1811_v58 }
0x133e   :  { %2284 = vmatpush.msrb.mxu2 %v1802_v28  ;;  %2505 = vmatpush.msrb.mxu0 %v1802_v28 }
0x133f   :  { %2301 = vmatpush.msrb.mxu3 %v1809_v1  ;;  %2522 = vmatpush.msrb.mxu1 %v1809_v1 }
0x1341   :  { %v4902_v15 = vld [vmem:[#allocation5] sm:$0x3]  ;;  %2302 = vmatpush.msrb.mxu3 %v1807_v4  ;;  %2523 = vmatpush.msrb.mxu1 %v1807_v4 }
0x1342   :  { %1798 = vrot.lane.b32.xlu2 %v4902_v15, %s4231_s22 }
0x1343   :  { %2303 = vmatpush.msrb.mxu3 %v1805_v11  ;;  %2524 = vmatpush.msrb.mxu1 %v1805_v11 }
0x1345   :  { %2304 = vmatpush.msrb.mxu3 %v1803_v2  ;;  %2525 = vmatpush.msrb.mxu1 %v1803_v2 }
0x134a   :  { %1768 = vrot.lane.b32.xlu2 %v1767_v38, %s4234_s8 }
0x139c   :  { %v1799_v16 = vpop.permute.xlu2 %1798 }
0x139d   :  { %v1801_v17 = vsel %vm213_vm2, %v4913_v51, %v1799_v16 }
0x139e   :  { %3879 = vmatmul.msk.f32.vlgmr.msra.gmra.mxu2 %vm231_vm3, %v1801_v17  ;;  %3880 = vmatmul.msk.f32.vlgmr.msra.gmra.mxu3 %vm231_vm3, %v1801_v17 }
0x13a4   :  { %v1769_v18 = vpop.permute.xlu2 %1768 }
0x13a5   :  { %v1771_v20 = vsel %vm6037_vm9, %v1769_v18, %v4819_v45 }
0x13a6   :  { %1772 = vst.msk [vmem:[#allocation6] sm:$0x3] %vm184_vm0, %v1771_v20 }
0x13ad   :  { %v4929_v45 = vld [vmem:[#allocation6] sm:$0x3] }
0x1421   :  { %v1838_v30 = vpop.f32.mrf.mxu2  ;;  %v1858_v37 = vpop.f32.mrf.mxu3 }
0x1422   :  { %v1863_v38 = vadd.f32 %v1862_v32, %v1838_v30  ;;  %v1869_v50 = vadd.f32 %v1867_v29, %v1858_v37 }
0x1424   :  { %4086 = vtanh.f32 %v1863_v38  ;;  %v3881_v31 = vmul.f32 -1.442695, %v1863_v38  ;;  %v3882_v27 = vmul.f32 -1.442695, %v1869_v50 }
0x1425   :  { %4088 = vtanh.f32 %v1869_v50 }
0x1426   :  { %4090 = vpow2.f32 %v3881_v31 }
0x1427   :  { %4092 = vpow2.f32 %v3882_v27 }
0x142a   :  { %v4087_v14 = vpop.eup %4086 }
0x142b   :  { %v4089_v52 = vpop.eup %4088  ;;  %1896 = vrot.lane.b32.xlu1 %v4087_v14, %s4232_s3 }
0x142c   :  { %1937 = vrot.lane.b32.xlu0 %v4089_v52, %s4232_s3  ;;  %v4091_v53 = vpop.eup %4090  ;;  %v3884_v52 = vld [vmem:[%s6026_s4 + $0x10] sm:$0x3] }
0x142d   :  { %v4093_v9 = vpop.eup %4092  ;;  %v1873_v56 = vadd.f32 1.0, %v4091_v53 }
0x142e   :  { %v1914_v13 = vadd.f32 1.0, %v4093_v9 }
0x142f   :  { %4094 = vrcp.f32 %v1873_v56  ;;  %v1885_v28 = vand.u32 2147483648, %v1873_v56  ;;  %vm1879_vm1 = vweird.f32 %v1873_v56  ;;  %v1883_v16 = vand.u32 2147483647, %v1873_v56 }
0x1430   :  { %4096 = vrcp.f32 %v1914_v13  ;;  %v1926_v2 = vand.u32 2147483648, %v1914_v13  ;;  %vm1920_vm13 = vweird.f32 %v1914_v13  ;;  %v1924_v17 = vand.u32 2147483647, %v1914_v13 }
0x1431   :  { %v1886_v25 = vor.u32 1.1754944e-38, %v1885_v28  ;;  %vm1884_vm9 = vcmp.eq.f32.partialorder %v1883_v16, 8.507059e+37 }
0x1432   :  { %v1927_v29 = vor.u32 1.1754944e-38, %v1926_v2  ;;  %vm1925_vm8 = vcmp.eq.f32.partialorder %v1924_v17, 8.507059e+37 }
0x1433   :  { %1891 = vrot.lane.b32.xlu1 %v4925_v55, %s4231_s22 }
0x1434   :  { %1932 = vrot.lane.b32.xlu0 %v4929_v45, %s4231_s22 }
0x1435   :  { %v4095_v57 = vpop.eup %4094 }
0x1436   :  { %v4097_v58 = vpop.eup %4096  ;;  %v1875_v59 = vmul.f32 %v4095_v57, %v1873_v56  ;;  %vm1880_vm14 = vweird.f32 %v4095_v57 }
0x1437   :  { %v1916_v1 = vmul.f32 %v4097_v58, %v1914_v13  ;;  %vm1921_vm12 = vweird.f32 %v4097_v58  ;;  %vm1881_vm11 = vmor %vm1879_vm1, %vm1880_vm14  ;;  %vm1957_vm14 = vcmp.gt.f32.partialorder %v3884_v52, 0.0 }
0x1438   :  { %v1876_v3 = vsub.f32 1.0, %v1875_v59  ;;  %vm1922_vm15 = vmor %vm1920_vm13, %vm1921_vm12  ;;  %v1979_v31 = vsel %vm1957_vm14, 1, %v6047_v8 }
0x1439   :  { %v1917_v4 = vsub.f32 1.0, %v1916_v1 }
0x143a   :  { %v1877_v10 = vmul.f32 %v4095_v57, %v1876_v3 }
0x143b   :  { %v1918_v11 = vmul.f32 %v4097_v58, %v1917_v4  ;;  %v3883_v4 = vld [vmem:[%s6026_s4 + $0xe] sm:$0x3] }
0x143c   :  { %v1878_v54 = vadd.f32 %v4095_v57, %v1877_v10 }
0x143d   :  { %v1919_v12 = vadd.f32 %v4097_v58, %v1918_v11 }
0x143e   :  { %v1882_v18 = vsel %vm1881_vm11, %v4095_v57, %v1878_v54 }
0x143f   :  { %v1923_v20 = vsel %vm1922_vm15, %v4097_v58, %v1919_v12  ;;  %v1887_v32 = vsel %vm1884_vm9, %v1886_v25, %v1882_v18  ;;  %v4945_v12 = vld.sshfl [vmem:[#allocation1] sm:$0xff pattern:$0x73625140] }
0x1440   :  { %v1928_v38 = vsel %vm1925_vm8, %v1927_v29, %v1923_v20  ;;  %vm1954_vm8 = vcmp.gt.f32.partialorder %v3883_v4, 0.0 }
0x1441   :  { %v1958_v10 = vsel %vm1954_vm8, 1, %v6047_v8 }
0x149d   :  { %v1897_v30 = vpop.permute.xlu1 %1896 }
0x149e   :  { %v1938_v37 = vpop.permute.xlu0 %1937  ;;  %v1899_v50 = vmul.f32 %v1897_v30, %v1887_v32 }
0x149f   :  { %v1940_v14 = vmul.f32 %v1938_v37, %v1928_v38 }
0x14a0   :  { %1901 = vrot.lane.b32.xlu2 %v1899_v50, %s4231_s22 }
0x14a1   :  { %1942 = vrot.lane.b32.xlu1 %v1940_v14, %s4231_s22 }
0x14a5   :  { %v1892_v27 = vpop.permute.xlu1 %1891 }
0x14a6   :  { %v1894_v53 = vmul.f32 %v1892_v27, %v1887_v32  ;;  %v1933_v57 = vpop.permute.xlu0 %1932 }
0x14a7   :  { %v1935_v58 = vmul.f32 %v1933_v57, %v1928_v38  ;;  %v2088_v57 = vld [vmem:[#allocation2 + $0x20] sm:$0xf] }
0x14a9   :  { %1981 = vperm.xlu1 %3973, %v1979_v31  }
0x14fa   :  { %v1902_v9 = vpop.permute.xlu2 %1901 }
0x14fb   :  { %v1904_v56 = vadd.f32 %v1902_v9, %v1894_v53  ;;  %v2090_v9 = vld [vmem:[#allocation2 + $0x1c] sm:$0xf] }
0x14fd   :  { %4098 = vtanh.f32 %v1904_v56 }
0x1503   :  { %v4099_v13 = vpop.eup %4098 }
0x1504   :  { %1907 = vrot.lane.b32.xlu2 %v4099_v13, %s4232_s3 }
0x1513   :  { %v1943_v59 = vpop.permute.xlu1 %1942 }
0x1514   :  { %v1945_v1 = vadd.f32 %v1943_v59, %v1935_v58 }
0x1516   :  { %4100 = vtanh.f32 %v1945_v1 }
0x151b   :  { %v4952_v29 = vpop.permute.xlu1 %1981 }
0x151c   :  { %v4101_v3 = vpop.eup %4100  ;;  %vm6040_vm12 = vcmp.eq.s32.totalorder %v4952_v29, 1 }
0x151d   :  { %1948 = vrot.lane.b32.xlu0 %v4101_v3, %s4232_s3 }
0x1525   :  { %1960 = vperm.xlu0 %3971, %v1958_v10  }
0x155e   :  { %v1908_v11 = vpop.permute.xlu2 %1907 }
0x155f   :  { %v1910_v54 = vmul.f32 %v1908_v11, %v1887_v32 }
0x1561   :  { %1964 = vst [vmem:[#allocation1] ss:$4 sm:$0xff] %v1910_v54 }
0x1568   :  { %v1965_v28 = vld.sshfl [vmem:[#allocation1] sm:$0xff pattern:$0x73625140] }
0x1569   :  { %1966 = vrot.lane.b32.xlu1 %v1965_v28, %s4231_s22  ;;  %1972 = vst [vmem:[#allocation1] ss:$4 sm:$0xff] %v1904_v56  ;;  %v2092_v56 = vrot.slane %v2090_v9, 2 }
0x1570   :  { %v1973_v2 = vld.sshfl [vmem:[#allocation1] sm:$0xff pattern:$0x73625140] }
0x1571   :  { %1974 = vrot.lane.b32.xlu0 %v1973_v2, %s4234_s8 }
0x158f   :  { %v1949_v16 = vpop.permute.xlu0 %1948 }
0x1590   :  { %v1951_v17 = vmul.f32 %v1949_v16, %v1928_v38 }
0x1592   :  { %1985 = vst [vmem:[#allocation1] ss:$4 sm:$0xff] %v1951_v17 }
0x1597   :  { %v4954_v30 = vpop.permute.xlu0 %1960 }
0x1598   :  { %6079 = vst [vmem:[#allocation11_spill] sm:$0xff] %v4954_v30  ;;  %vm6039_vm9 = vcmp.eq.s32.totalorder %v4954_v30, 1 }
0x1599   :  { %v1986_v18 = vld.sshfl [vmem:[#allocation1] sm:$0xff pattern:$0x73625140] }
0x159a   :  { %1987 = vrot.lane.b32.xlu2 %v1986_v18, %s4231_s22  ;;  %1993 = vst [vmem:[#allocation1] ss:$4 sm:$0xff] %v1945_v1 }
0x15a1   :  { %v1994_v20 = vld.sshfl [vmem:[#allocation1] sm:$0xff pattern:$0x73625140] }
0x15a2   :  { %2002 = vst [vmem:[#allocation1] ss:$4 sm:$0xff] %v1910_v54 }
0x15a9   :  { %v4950_v25 = vld.sshfl [vmem:[#allocation1] sm:$0xff pattern:$0x73625140] }
0x15aa   :  { %2012 = vst [vmem:[#allocation1] ss:$4 sm:$0xff] %v1951_v17 }
0x15db   :  { %v1967_v32 = vpop.permute.xlu1 %1966 }
0x15dc   :  { %v1969_v37 = vsel %vm6039_vm9, %v1967_v32, %v4913_v51 }
0x15dd   :  { %1970 = vst.msk [vmem:[#allocation3] sm:$0x3] %vm184_vm0, %v1969_v37 }
0x15e3   :  { %v1975_v38 = vpop.permute.xlu0 %1974 }
0x15e4   :  { %v1977_v50 = vsel %vm6039_vm9, %v1975_v38, %v4925_v55  ;;  %v4975_v51 = vld [vmem:[#allocation3] sm:$0x3] }
0x15e5   :  { %1978 = vst.msk [vmem:[#allocation4] sm:$0x3] %vm184_vm0, %v1977_v50 }
0x15ec   :  { %v4987_v10 = vld [vmem:[#allocation4] sm:$0x3] }
0x15f4   :  { %v1988_v14 = vpop.permute.xlu2 %1987 }
0x15f5   :  { %v1990_v52 = vsel %vm6040_vm12, %v1988_v14, %v4902_v15 }
0x15f6   :  { %1991 = vst.msk [vmem:[#allocation5] sm:$0x3] %vm184_vm0, %v1990_v52 }
0x15fd   :  { %v4970_v31 = vld [vmem:[#allocation5] sm:$0x3] }
0x15fe   :  { %2025 = vrot.lane.b32.xlu2 %v4970_v31, %s4231_s22 }
0x1606   :  { %1995 = vrot.lane.b32.xlu2 %v1994_v20, %s4234_s8 }
0x1658   :  { %v2026_v55 = vpop.permute.xlu2 %2025 }
0x1659   :  { %v2028_v27 = vsel %vm213_vm2, %v4975_v51, %v2026_v55 }
0x165a   :  { %3889 = vmatmul.msk.f32.vlgmr.msra.gmra.mxu0 %vm231_vm3, %v2028_v27  ;;  %3890 = vmatmul.msk.f32.vlgmr.msra.gmra.mxu1 %vm231_vm3, %v2028_v27 }
0x1660   :  { %v1996_v15 = vpop.permute.xlu2 %1995 }
0x1661   :  { %v1998_v53 = vsel %vm6040_vm12, %v1996_v15, %v4929_v45 }
0x1662   :  { %1999 = vst.msk [vmem:[#allocation6] sm:$0x3] %vm184_vm0, %v1998_v53 }
0x1669   :  { %v4991_v45 = vld [vmem:[#allocation6] sm:$0x3] }
0x16d7   :  { %v2065_v13 = vpop.f32.mrf.mxu0  ;;  %v2085_v58 = vpop.f32.mrf.mxu1 }
0x16d8   :  { %v2089_v59 = vadd.f32 %v2088_v57, %v2065_v13  ;;  %v2094_v1 = vadd.f32 %v2092_v56, %v2085_v58 }
0x16da   :  { %4102 = vtanh.f32 %v2089_v59  ;;  %v3891_v11 = vmul.f32 -1.442695, %v2089_v59  ;;  %v3892_v54 = vmul.f32 -1.442695, %v2094_v1 }
0x16db   :  { %4104 = vtanh.f32 %v2094_v1 }
0x16dc   :  { %4106 = vpow2.f32 %v3891_v11 }
0x16dd   :  { %4108 = vpow2.f32 %v3892_v54 }
0x16e0   :  { %v4103_v3 = vpop.eup %4102 }
0x16e1   :  { %v4105_v4 = vpop.eup %4104  ;;  %2121 = vrot.lane.b32.xlu1 %v4103_v3, %s4232_s3 }
0x16e2   :  { %2162 = vrot.lane.b32.xlu0 %v4105_v4, %s4232_s3  ;;  %v4107_v28 = vpop.eup %4106 }
0x16e3   :  { %v4109_v2 = vpop.eup %4108  ;;  %v2098_v16 = vadd.f32 1.0, %v4107_v28 }
0x16e4   :  { %v2139_v17 = vadd.f32 1.0, %v4109_v2  ;;  %v3894_v2 = vld [vmem:[%s6026_s4 + $0xe] sm:$0x3] }
0x16e5   :  { %4110 = vrcp.f32 %v2098_v16  ;;  %v2110_v15 = vand.u32 2147483648, %v2098_v16  ;;  %vm2104_vm11 = vweird.f32 %v2098_v16  ;;  %v2108_v9 = vand.u32 2147483647, %v2098_v16 }
0x16e6   :  { %4112 = vrcp.f32 %v2139_v17  ;;  %v2151_v53 = vand.u32 2147483648, %v2139_v17  ;;  %vm2145_vm15 = vweird.f32 %v2139_v17  ;;  %v2149_v56 = vand.u32 2147483647, %v2139_v17 }
0x16e7   :  { %v2111_v58 = vor.u32 1.1754944e-38, %v2110_v15  ;;  %vm2109_vm9 = vcmp.eq.f32.partialorder %v2108_v9, 8.507059e+37 }
0x16e8   :  { %v2152_v59 = vor.u32 1.1754944e-38, %v2151_v53  ;;  %vm2150_vm12 = vcmp.eq.f32.partialorder %v2149_v56, 8.507059e+37  ;;  %v5007_v56 = vld.sshfl [vmem:[#allocation1] sm:$0xff pattern:$0x73625140] }
0x16e9   :  { %2116 = vrot.lane.b32.xlu1 %v4987_v10, %s4231_s22 }
0x16ea   :  { %2157 = vrot.lane.b32.xlu0 %v4991_v45, %s4231_s22 }
0x16eb   :  { %v4111_v18 = vpop.eup %4110 }
0x16ec   :  { %v4113_v20 = vpop.eup %4112  ;;  %v2100_v32 = vmul.f32 %v4111_v18, %v2098_v16  ;;  %vm2105_vm1 = vweird.f32 %v4111_v18 }
0x16ed   :  { %v2141_v37 = vmul.f32 %v4113_v20, %v2139_v17  ;;  %vm2146_vm13 = vweird.f32 %v4113_v20  ;;  %vm2106_vm14 = vmor %vm2104_vm11, %vm2105_vm1  ;;  %vm2180_vm1 = vcmp.gt.f32.partialorder %v3894_v2, 0.0 }
0x16ee   :  { %v2101_v38 = vsub.f32 1.0, %v2100_v32  ;;  %vm2147_vm8 = vmor %vm2145_vm15, %vm2146_vm13  ;;  %v2202_v16 = vsel %vm2180_vm1, 1, %v6047_v8 }
0x16ef   :  { %v2142_v50 = vsub.f32 1.0, %v2141_v37 }
0x16f0   :  { %v2102_v14 = vmul.f32 %v4111_v18, %v2101_v38 }
0x16f1   :  { %v2143_v52 = vmul.f32 %v4113_v20, %v2142_v50 }
0x16f2   :  { %v2103_v55 = vadd.f32 %v4111_v18, %v2102_v14 }
0x16f3   :  { %v2144_v27 = vadd.f32 %v4113_v20, %v2143_v52 }
0x16f4   :  { %v2107_v13 = vsel %vm2106_vm14, %v4111_v18, %v2103_v55 }
0x16f5   :  { %v2148_v57 = vsel %vm2147_vm8, %v4113_v20, %v2144_v27  ;;  %v2112_v3 = vsel %vm2109_vm9, %v2111_v58, %v2107_v13  ;;  %v3893_v27 = vld [vmem:[%s6026_s4 + $0x10] sm:$0x3] }
0x16f6   :  { %v2153_v11 = vsel %vm2150_vm12, %v2152_v59, %v2148_v57  ;;  %vm2178_vm9 = vcmp.gt.f32.partialorder %v3893_v27, 0.0 }
0x16f7   :  { %v2181_v15 = vsel %vm2178_vm9, 1, %v6047_v8 }
0x1753   :  { %v2122_v1 = vpop.permute.xlu1 %2121 }
0x1754   :  { %v2163_v4 = vpop.permute.xlu0 %2162  ;;  %v2124_v54 = vmul.f32 %v2122_v1, %v2112_v3 }
0x1755   :  { %v2165_v28 = vmul.f32 %v2163_v4, %v2153_v11 }
0x1756   :  { %2126 = vrot.lane.b32.xlu2 %v2124_v54, %s4231_s22 }
0x1757   :  { %2167 = vrot.lane.b32.xlu1 %v2165_v28, %s4231_s22 }
0x175b   :  { %v2117_v17 = vpop.permute.xlu1 %2116 }
0x175c   :  { %v2119_v18 = vmul.f32 %v2117_v17, %v2112_v3  ;;  %v2158_v38 = vpop.permute.xlu0 %2157 }
0x175d   :  { %v2160_v50 = vmul.f32 %v2158_v38, %v2153_v11 }
0x175f   :  { %2204 = vperm.xlu1 %3973, %v2202_v16  }
0x17b0   :  { %v2127_v20 = vpop.permute.xlu2 %2126 }
0x17b1   :  { %v2129_v32 = vadd.f32 %v2127_v20, %v2119_v18 }
0x17b3   :  { %4114 = vtanh.f32 %v2129_v32 }
0x17b9   :  { %v4115_v37 = vpop.eup %4114 }
0x17ba   :  { %2132 = vrot.lane.b32.xlu2 %v4115_v37, %s4232_s3 }
0x17c9   :  { %v2168_v14 = vpop.permute.xlu1 %2167 }
0x17ca   :  { %v2170_v52 = vadd.f32 %v2168_v14, %v2160_v50  ;;  %v2311_v50 = vld [vmem:[#allocation2 + $0x18] sm:$0xf] }
0x17cb   :  { %v2313_v14 = vrot.slane %v2311_v50, 2 }
0x17cc   :  { %4116 = vtanh.f32 %v2170_v52 }
0x17d1   :  { %v5014_v54 = vpop.permute.xlu1 %2204 }
0x17d2   :  { %v4117_v55 = vpop.eup %4116  ;;  %6080 = vst [vmem:[#allocation12_spill] sm:$0xff] %v5014_v54  ;;  %vm6041_vm13 = vcmp.eq.s32.totalorder %v5014_v54, 1 }
0x17d3   :  { %2173 = vrot.lane.b32.xlu0 %v4117_v55, %s4232_s3  ;;  %v2309_v55 = vld [vmem:[#allocation2 + $0x24] sm:$0xf] }
0x17db   :  { %2183 = vperm.xlu0 %3971, %v2181_v15  }
0x1814   :  { %v2133_v53 = vpop.permute.xlu2 %2132 }
0x1815   :  { %v2135_v9 = vmul.f32 %v2133_v53, %v2112_v3 }
0x1817   :  { %2187 = vst [vmem:[#allocation1] ss:$4 sm:$0xff] %v2135_v9 }
0x181e   :  { %v2188_v13 = vld.sshfl [vmem:[#allocation1] sm:$0xff pattern:$0x73625140] }
0x181f   :  { %2189 = vrot.lane.b32.xlu1 %v2188_v13, %s4231_s22  ;;  %2195 = vst [vmem:[#allocation1] ss:$4 sm:$0xff] %v2129_v32 }
0x1826   :  { %v2196_v57 = vld.sshfl [vmem:[#allocation1] sm:$0xff pattern:$0x73625140] }
0x1827   :  { %2197 = vrot.lane.b32.xlu0 %v2196_v57, %s4234_s8 }
0x1845   :  { %v2174_v58 = vpop.permute.xlu0 %2173 }
0x1846   :  { %v2176_v59 = vmul.f32 %v2174_v58, %v2153_v11 }
0x1848   :  { %2208 = vst [vmem:[#allocation1] ss:$4 sm:$0xff] %v2176_v59 }
0x184d   :  { %v5016_v28 = vpop.permute.xlu0 %2183 }
0x184e   :  { %6081 = vst [vmem:[#allocation13_spill] sm:$0xff] %v5016_v28  ;;  %vm6042_vm12 = vcmp.eq.s32.totalorder %v5016_v28, 1 }
0x184f   :  { %v2209_v1 = vld.sshfl [vmem:[#allocation1] sm:$0xff pattern:$0x73625140] }
0x1850   :  { %2210 = vrot.lane.b32.xlu2 %v2209_v1, %s4231_s22  ;;  %2216 = vst [vmem:[#allocation1] ss:$4 sm:$0xff] %v2170_v52 }
0x1857   :  { %v2217_v4 = vld.sshfl [vmem:[#allocation1] sm:$0xff pattern:$0x73625140] }
0x1858   :  { %2224 = vst [vmem:[#allocation1] ss:$4 sm:$0xff] %v2135_v9 }
0x185f   :  { %v5012_v3 = vld.sshfl [vmem:[#allocation1] sm:$0xff pattern:$0x73625140] }
0x1860   :  { %2233 = vst [vmem:[#allocation1] ss:$4 sm:$0xff] %v2176_v59 }
0x1891   :  { %v2190_v2 = vpop.permute.xlu1 %2189 }
0x1892   :  { %v2192_v11 = vsel %vm6042_vm12, %v2190_v2, %v4975_v51 }
0x1893   :  { %2193 = vst.msk [vmem:[#allocation3] sm:$0x3] %vm184_vm0, %v2192_v11 }
0x1899   :  { %v2198_v16 = vpop.permute.xlu0 %2197 }
0x189a   :  { %v2200_v17 = vsel %vm6042_vm12, %v2198_v16, %v4987_v10  ;;  %v5037_v51 = vld [vmem:[#allocation3] sm:$0x3] }
0x189b   :  { %2201 = vst.msk [vmem:[#allocation4] sm:$0x3] %vm184_vm0, %v2200_v17 }
0x18a2   :  { %v5049_v57 = vld [vmem:[#allocation4] sm:$0x3] }
0x18aa   :  { %v2211_v18 = vpop.permute.xlu2 %2210 }
0x18ab   :  { %v2213_v20 = vsel %vm6041_vm13, %v2211_v18, %v4970_v31 }
0x18ac   :  { %2214 = vst.msk [vmem:[#allocation5] sm:$0x3] %vm184_vm0, %v2213_v20 }
0x18b3   :  { %v5032_v32 = vld [vmem:[#allocation5] sm:$0x3] }
0x18b4   :  { %2246 = vrot.lane.b32.xlu2 %v5032_v32, %s4231_s22 }
0x18bc   :  { %2218 = vrot.lane.b32.xlu2 %v2217_v4, %s4234_s8 }
0x190e   :  { %v2247_v10 = vpop.permute.xlu2 %2246 }
0x190f   :  { %v2249_v37 = vsel %vm213_vm2, %v5037_v51, %v2247_v10 }
0x1910   :  { %3899 = vmatmul.msk.f32.vlgmr.msrb.gmra.mxu2 %vm231_vm3, %v2249_v37  ;;  %3900 = vmatmul.msk.f32.vlgmr.msrb.gmra.mxu3 %vm231_vm3, %v2249_v37 }
0x1916   :  { %v2219_v31 = vpop.permute.xlu2 %2218 }
0x1917   :  { %v2221_v38 = vsel %vm6041_vm13, %v2219_v31, %v4991_v45 }
0x1918   :  { %2222 = vst.msk [vmem:[#allocation6] sm:$0x3] %vm184_vm0, %v2221_v38 }
0x191f   :  { %v5053_v45 = vld [vmem:[#allocation6] sm:$0x3] }
0x1993   :  { %v2286_v52 = vpop.f32.mrf.mxu2  ;;  %v2306_v27 = vpop.f32.mrf.mxu3 }
0x1994   :  { %v2310_v15 = vadd.f32 %v2309_v55, %v2286_v52  ;;  %v2315_v53 = vadd.f32 %v2313_v14, %v2306_v27 }
0x1996   :  { %4118 = vtanh.f32 %v2310_v15  ;;  %v3901_v58 = vmul.f32 -1.442695, %v2310_v15  ;;  %v3902_v59 = vmul.f32 -1.442695, %v2315_v53 }
0x1997   :  { %4120 = vtanh.f32 %v2315_v53 }
0x1998   :  { %4122 = vpow2.f32 %v3901_v58 }
0x1999   :  { %4124 = vpow2.f32 %v3902_v59 }
0x199c   :  { %v4119_v9 = vpop.eup %4118 }
0x199d   :  { %v4121_v13 = vpop.eup %4120  ;;  %2342 = vrot.lane.b32.xlu1 %v4119_v9, %s4232_s3 }
0x199e   :  { %2383 = vrot.lane.b32.xlu0 %v4121_v13, %s4232_s3  ;;  %v4123_v1 = vpop.eup %4122 }
0x199f   :  { %v4125_v4 = vpop.eup %4124  ;;  %v2319_v2 = vadd.f32 1.0, %v4123_v1 }
0x19a0   :  { %v2360_v11 = vadd.f32 1.0, %v4125_v4 }
0x19a1   :  { %4126 = vrcp.f32 %v2319_v2  ;;  %v2331_v52 = vand.u32 2147483648, %v2319_v2  ;;  %vm2325_vm14 = vweird.f32 %v2319_v2  ;;  %v2329_v27 = vand.u32 2147483647, %v2319_v2 }
0x19a2   :  { %4128 = vrcp.f32 %v2360_v11  ;;  %v2372_v55 = vand.u32 2147483648, %v2360_v11  ;;  %vm2366_vm8 = vweird.f32 %v2360_v11  ;;  %v2370_v15 = vand.u32 2147483647, %v2360_v11 }
0x19a3   :  { %v2332_v13 = vor.u32 1.1754944e-38, %v2331_v52  ;;  %vm2330_vm13 = vcmp.eq.f32.partialorder %v2329_v27, 8.507059e+37 }
0x19a4   :  { %v2373_v58 = vor.u32 1.1754944e-38, %v2372_v55  ;;  %vm2371_vm12 = vcmp.eq.f32.partialorder %v2370_v15, 8.507059e+37  ;;  %v3903_v15 = vld [vmem:[%s6026_s4 + $0x12] sm:$0x3] }
0x19a5   :  { %2337 = vrot.lane.b32.xlu1 %v5049_v57, %s4231_s22 }
0x19a6   :  { %2378 = vrot.lane.b32.xlu0 %v5053_v45, %s4231_s22 }
0x19a7   :  { %v4127_v16 = vpop.eup %4126 }
0x19a8   :  { %v4129_v17 = vpop.eup %4128  ;;  %v2321_v18 = vmul.f32 %v4127_v16, %v2319_v2  ;;  %vm2326_vm11 = vweird.f32 %v4127_v16  ;;  %v3904_v2 = vld [vmem:[%s6026_s4 + $0xc] sm:$0x3] }
0x19a9   :  { %v2362_v20 = vmul.f32 %v4129_v17, %v2360_v11  ;;  %vm2367_vm15 = vweird.f32 %v4129_v17  ;;  %vm2327_vm1 = vmor %vm2325_vm14, %vm2326_vm11  ;;  %vm2401_vm11 = vcmp.gt.f32.partialorder %v3904_v2, 0.0 }
0x19aa   :  { %v2322_v10 = vsub.f32 1.0, %v2321_v18  ;;  %vm2368_vm9 = vmor %vm2366_vm8, %vm2367_vm15  ;;  %v2423_v11 = vsel %vm2401_vm11, 1, %v6047_v8 }
0x19ab   :  { %v2363_v37 = vsub.f32 1.0, %v2362_v20 }
0x19ac   :  { %v2323_v31 = vmul.f32 %v4127_v16, %v2322_v10 }
0x19ad   :  { %v2364_v38 = vmul.f32 %v4129_v17, %v2363_v37 }
0x19ae   :  { %v2324_v50 = vadd.f32 %v4127_v16, %v2323_v31 }
0x19af   :  { %v2365_v14 = vadd.f32 %v4129_v17, %v2364_v38 }
0x19b0   :  { %v2328_v53 = vsel %vm2327_vm1, %v4127_v16, %v2324_v50 }
0x19b1   :  { %v2369_v9 = vsel %vm2368_vm9, %v4129_v17, %v2365_v14  ;;  %v2333_v1 = vsel %vm2330_vm13, %v2332_v13, %v2328_v53 }
0x19b2   :  { %v2374_v18 = vsel %vm2371_vm12, %v2373_v58, %v2369_v9  ;;  %vm2399_vm12 = vcmp.gt.f32.partialorder %v3903_v15, 0.0  ;;  %v5069_v58 = vld.sshfl [vmem:[#allocation1] sm:$0xff pattern:$0x73625140]  ;;  %v2532_v15 = vld [vmem:[#allocation2 + $0x14] sm:$0xf] }
0x19b3   :  { %v2402_v53 = vsel %vm2399_vm12, 1, %v6047_v8 }
0x1a0f   :  { %v2343_v59 = vpop.permute.xlu1 %2342 }
0x1a10   :  { %v2384_v4 = vpop.permute.xlu0 %2383  ;;  %v2345_v20 = vmul.f32 %v2343_v59, %v2333_v1 }
0x1a11   :  { %v2386_v10 = vmul.f32 %v2384_v4, %v2374_v18 }
0x1a12   :  { %2347 = vrot.lane.b32.xlu2 %v2345_v20, %s4231_s22 }
0x1a13   :  { %2388 = vrot.lane.b32.xlu1 %v2386_v10, %s4231_s22 }
0x1a17   :  { %v2338_v16 = vpop.permute.xlu1 %2337 }
0x1a18   :  { %v2340_v17 = vmul.f32 %v2338_v16, %v2333_v1  ;;  %v2379_v50 = vpop.permute.xlu0 %2378 }
0x1a19   :  { %v2381_v14 = vmul.f32 %v2379_v50, %v2374_v18 }
0x1a1b   :  { %2425 = vperm.xlu1 %3973, %v2423_v11  }
0x1a6c   :  { %v2348_v37 = vpop.permute.xlu2 %2347 }
0x1a6d   :  { %v2350_v31 = vadd.f32 %v2348_v37, %v2340_v17 }
0x1a6f   :  { %4130 = vtanh.f32 %v2350_v31 }
0x1a75   :  { %v4131_v38 = vpop.eup %4130 }
0x1a76   :  { %2353 = vrot.lane.b32.xlu2 %v4131_v38, %s4232_s3 }
0x1a85   :  { %v2389_v52 = vpop.permute.xlu1 %2388 }
0x1a86   :  { %v2391_v55 = vadd.f32 %v2389_v52, %v2381_v14 }
0x1a88   :  { %4132 = vtanh.f32 %v2391_v55 }
0x1a8d   :  { %v5076_v16 = vpop.permute.xlu1 %2425 }
0x1a8e   :  { %v4133_v27 = vpop.eup %4132  ;;  %6082 = vst [vmem:[#allocation14_spill] sm:$0xff] %v5076_v16  ;;  %vm6045_vm15 = vcmp.eq.s32.totalorder %v5076_v16, 1 }
0x1a8f   :  { %2394 = vrot.lane.b32.xlu0 %v4133_v27, %s4232_s3 }
0x1a97   :  { %2404 = vperm.xlu0 %3971, %v2402_v53   ;;  %v2534_v53 = vrot.slane %v2532_v15, 2 }
0x1ad0   :  { %v2354_v9 = vpop.permute.xlu2 %2353 }
0x1ad1   :  { %v2356_v13 = vmul.f32 %v2354_v9, %v2333_v1 }
0x1ad3   :  { %2408 = vst [vmem:[#allocation1] ss:$4 sm:$0xff] %v2356_v13 }
0x1ada   :  { %v2409_v59 = vld.sshfl [vmem:[#allocation1] sm:$0xff pattern:$0x73625140] }
0x1adb   :  { %2410 = vrot.lane.b32.xlu1 %v2409_v59, %s4231_s22  ;;  %2416 = vst [vmem:[#allocation1] ss:$4 sm:$0xff] %v2350_v31 }
0x1ae2   :  { %v2417_v4 = vld.sshfl [vmem:[#allocation1] sm:$0xff pattern:$0x73625140] }
0x1ae3   :  { %2418 = vrot.lane.b32.xlu0 %v2417_v4, %s4234_s8 }
0x1b01   :  { %v2395_v20 = vpop.permute.xlu0 %2394 }
0x1b02   :  { %v2397_v10 = vmul.f32 %v2395_v20, %v2374_v18 }
0x1b04   :  { %2429 = vst [vmem:[#allocation1] ss:$4 sm:$0xff] %v2397_v10 }
0x1b09   :  { %v5078_v17 = vpop.permute.xlu0 %2404 }
0x1b0a   :  { %6083 = vst [vmem:[#allocation15_spill] sm:$0xff] %v5078_v17  ;;  %vm6046_vm13 = vcmp.eq.s32.totalorder %v5078_v17, 1 }
0x1b0b   :  { %v2430_v2 = vld.sshfl [vmem:[#allocation1] sm:$0xff pattern:$0x73625140] }
0x1b0c   :  { %2431 = vrot.lane.b32.xlu2 %v2430_v2, %s4231_s22  ;;  %2437 = vst [vmem:[#allocation1] ss:$4 sm:$0xff] %v2391_v55 }
0x1b13   :  { %v2438_v11 = vld.sshfl [vmem:[#allocation1] sm:$0xff pattern:$0x73625140] }
0x1b14   :  { %2445 = vst [vmem:[#allocation1] ss:$4 sm:$0xff] %v2356_v13  ;;  %v2530_v13 = vld [vmem:[#allocation2 + $0x28] sm:$0xf] }
0x1b1b   :  { %v5074_v1 = vld.sshfl [vmem:[#allocation1] sm:$0xff pattern:$0x73625140] }
0x1b1c   :  { %2454 = vst [vmem:[#allocation1] ss:$4 sm:$0xff] %v2397_v10 }
0x1b4d   :  { %v2411_v37 = vpop.permute.xlu1 %2410 }
0x1b4e   :  { %v2413_v18 = vsel %vm6046_vm13, %v2411_v37, %v5037_v51 }
0x1b4f   :  { %2414 = vst.msk [vmem:[#allocation3] sm:$0x3] %vm184_vm0, %v2413_v18 }
0x1b55   :  { %v2419_v31 = vpop.permute.xlu0 %2418 }
0x1b56   :  { %v2421_v38 = vsel %vm6046_vm13, %v2419_v31, %v5049_v57  ;;  %v5099_v51 = vld [vmem:[#allocation3] sm:$0x3] }
0x1b57   :  { %2422 = vst.msk [vmem:[#allocation4] sm:$0x3] %vm184_vm0, %v2421_v38 }
0x1b66   :  { %v2432_v50 = vpop.permute.xlu2 %2431 }
0x1b67   :  { %v2434_v14 = vsel %vm6045_vm15, %v2432_v50, %v5032_v32 }
0x1b68   :  { %2435 = vst.msk [vmem:[#allocation5] sm:$0x3] %vm184_vm0, %v2434_v14 }
0x1b6f   :  { %v5094_v52 = vld [vmem:[#allocation5] sm:$0x3] }
0x1b70   :  { %2467 = vrot.lane.b32.xlu2 %v5094_v52, %s4231_s22 }
0x1b78   :  { %2439 = vrot.lane.b32.xlu2 %v2438_v11, %s4234_s8  ;;  %v5111_v11 = vld [vmem:[#allocation4] sm:$0x3] }
0x1bca   :  { %v2468_v57 = vpop.permute.xlu2 %2467 }
0x1bcb   :  { %v2470_v55 = vsel %vm213_vm2, %v5099_v51, %v2468_v57 }
0x1bcc   :  { %3909 = vmatmul.msk.f32.vlgmr.msrb.gmra.mxu0 %vm231_vm3, %v2470_v55  ;;  %3910 = vmatmul.msk.f32.vlgmr.msrb.gmra.mxu1 %vm231_vm3, %v2470_v55 }
0x1bd2   :  { %v2440_v32 = vpop.permute.xlu2 %2439 }
0x1bd3   :  { %v2442_v27 = vsel %vm6045_vm15, %v2440_v32, %v5053_v45 }
0x1bd4   :  { %2443 = vst.msk [vmem:[#allocation6] sm:$0x3] %vm184_vm0, %v2442_v27 }
0x1bdb   :  { %v5115_v45 = vld [vmem:[#allocation6] sm:$0x3] }
0x1c49   :  { %v2507_v9 = vpop.f32.mrf.mxu0  ;;  %v2527_v59 = vpop.f32.mrf.mxu1 }
0x1c4a   :  { %v2531_v4 = vadd.f32 %v2530_v13, %v2507_v9  ;;  %v2536_v20 = vadd.f32 %v2534_v53, %v2527_v59 }
0x1c4c   :  { %4134 = vtanh.f32 %v2531_v4  ;;  %v3911_v37 = vmul.f32 -1.442695, %v2531_v4  ;;  %v3912_v18 = vmul.f32 -1.442695, %v2536_v20 }
0x1c4d   :  { %4136 = vtanh.f32 %v2536_v20 }
0x1c4e   :  { %4138 = vpow2.f32 %v3911_v37 }
0x1c4f   :  { %4140 = vpow2.f32 %v3912_v18 }
0x1c52   :  { %v4135_v10 = vpop.eup %4134 }
0x1c53   :  { %v4137_v2 = vpop.eup %4136  ;;  %2563 = vrot.lane.b32.xlu1 %v4135_v10, %s4232_s3 }
0x1c54   :  { %2604 = vrot.lane.b32.xlu0 %v4137_v2, %s4232_s3  ;;  %v4139_v31 = vpop.eup %4138 }
0x1c55   :  { %v4141_v38 = vpop.eup %4140  ;;  %v2540_v50 = vadd.f32 1.0, %v4139_v31 }
0x1c56   :  { %v2581_v14 = vadd.f32 1.0, %v4141_v38 }
0x1c57   :  { %4142 = vrcp.f32 %v2540_v50  ;;  %v2552_v20 = vand.u32 2147483648, %v2540_v50  ;;  %vm2546_vm1 = vweird.f32 %v2540_v50  ;;  %v2550_v2 = vand.u32 2147483647, %v2540_v50 }
0x1c58   :  { %4144 = vrcp.f32 %v2581_v14  ;;  %v2593_v10 = vand.u32 2147483648, %v2581_v14  ;;  %vm2587_vm9 = vweird.f32 %v2581_v14  ;;  %v2591_v37 = vand.u32 2147483647, %v2581_v14 }
0x1c59   :  { %v2553_v38 = vor.u32 1.1754944e-38, %v2552_v20  ;;  %vm2551_vm15 = vcmp.eq.f32.partialorder %v2550_v2, 8.507059e+37 }
0x1c5a   :  { %v2594_v0 = vor.u32 1.1754944e-38, %v2593_v10  ;;  %vm2592_vm13 = vcmp.eq.f32.partialorder %v2591_v37, 8.507059e+37 }
0x1c5b   :  { %2558 = vrot.lane.b32.xlu1 %v5111_v11, %s4231_s22 }
0x1c5c   :  { %2599 = vrot.lane.b32.xlu0 %v5115_v45, %s4231_s22 }
0x1c5d   :  { %v4143_v57 = vpop.eup %4142 }
0x1c5e   :  { %v4145_v55 = vpop.eup %4144  ;;  %v2542_v32 = vmul.f32 %v4143_v57, %v2540_v50  ;;  %vm2547_vm14 = vweird.f32 %v4143_v57  ;;  %v3914_v50 = vld [vmem:[%s6026_s4 + $0xa] sm:$0x3] }
0x1c5f   :  { %v2583_v27 = vmul.f32 %v4145_v55, %v2581_v14  ;;  %vm2588_vm8 = vweird.f32 %v4145_v55  ;;  %vm2548_vm11 = vmor %vm2546_vm1, %vm2547_vm14  ;;  %vm2622_vm14 = vcmp.gt.f32.partialorder %v3914_v50, 0.0 }
0x1c60   :  { %v2543_v15 = vsub.f32 1.0, %v2542_v32  ;;  %vm2589_vm12 = vmor %vm2587_vm9, %vm2588_vm8  ;;  %v2644_v14 = vsel %vm2622_vm14, 1, %v6047_v8 }
0x1c61   :  { %v2584_v53 = vsub.f32 1.0, %v2583_v27 }
0x1c62   :  { %v2544_v9 = vmul.f32 %v4143_v57, %v2543_v15 }
0x1c63   :  { %v2585_v13 = vmul.f32 %v4145_v55, %v2584_v53 }
0x1c64   :  { %v2545_v59 = vadd.f32 %v4143_v57, %v2544_v9 }
0x1c65   :  { %v2586_v4 = vadd.f32 %v4145_v55, %v2585_v13 }
0x1c66   :  { %v2549_v18 = vsel %vm2548_vm11, %v4143_v57, %v2545_v59 }
0x1c67   :  { %v2590_v31 = vsel %vm2589_vm12, %v4145_v55, %v2586_v4  ;;  %v2554_v27 = vsel %vm2551_vm15, %v2553_v38, %v2549_v18 }
0x1c68   :  { %v2595_v53 = vsel %vm2592_vm13, %v2594_v0, %v2590_v31  ;;  %v3913_v31 = vld [vmem:[%s6026_s4 + $0x14] sm:$0x3] }
0x1c69   :  { %vm2620_vm13 = vcmp.gt.f32.partialorder %v3913_v31, 0.0  ;;  %v2702_v31 = vld [vmem:[%s6024_s2 + $0x50] sm:$0xff] }
0x1c6a   :  { %v2623_v38 = vsel %vm2620_vm13, 1, %v6047_v8  ;;  %v2692_v8 = vld [vmem:[%s6024_s2] sm:$0xff] }
0x1cc5   :  { %v2564_v32 = vpop.permute.xlu1 %2563 }
0x1cc6   :  { %v2605_v15 = vpop.permute.xlu0 %2604  ;;  %v2566_v9 = vmul.f32 %v2564_v32, %v2554_v27 }
0x1cc7   :  { %v2607_v13 = vmul.f32 %v2605_v15, %v2595_v53 }
0x1cc8   :  { %2568 = vrot.lane.b32.xlu2 %v2566_v9, %s4231_s22  ;;  %v5131_v9 = vld.sshfl [vmem:[#allocation1] sm:$0xff pattern:$0x73625140] }
0x1cc9   :  { %2609 = vrot.lane.b32.xlu1 %v2607_v13, %s4231_s22 }
0x1ccd   :  { %v2559_v57 = vpop.permute.xlu1 %2558 }
0x1cce   :  { %v2561_v55 = vmul.f32 %v2559_v57, %v2554_v27  ;;  %v2600_v20 = vpop.permute.xlu0 %2599 }
0x1ccf   :  { %v2602_v10 = vmul.f32 %v2600_v20, %v2595_v53 }
0x1cd1   :  { %2646 = vperm.xlu1 %3973, %v2644_v14  }
0x1d22   :  { %v2569_v59 = vpop.permute.xlu2 %2568 }
0x1d23   :  { %v2571_v4 = vadd.f32 %v2569_v59, %v2561_v55 }
0x1d25   :  { %4146 = vtanh.f32 %v2571_v4 }
0x1d2b   :  { %v4147_v0 = vpop.eup %4146 }
0x1d2c   :  { %2574 = vrot.lane.b32.xlu2 %v4147_v0, %s4232_s3 }
0x1d3b   :  { %v2610_v2 = vpop.permute.xlu1 %2609 }
0x1d3c   :  { %v2612_v37 = vadd.f32 %v2610_v2, %v2602_v10 }
0x1d3e   :  { %4148 = vtanh.f32 %v2612_v37 }
0x1d43   :  { %v5138_v0 = vpop.permute.xlu1 %2646 }
0x1d44   :  { %v4149_v18 = vpop.eup %4148  ;;  %6084 = vst [vmem:[#allocation16_spill] sm:$0xff] %v5138_v0  ;;  %vm6053_vm8 = vcmp.eq.s32.totalorder %v5138_v0, 1 }
0x1d45   :  { %2615 = vrot.lane.b32.xlu0 %v4149_v18, %s4232_s3  ;;  %v2707_v18 = vld [vmem:[%s6024_s2 + $0x78] sm:$0xff] }
0x1d46   :  { %2739 = vmatpush.msra.mxu3 %v2707_v18  ;;  %2960 = vmatpush.msra.mxu1 %v2707_v18 }
0x1d4d   :  { %2625 = vperm.xlu0 %3971, %v2623_v38   ;;  %v2703_v38 = vld [vmem:[%s6024_s2 + $0x58] sm:$0xff] }
0x1d86   :  { %v2575_v32 = vpop.permute.xlu2 %2574 }
0x1d87   :  { %v2577_v15 = vmul.f32 %v2575_v32, %v2554_v27  ;;  %v2700_v32 = vld [vmem:[%s6024_s2 + $0x40] sm:$0xff] }
0x1d89   :  { %2629 = vst [vmem:[#allocation1] ss:$4 sm:$0xff] %v2577_v15 }
0x1d90   :  { %v2630_v13 = vld.sshfl [vmem:[#allocation1] sm:$0xff pattern:$0x73625140] }
0x1d91   :  { %2631 = vrot.lane.b32.xlu1 %v2630_v13, %s4231_s22  ;;  %2637 = vst [vmem:[#allocation1] ss:$4 sm:$0xff] %v2571_v4  ;;  %v2698_v13 = vld [vmem:[%s6024_s2 + $0x30] sm:$0xff] }
0x1d98   :  { %v2638_v50 = vld.sshfl [vmem:[#allocation1] sm:$0xff pattern:$0x73625140] }
0x1d99   :  { %2639 = vrot.lane.b32.xlu0 %v2638_v50, %s4234_s8  ;;  %v2699_v50 = vld [vmem:[%s6024_s2 + $0x38] sm:$0xff] }
0x1db7   :  { %v2616_v14 = vpop.permute.xlu0 %2615 }
0x1db8   :  { %v2618_v57 = vmul.f32 %v2616_v14, %v2595_v53  ;;  %v2696_v14 = vld [vmem:[%s6024_s2 + $0x20] sm:$0xff] }
0x1dba   :  { %2650 = vst [vmem:[#allocation1] ss:$4 sm:$0xff] %v2618_v57 }
0x1dbf   :  { %v5140_v20 = vpop.permute.xlu0 %2625 }
0x1dc0   :  { %6085 = vst [vmem:[#allocation17_spill] sm:$0xff] %v5140_v20  ;;  %vm6052_vm15 = vcmp.eq.s32.totalorder %v5140_v20, 1  ;;  %v2693_v20 = vld [vmem:[%s6024_s2 + $0x8] sm:$0xff] }
0x1dc1   :  { %v2651_v55 = vld.sshfl [vmem:[#allocation1] sm:$0xff pattern:$0x73625140] }
0x1dc2   :  { %2652 = vrot.lane.b32.xlu2 %v2651_v55, %s4231_s22  ;;  %2658 = vst [vmem:[#allocation1] ss:$4 sm:$0xff] %v2612_v37  ;;  %v2706_v37 = vld [vmem:[%s6024_s2 + $0x70] sm:$0xff] }
0x1dc3   :  { %2719 = vmatpush.msra.mxu2 %v2706_v37  ;;  %2940 = vmatpush.msra.mxu0 %v2706_v37  ;;  %v2694_v55 = vld [vmem:[%s6024_s2 + $0x10] sm:$0xff] }
0x1dc9   :  { %v2659_v59 = vld.sshfl [vmem:[#allocation1] sm:$0xff pattern:$0x73625140] }
0x1dca   :  { %2666 = vst [vmem:[#allocation1] ss:$4 sm:$0xff] %v2577_v15  ;;  %v2701_v15 = vld [vmem:[%s6024_s2 + $0x48] sm:$0xff] }
0x1dd1   :  { %v5136_v27 = vld.sshfl [vmem:[#allocation1] sm:$0xff pattern:$0x73625140] }
0x1dd2   :  { %2675 = vst [vmem:[#allocation1] ss:$4 sm:$0xff] %v2618_v57  ;;  %v2697_v57 = vld [vmem:[%s6024_s2 + $0x28] sm:$0xff] }
0x1e03   :  { %v2632_v4 = vpop.permute.xlu1 %2631 }
0x1e04   :  { %v2634_v53 = vsel %vm6052_vm15, %v2632_v4, %v5099_v51  ;;  %v2704_v51 = vld [vmem:[%s6024_s2 + $0x60] sm:$0xff]  ;;  %v2695_v4 = vld [vmem:[%s6024_s2 + $0x18] sm:$0xff] }
0x1e05   :  { %2635 = vst.msk [vmem:[#allocation3] sm:$0x3] %vm184_vm0, %v2634_v53  ;;  %2720 = vmatpush.msra.mxu2 %v2704_v51  ;;  %2941 = vmatpush.msra.mxu0 %v2704_v51 }
0x1e07   :  { %2721 = vmatpush.msra.mxu2 %v2702_v31  ;;  %2942 = vmatpush.msra.mxu0 %v2702_v31 }
0x1e09   :  { %2722 = vmatpush.msra.mxu2 %v2700_v32  ;;  %2943 = vmatpush.msra.mxu0 %v2700_v32 }
0x1e0b   :  { %v2640_v10 = vpop.permute.xlu0 %2639  ;;  %2723 = vmatpush.msra.mxu2 %v2698_v13  ;;  %2944 = vmatpush.msra.mxu0 %v2698_v13 }
0x1e0c   :  { %v2642_v2 = vsel %vm6052_vm15, %v2640_v10, %v5111_v11  ;;  %v2705_v11 = vld [vmem:[%s6024_s2 + $0x68] sm:$0xff] }
0x1e0d   :  { %2643 = vst.msk [vmem:[#allocation4] sm:$0x3] %vm184_vm0, %v2642_v2  ;;  %2740 = vmatpush.msra.mxu3 %v2705_v11  ;;  %2961 = vmatpush.msra.mxu1 %v2705_v11 }
0x1e0e   :  { %2724 = vmatpush.msra.mxu2 %v2696_v14  ;;  %2945 = vmatpush.msra.mxu0 %v2696_v14 }
0x1e0f   :  { %2741 = vmatpush.msra.mxu3 %v2703_v38  ;;  %2962 = vmatpush.msra.mxu1 %v2703_v38 }
0x1e10   :  { %2725 = vmatpush.msra.mxu2 %v2694_v55  ;;  %2946 = vmatpush.msra.mxu0 %v2694_v55 }
0x1e11   :  { %2742 = vmatpush.msra.mxu3 %v2701_v15  ;;  %2963 = vmatpush.msra.mxu1 %v2701_v15 }
0x1e12   :  { %2726 = vmatpush.msra.mxu2 %v2692_v8  ;;  %2947 = vmatpush.msra.mxu0 %v2692_v8 }
0x1e13   :  { %2743 = vmatpush.msra.mxu3 %v2699_v50  ;;  %2964 = vmatpush.msra.mxu1 %v2699_v50 }
0x1e14   :  { %3161 = vmatpush.msrb.mxu2 %v2706_v37  ;;  %3382 = vmatpush.msrb.mxu0 %v2706_v37 }
0x1e15   :  { %2744 = vmatpush.msra.mxu3 %v2697_v57  ;;  %2965 = vmatpush.msra.mxu1 %v2697_v57 }
0x1e16   :  { %3162 = vmatpush.msrb.mxu2 %v2704_v51  ;;  %3383 = vmatpush.msrb.mxu0 %v2704_v51 }
0x1e17   :  { %2745 = vmatpush.msra.mxu3 %v2695_v4  ;;  %2966 = vmatpush.msra.mxu1 %v2695_v4 }
0x1e18   :  { %3163 = vmatpush.msrb.mxu2 %v2702_v31  ;;  %3384 = vmatpush.msrb.mxu0 %v2702_v31  ;;  %v2751_v31 = vld [vmem:[#allocation2 + $0x2c] sm:$0xf] }
0x1e19   :  { %2746 = vmatpush.msra.mxu3 %v2693_v20  ;;  %2967 = vmatpush.msra.mxu1 %v2693_v20 }
0x1e1a   :  { %3164 = vmatpush.msrb.mxu2 %v2700_v32  ;;  %3385 = vmatpush.msrb.mxu0 %v2700_v32 }
0x1e1b   :  { %3181 = vmatpush.msrb.mxu3 %v2707_v18  ;;  %3402 = vmatpush.msrb.mxu1 %v2707_v18 }
0x1e1c   :  { %v2653_v53 = vpop.permute.xlu2 %2652  ;;  %3165 = vmatpush.msrb.mxu2 %v2698_v13  ;;  %3386 = vmatpush.msrb.mxu0 %v2698_v13 }
0x1e1d   :  { %v2655_v10 = vsel %vm6053_vm8, %v2653_v53, %v5094_v52  ;;  %3182 = vmatpush.msrb.mxu3 %v2705_v11  ;;  %3403 = vmatpush.msrb.mxu1 %v2705_v11  ;;  %v5209_v52 = vld [vmem:[#allocation3] sm:$0x3]  ;;  %v2753_v11 = vld [vmem:[#allocation2 + $0x10] sm:$0xf] }
0x1e1e   :  { %2656 = vst.msk [vmem:[#allocation5] sm:$0x3] %vm184_vm0, %v2655_v10  ;;  %3166 = vmatpush.msrb.mxu2 %v2696_v14  ;;  %3387 = vmatpush.msrb.mxu0 %v2696_v14  ;;  %v5221_v14 = vld [vmem:[#allocation4] sm:$0x3] }
0x1e1f   :  { %3183 = vmatpush.msrb.mxu3 %v2703_v38  ;;  %3404 = vmatpush.msrb.mxu1 %v2703_v38 }
0x1e20   :  { %3167 = vmatpush.msrb.mxu2 %v2694_v55  ;;  %3388 = vmatpush.msrb.mxu0 %v2694_v55 }
0x1e21   :  { %3184 = vmatpush.msrb.mxu3 %v2701_v15  ;;  %3405 = vmatpush.msrb.mxu1 %v2701_v15 }
0x1e22   :  { %3168 = vmatpush.msrb.mxu2 %v2692_v8  ;;  %3389 = vmatpush.msrb.mxu0 %v2692_v8  ;;  %v2755_v8 = vrot.slane %v2753_v11, 2 }
0x1e23   :  { %3185 = vmatpush.msrb.mxu3 %v2699_v50  ;;  %3406 = vmatpush.msrb.mxu1 %v2699_v50 }
0x1e25   :  { %v5198_v2 = vld [vmem:[#allocation5] sm:$0x3]  ;;  %3186 = vmatpush.msrb.mxu3 %v2697_v57  ;;  %3407 = vmatpush.msrb.mxu1 %v2697_v57 }
0x1e26   :  { %2688 = vrot.lane.b32.xlu2 %v5198_v2, %s4231_s22 }
0x1e27   :  { %3187 = vmatpush.msrb.mxu3 %v2695_v4  ;;  %3408 = vmatpush.msrb.mxu1 %v2695_v4 }
0x1e29   :  { %3188 = vmatpush.msrb.mxu3 %v2693_v20  ;;  %3409 = vmatpush.msrb.mxu1 %v2693_v20 }
0x1e2e   :  { %2660 = vrot.lane.b32.xlu2 %v2659_v59, %s4234_s8 }
0x1e80   :  { %v2689_v59 = vpop.permute.xlu2 %2688 }
0x1e81   :  { %v2691_v37 = vsel %vm213_vm2, %v5209_v52, %v2689_v59 }
0x1e82   :  { %3919 = vmatmul.msk.f32.vlgmr.msra.gmra.mxu2 %vm231_vm3, %v2691_v37  ;;  %3920 = vmatmul.msk.f32.vlgmr.msra.gmra.mxu3 %vm231_vm3, %v2691_v37 }
0x1e88   :  { %v2661_v18 = vpop.permute.xlu2 %2660 }
0x1e89   :  { %v2663_v51 = vsel %vm6053_vm8, %v2661_v18, %v5115_v45 }
0x1e8a   :  { %2664 = vst.msk [vmem:[#allocation6] sm:$0x3] %vm184_vm0, %v2663_v51 }
0x1e91   :  { %v5225_v45 = vld [vmem:[#allocation6] sm:$0x3] }
0x1f05   :  { %v2728_v20 = vpop.f32.mrf.mxu2  ;;  %v2748_v38 = vpop.f32.mrf.mxu3 }
0x1f06   :  { %v2752_v32 = vadd.f32 %v2751_v31, %v2728_v20  ;;  %v2757_v15 = vadd.f32 %v2755_v8, %v2748_v38 }
0x1f08   :  { %4150 = vtanh.f32 %v2752_v32  ;;  %v3921_v57 = vmul.f32 -1.442695, %v2752_v32  ;;  %v3922_v55 = vmul.f32 -1.442695, %v2757_v15 }
0x1f09   :  { %4152 = vtanh.f32 %v2757_v15 }
0x1f0a   :  { %4154 = vpow2.f32 %v3921_v57 }
0x1f0b   :  { %4156 = vpow2.f32 %v3922_v55 }
0x1f0e   :  { %v4151_v13 = vpop.eup %4150 }
0x1f0f   :  { %v4153_v50 = vpop.eup %4152  ;;  %2784 = vrot.lane.b32.xlu1 %v4151_v13, %s4232_s3 }
0x1f10   :  { %2825 = vrot.lane.b32.xlu0 %v4153_v50, %s4232_s3  ;;  %v4155_v4 = vpop.eup %4154 }
0x1f11   :  { %v4157_v53 = vpop.eup %4156  ;;  %v2761_v10 = vadd.f32 1.0, %v4155_v4 }
0x1f12   :  { %v2802_v59 = vadd.f32 1.0, %v4157_v53 }
0x1f13   :  { %4158 = vrcp.f32 %v2761_v10  ;;  %v2773_v15 = vand.u32 2147483648, %v2761_v10  ;;  %vm2767_vm11 = vweird.f32 %v2761_v10  ;;  %v2771_v57 = vand.u32 2147483647, %v2761_v10 }
0x1f14   :  { %4160 = vrcp.f32 %v2802_v59  ;;  %v2814_v50 = vand.u32 2147483648, %v2802_v59  ;;  %vm2808_vm12 = vweird.f32 %v2802_v59  ;;  %v2812_v55 = vand.u32 2147483647, %v2802_v59 }
0x1f15   :  { %v2774_v54 = vor.u32 1.1754944e-38, %v2773_v15  ;;  %vm2772_vm15 = vcmp.eq.f32.partialorder %v2771_v57, 8.507059e+37 }
0x1f16   :  { %v2815_v30 = vor.u32 1.1754944e-38, %v2814_v50  ;;  %vm2813_vm8 = vcmp.eq.f32.partialorder %v2812_v55, 8.507059e+37 }
0x1f17   :  { %2779 = vrot.lane.b32.xlu1 %v5221_v14, %s4231_s22 }
0x1f18   :  { %2820 = vrot.lane.b32.xlu0 %v5225_v45, %s4231_s22 }
0x1f19   :  { %v4159_v37 = vpop.eup %4158 }
0x1f1a   :  { %v4161_v18 = vpop.eup %4160  ;;  %v2763_v51 = vmul.f32 %v4159_v37, %v2761_v10  ;;  %vm2768_vm1 = vweird.f32 %v4159_v37  ;;  %v3924_v10 = vld [vmem:[%s6026_s4 + $0x8] sm:$0x3] }
0x1f1b   :  { %v2804_v11 = vmul.f32 %v4161_v18, %v2802_v59  ;;  %vm2809_vm9 = vweird.f32 %v4161_v18  ;;  %vm2769_vm14 = vmor %vm2767_vm11, %vm2768_vm1  ;;  %vm2843_vm1 = vcmp.gt.f32.partialorder %v3924_v10, 0.0  ;;  %v6086_v59 = vmov 0  }
0x1f1c   :  { %v2764_v8 = vsub.f32 1.0, %v2763_v51  ;;  %vm2810_vm13 = vmor %vm2808_vm12, %vm2809_vm9 }
0x1f1d   :  { %v2805_v20 = vsub.f32 1.0, %v2804_v11 }
0x1f1e   :  { %v2765_v31 = vmul.f32 %v4159_v37, %v2764_v8 }
0x1f1f   :  { %v2806_v38 = vmul.f32 %v4161_v18, %v2805_v20 }
0x1f20   :  { %v2766_v13 = vadd.f32 %v4159_v37, %v2765_v31 }
0x1f21   :  { %v2807_v32 = vadd.f32 %v4161_v18, %v2806_v38 }
0x1f22   :  { %v2770_v4 = vsel %vm2769_vm14, %v4159_v37, %v2766_v13  ;;  %v2865_v37 = vsel %vm2843_vm1, 1, %v6086_v59 }
0x1f23   :  { %v2811_v53 = vsel %vm2810_vm13, %v4161_v18, %v2807_v32  ;;  %v2775_v11 = vsel %vm2772_vm15, %v2774_v54, %v2770_v4 }
0x1f24   :  { %v2816_v20 = vsel %vm2813_vm8, %v2815_v30, %v2811_v53  ;;  %v3923_v53 = vld [vmem:[%s6026_s4 + $0x16] sm:$0x3] }
0x1f25   :  { %vm2841_vm15 = vcmp.gt.f32.partialorder %v3923_v53, 0.0 }
0x1f81   :  { %v2785_v51 = vpop.permute.xlu1 %2784 }
0x1f82   :  { %v2826_v8 = vpop.permute.xlu0 %2825  ;;  %v2787_v31 = vmul.f32 %v2785_v51, %v2775_v11  ;;  %v2844_v51 = vsel %vm2841_vm15, 1, %v6086_v59 }
0x1f83   :  { %v2828_v38 = vmul.f32 %v2826_v8, %v2816_v20 }
0x1f84   :  { %2789 = vrot.lane.b32.xlu2 %v2787_v31, %s4231_s22 }
0x1f85   :  { %2830 = vrot.lane.b32.xlu1 %v2828_v38, %s4231_s22  ;;  %v5241_v38 = vld.sshfl [vmem:[#allocation1] sm:$0xff pattern:$0x73625140] }
0x1f89   :  { %v2780_v18 = vpop.permute.xlu1 %2779 }
0x1f8a   :  { %v2782_v13 = vmul.f32 %v2780_v18, %v2775_v11  ;;  %v2821_v15 = vpop.permute.xlu0 %2820 }
0x1f8b   :  { %v2823_v50 = vmul.f32 %v2821_v15, %v2816_v20 }
0x1f8d   :  { %2867 = vperm.xlu1 %3973, %v2865_v37  }
0x1fde   :  { %v2790_v32 = vpop.permute.xlu2 %2789 }
0x1fdf   :  { %v2792_v54 = vadd.f32 %v2790_v32, %v2782_v13 }
0x1fe1   :  { %4162 = vtanh.f32 %v2792_v54 }
0x1fe7   :  { %v4163_v30 = vpop.eup %4162 }
0x1fe8   :  { %2795 = vrot.lane.b32.xlu2 %v4163_v30, %s4232_s3 }
0x1ff7   :  { %v2831_v57 = vpop.permute.xlu1 %2830 }
0x1ff8   :  { %v2833_v55 = vadd.f32 %v2831_v57, %v2823_v50 }
0x1ffa   :  { %4164 = vtanh.f32 %v2833_v55 }
0x1fff   :  { %v5248_v15 = vpop.permute.xlu1 %2867 }
0x2000   :  { %v4165_v4 = vpop.eup %4164  ;;  %6087 = vst [vmem:[#allocation18_spill] sm:$0xff] %v5248_v15  ;;  %vm6059_vm9 = vcmp.eq.s32.totalorder %v5248_v15, 1 }
0x2001   :  { %2836 = vrot.lane.b32.xlu0 %v4165_v4, %s4232_s3 }
0x2009   :  { %2846 = vperm.xlu0 %3971, %v2844_v51  }
0x2042   :  { %v2796_v8 = vpop.permute.xlu2 %2795 }
0x2043   :  { %v2798_v31 = vmul.f32 %v2796_v8, %v2775_v11 }
0x2045   :  { %2850 = vst [vmem:[#allocation1] ss:$4 sm:$0xff] %v2798_v31 }
0x204c   :  { %v2851_v10 = vld.sshfl [vmem:[#allocation1] sm:$0xff pattern:$0x73625140] }
0x204d   :  { %2852 = vrot.lane.b32.xlu1 %v2851_v10, %s4231_s22  ;;  %2858 = vst [vmem:[#allocation1] ss:$4 sm:$0xff] %v2792_v54  ;;  %v2974_v10 = vld [vmem:[#allocation2 + $0xc] sm:$0xf] }
0x2054   :  { %v2859_v37 = vld.sshfl [vmem:[#allocation1] sm:$0xff pattern:$0x73625140] }
0x2055   :  { %2860 = vrot.lane.b32.xlu0 %v2859_v37, %s4234_s8  ;;  %v2976_v37 = vrot.slane %v2974_v10, 2 }
0x2073   :  { %v2837_v18 = vpop.permute.xlu0 %2836 }
0x2074   :  { %v2839_v13 = vmul.f32 %v2837_v18, %v2816_v20 }
0x2076   :  { %2871 = vst [vmem:[#allocation1] ss:$4 sm:$0xff] %v2839_v13 }
0x207b   :  { %v5250_v50 = vpop.permute.xlu0 %2846 }
0x207c   :  { %6088 = vst [vmem:[#allocation19_spill] sm:$0xff] %v5250_v50  ;;  %vm6060_vm8 = vcmp.eq.s32.totalorder %v5250_v50, 1 }
0x207d   :  { %v2872_v32 = vld.sshfl [vmem:[#allocation1] sm:$0xff pattern:$0x73625140] }
0x207e   :  { %2873 = vrot.lane.b32.xlu2 %v2872_v32, %s4231_s22  ;;  %2879 = vst [vmem:[#allocation1] ss:$4 sm:$0xff] %v2833_v55 }
0x2085   :  { %v2880_v30 = vld.sshfl [vmem:[#allocation1] sm:$0xff pattern:$0x73625140] }
0x2086   :  { %2887 = vst [vmem:[#allocation1] ss:$4 sm:$0xff] %v2798_v31 }
0x208d   :  { %v5246_v11 = vld.sshfl [vmem:[#allocation1] sm:$0xff pattern:$0x73625140] }
0x208e   :  { %2896 = vst [vmem:[#allocation1] ss:$4 sm:$0xff] %v2839_v13  ;;  %v2972_v13 = vld [vmem:[#allocation2 + $0x30] sm:$0xf] }
0x20bf   :  { %v2853_v54 = vpop.permute.xlu1 %2852 }
0x20c0   :  { %v2855_v20 = vsel %vm6060_vm8, %v2853_v54, %v5209_v52 }
0x20c1   :  { %2856 = vst.msk [vmem:[#allocation3] sm:$0x3] %vm184_vm0, %v2855_v20 }
0x20c7   :  { %v2861_v57 = vpop.permute.xlu0 %2860 }
0x20c8   :  { %v2863_v55 = vsel %vm6060_vm8, %v2861_v57, %v5221_v14  ;;  %v5271_v52 = vld [vmem:[#allocation3] sm:$0x3] }
0x20c9   :  { %2864 = vst.msk [vmem:[#allocation4] sm:$0x3] %vm184_vm0, %v2863_v55 }
0x20d0   :  { %v5283_v55 = vld [vmem:[#allocation4] sm:$0x3] }
0x20d8   :  { %v2874_v4 = vpop.permute.xlu2 %2873 }
0x20d9   :  { %v2876_v53 = vsel %vm6059_vm9, %v2874_v4, %v5198_v2 }
0x20da   :  { %2877 = vst.msk [vmem:[#allocation5] sm:$0x3] %vm184_vm0, %v2876_v53 }
0x20e1   :  { %v5266_v51 = vld [vmem:[#allocation5] sm:$0x3] }
0x20e2   :  { %2909 = vrot.lane.b32.xlu2 %v5266_v51, %s4231_s22 }
0x20ea   :  { %2881 = vrot.lane.b32.xlu2 %v2880_v30, %s4234_s8 }
0x213c   :  { %v2910_v14 = vpop.permute.xlu2 %2909 }
0x213d   :  { %v2912_v8 = vsel %vm213_vm2, %v5271_v52, %v2910_v14 }
0x213e   :  { %3929 = vmatmul.msk.f32.vlgmr.msra.gmra.mxu0 %vm231_vm3, %v2912_v8  ;;  %3930 = vmatmul.msk.f32.vlgmr.msra.gmra.mxu1 %vm231_vm3, %v2912_v8 }
0x2144   :  { %v2882_v2 = vpop.permute.xlu2 %2881 }
0x2145   :  { %v2884_v31 = vsel %vm6059_vm9, %v2882_v2, %v5225_v45 }
0x2146   :  { %2885 = vst.msk [vmem:[#allocation6] sm:$0x3] %vm184_vm0, %v2884_v31 }
0x214d   :  { %v5287_v45 = vld [vmem:[#allocation6] sm:$0x3] }
0x21bb   :  { %v2949_v18 = vpop.f32.mrf.mxu0  ;;  %v2969_v32 = vpop.f32.mrf.mxu1 }
0x21bc   :  { %v2973_v30 = vadd.f32 %v2972_v13, %v2949_v18  ;;  %v2978_v54 = vadd.f32 %v2976_v37, %v2969_v32 }
0x21be   :  { %4166 = vtanh.f32 %v2973_v30  ;;  %v3931_v4 = vmul.f32 -1.442695, %v2973_v30  ;;  %v3932_v53 = vmul.f32 -1.442695, %v2978_v54 }
0x21bf   :  { %4168 = vtanh.f32 %v2978_v54 }
0x21c0   :  { %4170 = vpow2.f32 %v3931_v4 }
0x21c1   :  { %4172 = vpow2.f32 %v3932_v53 }
0x21c4   :  { %v4167_v20 = vpop.eup %4166 }
0x21c5   :  { %v4169_v57 = vpop.eup %4168  ;;  %3005 = vrot.lane.b32.xlu1 %v4167_v20, %s4232_s3 }
0x21c6   :  { %3046 = vrot.lane.b32.xlu0 %v4169_v57, %s4232_s3  ;;  %v4171_v14 = vpop.eup %4170 }
0x21c7   :  { %v4173_v8 = vpop.eup %4172  ;;  %v2982_v2 = vadd.f32 1.0, %v4171_v14 }
0x21c8   :  { %v3023_v31 = vadd.f32 1.0, %v4173_v8 }
0x21c9   :  { %4174 = vrcp.f32 %v2982_v2  ;;  %v2994_v54 = vand.u32 2147483648, %v2982_v2  ;;  %vm2988_vm14 = vweird.f32 %v2982_v2  ;;  %v2992_v53 = vand.u32 2147483647, %v2982_v2 }
0x21ca   :  { %4176 = vrcp.f32 %v3023_v31  ;;  %v3035_v4 = vand.u32 2147483648, %v3023_v31  ;;  %vm3029_vm13 = vweird.f32 %v3023_v31  ;;  %v3033_v14 = vand.u32 2147483647, %v3023_v31 }
0x21cb   :  { %v2995_v50 = vor.u32 1.1754944e-38, %v2994_v54  ;;  %vm2993_vm9 = vcmp.eq.f32.partialorder %v2992_v53, 8.507059e+37 }
0x21cc   :  { %v3036_v16 = vor.u32 1.1754944e-38, %v3035_v4  ;;  %vm3034_vm8 = vcmp.eq.f32.partialorder %v3033_v14, 8.507059e+37  ;;  %v3933_v14 = vld [vmem:[%s6026_s4 + $0x18] sm:$0x3] }
0x21cd   :  { %3000 = vrot.lane.b32.xlu1 %v5283_v55, %s4231_s22 }
0x21ce   :  { %3041 = vrot.lane.b32.xlu0 %v5287_v45, %s4231_s22 }
0x21cf   :  { %v4175_v10 = vpop.eup %4174 }
0x21d0   :  { %v4177_v37 = vpop.eup %4176  ;;  %v2984_v18 = vmul.f32 %v4175_v10, %v2982_v2  ;;  %vm2989_vm11 = vweird.f32 %v4175_v10  ;;  %v3934_v2 = vld [vmem:[%s6026_s4 + $0x6] sm:$0x3] }
0x21d1   :  { %v3025_v13 = vmul.f32 %v4177_v37, %v3023_v31  ;;  %vm3030_vm12 = vweird.f32 %v4177_v37  ;;  %vm2990_vm1 = vmor %vm2988_vm14, %vm2989_vm11  ;;  %vm3064_vm11 = vcmp.gt.f32.partialorder %v3934_v2, 0.0 }
0x21d2   :  { %v2985_v32 = vsub.f32 1.0, %v2984_v18  ;;  %vm3031_vm15 = vmor %vm3029_vm13, %vm3030_vm12 }
0x21d3   :  { %v3026_v20 = vsub.f32 1.0, %v3025_v13 }
0x21d4   :  { %v2986_v57 = vmul.f32 %v4175_v10, %v2985_v32 }
0x21d5   :  { %v3027_v15 = vmul.f32 %v4177_v37, %v3026_v20 }
0x21d6   :  { %v2987_v26 = vadd.f32 %v4175_v10, %v2986_v57 }
0x21d7   :  { %v3028_v30 = vadd.f32 %v4177_v37, %v3027_v15 }
0x21d8   :  { %v2991_v8 = vsel %vm2990_vm1, %v4175_v10, %v2987_v26  ;;  %v3086_v26 = vsel %vm3064_vm11, 1, %v6086_v59 }
0x21d9   :  { %v3032_v47 = vsel %vm3031_vm15, %v4177_v37, %v3028_v30  ;;  %v2996_v13 = vsel %vm2993_vm9, %v2995_v50, %v2991_v8 }
0x21da   :  { %v3037_v20 = vsel %vm3034_vm8, %v3036_v16, %v3032_v47  ;;  %vm3062_vm8 = vcmp.gt.f32.partialorder %v3933_v14, 0.0 }
0x21db   :  { %v3065_v8 = vsel %vm3062_vm8, 1, %v6086_v59 }
0x2237   :  { %v3006_v18 = vpop.permute.xlu1 %3005 }
0x2238   :  { %v3047_v32 = vpop.permute.xlu0 %3046  ;;  %v3008_v15 = vmul.f32 %v3006_v18, %v2996_v13 }
0x2239   :  { %v3049_v57 = vmul.f32 %v3047_v32, %v3037_v20 }
0x223a   :  { %3010 = vrot.lane.b32.xlu2 %v3008_v15, %s4231_s22  ;;  %v5303_v15 = vld.sshfl [vmem:[#allocation1] sm:$0xff pattern:$0x73625140] }
0x223b   :  { %3051 = vrot.lane.b32.xlu1 %v3049_v57, %s4231_s22 }
0x223f   :  { %v3001_v31 = vpop.permute.xlu1 %3000 }
0x2240   :  { %v3003_v10 = vmul.f32 %v3001_v31, %v2996_v13  ;;  %v3042_v16 = vpop.permute.xlu0 %3041 }
0x2241   :  { %v3044_v30 = vmul.f32 %v3042_v16, %v3037_v20 }
0x2243   :  { %3088 = vperm.xlu1 %3973, %v3086_v26  }
0x2294   :  { %v3011_v37 = vpop.permute.xlu2 %3010 }
0x2295   :  { %v3013_v50 = vadd.f32 %v3011_v37, %v3003_v10 }
0x2297   :  { %4178 = vtanh.f32 %v3013_v50 }
0x229d   :  { %v4179_v47 = vpop.eup %4178 }
0x229e   :  { %3016 = vrot.lane.b32.xlu2 %v4179_v47, %s4232_s3 }
0x22ad   :  { %v3052_v54 = vpop.permute.xlu1 %3051 }
0x22ae   :  { %v3054_v4 = vadd.f32 %v3052_v54, %v3044_v30 }
0x22b0   :  { %4180 = vtanh.f32 %v3054_v4 }
0x22b5   :  { %v5310_v47 = vpop.permute.xlu1 %3088 }
0x22b6   :  { %v4181_v53 = vpop.eup %4180  ;;  %6089 = vst [vmem:[#allocation20_spill] sm:$0xff] %v5310_v47  ;;  %vm6065_vm12 = vcmp.eq.s32.totalorder %v5310_v47, 1 }
0x22b7   :  { %3057 = vrot.lane.b32.xlu0 %v4181_v53, %s4232_s3 }
0x22bf   :  { %3067 = vperm.xlu0 %3971, %v3065_v8  }
0x22f8   :  { %v3017_v18 = vpop.permute.xlu2 %3016 }
0x22f9   :  { %v3019_v32 = vmul.f32 %v3017_v18, %v2996_v13 }
0x22fb   :  { %3071 = vst [vmem:[#allocation1] ss:$4 sm:$0xff] %v3019_v32 }
0x2302   :  { %v3072_v57 = vld.sshfl [vmem:[#allocation1] sm:$0xff pattern:$0x73625140] }
0x2303   :  { %3073 = vrot.lane.b32.xlu1 %v3072_v57, %s4231_s22  ;;  %3079 = vst [vmem:[#allocation1] ss:$4 sm:$0xff] %v3013_v50 }
0x230a   :  { %v3080_v2 = vld.sshfl [vmem:[#allocation1] sm:$0xff pattern:$0x73625140] }
0x230b   :  { %3081 = vrot.lane.b32.xlu0 %v3080_v2, %s4234_s8 }
0x2329   :  { %v3058_v26 = vpop.permute.xlu0 %3057 }
0x232a   :  { %v3060_v31 = vmul.f32 %v3058_v26, %v3037_v20  ;;  %v3193_v26 = vld [vmem:[#allocation2 + $0x34] sm:$0xf] }
0x232c   :  { %3092 = vst [vmem:[#allocation1] ss:$4 sm:$0xff] %v3060_v31 }
0x2331   :  { %v5312_v16 = vpop.permute.xlu0 %3067 }
0x2332   :  { %6090 = vst [vmem:[#allocation21_spill] sm:$0xff] %v5312_v16  ;;  %vm6066_vm9 = vcmp.eq.s32.totalorder %v5312_v16, 1 }
0x2333   :  { %v3093_v10 = vld.sshfl [vmem:[#allocation1] sm:$0xff pattern:$0x73625140] }
0x2334   :  { %3094 = vrot.lane.b32.xlu2 %v3093_v10, %s4231_s22  ;;  %3100 = vst [vmem:[#allocation1] ss:$4 sm:$0xff] %v3054_v4 }
0x233b   :  { %v3101_v37 = vld.sshfl [vmem:[#allocation1] sm:$0xff pattern:$0x73625140] }
0x233c   :  { %3108 = vst [vmem:[#allocation1] ss:$4 sm:$0xff] %v3019_v32  ;;  %v3195_v32 = vld [vmem:[#allocation2 + $0x8] sm:$0xf] }
0x233d   :  { %v3197_v57 = vrot.slane %v3195_v32, 2 }
0x2343   :  { %v5308_v13 = vld.sshfl [vmem:[#allocation1] sm:$0xff pattern:$0x73625140] }
0x2344   :  { %3117 = vst [vmem:[#allocation1] ss:$4 sm:$0xff] %v3060_v31 }
0x2375   :  { %v3074_v50 = vpop.permute.xlu1 %3073 }
0x2376   :  { %v3076_v20 = vsel %vm6066_vm9, %v3074_v50, %v5271_v52 }
0x2377   :  { %3077 = vst.msk [vmem:[#allocation3] sm:$0x3] %vm184_vm0, %v3076_v20 }
0x237d   :  { %v3082_v30 = vpop.permute.xlu0 %3081 }
0x237e   :  { %v3084_v54 = vsel %vm6066_vm9, %v3082_v30, %v5283_v55  ;;  %v5333_v52 = vld [vmem:[#allocation3] sm:$0x3] }
0x237f   :  { %3085 = vst.msk [vmem:[#allocation4] sm:$0x3] %vm184_vm0, %v3084_v54 }
0x2386   :  { %v5345_v30 = vld [vmem:[#allocation4] sm:$0x3] }
0x238e   :  { %v3095_v4 = vpop.permute.xlu2 %3094 }
0x238f   :  { %v3097_v53 = vsel %vm6065_vm12, %v3095_v4, %v5266_v51 }
0x2390   :  { %3098 = vst.msk [vmem:[#allocation5] sm:$0x3] %vm184_vm0, %v3097_v53 }
0x2397   :  { %v5328_v14 = vld [vmem:[#allocation5] sm:$0x3] }
0x2398   :  { %3130 = vrot.lane.b32.xlu2 %v5328_v14, %s4231_s22 }
0x23a0   :  { %3102 = vrot.lane.b32.xlu2 %v3101_v37, %s4234_s8 }
0x23f2   :  { %v3131_v55 = vpop.permute.xlu2 %3130 }
0x23f3   :  { %v3133_v8 = vsel %vm213_vm2, %v5333_v52, %v3131_v55 }
0x23f4   :  { %3939 = vmatmul.msk.f32.vlgmr.msrb.gmra.mxu2 %vm231_vm3, %v3133_v8  ;;  %3940 = vmatmul.msk.f32.vlgmr.msrb.gmra.mxu3 %vm231_vm3, %v3133_v8 }
0x23fa   :  { %v3103_v51 = vpop.permute.xlu2 %3102 }
0x23fb   :  { %v3105_v18 = vsel %vm6065_vm12, %v3103_v51, %v5287_v45 }
0x23fc   :  { %3106 = vst.msk [vmem:[#allocation6] sm:$0x3] %vm184_vm0, %v3105_v18 }
0x2403   :  { %v5349_v45 = vld [vmem:[#allocation6] sm:$0x3] }
0x2477   :  { %v3170_v2 = vpop.f32.mrf.mxu2  ;;  %v3190_v31 = vpop.f32.mrf.mxu3 }
0x2478   :  { %v3194_v10 = vadd.f32 %v3193_v26, %v3170_v2  ;;  %v3199_v37 = vadd.f32 %v3197_v57, %v3190_v31 }
0x247a   :  { %4182 = vtanh.f32 %v3194_v10  ;;  %v3941_v54 = vmul.f32 -1.442695, %v3194_v10  ;;  %v3942_v4 = vmul.f32 -1.442695, %v3199_v37 }
0x247b   :  { %4184 = vtanh.f32 %v3199_v37 }
0x247c   :  { %4186 = vpow2.f32 %v3941_v54 }
0x247d   :  { %4188 = vpow2.f32 %v3942_v4 }
0x2480   :  { %v4183_v50 = vpop.eup %4182 }
0x2481   :  { %v4185_v20 = vpop.eup %4184  ;;  %3226 = vrot.lane.b32.xlu1 %v4183_v50, %s4232_s3 }
0x2482   :  { %3267 = vrot.lane.b32.xlu0 %v4185_v20, %s4232_s3  ;;  %v4187_v53 = vpop.eup %4186 }
0x2483   :  { %v4189_v55 = vpop.eup %4188  ;;  %v3203_v8 = vadd.f32 1.0, %v4187_v53 }
0x2484   :  { %v3244_v51 = vadd.f32 1.0, %v4189_v55 }
0x2485   :  { %4190 = vrcp.f32 %v3203_v8  ;;  %v3215_v37 = vand.u32 2147483648, %v3203_v8  ;;  %vm3209_vm1 = vweird.f32 %v3203_v8  ;;  %v3213_v4 = vand.u32 2147483647, %v3203_v8 }
0x2486   :  { %4192 = vrcp.f32 %v3244_v51  ;;  %v3256_v54 = vand.u32 2147483648, %v3244_v51  ;;  %vm3250_vm15 = vweird.f32 %v3244_v51  ;;  %v3254_v53 = vand.u32 2147483647, %v3244_v51 }
0x2487   :  { %v3216_v17 = vor.u32 1.1754944e-38, %v3215_v37  ;;  %vm3214_vm12 = vcmp.eq.f32.partialorder %v3213_v4, 8.507059e+37 }
0x2488   :  { %v3257_v28 = vor.u32 1.1754944e-38, %v3256_v54  ;;  %vm3255_vm9 = vcmp.eq.f32.partialorder %v3254_v53, 8.507059e+37  ;;  %v3943_v53 = vld [vmem:[%s6026_s4 + $0x1a] sm:$0x3] }
0x2489   :  { %3221 = vrot.lane.b32.xlu1 %v5345_v30, %s4231_s22 }
0x248a   :  { %3262 = vrot.lane.b32.xlu0 %v5349_v45, %s4231_s22 }
0x248b   :  { %v4191_v18 = vpop.eup %4190 }
0x248c   :  { %v4193_v32 = vpop.eup %4192  ;;  %v3205_v57 = vmul.f32 %v4191_v18, %v3203_v8  ;;  %vm3210_vm14 = vweird.f32 %v4191_v18  ;;  %v3944_v8 = vld [vmem:[%s6026_s4 + $0x4] sm:$0x3] }
0x248d   :  { %v3246_v2 = vmul.f32 %v4193_v32, %v3244_v51  ;;  %vm3251_vm13 = vweird.f32 %v4193_v32  ;;  %vm3211_vm11 = vmor %vm3209_vm1, %vm3210_vm14  ;;  %vm3285_vm14 = vcmp.gt.f32.partialorder %v3944_v8, 0.0 }
0x248e   :  { %v3206_v26 = vsub.f32 1.0, %v3205_v57  ;;  %vm3252_vm8 = vmor %vm3250_vm15, %vm3251_vm13 }
0x248f   :  { %v3247_v31 = vsub.f32 1.0, %v3246_v2 }
0x2490   :  { %v3207_v50 = vmul.f32 %v4191_v18, %v3206_v26 }
0x2491   :  { %v3248_v20 = vmul.f32 %v4193_v32, %v3247_v31 }
0x2492   :  { %v3208_v47 = vadd.f32 %v4191_v18, %v3207_v50 }
0x2493   :  { %v3249_v10 = vadd.f32 %v4193_v32, %v3248_v20 }
0x2494   :  { %v3212_v55 = vsel %vm3211_vm11, %v4191_v18, %v3208_v47  ;;  %v3307_v47 = vsel %vm3285_vm14, 1, %v6086_v59 }
0x2495   :  { %v3253_v16 = vsel %vm3252_vm8, %v4193_v32, %v3249_v10  ;;  %v3217_v2 = vsel %vm3214_vm12, %v3216_v17, %v3212_v55 }
0x2496   :  { %v3258_v31 = vsel %vm3255_vm9, %v3257_v28, %v3253_v16  ;;  %vm3283_vm9 = vcmp.gt.f32.partialorder %v3943_v53, 0.0 }
0x2497   :  { %v3286_v55 = vsel %vm3283_vm9, 1, %v6086_v59 }
0x24f3   :  { %v3227_v57 = vpop.permute.xlu1 %3226 }
0x24f4   :  { %v3268_v26 = vpop.permute.xlu0 %3267  ;;  %v3229_v50 = vmul.f32 %v3227_v57, %v3217_v2 }
0x24f5   :  { %v3270_v20 = vmul.f32 %v3268_v26, %v3258_v31 }
0x24f6   :  { %3231 = vrot.lane.b32.xlu2 %v3229_v50, %s4231_s22  ;;  %v5365_v50 = vld.sshfl [vmem:[#allocation1] sm:$0xff pattern:$0x73625140] }
0x24f7   :  { %3272 = vrot.lane.b32.xlu1 %v3270_v20, %s4231_s22 }
0x24fb   :  { %v3222_v51 = vpop.permute.xlu1 %3221 }
0x24fc   :  { %v3224_v18 = vmul.f32 %v3222_v51, %v3217_v2  ;;  %v3263_v16 = vpop.permute.xlu0 %3262 }
0x24fd   :  { %v3265_v10 = vmul.f32 %v3263_v16, %v3258_v31 }
0x24ff   :  { %3309 = vperm.xlu1 %3973, %v3307_v47  }
0x2550   :  { %v3232_v32 = vpop.permute.xlu2 %3231 }
0x2551   :  { %v3234_v17 = vadd.f32 %v3232_v32, %v3224_v18 }
0x2553   :  { %4194 = vtanh.f32 %v3234_v17 }
0x2559   :  { %v4195_v28 = vpop.eup %4194 }
0x255a   :  { %3237 = vrot.lane.b32.xlu2 %v4195_v28, %s4232_s3 }
0x2569   :  { %v3273_v37 = vpop.permute.xlu1 %3272 }
0x256a   :  { %v3275_v54 = vadd.f32 %v3273_v37, %v3265_v10 }
0x256c   :  { %4196 = vtanh.f32 %v3275_v54 }
0x2571   :  { %v5372_v28 = vpop.permute.xlu1 %3309 }
0x2572   :  { %v4197_v4 = vpop.eup %4196  ;;  %6091 = vst [vmem:[#allocation22_spill] sm:$0xff] %v5372_v28  ;;  %vm6071_vm13 = vcmp.eq.s32.totalorder %v5372_v28, 1 }
0x2573   :  { %3278 = vrot.lane.b32.xlu0 %v4197_v4, %s4232_s3 }
0x257b   :  { %3288 = vperm.xlu0 %3971, %v3286_v55  }
0x25b4   :  { %v3238_v57 = vpop.permute.xlu2 %3237 }
0x25b5   :  { %v3240_v26 = vmul.f32 %v3238_v57, %v3217_v2 }
0x25b7   :  { %3292 = vst [vmem:[#allocation1] ss:$4 sm:$0xff] %v3240_v26 }
0x25be   :  { %v3293_v20 = vld.sshfl [vmem:[#allocation1] sm:$0xff pattern:$0x73625140] }
0x25bf   :  { %3294 = vrot.lane.b32.xlu1 %v3293_v20, %s4231_s22  ;;  %3300 = vst [vmem:[#allocation1] ss:$4 sm:$0xff] %v3234_v17 }
0x25c6   :  { %v3301_v8 = vld.sshfl [vmem:[#allocation1] sm:$0xff pattern:$0x73625140] }
0x25c7   :  { %3302 = vrot.lane.b32.xlu0 %v3301_v8, %s4234_s8 }
0x25e5   :  { %v3279_v47 = vpop.permute.xlu0 %3278 }
0x25e6   :  { %v3281_v51 = vmul.f32 %v3279_v47, %v3258_v31  ;;  %v3414_v47 = vld [vmem:[#allocation2 + $0x38] sm:$0xf] }
0x25e8   :  { %3313 = vst [vmem:[#allocation1] ss:$4 sm:$0xff] %v3281_v51 }
0x25ed   :  { %v5374_v16 = vpop.permute.xlu0 %3288 }
0x25ee   :  { %vm6072_vm12 = vcmp.eq.s32.totalorder %v5374_v16, 1 }
0x25ef   :  { %v3314_v18 = vld.sshfl [vmem:[#allocation1] sm:$0xff pattern:$0x73625140] }
0x25f0   :  { %3315 = vrot.lane.b32.xlu2 %v3314_v18, %s4231_s22  ;;  %3321 = vst [vmem:[#allocation1] ss:$4 sm:$0xff] %v3275_v54 }
0x25f7   :  { %v3322_v32 = vld.sshfl [vmem:[#allocation1] sm:$0xff pattern:$0x73625140] }
0x25f8   :  { %3329 = vst [vmem:[#allocation1] ss:$4 sm:$0xff] %v3240_v26  ;;  %v3416_v26 = vld [vmem:[#allocation2 + $0x4] sm:$0xf] }
0x25f9   :  { %v3418_v20 = vrot.slane %v3416_v26, 2 }
0x25ff   :  { %v5370_v2 = vld.sshfl [vmem:[#allocation1] sm:$0xff pattern:$0x73625140] }
0x2600   :  { %3338 = vst [vmem:[#allocation1] ss:$4 sm:$0xff] %v3281_v51 }
0x2631   :  { %v3295_v17 = vpop.permute.xlu1 %3294 }
0x2632   :  { %v3297_v31 = vsel %vm6072_vm12, %v3295_v17, %v5333_v52 }
0x2633   :  { %3298 = vst.msk [vmem:[#allocation3] sm:$0x3] %vm184_vm0, %v3297_v31 }
0x2639   :  { %v3303_v10 = vpop.permute.xlu0 %3302 }
0x263a   :  { %v3305_v37 = vsel %vm6072_vm12, %v3303_v10, %v5345_v30  ;;  %v5395_v52 = vld [vmem:[#allocation3] sm:$0x3] }
0x263b   :  { %3306 = vst.msk [vmem:[#allocation4] sm:$0x3] %vm184_vm0, %v3305_v37 }
0x2642   :  { %v5407_v10 = vld [vmem:[#allocation4] sm:$0x3] }
0x264a   :  { %v3316_v54 = vpop.permute.xlu2 %3315 }
0x264b   :  { %v3318_v4 = vsel %vm6071_vm13, %v3316_v54, %v5328_v14 }
0x264c   :  { %3319 = vst.msk [vmem:[#allocation5] sm:$0x3] %vm184_vm0, %v3318_v4 }
0x2653   :  { %v5390_v53 = vld [vmem:[#allocation5] sm:$0x3] }
0x2654   :  { %3351 = vrot.lane.b32.xlu2 %v5390_v53, %s4231_s22 }
0x265c   :  { %3323 = vrot.lane.b32.xlu2 %v3322_v32, %s4234_s8 }
0x26ae   :  { %v3352_v30 = vpop.permute.xlu2 %3351 }
0x26af   :  { %v3354_v55 = vsel %vm213_vm2, %v5395_v52, %v3352_v30 }
0x26b0   :  { %3949 = vmatmul.msk.f32.vlgmr.msrb.gmra.mxu0 %vm231_vm3, %v3354_v55  ;;  %3950 = vmatmul.msk.f32.vlgmr.msrb.gmra.mxu1 %vm231_vm3, %v3354_v55 }
0x26b6   :  { %v3324_v14 = vpop.permute.xlu2 %3323 }
0x26b7   :  { %v3326_v57 = vsel %vm6071_vm13, %v3324_v14, %v5349_v45 }
0x26b8   :  { %3327 = vst.msk [vmem:[#allocation6] sm:$0x3] %vm184_vm0, %v3326_v57 }
0x26bf   :  { %v5411_v45 = vld [vmem:[#allocation6] sm:$0x3] }
0x272d   :  { %v3391_v8 = vpop.f32.mrf.mxu0  ;;  %v3411_v51 = vpop.f32.mrf.mxu1 }
0x272e   :  { %v3415_v18 = vadd.f32 %v3414_v47, %v3391_v8  ;;  %v3420_v32 = vadd.f32 %v3418_v20, %v3411_v51 }
0x2730   :  { %4198 = vtanh.f32 %v3415_v18  ;;  %v3951_v37 = vmul.f32 -1.442695, %v3415_v18  ;;  %v3952_v54 = vmul.f32 -1.442695, %v3420_v32 }
0x2731   :  { %4200 = vtanh.f32 %v3420_v32 }
0x2732   :  { %4202 = vpow2.f32 %v3951_v37 }
0x2733   :  { %4204 = vpow2.f32 %v3952_v54 }
0x2736   :  { %v4199_v17 = vpop.eup %4198 }
0x2737   :  { %v4201_v31 = vpop.eup %4200  ;;  %3447 = vrot.lane.b32.xlu1 %v4199_v17, %s4232_s3 }
0x2738   :  { %3488 = vrot.lane.b32.xlu0 %v4201_v31, %s4232_s3  ;;  %v4203_v4 = vpop.eup %4202 }
0x2739   :  { %v4205_v30 = vpop.eup %4204  ;;  %v3424_v55 = vadd.f32 1.0, %v4203_v4 }
0x273a   :  { %v3465_v14 = vadd.f32 1.0, %v4205_v30 }
0x273b   :  { %4206 = vrcp.f32 %v3424_v55  ;;  %v3436_v32 = vand.u32 2147483648, %v3424_v55  ;;  %vm3430_vm11 = vweird.f32 %v3424_v55  ;;  %v3434_v54 = vand.u32 2147483647, %v3424_v55 }
0x273c   :  { %4208 = vrcp.f32 %v3465_v14  ;;  %v3477_v37 = vand.u32 2147483648, %v3465_v14  ;;  %vm3471_vm8 = vweird.f32 %v3465_v14  ;;  %v3475_v4 = vand.u32 2147483647, %v3465_v14 }
0x273d   :  { %v3437_v48 = vor.u32 1.1754944e-38, %v3436_v32  ;;  %vm3435_vm13 = vcmp.eq.f32.partialorder %v3434_v54, 8.507059e+37 }
0x273e   :  { %v3478_v36 = vor.u32 1.1754944e-38, %v3477_v37  ;;  %vm3476_vm12 = vcmp.eq.f32.partialorder %v3475_v4, 8.507059e+37  ;;  %v3953_v4 = vld [vmem:[%s6026_s4 + $0x1c] sm:$0x3] }
0x273f   :  { %3442 = vrot.lane.b32.xlu1 %v5407_v10, %s4231_s22 }
0x2740   :  { %3483 = vrot.lane.b32.xlu0 %v5411_v45, %s4231_s22 }
0x2741   :  { %v4207_v57 = vpop.eup %4206 }
0x2742   :  { %v4209_v26 = vpop.eup %4208  ;;  %v3426_v20 = vmul.f32 %v4207_v57, %v3424_v55  ;;  %vm3431_vm1 = vweird.f32 %v4207_v57  ;;  %v3954_v55 = vld [vmem:[%s6026_s4 + $0x2] sm:$0x3] }
0x2743   :  { %v3467_v8 = vmul.f32 %v4209_v26, %v3465_v14  ;;  %vm3472_vm15 = vweird.f32 %v4209_v26  ;;  %vm3432_vm14 = vmor %vm3430_vm11, %vm3431_vm1  ;;  %vm3506_vm1 = vcmp.gt.f32.partialorder %v3954_v55, 0.0 }
0x2744   :  { %v3427_v47 = vsub.f32 1.0, %v3426_v20  ;;  %vm3473_vm9 = vmor %vm3471_vm8, %vm3472_vm15 }
0x2745   :  { %v3468_v51 = vsub.f32 1.0, %v3467_v8 }
0x2746   :  { %v3428_v17 = vmul.f32 %v4207_v57, %v3427_v47 }
0x2747   :  { %v3469_v31 = vmul.f32 %v4209_v26, %v3468_v51 }
0x2748   :  { %v3429_v28 = vadd.f32 %v4207_v57, %v3428_v17 }
0x2749   :  { %v3470_v18 = vadd.f32 %v4209_v26, %v3469_v31 }
0x274a   :  { %v3433_v30 = vsel %vm3432_vm14, %v4207_v57, %v3429_v28  ;;  %v3528_v28 = vsel %vm3506_vm1, 1, %v6086_v59 }
0x274b   :  { %v3474_v0 = vsel %vm3473_vm9, %v4209_v26, %v3470_v18  ;;  %v3438_v8 = vsel %vm3435_vm13, %v3437_v48, %v3433_v30 }
0x274c   :  { %v3479_v51 = vsel %vm3476_vm12, %v3478_v36, %v3474_v0  ;;  %vm3504_vm12 = vcmp.gt.f32.partialorder %v3953_v4, 0.0  ;;  %v3586_v4 = vld [vmem:[%s6024_s2 + $0x50] sm:$0xff] }
0x274d   :  { %v3507_v30 = vsel %vm3504_vm12, 1, %v6086_v59 }
0x27a9   :  { %v3448_v20 = vpop.permute.xlu1 %3447 }
0x27aa   :  { %v3489_v47 = vpop.permute.xlu0 %3488  ;;  %v3450_v17 = vmul.f32 %v3448_v20, %v3438_v8 }
0x27ab   :  { %v3491_v31 = vmul.f32 %v3489_v47, %v3479_v51 }
0x27ac   :  { %3452 = vrot.lane.b32.xlu2 %v3450_v17, %s4231_s22  ;;  %v5427_v17 = vld.sshfl [vmem:[#allocation1] sm:$0xff pattern:$0x73625140] }
0x27ad   :  { %3493 = vrot.lane.b32.xlu1 %v3491_v31, %s4231_s22 }
0x27b1   :  { %v3443_v14 = vpop.permute.xlu1 %3442 }
0x27b2   :  { %v3445_v57 = vmul.f32 %v3443_v14, %v3438_v8  ;;  %v3484_v0 = vpop.permute.xlu0 %3483 }
0x27b3   :  { %v3486_v18 = vmul.f32 %v3484_v0, %v3479_v51 }
0x27b5   :  { %3530 = vperm.xlu1 %3973, %v3528_v28  }
0x2806   :  { %v3453_v26 = vpop.permute.xlu2 %3452 }
0x2807   :  { %v3455_v48 = vadd.f32 %v3453_v26, %v3445_v57 }
0x2809   :  { %4210 = vtanh.f32 %v3455_v48 }
0x280f   :  { %v4211_v36 = vpop.eup %4210 }
0x2810   :  { %3458 = vrot.lane.b32.xlu2 %v4211_v36, %s4232_s3 }
0x281f   :  { %v3494_v32 = vpop.permute.xlu1 %3493 }
0x2820   :  { %v3496_v37 = vadd.f32 %v3494_v32, %v3486_v18 }
0x2822   :  { %4212 = vtanh.f32 %v3496_v37 }
0x2827   :  { %v5434_v36 = vpop.permute.xlu1 %3530 }
0x2828   :  { %v4213_v54 = vpop.eup %4212  ;;  %vm3532_vm15 = vcmp.eq.s32.totalorder %v5434_v36, 1 }
0x2829   :  { %3499 = vrot.lane.b32.xlu0 %v4213_v54, %s4232_s3  ;;  %v3591_v54 = vld [vmem:[%s6024_s2 + $0x78] sm:$0xff] }
0x282a   :  { %3623 = vmatpush.msra.mxu3 %v3591_v54  ;;  %v3577_v54 = vld [vmem:[%s6024_s2 + $0x8] sm:$0xff] }
0x2831   :  { %3509 = vperm.xlu0 %3971, %v3507_v30   ;;  %v3587_v30 = vld [vmem:[%s6024_s2 + $0x58] sm:$0xff] }
0x286a   :  { %v3459_v20 = vpop.permute.xlu2 %3458 }
0x286b   :  { %v3461_v47 = vmul.f32 %v3459_v20, %v3438_v8  ;;  %v3584_v20 = vld [vmem:[%s6024_s2 + $0x40] sm:$0xff] }
0x286d   :  { %3513 = vst [vmem:[#allocation1] ss:$4 sm:$0xff] %v3461_v47 }
0x2874   :  { %v3514_v31 = vld.sshfl [vmem:[#allocation1] sm:$0xff pattern:$0x73625140] }
0x2875   :  { %3515 = vrot.lane.b32.xlu1 %v3514_v31, %s4231_s22  ;;  %3521 = vst [vmem:[#allocation1] ss:$4 sm:$0xff] %v3455_v48  ;;  %v3582_v31 = vld [vmem:[%s6024_s2 + $0x30] sm:$0xff] }
0x287c   :  { %v3522_v55 = vld.sshfl [vmem:[#allocation1] sm:$0xff pattern:$0x73625140] }
0x287d   :  { %3523 = vrot.lane.b32.xlu0 %v3522_v55, %s4234_s8  ;;  %v3583_v55 = vld [vmem:[%s6024_s2 + $0x38] sm:$0xff] }
0x289b   :  { %v3500_v28 = vpop.permute.xlu0 %3499 }
0x289c   :  { %v3502_v14 = vmul.f32 %v3500_v28, %v3479_v51  ;;  %v3580_v28 = vld [vmem:[%s6024_s2 + $0x20] sm:$0xff] }
0x289e   :  { %3534 = vst [vmem:[#allocation1] ss:$4 sm:$0xff] %v3502_v14 }
0x28a3   :  { %v5436_v0 = vpop.permute.xlu0 %3509 }
0x28a4   :  { %vm3511_vm13 = vcmp.eq.s32.totalorder %v5436_v0, 1 }
0x28a5   :  { %v3535_v57 = vld.sshfl [vmem:[#allocation1] sm:$0xff pattern:$0x73625140] }
0x28a6   :  { %3536 = vrot.lane.b32.xlu2 %v3535_v57, %s4231_s22  ;;  %3542 = vst [vmem:[#allocation1] ss:$4 sm:$0xff] %v3496_v37  ;;  %v3590_v37 = vld [vmem:[%s6024_s2 + $0x70] sm:$0xff] }
0x28a7   :  { %3603 = vmatpush.msra.mxu2 %v3590_v37  ;;  %v3578_v57 = vld [vmem:[%s6024_s2 + $0x10] sm:$0xff]  ;;  %v3576_v37 = vld [vmem:[%s6024_s2] sm:$0xff] }
0x28ad   :  { %v3543_v26 = vld.sshfl [vmem:[#allocation1] sm:$0xff pattern:$0x73625140] }
0x28ae   :  { %3550 = vst [vmem:[#allocation1] ss:$4 sm:$0xff] %v3461_v47  ;;  %v3585_v47 = vld [vmem:[%s6024_s2 + $0x48] sm:$0xff] }
0x28b5   :  { %v5432_v8 = vld.sshfl [vmem:[#allocation1] sm:$0xff pattern:$0x73625140] }
0x28b6   :  { %3559 = vst [vmem:[#allocation1] ss:$4 sm:$0xff] %v3502_v14  ;;  %v3581_v14 = vld [vmem:[%s6024_s2 + $0x28] sm:$0xff] }
0x28e7   :  { %v3516_v48 = vpop.permute.xlu1 %3515 }
0x28e8   :  { %v3518_v51 = vsel %vm3511_vm13, %v3516_v48, %v5395_v52  ;;  %v3588_v52 = vld [vmem:[%s6024_s2 + $0x60] sm:$0xff]  ;;  %v3579_v48 = vld [vmem:[%s6024_s2 + $0x18] sm:$0xff] }
0x28e9   :  { %3519 = vst.msk [vmem:[#allocation3] sm:$0x3] %vm184_vm0, %v3518_v51  ;;  %3604 = vmatpush.msra.mxu2 %v3588_v52 }
0x28eb   :  { %3605 = vmatpush.msra.mxu2 %v3586_v4 }
0x28ed   :  { %3606 = vmatpush.msra.mxu2 %v3584_v20 }
0x28ef   :  { %v3524_v18 = vpop.permute.xlu0 %3523  ;;  %3607 = vmatpush.msra.mxu2 %v3582_v31  ;;  %v3635_v31 = vld [vmem:[#allocation2 + $0x3c] sm:$0xf] }
0x28f0   :  { %v3526_v32 = vsel %vm3511_vm13, %v3524_v18, %v5407_v10  ;;  %v3589_v10 = vld [vmem:[%s6024_s2 + $0x68] sm:$0xff] }
0x28f1   :  { %3527 = vst.msk [vmem:[#allocation4] sm:$0x3] %vm184_vm0, %v3526_v32  ;;  %3624 = vmatpush.msra.mxu3 %v3589_v10  ;;  %3608 = vmatpush.msra.mxu2 %v3580_v28 }
0x28f3   :  { %3625 = vmatpush.msra.mxu3 %v3587_v30  ;;  %3609 = vmatpush.msra.mxu2 %v3578_v57  ;;  %v3637_v30 = vld [vmem:[#allocation2] sm:$0xf]  ;;  %v6092_v57 = vmov 0.0  }
0x28f4   :  { %v3639_v20 = vrot.slane %v3637_v30, 2  ;;  %189 = vst.msk [vmem:[%s6027_s5] sm:$0x3] %vm184_vm0, %v6092_v57 }
0x28f5   :  { %3626 = vmatpush.msra.mxu3 %v3585_v47  ;;  %3610 = vmatpush.msra.mxu2 %v3576_v37  ;;  %190 = vst.msk [vmem:[%s6027_s5 + $0x2] sm:$0x3] %vm184_vm0, %v6092_v57 }
0x28f6   :  { %191 = vst.msk [vmem:[%s6027_s5 + $0x4] sm:$0x3] %vm184_vm0, %v6092_v57 }
0x28f7   :  { %3627 = vmatpush.msra.mxu3 %v3583_v55  ;;  %192 = vst.msk [vmem:[%s6027_s5 + $0x6] sm:$0x3] %vm184_vm0, %v6092_v57 }
0x28f8   :  { %193 = vst.msk [vmem:[%s6027_s5 + $0x8] sm:$0x3] %vm184_vm0, %v6092_v57 }
0x28f9   :  { %3628 = vmatpush.msra.mxu3 %v3581_v14  ;;  %194 = vst.msk [vmem:[%s6027_s5 + $0xa] sm:$0x3] %vm184_vm0, %v6092_v57 }
0x28fa   :  { %195 = vst.msk [vmem:[%s6027_s5 + $0xc] sm:$0x3] %vm184_vm0, %v6092_v57 }
0x28fb   :  { %3629 = vmatpush.msra.mxu3 %v3579_v48  ;;  %196 = vst.msk [vmem:[%s6027_s5 + $0xe] sm:$0x3] %vm184_vm0, %v6092_v57 }
0x28fc   :  { %197 = vst.msk [vmem:[%s6027_s5 + $0x10] sm:$0x3] %vm184_vm0, %v6092_v57 }
0x28fd   :  { %3630 = vmatpush.msra.mxu3 %v3577_v54  ;;  %198 = vst.msk [vmem:[%s6027_s5 + $0x12] sm:$0x3] %vm184_vm0, %v6092_v57 }
0x28fe   :  { %199 = vst.msk [vmem:[%s6027_s5 + $0x14] sm:$0x3] %vm184_vm0, %v6092_v57 }
0x28ff   :  { %200 = vst.msk [vmem:[%s6027_s5 + $0x16] sm:$0x3] %vm184_vm0, %v6092_v57 }
0x2900   :  { %v3537_v51 = vpop.permute.xlu2 %3536  ;;  %201 = vst.msk [vmem:[%s6027_s5 + $0x18] sm:$0x3] %vm184_vm0, %v6092_v57 }
0x2901   :  { %v3539_v18 = vsel %vm3532_vm15, %v3537_v51, %v5390_v53  ;;  %v5505_v53 = vld [vmem:[#allocation3] sm:$0x3]  ;;  %v5567_v51 = vld [vmem:[#allocation4] sm:$0x3]  ;;  %202 = vst.msk [vmem:[%s6027_s5 + $0x1a] sm:$0x3] %vm184_vm0, %v6092_v57 }
0x2902   :  { %3540 = vst.msk [vmem:[#allocation5] sm:$0x3] %vm184_vm0, %v3539_v18 }
0x2903   :  { %6093 = vst [vmem:[#allocation23_spill] sm:$0xff] %v5567_v51 }
0x2904   :  { %203 = vst.msk [vmem:[%s6027_s5 + $0x1c] sm:$0x3] %vm184_vm0, %v6092_v57  ;;  %v3877_v36 = vld [vmem:[%s6027_s5 + $0x12] sm:$0x3] }
0x2905   :  { %204 = vst.msk [vmem:[%s6027_s5 + $0x1e] sm:$0x3] %vm184_vm0, %v6092_v57 }
0x2909   :  { %v5494_v32 = vld [vmem:[#allocation5] sm:$0x3] }
0x290a   :  { %3572 = vrot.lane.b32.xlu2 %v5494_v32, %s4231_s22 }
0x290c   :  { %v3817_v46 = vld [vmem:[%s6027_s5 + $0x1e] sm:$0x3] }
0x2912   :  { %3544 = vrot.lane.b32.xlu2 %v3543_v26, %s4234_s8 }
0x2964   :  { %v3573_v52 = vpop.permute.xlu2 %3572 }
0x2965   :  { %v3575_v10 = vsel %vm213_vm2, %v5505_v53, %v3573_v52 }
0x2966   :  { %3959 = vmatmul.msk.f32.vlgmr.msra.gmra.mxu2 %vm231_vm3, %v3575_v10  ;;  %3960 = vmatmul.msk.f32.vlgmr.msra.gmra.mxu3 %vm231_vm3, %v3575_v10 }
0x296c   :  { %v3545_v26 = vpop.permute.xlu2 %3544 }
0x296d   :  { %v3547_v4 = vsel %vm3532_vm15, %v3545_v26, %v5411_v45 }
0x296e   :  { %3548 = vst.msk [vmem:[#allocation6] sm:$0x3] %vm184_vm0, %v3547_v4 }
0x2975   :  { %v5576_v18 = vld [vmem:[#allocation6] sm:$0x3] }
0x2976   :  { %6094 = vst [vmem:[#allocation24_spill] sm:$0xff] %v5576_v18 }
0x29e9   :  { %v3612_v47 = vpop.f32.mrf.mxu2  ;;  %v3632_v55 = vpop.f32.mrf.mxu3 }
0x29ea   :  { %v3636_v28 = vadd.f32 %v3635_v31, %v3612_v47  ;;  %v3641_v14 = vadd.f32 %v3639_v20, %v3632_v55 }
0x29ec   :  { %4214 = vtanh.f32 %v3636_v28  ;;  %v3961_v37 = vmul.f32 -1.442695, %v3636_v28  ;;  %v3962_v54 = vmul.f32 -1.442695, %v3641_v14 }
0x29ed   :  { %4216 = vtanh.f32 %v3641_v14 }
0x29ee   :  { %4218 = vpow2.f32 %v3961_v37 }
0x29ef   :  { %4220 = vpow2.f32 %v3962_v54 }
0x29f2   :  { %v4215_v45 = vpop.eup %4214 }
0x29f3   :  { %v4217_v48 = vpop.eup %4216  ;;  %3668 = vrot.lane.b32.xlu1 %v4215_v45, %s4232_s3 }
0x29f4   :  { %3709 = vrot.lane.b32.xlu0 %v4217_v48, %s4232_s3  ;;  %v4219_v52 = vpop.eup %4218 }
0x29f5   :  { %v4221_v10 = vpop.eup %4220  ;;  %v3645_v26 = vadd.f32 1.0, %v4219_v52 }
0x29f6   :  { %v3686_v4 = vadd.f32 1.0, %v4221_v10 }
0x29f7   :  { %4222 = vrcp.f32 %v3645_v26  ;;  %v3657_v28 = vand.u32 2147483648, %v3645_v26  ;;  %vm3651_vm11 = vweird.f32 %v3645_v26  ;;  %v3655_v37 = vand.u32 2147483647, %v3645_v26 }
0x29f8   :  { %4224 = vrcp.f32 %v3686_v4  ;;  %v3698_v14 = vand.u32 2147483648, %v3686_v4  ;;  %vm3692_vm8 = vweird.f32 %v3686_v4  ;;  %v3696_v54 = vand.u32 2147483647, %v3686_v4 }
0x29f9   :  { %vm3656_vm1 = vcmp.eq.f32.partialorder %v3655_v37, 8.507059e+37 }
0x29fa   :  { %vm3697_vm12 = vcmp.eq.f32.partialorder %v3696_v54, 8.507059e+37 }
0x29fb   :  { %3663 = vrot.lane.b32.xlu1 %v5567_v51, %s4231_s22  ;;  %v3699_v51 = vor.u32 1.1754944e-38, %v3698_v14 }
0x29fc   :  { %3704 = vrot.lane.b32.xlu0 %v5576_v18, %s4231_s22  ;;  %v3658_v18 = vor.u32 1.1754944e-38, %v3657_v28 }
0x29fd   :  { %v4223_v30 = vpop.eup %4222 }
0x29fe   :  { %v4225_v20 = vpop.eup %4224  ;;  %v3647_v47 = vmul.f32 %v4223_v30, %v3645_v26  ;;  %vm3652_vm2 = vweird.f32 %v4223_v30 }
0x29ff   :  { %v3688_v31 = vmul.f32 %v4225_v20, %v3686_v4  ;;  %vm3693_vm3 = vweird.f32 %v4225_v20  ;;  %vm3653_vm14 = vmor %vm3651_vm11, %vm3652_vm2  ;;  %vm6098_vm2 = vcmp.eq.s32.totalorder %v4952_v29, 1  ;;  %vm6100_vm11 = vcmp.eq.s32.totalorder %v5374_v16, 1 }
0x2a00   :  { %v3648_v55 = vsub.f32 1.0, %v3647_v47  ;;  %vm3694_vm9 = vmor %vm3692_vm8, %vm3693_vm3  ;;  %vm6099_vm3 = vcmp.eq.s32.totalorder %v4548_v7, 1  ;;  %vm6101_vm8 = vcmp.eq.s32.totalorder %v4656_v62, 1  ;;  %v3865_v62 = vld [vmem:[%s6027_s5 + $0xa] sm:$0x3] }
0x2a01   :  { %v3689_v57 = vsub.f32 1.0, %v3688_v31 }
0x2a03   :  { %v3690_v45 = vmul.f32 %v4225_v20, %v3689_v57 }
0x2a04   :  { %415 = vrot.lane.b32.xlu0 %v4420_v21, %s4231_s22  ;;  %v3649_v21 = vmul.f32 %v4223_v30, %v3648_v55 }
0x2a06   :  { %v3650_v48 = vadd.f32 %v4223_v30, %v3649_v21 }
0x2a08   :  { %v3654_v52 = vsel %vm3653_vm14, %v4223_v30, %v3650_v48 }
0x2a09   :  { %v5609_v31 = vsel %vm3656_vm1, %v3658_v18, %v3654_v52 }
0x2a0c   :  { %879 = vrot.lane.b32.xlu0 %v4649_v44, %s4231_s22  ;;  %v3691_v44 = vadd.f32 %v4225_v20, %v3690_v45 }
0x2a0e   :  { %v3695_v10 = vsel %vm3694_vm9, %v4225_v20, %v3691_v44  ;;  %v3825_v44 = vld [vmem:[%s6027_s5 + $0x2] sm:$0x3] }
0x2a0f   :  { %v5611_v57 = vsel %vm3697_vm12, %v3699_v51, %v3695_v10  ;;  %v412_v51 = vld [vmem:[%s6027_s5] sm:$0x3] }
0x2a65   :  { %v3669_v47 = vpop.permute.xlu1 %3668 }
0x2a66   :  { %v3710_v55 = vpop.permute.xlu0 %3709  ;;  %v3671_v21 = vmul.f32 %v3669_v47, %v5609_v31 }
0x2a67   :  { %v3712_v26 = vmul.f32 %v3710_v55, %v5611_v57 }
0x2a68   :  { %3673 = vrot.lane.b32.xlu2 %v3671_v21, %s4231_s22 }
0x2a69   :  { %3714 = vrot.lane.b32.xlu1 %v3712_v26, %s4231_s22  ;;  %v3845_v26 = vld [vmem:[%s6027_s5 + $0x6] sm:$0x3] }
0x2a6e   :  { %v3705_v4 = vpop.permute.xlu0 %3704 }
0x2a70   :  { %642 = vrot.lane.b32.xlu2 %v4482_v42, %s4231_s22 }
0x2a71   :  { %425 = vrot.lane.b32.xlu1 %v4477_v35, %s4231_s22  ;;  %v3837_v35 = vld [vmem:[%s6027_s5 + $0x1a] sm:$0x3] }
0x2a76   :  { %v416_v18 = vpop.permute.xlu0 %415 }
0x2a77   :  { %v418_v30 = vsel %vm374_vm5, %v416_v18, 0.0  ;;  %vm3727_vm5 = vcmp.gt.f32.partialorder %v3726_v23, 0.0  ;;  %v3847_v23 = vld [vmem:[%s6027_s5 + $0x18] sm:$0x3] }
0x2a78   :  { %v419_v20 = vadd.f32 %v418_v30, %v412_v51 }
0x2a79   :  { %652 = vrot.lane.b32.xlu1 %v4539_v60, %s4231_s22  ;;  %v3749_v60 = vsel %vm3727_vm5, 1, %v6086_v59 }
0x2a7a   :  { %420 = vst.msk [vmem:[%s6027_s5] sm:$0x3] %vm184_vm0, %v419_v20 }
0x2a7e   :  { %v880_v42 = vpop.permute.xlu0 %879 }
0x2a7f   :  { %v882_v45 = vsel %vm848_vm10, %v880_v42, 0.0  ;;  %vm3725_vm10 = vcmp.gt.f32.partialorder %v3963_v6, 0.0 }
0x2a80   :  { %v883_v48 = vadd.f32 %v3837_v35, %v882_v45 }
0x2a81   :  { %1096 = vrot.lane.b32.xlu1 %v4654_v61, %s4231_s22  ;;  %v3728_v61 = vsel %vm3725_vm10, 1, %v6086_v59 }
0x2a82   :  { %3838 = vst.msk [vmem:[%s6027_s5 + $0x1a] sm:$0x3] %vm184_vm0, %v883_v48 }
0x2a89   :  { %1333 = vrot.lane.b32.xlu1 %v4773_v19, %s4231_s22  ;;  %v3664_v19 = vpop.permute.xlu1 %3663 }
0x2a91   :  { %1777 = vrot.lane.b32.xlu1 %v4840_v39, %s4231_s22  ;;  %v3666_v39 = vmul.f32 %v3664_v19, %v5609_v31 }
0x2a99   :  { %2014 = vrot.lane.b32.xlu1 %v5007_v56, %s4231_s22 }
0x2aa1   :  { %2447 = vrot.lane.b32.xlu1 %v5074_v1, %s4231_s22 }
0x2aa9   :  { %2677 = vrot.lane.b32.xlu1 %v5241_v38, %s4231_s22  ;;  %v3560_v38 = vld.sshfl [vmem:[#allocation1] sm:$0xff pattern:$0x73625140] }
0x2ab1   :  { %3751 = vperm.xlu1 %3973, %v3749_v60  }
0x2ab9   :  { %3730 = vperm.xlu1 %3973, %v3728_v61  }
0x2ac1   :  { %3331 = vrot.lane.b32.xlu1 %v5370_v2, %s4231_s22  ;;  %v3707_v2 = vmul.f32 %v3705_v4, %v5611_v57 }
0x2ac2   :  { %v3674_v56 = vpop.permute.xlu2 %3673 }
0x2ac3   :  { %v5664_v1 = vadd.f32 %v3674_v56, %v3666_v39 }
0x2ac5   :  { %4226 = vtanh.f32 %v5664_v1 }
0x2ac9   :  { %3561 = vrot.lane.b32.xlu1 %v3560_v38, %s4231_s22  ;;  %v6102_v38 = vld [vmem:[#allocation9_spill] sm:$0xff] }
0x2aca   :  { %v643_v59 = vpop.permute.xlu2 %642  ;;  %vm6103_vm14 = vcmp.eq.s32.totalorder %v6102_v38, 1 }
0x2acb   :  { %v4227_v28 = vpop.eup %4226  ;;  %v645_v14 = vsel %vm600_vm4, %v643_v59, 0.0  ;;  %vm6096_vm4 = vcmp.eq.s32.totalorder %v4718_v41, 1 }
0x2acc   :  { %v646_v37 = vadd.f32 %v3825_v44, %v645_v14  ;;  %3679 = vrot.lane.b32.xlu2 %v4227_v28, %s4232_s3  ;;  %v6104_v14 = vld [vmem:[#allocation10_spill] sm:$0xff] }
0x2ace   :  { %3826 = vst.msk [vmem:[%s6027_s5 + $0x2] sm:$0x3] %vm184_vm0, %v646_v37 }
0x2ad4   :  { %869 = vrot.lane.b32.xlu2 %v4544_v5, %s4231_s22 }
0x2ad5   :  { %v3957_v19 = vld [vmem:[%s6027_s5 + $0x2] sm:$0x3] }
0x2adb   :  { %v3715_v54 = vpop.permute.xlu1 %3714 }
0x2adc   :  { %v5681_v52 = vadd.f32 %v3715_v54, %v3707_v2  ;;  %1106 = vrot.lane.b32.xlu2 %v4711_v33, %s4231_s22  ;;  %v3827_v33 = vld [vmem:[%s6027_s5 + $0x1c] sm:$0x3] }
0x2add   :  { %v6106_v54 = vld [vmem:[#allocation16_spill] sm:$0xff] }
0x2ade   :  { %4228 = vtanh.f32 %v5681_v52  ;;  %vm6107_vm9 = vcmp.eq.s32.totalorder %v6106_v54, 1 }
0x2ae3   :  { %v426_v10 = vpop.permute.xlu1 %425 }
0x2ae4   :  { %v4229_v47 = vpop.eup %4228  ;;  %v428_v55 = vsel %vm395_vm6, %v426_v10, 0.0  ;;  %1550 = vrot.lane.b32.xlu2 %v4778_v34, %s4231_s22  ;;  %vm6095_vm6 = vcmp.eq.s32.totalorder %v4658_v63, 1 }
0x2ae5   :  { %v429_v5 = vadd.f32 %v3817_v46, %v428_v55  ;;  %3720 = vrot.lane.b32.xlu0 %v4229_v47, %s4232_s3 }
0x2ae7   :  { %3818 = vst.msk [vmem:[%s6027_s5 + $0x1e] sm:$0x3] %vm184_vm0, %v429_v5 }
0x2aeb   :  { %v653_v21 = vpop.permute.xlu1 %652 }
0x2aec   :  { %v655_v22 = vsel %vm621_vm7, %v653_v21, 0.0  ;;  %1787 = vrot.lane.b32.xlu2 %v4945_v12, %s4231_s22  ;;  %vm6097_vm7 = vcmp.eq.s32.totalorder %v4844_v49, 1 }
0x2aed   :  { %v656_v34 = vadd.f32 %v3827_v33, %v655_v22  ;;  %1323 = vrot.lane.b32.xlu0 %v4716_v40, %s4231_s22  ;;  %v3857_v40 = vld [vmem:[%s6027_s5 + $0x16] sm:$0x3]  ;;  %v6108_v33 = vld [vmem:[#allocation13_spill] sm:$0xff] }
0x2aee   :  { %vm6109_vm1 = vcmp.eq.s32.totalorder %v6108_v33, 1 }
0x2aef   :  { %3828 = vst.msk [vmem:[%s6027_s5 + $0x1c] sm:$0x3] %vm184_vm0, %v656_v34  ;;  %v6110_v34 = vld [vmem:[#allocation15_spill] sm:$0xff] }
0x2af0   :  { %vm6111_vm12 = vcmp.eq.s32.totalorder %v6110_v34, 1 }
0x2af3   :  { %v1097_v4 = vpop.permute.xlu1 %1096 }
0x2af4   :  { %v1099_v43 = vsel %vm6095_vm6, %v1097_v4, 0.0  ;;  %2226 = vrot.lane.b32.xlu2 %v5012_v3, %s4231_s22 }
0x2af5   :  { %v1100_v12 = vadd.f32 %v3845_v26, %v1099_v43  ;;  %1560 = vrot.lane.b32.xlu0 %v4835_v24, %s4231_s22  ;;  %v3875_v24 = vld [vmem:[%s6027_s5 + $0xc] sm:$0x3] }
0x2af7   :  { %3846 = vst.msk [vmem:[%s6027_s5 + $0x6] sm:$0x3] %vm184_vm0, %v1100_v12 }
0x2afb   :  { %v1334_v51 = vpop.permute.xlu1 %1333 }
0x2afc   :  { %v1336_v63 = vsel %vm6096_vm4, %v1334_v51, 0.0  ;;  %2456 = vrot.lane.b32.xlu2 %v5131_v9, %s4231_s22 }
0x2afd   :  { %v1337_v3 = vadd.f32 %v3857_v40, %v1336_v63  ;;  %2004 = vrot.lane.b32.xlu0 %v4950_v25, %s4231_s22  ;;  %v3887_v25 = vld [vmem:[%s6027_s5 + $0x10] sm:$0x3]  ;;  %v6112_v63 = vld [vmem:[#allocation14_spill] sm:$0xff] }
0x2afe   :  { %vm6113_vm5 = vcmp.eq.s32.totalorder %v6112_v63, 1 }
0x2aff   :  { %3858 = vst.msk [vmem:[%s6027_s5 + $0x16] sm:$0x3] %vm184_vm0, %v1337_v3 }
0x2b03   :  { %v1778_v18 = vpop.permute.xlu1 %1777 }
0x2b04   :  { %v1780_v41 = vsel %vm6097_vm7, %v1778_v18, 0.0  ;;  %2889 = vrot.lane.b32.xlu2 %v5246_v11, %s4231_s22 }
0x2b05   :  { %v1781_v9 = vadd.f32 %v3875_v24, %v1780_v41  ;;  %2235 = vrot.lane.b32.xlu0 %v5069_v58, %s4231_s22 }
0x2b07   :  { %3876 = vst.msk [vmem:[%s6027_s5 + $0xc] sm:$0x3] %vm184_vm0, %v1781_v9  ;;  %v3855_v9 = vld [vmem:[%s6027_s5 + $0x8] sm:$0x3] }
0x2b0b   :  { %v2015_v30 = vpop.permute.xlu1 %2014 }
0x2b0c   :  { %v2017_v49 = vsel %vm6098_vm2, %v2015_v30, 0.0  ;;  %3110 = vrot.lane.b32.xlu2 %v5308_v13, %s4231_s22 }
0x2b0d   :  { %v2018_v11 = vadd.f32 %v3887_v25, %v2017_v49  ;;  %2668 = vrot.lane.b32.xlu0 %v5136_v27, %s4231_s22  ;;  %v3925_v49 = vld [vmem:[%s6027_s5 + $0x16] sm:$0x3] }
0x2b0e   :  { %v3907_v51 = vld [vmem:[%s6027_s5 + $0xc] sm:$0x3] }
0x2b0f   :  { %3888 = vst.msk [vmem:[%s6027_s5 + $0x10] sm:$0x3] %vm184_vm0, %v2018_v11  ;;  %v6114_v11 = vld [vmem:[#allocation19_spill] sm:$0xff] }
0x2b10   :  { %vm6115_vm10 = vcmp.eq.s32.totalorder %v6114_v11, 1 }
0x2b13   :  { %v2448_v58 = vpop.permute.xlu1 %2447 }
0x2b14   :  { %3340 = vrot.lane.b32.xlu2 %v5427_v17, %s4231_s22  ;;  %v2450_v26 = vsel %vm6111_vm12, %v2448_v58, 0.0  ;;  %v6116_v58 = vld [vmem:[#allocation7_spill] sm:$0xff] }
0x2b15   :  { %2898 = vrot.lane.b32.xlu0 %v5303_v15, %s4231_s22  ;;  %v3835_v15 = vld [vmem:[%s6027_s5 + $0x4] sm:$0x3]  ;;  %vm6117_vm6 = vcmp.eq.s32.totalorder %v6116_v58, 1  ;;  %v6134_v58 = vld [vmem:[#allocation23_spill] sm:$0xff] }
0x2b16   :  { %v3895_v5 = vld [vmem:[%s6027_s5 + $0x10] sm:$0x3] }
0x2b1b   :  { %v2678_v29 = vpop.permute.xlu1 %2677 }
0x2b1c   :  { %v2680_v46 = vsel %vm6107_vm9, %v2678_v29, 0.0 }
0x2b1d   :  { %3119 = vrot.lane.b32.xlu0 %v5365_v50, %s4231_s22 }
0x2b23   :  { %v5769_v13 = vpop.permute.xlu1 %3751 }
0x2b25   :  { %3552 = vrot.lane.b32.xlu0 %v5432_v8, %s4231_s22 }
0x2b26   :  { %v3680_v27 = vpop.permute.xlu2 %3679 }
0x2b27   :  { %v5774_v20 = vmul.f32 %v3680_v27, %v5609_v31  ;;  %v3945_v31 = vld [vmem:[%s6027_s5 + $0x1a] sm:$0x3] }
0x2b29   :  { %3734 = vst [vmem:[#allocation1] ss:$4 sm:$0xff] %v5774_v20 }
0x2b2b   :  { %v5777_v35 = vpop.permute.xlu1 %3730 }
0x2b2c   :  { %vm3732_vm9 = vcmp.eq.s32.totalorder %v5777_v35, 1  ;;  %v3779_v35 = vld [vmem:[%s6027_s5] sm:$0x3] }
0x2b2e   :  { %v870_v17 = vpop.permute.xlu2 %869 }
0x2b2f   :  { %v872_v50 = vsel %vm6099_vm3, %v870_v17, 0.0 }
0x2b30   :  { %v873_v42 = vadd.f32 %v3835_v15, %v872_v50  ;;  %v3735_v45 = vld.sshfl [vmem:[#allocation1] sm:$0xff pattern:$0x73625140]  ;;  %v3867_v50 = vld [vmem:[%s6027_s5 + $0x14] sm:$0x3] }
0x2b31   :  { %3736 = vrot.lane.b32.xlu1 %v3735_v45, %s4231_s22  ;;  %3742 = vst [vmem:[#allocation1] ss:$4 sm:$0xff] %v5664_v1 }
0x2b32   :  { %3836 = vst.msk [vmem:[%s6027_s5 + $0x4] sm:$0x3] %vm184_vm0, %v873_v42 }
0x2b33   :  { %v3332_v8 = vpop.permute.xlu1 %3331 }
0x2b34   :  { %v3334_v7 = vsel %vm6100_vm11, %v3332_v8, 0.0 }
0x2b35   :  { %v3335_v48 = vadd.f32 %v3945_v31, %v3334_v7  ;;  %v6118_v31 = vld [vmem:[#allocation21_spill] sm:$0xff] }
0x2b36   :  { %v1107_v60 = vpop.permute.xlu2 %1106  ;;  %vm6119_vm4 = vcmp.eq.s32.totalorder %v6118_v31, 1 }
0x2b37   :  { %3946 = vst.msk [vmem:[%s6027_s5 + $0x1a] sm:$0x3] %vm184_vm0, %v3335_v48  ;;  %v1109_v6 = vsel %vm6101_vm8, %v1107_v60, 0.0  ;;  %v6120_v48 = vld [vmem:[#allocation8_spill] sm:$0xff] }
0x2b38   :  { %v1110_v61 = vadd.f32 %v3847_v23, %v1109_v6  ;;  %v3743_v41 = vld.sshfl [vmem:[#allocation1] sm:$0xff pattern:$0x73625140]  ;;  %vm6121_vm7 = vcmp.eq.s32.totalorder %v6120_v48, 1 }
0x2b3a   :  { %3848 = vst.msk [vmem:[%s6027_s5 + $0x18] sm:$0x3] %vm184_vm0, %v1110_v61  ;;  %v3885_v61 = vld [vmem:[%s6027_s5 + $0xe] sm:$0x3] }
0x2b3b   :  { %v3562_v16 = vpop.permute.xlu1 %3561 }
0x2b3c   :  { %v3564_v39 = vsel %vm3532_vm15, %v3562_v16, 0.0  ;;  %vm6105_vm15 = vcmp.eq.s32.totalorder %v6104_v14, 1  ;;  %v6126_v14 = vld [vmem:[#allocation12_spill] sm:$0xff] }
0x2b3d   :  { %v3565_v56 = vadd.f32 %v3957_v19, %v3564_v39  ;;  %v3947_v39 = vld [vmem:[%s6027_s5 + $0x4] sm:$0x3]  ;;  %vm6127_vm11 = vcmp.eq.s32.totalorder %v6126_v14, 1 }
0x2b3e   :  { %v1551_v1 = vpop.permute.xlu2 %1550 }
0x2b3f   :  { %3958 = vst.msk [vmem:[%s6027_s5 + $0x2] sm:$0x3] %vm184_vm0, %v3565_v56  ;;  %v1553_v44 = vsel %vm6103_vm14, %v1551_v1, 0.0  ;;  %v6122_v56 = vld [vmem:[#allocation22_spill] sm:$0xff]  ;;  %v6124_v1 = vld [vmem:[#allocation11_spill] sm:$0xff] }
0x2b40   :  { %v1554_v59 = vadd.f32 %v3865_v62, %v1553_v44  ;;  %vm6123_vm2 = vcmp.eq.s32.totalorder %v6122_v56, 1  ;;  %vm6125_vm3 = vcmp.eq.s32.totalorder %v6124_v1, 1 }
0x2b41   :  { %v3935_v8 = vld [vmem:[%s6027_s5 + $0x18] sm:$0x3] }
0x2b42   :  { %3866 = vst.msk [vmem:[%s6027_s5 + $0xa] sm:$0x3] %vm184_vm0, %v1554_v59 }
0x2b46   :  { %v1788_v28 = vpop.permute.xlu2 %1787 }
0x2b47   :  { %v1790_v37 = vsel %vm6105_vm15, %v1788_v28, 0.0 }
0x2b48   :  { %v1791_v2 = vadd.f32 %v3877_v36, %v1790_v37 }
0x2b49   :  { %v3917_v10 = vld [vmem:[%s6027_s5 + $0xa] sm:$0x3] }
0x2b4a   :  { %v2681_v47 = vadd.f32 %v3917_v10, %v2680_v46  ;;  %3878 = vst.msk [vmem:[%s6027_s5 + $0x12] sm:$0x3] %vm184_vm0, %v1791_v2 }
0x2b4c   :  { %3918 = vst.msk [vmem:[%s6027_s5 + $0xa] sm:$0x3] %vm184_vm0, %v2681_v47  ;;  %v6128_v47 = vld [vmem:[#allocation17_spill] sm:$0xff] }
0x2b4d   :  { %vm6129_vm8 = vcmp.eq.s32.totalorder %v6128_v47, 1 }
0x2b4e   :  { %v2227_v55 = vpop.permute.xlu2 %2226 }
0x2b4f   :  { %v2229_v21 = vsel %vm6109_vm1, %v2227_v55, 0.0  ;;  %vm3753_vm1 = vcmp.eq.s32.totalorder %v5769_v13, 1 }
0x2b50   :  { %v2230_v22 = vadd.f32 %v3895_v5, %v2229_v21 }
0x2b51   :  { %v3905_v4 = vld [vmem:[%s6027_s5 + $0x12] sm:$0x3] }
0x2b52   :  { %v2451_v43 = vadd.f32 %v3905_v4, %v2450_v26  ;;  %3896 = vst.msk [vmem:[%s6027_s5 + $0x10] sm:$0x3] %vm184_vm0, %v2230_v22  ;;  %v6130_v22 = vld [vmem:[#allocation18_spill] sm:$0xff] }
0x2b53   :  { %vm6131_vm14 = vcmp.eq.s32.totalorder %v6130_v22, 1 }
0x2b54   :  { %3906 = vst.msk [vmem:[%s6027_s5 + $0x12] sm:$0x3] %vm184_vm0, %v2451_v43  ;;  %v3937_v43 = vld [vmem:[%s6027_s5 + $0x6] sm:$0x3] }
0x2b56   :  { %v2457_v12 = vpop.permute.xlu2 %2456 }
0x2b57   :  { %v3721_v40 = vpop.permute.xlu0 %3720  ;;  %v2459_v3 = vsel %vm6113_vm5, %v2457_v12, 0.0  ;;  %v6132_v12 = vld [vmem:[#allocation20_spill] sm:$0xff] }
0x2b58   :  { %v3723_v24 = vmul.f32 %v3721_v40, %v5611_v57  ;;  %v2460_v18 = vadd.f32 %v3907_v51, %v2459_v3  ;;  %vm6133_vm15 = vcmp.eq.s32.totalorder %v6132_v12, 1  ;;  %v3955_v3 = vld [vmem:[%s6027_s5 + $0x1c] sm:$0x3] }
0x2b5a   :  { %3755 = vst [vmem:[#allocation1] ss:$4 sm:$0xff] %v3723_v24 }
0x2b5b   :  { %3908 = vst.msk [vmem:[%s6027_s5 + $0xc] sm:$0x3] %vm184_vm0, %v2460_v18 }
0x2b5e   :  { %v2890_v25 = vpop.permute.xlu2 %2889 }
0x2b5f   :  { %v1324_v30 = vpop.permute.xlu0 %1323  ;;  %v2892_v57 = vsel %vm6115_vm10, %v2890_v25, 0.0 }
0x2b60   :  { %v1326_v29 = vsel %vm6117_vm6, %v1324_v30, 0.0  ;;  %v2893_v27 = vadd.f32 %v3925_v49, %v2892_v57 }
0x2b61   :  { %v1327_v15 = vadd.f32 %v3855_v9, %v1326_v29  ;;  %v3756_v17 = vld.sshfl [vmem:[#allocation1] sm:$0xff pattern:$0x73625140] }
0x2b62   :  { %3926 = vst.msk [vmem:[%s6027_s5 + $0x16] sm:$0x3] %vm184_vm0, %v2893_v27  ;;  %3757 = vrot.lane.b32.xlu2 %v3756_v17, %s4231_s22 }
0x2b63   :  { %3856 = vst.msk [vmem:[%s6027_s5 + $0x8] sm:$0x3] %vm184_vm0, %v1327_v15  ;;  %v6135_v15 = vld [vmem:[#allocation24_spill] sm:$0xff] }
0x2b64   :  { %3763 = vst [vmem:[#allocation1] ss:$4 sm:$0xff] %v5681_v52 }
0x2b66   :  { %v3111_v42 = vpop.permute.xlu2 %3110 }
0x2b67   :  { %v1561_v45 = vpop.permute.xlu0 %1560  ;;  %v3113_v7 = vsel %vm6119_vm4, %v3111_v42, 0.0 }
0x2b68   :  { %v1563_v23 = vsel %vm6121_vm7, %v1561_v45, 0.0  ;;  %v3114_v60 = vadd.f32 %v3935_v8, %v3113_v7 }
0x2b69   :  { %v1564_v6 = vadd.f32 %v3867_v50, %v1563_v23 }
0x2b6a   :  { %3936 = vst.msk [vmem:[%s6027_s5 + $0x18] sm:$0x3] %vm184_vm0, %v3114_v60  ;;  %v3927_v21 = vld [vmem:[%s6027_s5 + $0x8] sm:$0x3] }
0x2b6b   :  { %3868 = vst.msk [vmem:[%s6027_s5 + $0x14] sm:$0x3] %vm184_vm0, %v1564_v6  ;;  %v3764_v52 = vld.sshfl [vmem:[#allocation1] sm:$0xff pattern:$0x73625140] }
0x2b6c   :  { %3765 = vrot.lane.b32.xlu0 %v3764_v52, %s4234_s8  ;;  %3771 = vst [vmem:[#allocation1] ss:$4 sm:$0xff] %v5774_v20 }
0x2b6e   :  { %v3341_v16 = vpop.permute.xlu2 %3340 }
0x2b6f   :  { %v2005_v19 = vpop.permute.xlu0 %2004  ;;  %v3343_v62 = vsel %vm6123_vm2, %v3341_v16, 0.0 }
0x2b70   :  { %v2007_v38 = vsel %vm6125_vm3, %v2005_v19, 0.0  ;;  %v3344_v44 = vadd.f32 %v3947_v39, %v3343_v62 }
0x2b71   :  { %v2008_v59 = vadd.f32 %v3885_v61, %v2007_v38 }
0x2b72   :  { %3948 = vst.msk [vmem:[%s6027_s5 + $0x4] sm:$0x3] %vm184_vm0, %v3344_v44  ;;  %v3915_v10 = vld [vmem:[%s6027_s5 + $0x14] sm:$0x3] }
0x2b73   :  { %3886 = vst.msk [vmem:[%s6027_s5 + $0xe] sm:$0x3] %vm184_vm0, %v2008_v59  ;;  %v3772_v20 = vld.sshfl [vmem:[#allocation1] sm:$0xff pattern:$0x73625140] }
0x2b74   :  { %3773 = vrot.lane.b32.xlu2 %v3772_v20, %s4231_s22  ;;  %3780 = vst [vmem:[#allocation1] ss:$4 sm:$0xff] %v3723_v24 }
0x2b77   :  { %v2236_v36 = vpop.permute.xlu0 %2235 }
0x2b78   :  { %v2238_v37 = vsel %vm6127_vm11, %v2236_v36, 0.0 }
0x2b7a   :  { %v3897_v28 = vld [vmem:[%s6027_s5 + $0xe] sm:$0x3] }
0x2b7b   :  { %v2239_v2 = vadd.f32 %v3897_v28, %v2238_v37  ;;  %v3781_v54 = vld.sshfl [vmem:[#allocation1] sm:$0xff pattern:$0x73625140] }
0x2b7c   :  { %3744 = vrot.lane.b32.xlu2 %v3743_v41, %s4234_s8  ;;  %3782 = vrot.lane.b32.xlu0 %v3781_v54, %s4231_s22 }
0x2b7d   :  { %3898 = vst.msk [vmem:[%s6027_s5 + $0xe] sm:$0x3] %vm184_vm0, %v2239_v2 }
0x2b7f   :  { %v2669_v46 = vpop.permute.xlu0 %2668 }
0x2b80   :  { %v2671_v55 = vsel %vm6129_vm8, %v2669_v46, 0.0 }
0x2b81   :  { %v2672_v5 = vadd.f32 %v3915_v10, %v2671_v55 }
0x2b83   :  { %3916 = vst.msk [vmem:[%s6027_s5 + $0x14] sm:$0x3] %vm184_vm0, %v2672_v5 }
0x2b87   :  { %v2899_v33 = vpop.permute.xlu0 %2898 }
0x2b88   :  { %v2901_v34 = vsel %vm6131_vm14, %v2899_v33, 0.0 }
0x2b89   :  { %v2902_v26 = vadd.f32 %v3927_v21, %v2901_v34 }
0x2b8b   :  { %3928 = vst.msk [vmem:[%s6027_s5 + $0x8] sm:$0x3] %vm184_vm0, %v2902_v26 }
0x2b8f   :  { %v3120_v4 = vpop.permute.xlu0 %3119 }
0x2b90   :  { %v3122_v40 = vsel %vm6133_vm15, %v3120_v4, 0.0 }
0x2b91   :  { %v3123_v51 = vadd.f32 %v3937_v43, %v3122_v40 }
0x2b93   :  { %3938 = vst.msk [vmem:[%s6027_s5 + $0x6] sm:$0x3] %vm184_vm0, %v3123_v51 }
0x2b97   :  { %v3553_v63 = vpop.permute.xlu0 %3552 }
0x2b98   :  { %v3555_v24 = vsel %vm3511_vm13, %v3553_v63, 0.0 }
0x2b99   :  { %v3556_v18 = vadd.f32 %v3955_v3, %v3555_v24 }
0x2b9b   :  { %3956 = vst.msk [vmem:[%s6027_s5 + $0x1c] sm:$0x3] %vm184_vm0, %v3556_v18 }
0x2ba3   :  { %v3737_v41 = vpop.permute.xlu1 %3736 }
0x2ba4   :  { %v3739_v9 = vsel %vm3732_vm9, %v3737_v41, %v5505_v53  ;;  %v3964_v53 = vld [vmem:[%s6027_s5 + $0x1e] sm:$0x3] }
0x2ba5   :  { %3740 = vst.msk [vmem:[#allocation3] sm:$0x3] %vm184_vm0, %v3739_v9 }
0x2bbc   :  { %v3758_v25 = vpop.permute.xlu2 %3757 }
0x2bbd   :  { %v3760_v0 = vsel %vm3753_vm1, %v3758_v25, %v5494_v32 }
0x2bbe   :  { %3761 = vst.msk [vmem:[#allocation5] sm:$0x3] %vm184_vm0, %v3760_v0 }
0x2bc5   :  { %v3788_v30 = vld [vmem:[#allocation5] sm:$0x3] }
0x2bc6   :  { %3789 = vst.msk [vmem:[%s6028_s6] sm:$0x3] %vm184_vm0, %v3788_v30 }
0x2bce   :  { %v3774_v49 = vpop.permute.xlu2 %3773 }
0x2bcf   :  { %v3776_v11 = vsel %vm3732_vm9, %v3774_v49, 0.0 }
0x2bd0   :  { %v3777_v57 = vadd.f32 %v3964_v53, %v3776_v11 }
0x2bd2   :  { %3965 = vst.msk [vmem:[%s6027_s5 + $0x1e] sm:$0x3] %vm184_vm0, %v3777_v57 }
0x2bd6   :  { %v3745_v32 = vpop.permute.xlu2 %3744 }
0x2bd7   :  { %v3747_v29 = vsel %vm3732_vm9, %v3745_v32, %v6134_v58 }
0x2bd8   :  { %3748 = vst.msk [vmem:[#allocation4] sm:$0x3] %vm184_vm0, %v3747_v29 }
0x2bde   :  { %v3766_v27 = vpop.permute.xlu0 %3765 }
0x2bdf   :  { %v3768_v17 = vsel %vm3753_vm1, %v3766_v27, %v6135_v15 }
0x2be0   :  { %3769 = vst.msk [vmem:[#allocation6] sm:$0x3] %vm184_vm0, %v3768_v17 }
0x2be7   :  { %v3790_v50 = vld [vmem:[#allocation6] sm:$0x3] }
0x2be8   :  { %3791 = vst.msk [vmem:[%s6029_s7] sm:$0x3] %vm184_vm0, %v3790_v50 }
0x2bee   :  { %v3783_v42 = vpop.permute.xlu0 %3782 }
0x2bef   :  { %v3785_v45 = vsel %vm3753_vm1, %v3783_v42, 0.0 }
0x2bf0   :  { %v3786_v8 = vadd.f32 %v3785_v45, %v3779_v35 }
0x2bf2   :  { %3787 = vst.msk [vmem:[%s6027_s5] sm:$0x3] %vm184_vm0, %v3786_v8 }

</bundles_post_ra>
